<compile_context>
chip_gen: v7x
topology: tpu7x:2x2x1
jax: 0.10.0
libtpu: 0.0.40
codegen_flags: <defaults>
</compile_context>

<pallas_src>
import jax
import jax.numpy as jnp
from jax.experimental import pallas as pl
from jax.experimental.pallas import tpu as pltpu

# ---------------- sizes (small, consistent with the module's forward) -------
B = 2            # batch
S = 8            # source sequence length
T = 6            # target sequence length
EMB = 16         # embedding dim
HID = 32         # GRU hidden dim
SRC_VOCAB = 20
TGT_VOCAB = 24   # decoder.vocab_size
VPAD = 128       # vocab padded to a full 128-lane register (lane-dense stores)

_VMEM = pl.BlockSpec(memory_space=pltpu.MemorySpace.VMEM)
_SMEM = pl.BlockSpec(memory_space=pltpu.MemorySpace.SMEM)


# ---------------- the single fused encoder + decoder kernel -----------------
def _seq2seq_kernel(
        # SMEM scalars
        flags_ref,                                   # [T-1] int32 teacher-forcing flips
        # VMEM inputs
        len_ref,                                     # [B, 1] int32 source lengths
        xsrc_ref,                                    # [S, B, E] source embeddings (time-major)
        teach_ref,                                   # [T, B, E] target embeddings (time-major)
        maskt_ref,                                   # [S, B] attention mask (time-major)
        enc_wih_ref, enc_whh_ref, enc_bih_ref, enc_bhh_ref,
        wa_e_ref,                                    # [H, H] attention key projection
        w_h_ref,                                     # [H, 4H] merged (wa_h | dec_whh)
        b_h_ref,                                     # [1, 4H] merged (0 | dec_bhh)
        va_ref,                                      # [1, H]
        wih_e_ref, wih_c_ref, dec_bih_ref,
        wout_h_ref, wout_c_ref, wout_e_ref, bout_ref,
        emb_tgt_ref,                                 # [VPAD, E] padded target embedding table
        # outputs
        logits_ref,                                  # [T-1, B, VPAD]
        pred_ref,                                    # [B, T-1] int32
        # scratch
        enc_scr,                                     # [S, B, H] encoder outputs
        keys_scr,                                    # [S, B, H] attention keys
        h_scr,                                       # [B, H] running hidden
        h0_scr,                                      # [B, H] hidden at position length-1
        inp_scr):                                    # [B, E] next decoder input embedding
    f32 = jnp.float32

    # ======================= encoder recurrence (S steps) ===================
    # TODO(synk): pack_padded_sequence has no Pallas equivalent; the GRU also
    # runs over pad positions and the final hidden is the one at length-1.
    h_scr[...] = jnp.zeros_like(h_scr)
    h0_scr[...] = jnp.zeros_like(h0_scr)

    def enc_step(t, carry):
        h = h_scr[...]                                               # [B, H]
        x = xsrc_ref[t]                                              # [B, E]
        gi = jnp.dot(x, enc_wih_ref[...], preferred_element_type=f32) + enc_bih_ref[...]
        gh = jnp.dot(h, enc_whh_ref[...], preferred_element_type=f32) + enc_bhh_ref[...]
        # PyTorch GRU gate order: reset, update, new
        r = jax.nn.sigmoid(gi[:, :HID] + gh[:, :HID])
        z = jax.nn.sigmoid(gi[:, HID:2 * HID] + gh[:, HID:2 * HID])
        n = jnp.tanh(gi[:, 2 * HID:] + r * gh[:, 2 * HID:])
        hn = (1.0 - z) * n + z * h
        h_scr[...] = hn
        enc_scr[t] = hn
        # loop-invariant attention keys computed once here, not per decode step
        keys_scr[t] = jnp.dot(hn, wa_e_ref[...], preferred_element_type=f32)
        # collect the hidden at position length-1 for each batch row
        h0_scr[...] = jnp.where(len_ref[...] == t + 1, hn, h0_scr[...])
        return carry

    jax.lax.fori_loop(0, S, enc_step, None, unroll=True)

    # ======================= decoder loop (T-1 steps) ========================
    h_scr[...] = h0_scr[...]
    inp_scr[...] = teach_ref[0]                                      # emb(target[:, 0])
    pred_ref[...] = jnp.zeros_like(pred_ref)

    # hoisted iotas (JAX does not CSE broadcast_in_dim inside the loop)
    vocab_iota = jax.lax.broadcasted_iota(jnp.int32, (B, VPAD), 1)
    step_iota = jax.lax.broadcasted_iota(jnp.int32, (B, T - 1), 1)

    def dec_step(i, carry):
        h = h_scr[...]                                               # [B, H]
        emb = inp_scr[...]                                           # [B, E]

        # one lane-dense [B,32]x[32,128] MXU push covers both the attention
        # query projection (first H lanes) and the GRU recurrent gates.
        hg = jnp.dot(h, w_h_ref[...], preferred_element_type=f32) + b_h_ref[...]
        hi = hg[:, :HID]                                             # [B, H]
        gh = hg[:, HID:]                                             # [B, 3H]

        # ---- additive attention over the time-major encoder outputs --------
        energy = jnp.tanh(keys_scr[...] + hi[None, :, :])            # [S, B, H]
        scores = jnp.sum(energy * va_ref[...][None, :, :], axis=-1)  # [S, B]
        scores = jnp.where(maskt_ref[...] > 0.0, scores, -1e9)
        m = jnp.max(scores, axis=0, keepdims=True)
        e = jnp.exp(scores - m)
        attn = e / jnp.sum(e, axis=0, keepdims=True)                 # [S, B]
        ctx = jnp.sum(attn[:, :, None] * enc_scr[...], axis=0)       # [B, H]

        # ---- decoder GRU cell on [emb ; ctx] (weights pre-split, no concat) -
        gi = (jnp.dot(emb, wih_e_ref[...], preferred_element_type=f32)
              + jnp.dot(ctx, wih_c_ref[...], preferred_element_type=f32)
              + dec_bih_ref[...])                                    # [B, 3H]
        r = jax.nn.sigmoid(gi[:, :HID] + gh[:, :HID])
        z = jax.nn.sigmoid(gi[:, HID:2 * HID] + gh[:, HID:2 * HID])
        n = jnp.tanh(gi[:, 2 * HID:] + r * gh[:, 2 * HID:])
        hn = (1.0 - z) * n + z * h
        h_scr[...] = hn

        # ---- output projection on [hidden ; ctx ; emb] (128-lane vocab) ----
        logits = (jnp.dot(hn, wout_h_ref[...], preferred_element_type=f32)
                  + jnp.dot(ctx, wout_c_ref[...], preferred_element_type=f32)
                  + jnp.dot(emb, wout_e_ref[...], preferred_element_type=f32)
                  + bout_ref[...])                                   # [B, VPAD]
        logits_ref[i] = logits

        # ---- greedy argmax (needed every step for `predict`) ---------------
        mx = jnp.max(logits, axis=-1, keepdims=True)
        top = jnp.min(jnp.where(logits == mx, vocab_iota, VPAD),
                      axis=-1, keepdims=True)                        # [B, 1] int32
        pred_ref[...] = jnp.where(step_iota == i, top, pred_ref[...])

        # ---- next-input feedback: teacher forcing vs greedy one-hot lookup --
        force = flags_ref[i] == 1

        @pl.when(force)
        def _():
            inp_scr[...] = teach_ref[i + 1]                          # emb(target[:, i+1])

        @pl.when(jnp.logical_not(force))
        def _():
            onehot = (vocab_iota == top).astype(f32)                 # [B, VPAD]
            inp_scr[...] = jnp.dot(onehot, emb_tgt_ref[...],
                                   preferred_element_type=f32)       # [B, E]

        return carry

    jax.lax.fori_loop(0, T - 1, dec_step, None, unroll=True)


# ---------------- parameters (deterministic, synthetic) ---------------------
def init_params(key):
    def nrm(key, shape, scale=0.1):
        return scale * jax.random.normal(key, shape, jnp.float32)

    ks = jax.random.split(key, 16)
    return dict(
        emb_src=nrm(ks[0], (SRC_VOCAB, EMB)),
        enc_wih=nrm(ks[1], (EMB, 3 * HID)),
        enc_whh=nrm(ks[2], (HID, 3 * HID)),
        enc_bih=nrm(ks[3], (3 * HID,)),
        enc_bhh=nrm(ks[4], (3 * HID,)),
        emb_tgt=nrm(ks[5], (TGT_VOCAB, EMB)),
        wa_h=nrm(ks[6], (HID, HID)),
        wa_e=nrm(ks[7], (HID, HID)),
        va=nrm(ks[8], (HID,)),
        dec_wih=nrm(ks[9], (EMB + HID, 3 * HID)),
        dec_whh=nrm(ks[10], (HID, 3 * HID)),
        dec_bih=nrm(ks[11], (3 * HID,)),
        dec_bhh=nrm(ks[12], (3 * HID,)),
        w_out=nrm(ks[13], (HID + HID + EMB, TGT_VOCAB)),
        b_out=nrm(ks[14], (TGT_VOCAB,)),
    )


def prepare_params(p):
    """One-time constant weight re-packing, hoisted out of the jitted forward."""
    pad_cols = lambda w: jnp.pad(w, ((0, 0), (0, VPAD - TGT_VOCAB)))
    return dict(
        emb_src=p["emb_src"],
        emb_tgt=p["emb_tgt"],
        enc_wih=p["enc_wih"],
        enc_whh=p["enc_whh"],
        enc_bih=p["enc_bih"].reshape(1, 3 * HID),
        enc_bhh=p["enc_bhh"].reshape(1, 3 * HID),
        wa_e=p["wa_e"],
        # attention query proj + decoder recurrent proj merged -> [H, 4H] = [32, 128]
        w_h=jnp.concatenate([p["wa_h"], p["dec_whh"]], axis=1),
        b_h=jnp.concatenate([jnp.zeros((1, HID), jnp.float32),
                             p["dec_bhh"].reshape(1, 3 * HID)], axis=1),
        va=p["va"].reshape(1, HID),
        wih_e=p["dec_wih"][:EMB],
        wih_c=p["dec_wih"][EMB:],
        dec_bih=p["dec_bih"].reshape(1, 3 * HID),
        wout_h=pad_cols(p["w_out"][:HID]),
        wout_c=pad_cols(p["w_out"][HID:2 * HID]),
        wout_e=pad_cols(p["w_out"][2 * HID:]),
        bout=jnp.pad(p["b_out"], (0, VPAD - TGT_VOCAB),
                     constant_values=-1e9).reshape(1, VPAD),         # pad logits = -1e9
        emb_tgt_pad=jnp.pad(p["emb_tgt"], ((0, VPAD - TGT_VOCAB), (0, 0))),
    )


# ---------------- full forward (jitted, ONE pallas_call) --------------------
def _forward(pp, sent, target, power_force_ratio, length, mask, rng):
    # teacher-forcing flips for decoder steps t = 1 .. T-1 (last one unused,
    # matching the reference which draws-but-discards the final flip).
    flags = (jax.random.uniform(rng, (T - 1,)) <= power_force_ratio).astype(jnp.int32)

    # embedding gathers stay in XLA (gather glue); everything else is in-kernel.
    xsrc = jnp.transpose(jnp.take(pp["emb_src"], sent, axis=0), (1, 0, 2))      # [S, B, E]
    teach = jnp.transpose(jnp.take(pp["emb_tgt"], target, axis=0), (1, 0, 2))   # [T, B, E]
    mask_t = jnp.transpose(mask).astype(jnp.float32)                            # [S, B]
    len_col = length.astype(jnp.int32).reshape(B, 1)                            # [B, 1]

    logits_tm, predict = pl.pallas_call(
        _seq2seq_kernel,
        out_shape=(jax.ShapeDtypeStruct((T - 1, B, VPAD), jnp.float32),
                   jax.ShapeDtypeStruct((B, T - 1), jnp.int32)),
        in_specs=[_SMEM] + [_VMEM] * 20,
        out_specs=(_VMEM, _VMEM),
        scratch_shapes=[
            pltpu.VMEM((S, B, HID), jnp.float32),   # encoder outputs (time-major)
            pltpu.VMEM((S, B, HID), jnp.float32),   # attention keys  (time-major)
            pltpu.VMEM((B, HID), jnp.float32),      # running / decoder hidden
            pltpu.VMEM((B, HID), jnp.float32),      # hidden at position length-1
            pltpu.VMEM((B, EMB), jnp.float32),      # next decoder input embedding
        ],
    )(flags, len_col, xsrc, teach, mask_t,
      pp["enc_wih"], pp["enc_whh"], pp["enc_bih"], pp["enc_bhh"],
      pp["wa_e"], pp["w_h"], pp["b_h"], pp["va"],
      pp["wih_e"], pp["wih_c"], pp["dec_bih"],
      pp["wout_h"], pp["wout_c"], pp["wout_e"], pp["bout"], pp["emb_tgt_pad"])

    logits = jnp.transpose(logits_tm, (1, 0, 2))[:, :, :TGT_VOCAB]              # [B, T-1, V]
    # outputs[:, 0] stays zero, exactly as in the reference module.
    outputs = jnp.concatenate(
        [jnp.zeros((B, 1, TGT_VOCAB), jnp.float32), logits], axis=1)            # [B, T, V]
    return outputs, predict.astype(target.dtype)                                # [B, T-1]


seq2seq_forward = jax.jit(_forward)


# ---------------- main -------------------------------------------------------
if __name__ == "__main__":
    key = jax.random.PRNGKey(0)
    kp, k1, k2, kf = jax.random.split(key, 4)

    params = init_params(kp)
    prepared = prepare_params(params)     # one-time weight packing (not per call)

    sent = jax.random.randint(k1, (B, S), 0, SRC_VOCAB, dtype=jnp.int32)
    target = jax.random.randint(k2, (B, T), 0, TGT_VOCAB, dtype=jnp.int32)
    length = jnp.array([S, S - 2], dtype=jnp.int32)
    mask = (jnp.arange(S)[None, :] < length[:, None]).astype(jnp.float32)
    power_force_ratio = 0.5

    outputs, predict = seq2seq_forward(prepared, sent, target,
                                       power_force_ratio, length, mask, kf)
    jax.block_until_ready((outputs, predict))

    assert outputs.shape == (B, T, TGT_VOCAB)
    assert predict.shape == (B, T - 1)
    print("KERNEL_OK")
</pallas_src>

<mosaic_0001>
module attributes {stable_mosaic.version = 11 : i64} {
  func.func @_seq2seq_kernel(%arg0: memref<5xi32, #tpu.memory_space<smem>>, %arg1: memref<2x1xi32, #tpu.memory_space<vmem>>, %arg2: memref<8x2x16xf32, #tpu.memory_space<vmem>>, %arg3: memref<6x2x16xf32, #tpu.memory_space<vmem>>, %arg4: memref<8x2xf32, #tpu.memory_space<vmem>>, %arg5: memref<16x96xf32, #tpu.memory_space<vmem>>, %arg6: memref<32x96xf32, #tpu.memory_space<vmem>>, %arg7: memref<1x96xf32, #tpu.memory_space<vmem>>, %arg8: memref<1x96xf32, #tpu.memory_space<vmem>>, %arg9: memref<32x32xf32, #tpu.memory_space<vmem>>, %arg10: memref<32x128xf32, #tpu.memory_space<vmem>>, %arg11: memref<1x128xf32, #tpu.memory_space<vmem>>, %arg12: memref<1x32xf32, #tpu.memory_space<vmem>>, %arg13: memref<16x96xf32, #tpu.memory_space<vmem>>, %arg14: memref<32x96xf32, #tpu.memory_space<vmem>>, %arg15: memref<1x96xf32, #tpu.memory_space<vmem>>, %arg16: memref<32x128xf32, #tpu.memory_space<vmem>>, %arg17: memref<32x128xf32, #tpu.memory_space<vmem>>, %arg18: memref<16x128xf32, #tpu.memory_space<vmem>>, %arg19: memref<1x128xf32, #tpu.memory_space<vmem>>, %arg20: memref<128x16xf32, #tpu.memory_space<vmem>>, %arg21: memref<5x2x128xf32, #tpu.memory_space<vmem>>, %arg22: memref<2x5xi32, #tpu.memory_space<vmem>>, %arg23: memref<8x2x32xf32, #tpu.memory_space<vmem>>, %arg24: memref<8x2x32xf32, #tpu.memory_space<vmem>>, %arg25: memref<2x32xf32, #tpu.memory_space<vmem>>, %arg26: memref<2x32xf32, #tpu.memory_space<vmem>>, %arg27: memref<2x16xf32, #tpu.memory_space<vmem>>) attributes {dimension_semantics = [], scalar_prefetch = 0 : i64, scratch_operands = 5 : i64, tpu.core_type = #tpu.core_type<tc>} {
    %cst = arith.constant 0.000000e+00 : f32
    %0 = vector.broadcast %cst : f32 to vector<2x32xf32>
    %c0 = arith.constant 0 : index
    %c0_0 = arith.constant 0 : index
    %1 = vector.load %arg25[%c0, %c0_0] : memref<2x32xf32, #tpu.memory_space<vmem>>, vector<2x32xf32>
    tpu.vector_store %arg25[%c0, %c0_0], %0 {strides = array<i32>} : memref<2x32xf32, #tpu.memory_space<vmem>>, vector<2x32xf32>,
    %cst_1 = arith.constant 0.000000e+00 : f32
    %2 = vector.broadcast %cst_1 : f32 to vector<2x32xf32>
    %c0_2 = arith.constant 0 : index
    %c0_3 = arith.constant 0 : index
    %3 = vector.load %arg26[%c0_2, %c0_3] : memref<2x32xf32, #tpu.memory_space<vmem>>, vector<2x32xf32>
    tpu.vector_store %arg26[%c0_2, %c0_3], %2 {strides = array<i32>} : memref<2x32xf32, #tpu.memory_space<vmem>>, vector<2x32xf32>,
    %c0_i32 = arith.constant 0 : i32
    %c0_4 = arith.constant 0 : index
    %c0_5 = arith.constant 0 : index
    %4 = vector.load %arg25[%c0_4, %c0_5] : memref<2x32xf32, #tpu.memory_space<vmem>>, vector<2x32xf32>
    %5 = arith.index_cast %c0_i32 : i32 to index
    %c0_6 = arith.constant 0 : index
    %c0_7 = arith.constant 0 : index
    %6 = vector.load %arg2[%5, %c0_6, %c0_7] : memref<8x2x16xf32, #tpu.memory_space<vmem>>, vector<1x2x16xf32>
    %7 = vector.shape_cast %6 : vector<1x2x16xf32> to vector<2x16xf32>
    %c0_8 = arith.constant 0 : index
    %c0_9 = arith.constant 0 : index
    %8 = vector.load %arg5[%c0_8, %c0_9] : memref<16x96xf32, #tpu.memory_space<vmem>>, vector<16x96xf32>
    %cst_10 = arith.constant dense<0.000000e+00> : vector<2x96xf32>
    %9 = tpu.matmul %7, %8, %cst_10 {dimension_numbers = #tpu.dot_dimension_numbers<[1], [0], [0], [1], [0, 0, 1, 1], [], []>} : vector<2x16xf32>, vector<16x96xf32>, vector<2x96xf32> -> vector<2x96xf32>
    %c0_11 = arith.constant 0 : index
    %c0_12 = arith.constant 0 : index
    %10 = vector.load %arg7[%c0_11, %c0_12] : memref<1x96xf32, #tpu.memory_space<vmem>>, vector<1x96xf32>
    %11 = vector.broadcast %10 : vector<1x96xf32> to vector<2x96xf32>
    %12 = arith.addf %9, %11 : vector<2x96xf32>
    %c0_13 = arith.constant 0 : index
    %c0_14 = arith.constant 0 : index
    %13 = vector.load %arg6[%c0_13, %c0_14] : memref<32x96xf32, #tpu.memory_space<vmem>>, vector<32x96xf32>
    %cst_15 = arith.constant dense<0.000000e+00> : vector<2x96xf32>
    %14 = tpu.matmul %4, %13, %cst_15 {dimension_numbers = #tpu.dot_dimension_numbers<[1], [0], [0], [1], [0, 0, 1, 1], [], []>} : vector<2x32xf32>, vector<32x96xf32>, vector<2x96xf32> -> vector<2x96xf32>
    %c0_16 = arith.constant 0 : index
    %c0_17 = arith.constant 0 : index
    %15 = vector.load %arg8[%c0_16, %c0_17] : memref<1x96xf32, #tpu.memory_space<vmem>>, vector<1x96xf32>
    %16 = vector.broadcast %15 : vector<1x96xf32> to vector<2x96xf32>
    %17 = arith.addf %14, %16 : vector<2x96xf32>
    %18 = vector.extract_strided_slice %12 {offsets = [0, 0], sizes = [2, 32], strides = [1, 1]} : vector<2x96xf32> to vector<2x32xf32>
    %19 = vector.extract_strided_slice %17 {offsets = [0, 0], sizes = [2, 32], strides = [1, 1]} : vector<2x96xf32> to vector<2x32xf32>
    %20 = arith.addf %18, %19 : vector<2x32xf32>
    %21 = arith.negf %20 : vector<2x32xf32>
    %22 = math.exp %21 : vector<2x32xf32>
    %cst_18 = arith.constant 1.000000e+00 : f32
    %23 = vector.broadcast %cst_18 : f32 to vector<2x32xf32>
    %24 = arith.addf %23, %22 : vector<2x32xf32>
    %25 = arith.divf %23, %24 : vector<2x32xf32>
    %26 = vector.extract_strided_slice %12 {offsets = [0, 32], sizes = [2, 32], strides = [1, 1]} : vector<2x96xf32> to vector<2x32xf32>
    %27 = vector.extract_strided_slice %17 {offsets = [0, 32], sizes = [2, 32], strides = [1, 1]} : vector<2x96xf32> to vector<2x32xf32>
    %28 = arith.addf %26, %27 : vector<2x32xf32>
    %29 = arith.negf %28 : vector<2x32xf32>
    %30 = math.exp %29 : vector<2x32xf32>
    %cst_19 = arith.constant 1.000000e+00 : f32
    %31 = vector.broadcast %cst_19 : f32 to vector<2x32xf32>
    %32 = arith.addf %31, %30 : vector<2x32xf32>
    %33 = arith.divf %31, %32 : vector<2x32xf32>
    %34 = vector.extract_strided_slice %12 {offsets = [0, 64], sizes = [2, 32], strides = [1, 1]} : vector<2x96xf32> to vector<2x32xf32>
    %35 = vector.extract_strided_slice %17 {offsets = [0, 64], sizes = [2, 32], strides = [1, 1]} : vector<2x96xf32> to vector<2x32xf32>
    %36 = arith.mulf %25, %35 : vector<2x32xf32>
    %37 = arith.addf %34, %36 : vector<2x32xf32>
    %38 = math.tanh %37 : vector<2x32xf32>
    %cst_20 = arith.constant 1.000000e+00 : f32
    %39 = vector.broadcast %cst_20 : f32 to vector<2x32xf32>
    %40 = arith.subf %39, %33 : vector<2x32xf32>
    %41 = arith.mulf %40, %38 : vector<2x32xf32>
    %42 = arith.mulf %33, %4 : vector<2x32xf32>
    %43 = arith.addf %41, %42 : vector<2x32xf32>
    %c0_21 = arith.constant 0 : index
    %c0_22 = arith.constant 0 : index
    %44 = vector.load %arg25[%c0_21, %c0_22] : memref<2x32xf32, #tpu.memory_space<vmem>>, vector<2x32xf32>
    tpu.vector_store %arg25[%c0_21, %c0_22], %43 {strides = array<i32>} : memref<2x32xf32, #tpu.memory_space<vmem>>, vector<2x32xf32>,
    %45 = arith.index_cast %c0_i32 : i32 to index
    %c0_23 = arith.constant 0 : index
    %c0_24 = arith.constant 0 : index
    %46 = vector.load %arg23[%45, %c0_23, %c0_24] : memref<8x2x32xf32, #tpu.memory_space<vmem>>, vector<1x2x32xf32>
    %47 = vector.shape_cast %46 : vector<1x2x32xf32> to vector<2x32xf32>
    %48 = vector.shape_cast %43 : vector<2x32xf32> to vector<1x2x32xf32>
    tpu.vector_store %arg23[%45, %c0_23, %c0_24], %48 {strides = array<i32>} : memref<8x2x32xf32, #tpu.memory_space<vmem>>, vector<1x2x32xf32>,
    %c0_25 = arith.constant 0 : index
    %c0_26 = arith.constant 0 : index
    %49 = vector.load %arg9[%c0_25, %c0_26] : memref<32x32xf32, #tpu.memory_space<vmem>>, vector<32x32xf32>
    %cst_27 = arith.constant dense<0.000000e+00> : vector<2x32xf32>
    %50 = tpu.matmul %43, %49, %cst_27 {dimension_numbers = #tpu.dot_dimension_numbers<[1], [0], [0], [1], [0, 0, 1, 1], [], []>} : vector<2x32xf32>, vector<32x32xf32>, vector<2x32xf32> -> vector<2x32xf32>
    %51 = arith.index_cast %c0_i32 : i32 to index
    %c0_28 = arith.constant 0 : index
    %c0_29 = arith.constant 0 : index
    %52 = vector.load %arg24[%51, %c0_28, %c0_29] : memref<8x2x32xf32, #tpu.memory_space<vmem>>, vector<1x2x32xf32>
    %53 = vector.shape_cast %52 : vector<1x2x32xf32> to vector<2x32xf32>
    %54 = vector.shape_cast %50 : vector<2x32xf32> to vector<1x2x32xf32>
    tpu.vector_store %arg24[%51, %c0_28, %c0_29], %54 {strides = array<i32>} : memref<8x2x32xf32, #tpu.memory_space<vmem>>, vector<1x2x32xf32>,
    %c0_30 = arith.constant 0 : index
    %c0_31 = arith.constant 0 : index
    %55 = vector.load %arg1[%c0_30, %c0_31] : memref<2x1xi32, #tpu.memory_space<vmem>>, vector<2x1xi32>
    %c1_i32 = arith.constant 1 : i32
    %56 = arith.addi %c0_i32, %c1_i32 : i32
    %57 = vector.broadcast %56 : i32 to vector<2x1xi32>
    %58 = arith.cmpi eq, %55, %57 : vector<2x1xi32>
    %c0_32 = arith.constant 0 : index
    %c0_33 = arith.constant 0 : index
    %59 = vector.load %arg26[%c0_32, %c0_33] : memref<2x32xf32, #tpu.memory_space<vmem>>, vector<2x32xf32>
    %60 = vector.shape_cast %58 : vector<2x1xi1> to vector<2x1xi1>
    %61 = vector.broadcast %60 : vector<2x1xi1> to vector<2x32xi1>
    %62 = arith.select %61, %43, %59 : vector<2x32xi1>, vector<2x32xf32>
    %c0_34 = arith.constant 0 : index
    %c0_35 = arith.constant 0 : index
    %63 = vector.load %arg26[%c0_34, %c0_35] : memref<2x32xf32, #tpu.memory_space<vmem>>, vector<2x32xf32>
    tpu.vector_store %arg26[%c0_34, %c0_35], %62 {strides = array<i32>} : memref<2x32xf32, #tpu.memory_space<vmem>>, vector<2x32xf32>,
    %c1_i32_36 = arith.constant 1 : i32
    %c0_37 = arith.constant 0 : index
    %c0_38 = arith.constant 0 : index
    %64 = vector.load %arg25[%c0_37, %c0_38] : memref<2x32xf32, #tpu.memory_space<vmem>>, vector<2x32xf32>
    %65 = arith.index_cast %c1_i32_36 : i32 to index
    %c0_39 = arith.constant 0 : index
    %c0_40 = arith.constant 0 : index
    %66 = vector.load %arg2[%65, %c0_39, %c0_40] : memref<8x2x16xf32, #tpu.memory_space<vmem>>, vector<1x2x16xf32>
    %67 = vector.shape_cast %66 : vector<1x2x16xf32> to vector<2x16xf32>
    %c0_41 = arith.constant 0 : index
    %c0_42 = arith.constant 0 : index
    %68 = vector.load %arg5[%c0_41, %c0_42] : memref<16x96xf32, #tpu.memory_space<vmem>>, vector<16x96xf32>
    %cst_43 = arith.constant dense<0.000000e+00> : vector<2x96xf32>
    %69 = tpu.matmul %67, %68, %cst_43 {dimension_numbers = #tpu.dot_dimension_numbers<[1], [0], [0], [1], [0, 0, 1, 1], [], []>} : vector<2x16xf32>, vector<16x96xf32>, vector<2x96xf32> -> vector<2x96xf32>
    %c0_44 = arith.constant 0 : index
    %c0_45 = arith.constant 0 : index
    %70 = vector.load %arg7[%c0_44, %c0_45] : memref<1x96xf32, #tpu.memory_space<vmem>>, vector<1x96xf32>
    %71 = vector.broadcast %70 : vector<1x96xf32> to vector<2x96xf32>
    %72 = arith.addf %69, %71 : vector<2x96xf32>
    %c0_46 = arith.constant 0 : index
    %c0_47 = arith.constant 0 : index
    %73 = vector.load %arg6[%c0_46, %c0_47] : memref<32x96xf32, #tpu.memory_space<vmem>>, vector<32x96xf32>
    %cst_48 = arith.constant dense<0.000000e+00> : vector<2x96xf32>
    %74 = tpu.matmul %64, %73, %cst_48 {dimension_numbers = #tpu.dot_dimension_numbers<[1], [0], [0], [1], [0, 0, 1, 1], [], []>} : vector<2x32xf32>, vector<32x96xf32>, vector<2x96xf32> -> vector<2x96xf32>
    %c0_49 = arith.constant 0 : index
    %c0_50 = arith.constant 0 : index
    %75 = vector.load %arg8[%c0_49, %c0_50] : memref<1x96xf32, #tpu.memory_space<vmem>>, vector<1x96xf32>
    %76 = vector.broadcast %75 : vector<1x96xf32> to vector<2x96xf32>
    %77 = arith.addf %74, %76 : vector<2x96xf32>
    %78 = vector.extract_strided_slice %72 {offsets = [0, 0], sizes = [2, 32], strides = [1, 1]} : vector<2x96xf32> to vector<2x32xf32>
    %79 = vector.extract_strided_slice %77 {offsets = [0, 0], sizes = [2, 32], strides = [1, 1]} : vector<2x96xf32> to vector<2x32xf32>
    %80 = arith.addf %78, %79 : vector<2x32xf32>
    %81 = arith.negf %80 : vector<2x32xf32>
    %82 = math.exp %81 : vector<2x32xf32>
    %cst_51 = arith.constant 1.000000e+00 : f32
    %83 = vector.broadcast %cst_51 : f32 to vector<2x32xf32>
    %84 = arith.addf %83, %82 : vector<2x32xf32>
    %85 = arith.divf %83, %84 : vector<2x32xf32>
    %86 = vector.extract_strided_slice %72 {offsets = [0, 32], sizes = [2, 32], strides = [1, 1]} : vector<2x96xf32> to vector<2x32xf32>
    %87 = vector.extract_strided_slice %77 {offsets = [0, 32], sizes = [2, 32], strides = [1, 1]} : vector<2x96xf32> to vector<2x32xf32>
    %88 = arith.addf %86, %87 : vector<2x32xf32>
    %89 = arith.negf %88 : vector<2x32xf32>
    %90 = math.exp %89 : vector<2x32xf32>
    %cst_52 = arith.constant 1.000000e+00 : f32
    %91 = vector.broadcast %cst_52 : f32 to vector<2x32xf32>
    %92 = arith.addf %91, %90 : vector<2x32xf32>
    %93 = arith.divf %91, %92 : vector<2x32xf32>
    %94 = vector.extract_strided_slice %72 {offsets = [0, 64], sizes = [2, 32], strides = [1, 1]} : vector<2x96xf32> to vector<2x32xf32>
    %95 = vector.extract_strided_slice %77 {offsets = [0, 64], sizes = [2, 32], strides = [1, 1]} : vector<2x96xf32> to vector<2x32xf32>
    %96 = arith.mulf %85, %95 : vector<2x32xf32>
    %97 = arith.addf %94, %96 : vector<2x32xf32>
    %98 = math.tanh %97 : vector<2x32xf32>
    %cst_53 = arith.constant 1.000000e+00 : f32
    %99 = vector.broadcast %cst_53 : f32 to vector<2x32xf32>
    %100 = arith.subf %99, %93 : vector<2x32xf32>
    %101 = arith.mulf %100, %98 : vector<2x32xf32>
    %102 = arith.mulf %93, %64 : vector<2x32xf32>
    %103 = arith.addf %101, %102 : vector<2x32xf32>
    %c0_54 = arith.constant 0 : index
    %c0_55 = arith.constant 0 : index
    %104 = vector.load %arg25[%c0_54, %c0_55] : memref<2x32xf32, #tpu.memory_space<vmem>>, vector<2x32xf32>
    tpu.vector_store %arg25[%c0_54, %c0_55], %103 {strides = array<i32>} : memref<2x32xf32, #tpu.memory_space<vmem>>, vector<2x32xf32>,
    %105 = arith.index_cast %c1_i32_36 : i32 to index
    %c0_56 = arith.constant 0 : index
    %c0_57 = arith.constant 0 : index
    %106 = vector.load %arg23[%105, %c0_56, %c0_57] : memref<8x2x32xf32, #tpu.memory_space<vmem>>, vector<1x2x32xf32>
    %107 = vector.shape_cast %106 : vector<1x2x32xf32> to vector<2x32xf32>
    %108 = vector.shape_cast %103 : vector<2x32xf32> to vector<1x2x32xf32>
    tpu.vector_store %arg23[%105, %c0_56, %c0_57], %108 {strides = array<i32>} : memref<8x2x32xf32, #tpu.memory_space<vmem>>, vector<1x2x32xf32>,
    %c0_58 = arith.constant 0 : index
    %c0_59 = arith.constant 0 : index
    %109 = vector.load %arg9[%c0_58, %c0_59] : memref<32x32xf32, #tpu.memory_space<vmem>>, vector<32x32xf32>
    %cst_60 = arith.constant dense<0.000000e+00> : vector<2x32xf32>
    %110 = tpu.matmul %103, %109, %cst_60 {dimension_numbers = #tpu.dot_dimension_numbers<[1], [0], [0], [1], [0, 0, 1, 1], [], []>} : vector<2x32xf32>, vector<32x32xf32>, vector<2x32xf32> -> vector<2x32xf32>
    %111 = arith.index_cast %c1_i32_36 : i32 to index
    %c0_61 = arith.constant 0 : index
    %c0_62 = arith.constant 0 : index
    %112 = vector.load %arg24[%111, %c0_61, %c0_62] : memref<8x2x32xf32, #tpu.memory_space<vmem>>, vector<1x2x32xf32>
    %113 = vector.shape_cast %112 : vector<1x2x32xf32> to vector<2x32xf32>
    %114 = vector.shape_cast %110 : vector<2x32xf32> to vector<1x2x32xf32>
    tpu.vector_store %arg24[%111, %c0_61, %c0_62], %114 {strides = array<i32>} : memref<8x2x32xf32, #tpu.memory_space<vmem>>, vector<1x2x32xf32>,
    %c0_63 = arith.constant 0 : index
    %c0_64 = arith.constant 0 : index
    %115 = vector.load %arg1[%c0_63, %c0_64] : memref<2x1xi32, #tpu.memory_space<vmem>>, vector<2x1xi32>
    %c1_i32_65 = arith.constant 1 : i32
    %116 = arith.addi %c1_i32_36, %c1_i32_65 : i32
    %117 = vector.broadcast %116 : i32 to vector<2x1xi32>
    %118 = arith.cmpi eq, %115, %117 : vector<2x1xi32>
    %c0_66 = arith.constant 0 : index
    %c0_67 = arith.constant 0 : index
    %119 = vector.load %arg26[%c0_66, %c0_67] : memref<2x32xf32, #tpu.memory_space<vmem>>, vector<2x32xf32>
    %120 = vector.shape_cast %118 : vector<2x1xi1> to vector<2x1xi1>
    %121 = vector.broadcast %120 : vector<2x1xi1> to vector<2x32xi1>
    %122 = arith.select %121, %103, %119 : vector<2x32xi1>, vector<2x32xf32>
    %c0_68 = arith.constant 0 : index
    %c0_69 = arith.constant 0 : index
    %123 = vector.load %arg26[%c0_68, %c0_69] : memref<2x32xf32, #tpu.memory_space<vmem>>, vector<2x32xf32>
    tpu.vector_store %arg26[%c0_68, %c0_69], %122 {strides = array<i32>} : memref<2x32xf32, #tpu.memory_space<vmem>>, vector<2x32xf32>,
    %c2_i32 = arith.constant 2 : i32
    %c0_70 = arith.constant 0 : index
    %c0_71 = arith.constant 0 : index
    %124 = vector.load %arg25[%c0_70, %c0_71] : memref<2x32xf32, #tpu.memory_space<vmem>>, vector<2x32xf32>
    %125 = arith.index_cast %c2_i32 : i32 to index
    %c0_72 = arith.constant 0 : index
    %c0_73 = arith.constant 0 : index
    %126 = vector.load %arg2[%125, %c0_72, %c0_73] : memref<8x2x16xf32, #tpu.memory_space<vmem>>, vector<1x2x16xf32>
    %127 = vector.shape_cast %126 : vector<1x2x16xf32> to vector<2x16xf32>
    %c0_74 = arith.constant 0 : index
    %c0_75 = arith.constant 0 : index
    %128 = vector.load %arg5[%c0_74, %c0_75] : memref<16x96xf32, #tpu.memory_space<vmem>>, vector<16x96xf32>
    %cst_76 = arith.constant dense<0.000000e+00> : vector<2x96xf32>
    %129 = tpu.matmul %127, %128, %cst_76 {dimension_numbers = #tpu.dot_dimension_numbers<[1], [0], [0], [1], [0, 0, 1, 1], [], []>} : vector<2x16xf32>, vector<16x96xf32>, vector<2x96xf32> -> vector<2x96xf32>
    %c0_77 = arith.constant 0 : index
    %c0_78 = arith.constant 0 : index
    %130 = vector.load %arg7[%c0_77, %c0_78] : memref<1x96xf32, #tpu.memory_space<vmem>>, vector<1x96xf32>
    %131 = vector.broadcast %130 : vector<1x96xf32> to vector<2x96xf32>
    %132 = arith.addf %129, %131 : vector<2x96xf32>
    %c0_79 = arith.constant 0 : index
    %c0_80 = arith.constant 0 : index
    %133 = vector.load %arg6[%c0_79, %c0_80] : memref<32x96xf32, #tpu.memory_space<vmem>>, vector<32x96xf32>
    %cst_81 = arith.constant dense<0.000000e+00> : vector<2x96xf32>
    %134 = tpu.matmul %124, %133, %cst_81 {dimension_numbers = #tpu.dot_dimension_numbers<[1], [0], [0], [1], [0, 0, 1, 1], [], []>} : vector<2x32xf32>, vector<32x96xf32>, vector<2x96xf32> -> vector<2x96xf32>
    %c0_82 = arith.constant 0 : index
    %c0_83 = arith.constant 0 : index
    %135 = vector.load %arg8[%c0_82, %c0_83] : memref<1x96xf32, #tpu.memory_space<vmem>>, vector<1x96xf32>
    %136 = vector.broadcast %135 : vector<1x96xf32> to vector<2x96xf32>
    %137 = arith.addf %134, %136 : vector<2x96xf32>
    %138 = vector.extract_strided_slice %132 {offsets = [0, 0], sizes = [2, 32], strides = [1, 1]} : vector<2x96xf32> to vector<2x32xf32>
    %139 = vector.extract_strided_slice %137 {offsets = [0, 0], sizes = [2, 32], strides = [1, 1]} : vector<2x96xf32> to vector<2x32xf32>
    %140 = arith.addf %138, %139 : vector<2x32xf32>
    %141 = arith.negf %140 : vector<2x32xf32>
    %142 = math.exp %141 : vector<2x32xf32>
    %cst_84 = arith.constant 1.000000e+00 : f32
    %143 = vector.broadcast %cst_84 : f32 to vector<2x32xf32>
    %144 = arith.addf %143, %142 : vector<2x32xf32>
    %145 = arith.divf %143, %144 : vector<2x32xf32>
    %146 = vector.extract_strided_slice %132 {offsets = [0, 32], sizes = [2, 32], strides = [1, 1]} : vector<2x96xf32> to vector<2x32xf32>
    %147 = vector.extract_strided_slice %137 {offsets = [0, 32], sizes = [2, 32], strides = [1, 1]} : vector<2x96xf32> to vector<2x32xf32>
    %148 = arith.addf %146, %147 : vector<2x32xf32>
    %149 = arith.negf %148 : vector<2x32xf32>
    %150 = math.exp %149 : vector<2x32xf32>
    %cst_85 = arith.constant 1.000000e+00 : f32
    %151 = vector.broadcast %cst_85 : f32 to vector<2x32xf32>
    %152 = arith.addf %151, %150 : vector<2x32xf32>
    %153 = arith.divf %151, %152 : vector<2x32xf32>
    %154 = vector.extract_strided_slice %132 {offsets = [0, 64], sizes = [2, 32], strides = [1, 1]} : vector<2x96xf32> to vector<2x32xf32>
    %155 = vector.extract_strided_slice %137 {offsets = [0, 64], sizes = [2, 32], strides = [1, 1]} : vector<2x96xf32> to vector<2x32xf32>
    %156 = arith.mulf %145, %155 : vector<2x32xf32>
    %157 = arith.addf %154, %156 : vector<2x32xf32>
    %158 = math.tanh %157 : vector<2x32xf32>
    %cst_86 = arith.constant 1.000000e+00 : f32
    %159 = vector.broadcast %cst_86 : f32 to vector<2x32xf32>
    %160 = arith.subf %159, %153 : vector<2x32xf32>
    %161 = arith.mulf %160, %158 : vector<2x32xf32>
    %162 = arith.mulf %153, %124 : vector<2x32xf32>
    %163 = arith.addf %161, %162 : vector<2x32xf32>
    %c0_87 = arith.constant 0 : index
    %c0_88 = arith.constant 0 : index
    %164 = vector.load %arg25[%c0_87, %c0_88] : memref<2x32xf32, #tpu.memory_space<vmem>>, vector<2x32xf32>
    tpu.vector_store %arg25[%c0_87, %c0_88], %163 {strides = array<i32>} : memref<2x32xf32, #tpu.memory_space<vmem>>, vector<2x32xf32>,
    %165 = arith.index_cast %c2_i32 : i32 to index
    %c0_89 = arith.constant 0 : index
    %c0_90 = arith.constant 0 : index
    %166 = vector.load %arg23[%165, %c0_89, %c0_90] : memref<8x2x32xf32, #tpu.memory_space<vmem>>, vector<1x2x32xf32>
    %167 = vector.shape_cast %166 : vector<1x2x32xf32> to vector<2x32xf32>
    %168 = vector.shape_cast %163 : vector<2x32xf32> to vector<1x2x32xf32>
    tpu.vector_store %arg23[%165, %c0_89, %c0_90], %168 {strides = array<i32>} : memref<8x2x32xf32, #tpu.memory_space<vmem>>, vector<1x2x32xf32>,
    %c0_91 = arith.constant 0 : index
    %c0_92 = arith.constant 0 : index
    %169 = vector.load %arg9[%c0_91, %c0_92] : memref<32x32xf32, #tpu.memory_space<vmem>>, vector<32x32xf32>
    %cst_93 = arith.constant dense<0.000000e+00> : vector<2x32xf32>
    %170 = tpu.matmul %163, %169, %cst_93 {dimension_numbers = #tpu.dot_dimension_numbers<[1], [0], [0], [1], [0, 0, 1, 1], [], []>} : vector<2x32xf32>, vector<32x32xf32>, vector<2x32xf32> -> vector<2x32xf32>
    %171 = arith.index_cast %c2_i32 : i32 to index
    %c0_94 = arith.constant 0 : index
    %c0_95 = arith.constant 0 : index
    %172 = vector.load %arg24[%171, %c0_94, %c0_95] : memref<8x2x32xf32, #tpu.memory_space<vmem>>, vector<1x2x32xf32>
    %173 = vector.shape_cast %172 : vector<1x2x32xf32> to vector<2x32xf32>
    %174 = vector.shape_cast %170 : vector<2x32xf32> to vector<1x2x32xf32>
    tpu.vector_store %arg24[%171, %c0_94, %c0_95], %174 {strides = array<i32>} : memref<8x2x32xf32, #tpu.memory_space<vmem>>, vector<1x2x32xf32>,
    %c0_96 = arith.constant 0 : index
    %c0_97 = arith.constant 0 : index
    %175 = vector.load %arg1[%c0_96, %c0_97] : memref<2x1xi32, #tpu.memory_space<vmem>>, vector<2x1xi32>
    %c1_i32_98 = arith.constant 1 : i32
    %176 = arith.addi %c2_i32, %c1_i32_98 : i32
    %177 = vector.broadcast %176 : i32 to vector<2x1xi32>
    %178 = arith.cmpi eq, %175, %177 : vector<2x1xi32>
    %c0_99 = arith.constant 0 : index
    %c0_100 = arith.constant 0 : index
    %179 = vector.load %arg26[%c0_99, %c0_100] : memref<2x32xf32, #tpu.memory_space<vmem>>, vector<2x32xf32>
    %180 = vector.shape_cast %178 : vector<2x1xi1> to vector<2x1xi1>
    %181 = vector.broadcast %180 : vector<2x1xi1> to vector<2x32xi1>
    %182 = arith.select %181, %163, %179 : vector<2x32xi1>, vector<2x32xf32>
    %c0_101 = arith.constant 0 : index
    %c0_102 = arith.constant 0 : index
    %183 = vector.load %arg26[%c0_101, %c0_102] : memref<2x32xf32, #tpu.memory_space<vmem>>, vector<2x32xf32>
    tpu.vector_store %arg26[%c0_101, %c0_102], %182 {strides = array<i32>} : memref<2x32xf32, #tpu.memory_space<vmem>>, vector<2x32xf32>,
    %c3_i32 = arith.constant 3 : i32
    %c0_103 = arith.constant 0 : index
    %c0_104 = arith.constant 0 : index
    %184 = vector.load %arg25[%c0_103, %c0_104] : memref<2x32xf32, #tpu.memory_space<vmem>>, vector<2x32xf32>
    %185 = arith.index_cast %c3_i32 : i32 to index
    %c0_105 = arith.constant 0 : index
    %c0_106 = arith.constant 0 : index
    %186 = vector.load %arg2[%185, %c0_105, %c0_106] : memref<8x2x16xf32, #tpu.memory_space<vmem>>, vector<1x2x16xf32>
    %187 = vector.shape_cast %186 : vector<1x2x16xf32> to vector<2x16xf32>
    %c0_107 = arith.constant 0 : index
    %c0_108 = arith.constant 0 : index
    %188 = vector.load %arg5[%c0_107, %c0_108] : memref<16x96xf32, #tpu.memory_space<vmem>>, vector<16x96xf32>
    %cst_109 = arith.constant dense<0.000000e+00> : vector<2x96xf32>
    %189 = tpu.matmul %187, %188, %cst_109 {dimension_numbers = #tpu.dot_dimension_numbers<[1], [0], [0], [1], [0, 0, 1, 1], [], []>} : vector<2x16xf32>, vector<16x96xf32>, vector<2x96xf32> -> vector<2x96xf32>
    %c0_110 = arith.constant 0 : index
    %c0_111 = arith.constant 0 : index
    %190 = vector.load %arg7[%c0_110, %c0_111] : memref<1x96xf32, #tpu.memory_space<vmem>>, vector<1x96xf32>
    %191 = vector.broadcast %190 : vector<1x96xf32> to vector<2x96xf32>
    %192 = arith.addf %189, %191 : vector<2x96xf32>
    %c0_112 = arith.constant 0 : index
    %c0_113 = arith.constant 0 : index
    %193 = vector.load %arg6[%c0_112, %c0_113] : memref<32x96xf32, #tpu.memory_space<vmem>>, vector<32x96xf32>
    %cst_114 = arith.constant dense<0.000000e+00> : vector<2x96xf32>
    %194 = tpu.matmul %184, %193, %cst_114 {dimension_numbers = #tpu.dot_dimension_numbers<[1], [0], [0], [1], [0, 0, 1, 1], [], []>} : vector<2x32xf32>, vector<32x96xf32>, vector<2x96xf32> -> vector<2x96xf32>
    %c0_115 = arith.constant 0 : index
    %c0_116 = arith.constant 0 : index
    %195 = vector.load %arg8[%c0_115, %c0_116] : memref<1x96xf32, #tpu.memory_space<vmem>>, vector<1x96xf32>
    %196 = vector.broadcast %195 : vector<1x96xf32> to vector<2x96xf32>
    %197 = arith.addf %194, %196 : vector<2x96xf32>
    %198 = vector.extract_strided_slice %192 {offsets = [0, 0], sizes = [2, 32], strides = [1, 1]} : vector<2x96xf32> to vector<2x32xf32>
    %199 = vector.extract_strided_slice %197 {offsets = [0, 0], sizes = [2, 32], strides = [1, 1]} : vector<2x96xf32> to vector<2x32xf32>
    %200 = arith.addf %198, %199 : vector<2x32xf32>
    %201 = arith.negf %200 : vector<2x32xf32>
    %202 = math.exp %201 : vector<2x32xf32>
    %cst_117 = arith.constant 1.000000e+00 : f32
    %203 = vector.broadcast %cst_117 : f32 to vector<2x32xf32>
    %204 = arith.addf %203, %202 : vector<2x32xf32>
    %205 = arith.divf %203, %204 : vector<2x32xf32>
    %206 = vector.extract_strided_slice %192 {offsets = [0, 32], sizes = [2, 32], strides = [1, 1]} : vector<2x96xf32> to vector<2x32xf32>
    %207 = vector.extract_strided_slice %197 {offsets = [0, 32], sizes = [2, 32], strides = [1, 1]} : vector<2x96xf32> to vector<2x32xf32>
    %208 = arith.addf %206, %207 : vector<2x32xf32>
    %209 = arith.negf %208 : vector<2x32xf32>
    %210 = math.exp %209 : vector<2x32xf32>
    %cst_118 = arith.constant 1.000000e+00 : f32
    %211 = vector.broadcast %cst_118 : f32 to vector<2x32xf32>
    %212 = arith.addf %211, %210 : vector<2x32xf32>
    %213 = arith.divf %211, %212 : vector<2x32xf32>
    %214 = vector.extract_strided_slice %192 {offsets = [0, 64], sizes = [2, 32], strides = [1, 1]} : vector<2x96xf32> to vector<2x32xf32>
    %215 = vector.extract_strided_slice %197 {offsets = [0, 64], sizes = [2, 32], strides = [1, 1]} : vector<2x96xf32> to vector<2x32xf32>
    %216 = arith.mulf %205, %215 : vector<2x32xf32>
    %217 = arith.addf %214, %216 : vector<2x32xf32>
    %218 = math.tanh %217 : vector<2x32xf32>
    %cst_119 = arith.constant 1.000000e+00 : f32
    %219 = vector.broadcast %cst_119 : f32 to vector<2x32xf32>
    %220 = arith.subf %219, %213 : vector<2x32xf32>
    %221 = arith.mulf %220, %218 : vector<2x32xf32>
    %222 = arith.mulf %213, %184 : vector<2x32xf32>
    %223 = arith.addf %221, %222 : vector<2x32xf32>
    %c0_120 = arith.constant 0 : index
    %c0_121 = arith.constant 0 : index
    %224 = vector.load %arg25[%c0_120, %c0_121] : memref<2x32xf32, #tpu.memory_space<vmem>>, vector<2x32xf32>
    tpu.vector_store %arg25[%c0_120, %c0_121], %223 {strides = array<i32>} : memref<2x32xf32, #tpu.memory_space<vmem>>, vector<2x32xf32>,
    %225 = arith.index_cast %c3_i32 : i32 to index
    %c0_122 = arith.constant 0 : index
    %c0_123 = arith.constant 0 : index
    %226 = vector.load %arg23[%225, %c0_122, %c0_123] : memref<8x2x32xf32, #tpu.memory_space<vmem>>, vector<1x2x32xf32>
    %227 = vector.shape_cast %226 : vector<1x2x32xf32> to vector<2x32xf32>
    %228 = vector.shape_cast %223 : vector<2x32xf32> to vector<1x2x32xf32>
    tpu.vector_store %arg23[%225, %c0_122, %c0_123], %228 {strides = array<i32>} : memref<8x2x32xf32, #tpu.memory_space<vmem>>, vector<1x2x32xf32>,
    %c0_124 = arith.constant 0 : index
    %c0_125 = arith.constant 0 : index
    %229 = vector.load %arg9[%c0_124, %c0_125] : memref<32x32xf32, #tpu.memory_space<vmem>>, vector<32x32xf32>
    %cst_126 = arith.constant dense<0.000000e+00> : vector<2x32xf32>
    %230 = tpu.matmul %223, %229, %cst_126 {dimension_numbers = #tpu.dot_dimension_numbers<[1], [0], [0], [1], [0, 0, 1, 1], [], []>} : vector<2x32xf32>, vector<32x32xf32>, vector<2x32xf32> -> vector<2x32xf32>
    %231 = arith.index_cast %c3_i32 : i32 to index
    %c0_127 = arith.constant 0 : index
    %c0_128 = arith.constant 0 : index
    %232 = vector.load %arg24[%231, %c0_127, %c0_128] : memref<8x2x32xf32, #tpu.memory_space<vmem>>, vector<1x2x32xf32>
    %233 = vector.shape_cast %232 : vector<1x2x32xf32> to vector<2x32xf32>
    %234 = vector.shape_cast %230 : vector<2x32xf32> to vector<1x2x32xf32>
    tpu.vector_store %arg24[%231, %c0_127, %c0_128], %234 {strides = array<i32>} : memref<8x2x32xf32, #tpu.memory_space<vmem>>, vector<1x2x32xf32>,
    %c0_129 = arith.constant 0 : index
    %c0_130 = arith.constant 0 : index
    %235 = vector.load %arg1[%c0_129, %c0_130] : memref<2x1xi32, #tpu.memory_space<vmem>>, vector<2x1xi32>
    %c1_i32_131 = arith.constant 1 : i32
    %236 = arith.addi %c3_i32, %c1_i32_131 : i32
    %237 = vector.broadcast %236 : i32 to vector<2x1xi32>
    %238 = arith.cmpi eq, %235, %237 : vector<2x1xi32>
    %c0_132 = arith.constant 0 : index
    %c0_133 = arith.constant 0 : index
    %239 = vector.load %arg26[%c0_132, %c0_133] : memref<2x32xf32, #tpu.memory_space<vmem>>, vector<2x32xf32>
    %240 = vector.shape_cast %238 : vector<2x1xi1> to vector<2x1xi1>
    %241 = vector.broadcast %240 : vector<2x1xi1> to vector<2x32xi1>
    %242 = arith.select %241, %223, %239 : vector<2x32xi1>, vector<2x32xf32>
    %c0_134 = arith.constant 0 : index
    %c0_135 = arith.constant 0 : index
    %243 = vector.load %arg26[%c0_134, %c0_135] : memref<2x32xf32, #tpu.memory_space<vmem>>, vector<2x32xf32>
    tpu.vector_store %arg26[%c0_134, %c0_135], %242 {strides = array<i32>} : memref<2x32xf32, #tpu.memory_space<vmem>>, vector<2x32xf32>,
    %c4_i32 = arith.constant 4 : i32
    %c0_136 = arith.constant 0 : index
    %c0_137 = arith.constant 0 : index
    %244 = vector.load %arg25[%c0_136, %c0_137] : memref<2x32xf32, #tpu.memory_space<vmem>>, vector<2x32xf32>
    %245 = arith.index_cast %c4_i32 : i32 to index
    %c0_138 = arith.constant 0 : index
    %c0_139 = arith.constant 0 : index
    %246 = vector.load %arg2[%245, %c0_138, %c0_139] : memref<8x2x16xf32, #tpu.memory_space<vmem>>, vector<1x2x16xf32>
    %247 = vector.shape_cast %246 : vector<1x2x16xf32> to vector<2x16xf32>
    %c0_140 = arith.constant 0 : index
    %c0_141 = arith.constant 0 : index
    %248 = vector.load %arg5[%c0_140, %c0_141] : memref<16x96xf32, #tpu.memory_space<vmem>>, vector<16x96xf32>
    %cst_142 = arith.constant dense<0.000000e+00> : vector<2x96xf32>
    %249 = tpu.matmul %247, %248, %cst_142 {dimension_numbers = #tpu.dot_dimension_numbers<[1], [0], [0], [1], [0, 0, 1, 1], [], []>} : vector<2x16xf32>, vector<16x96xf32>, vector<2x96xf32> -> vector<2x96xf32>
    %c0_143 = arith.constant 0 : index
    %c0_144 = arith.constant 0 : index
    %250 = vector.load %arg7[%c0_143, %c0_144] : memref<1x96xf32, #tpu.memory_space<vmem>>, vector<1x96xf32>
    %251 = vector.broadcast %250 : vector<1x96xf32> to vector<2x96xf32>
    %252 = arith.addf %249, %251 : vector<2x96xf32>
    %c0_145 = arith.constant 0 : index
    %c0_146 = arith.constant 0 : index
    %253 = vector.load %arg6[%c0_145, %c0_146] : memref<32x96xf32, #tpu.memory_space<vmem>>, vector<32x96xf32>
    %cst_147 = arith.constant dense<0.000000e+00> : vector<2x96xf32>
    %254 = tpu.matmul %244, %253, %cst_147 {dimension_numbers = #tpu.dot_dimension_numbers<[1], [0], [0], [1], [0, 0, 1, 1], [], []>} : vector<2x32xf32>, vector<32x96xf32>, vector<2x96xf32> -> vector<2x96xf32>
    %c0_148 = arith.constant 0 : index
    %c0_149 = arith.constant 0 : index
    %255 = vector.load %arg8[%c0_148, %c0_149] : memref<1x96xf32, #tpu.memory_space<vmem>>, vector<1x96xf32>
    %256 = vector.broadcast %255 : vector<1x96xf32> to vector<2x96xf32>
    %257 = arith.addf %254, %256 : vector<2x96xf32>
    %258 = vector.extract_strided_slice %252 {offsets = [0, 0], sizes = [2, 32], strides = [1, 1]} : vector<2x96xf32> to vector<2x32xf32>
    %259 = vector.extract_strided_slice %257 {offsets = [0, 0], sizes = [2, 32], strides = [1, 1]} : vector<2x96xf32> to vector<2x32xf32>
    %260 = arith.addf %258, %259 : vector<2x32xf32>
    %261 = arith.negf %260 : vector<2x32xf32>
    %262 = math.exp %261 : vector<2x32xf32>
    %cst_150 = arith.constant 1.000000e+00 : f32
    %263 = vector.broadcast %cst_150 : f32 to vector<2x32xf32>
    %264 = arith.addf %263, %262 : vector<2x32xf32>
    %265 = arith.divf %263, %264 : vector<2x32xf32>
    %266 = vector.extract_strided_slice %252 {offsets = [0, 32], sizes = [2, 32], strides = [1, 1]} : vector<2x96xf32> to vector<2x32xf32>
    %267 = vector.extract_strided_slice %257 {offsets = [0, 32], sizes = [2, 32], strides = [1, 1]} : vector<2x96xf32> to vector<2x32xf32>
    %268 = arith.addf %266, %267 : vector<2x32xf32>
    %269 = arith.negf %268 : vector<2x32xf32>
    %270 = math.exp %269 : vector<2x32xf32>
    %cst_151 = arith.constant 1.000000e+00 : f32
    %271 = vector.broadcast %cst_151 : f32 to vector<2x32xf32>
    %272 = arith.addf %271, %270 : vector<2x32xf32>
    %273 = arith.divf %271, %272 : vector<2x32xf32>
    %274 = vector.extract_strided_slice %252 {offsets = [0, 64], sizes = [2, 32], strides = [1, 1]} : vector<2x96xf32> to vector<2x32xf32>
    %275 = vector.extract_strided_slice %257 {offsets = [0, 64], sizes = [2, 32], strides = [1, 1]} : vector<2x96xf32> to vector<2x32xf32>
    %276 = arith.mulf %265, %275 : vector<2x32xf32>
    %277 = arith.addf %274, %276 : vector<2x32xf32>
    %278 = math.tanh %277 : vector<2x32xf32>
    %cst_152 = arith.constant 1.000000e+00 : f32
    %279 = vector.broadcast %cst_152 : f32 to vector<2x32xf32>
    %280 = arith.subf %279, %273 : vector<2x32xf32>
    %281 = arith.mulf %280, %278 : vector<2x32xf32>
    %282 = arith.mulf %273, %244 : vector<2x32xf32>
    %283 = arith.addf %281, %282 : vector<2x32xf32>
    %c0_153 = arith.constant 0 : index
    %c0_154 = arith.constant 0 : index
    %284 = vector.load %arg25[%c0_153, %c0_154] : memref<2x32xf32, #tpu.memory_space<vmem>>, vector<2x32xf32>
    tpu.vector_store %arg25[%c0_153, %c0_154], %283 {strides = array<i32>} : memref<2x32xf32, #tpu.memory_space<vmem>>, vector<2x32xf32>,
    %285 = arith.index_cast %c4_i32 : i32 to index
    %c0_155 = arith.constant 0 : index
    %c0_156 = arith.constant 0 : index
    %286 = vector.load %arg23[%285, %c0_155, %c0_156] : memref<8x2x32xf32, #tpu.memory_space<vmem>>, vector<1x2x32xf32>
    %287 = vector.shape_cast %286 : vector<1x2x32xf32> to vector<2x32xf32>
    %288 = vector.shape_cast %283 : vector<2x32xf32> to vector<1x2x32xf32>
    tpu.vector_store %arg23[%285, %c0_155, %c0_156], %288 {strides = array<i32>} : memref<8x2x32xf32, #tpu.memory_space<vmem>>, vector<1x2x32xf32>,
    %c0_157 = arith.constant 0 : index
    %c0_158 = arith.constant 0 : index
    %289 = vector.load %arg9[%c0_157, %c0_158] : memref<32x32xf32, #tpu.memory_space<vmem>>, vector<32x32xf32>
    %cst_159 = arith.constant dense<0.000000e+00> : vector<2x32xf32>
    %290 = tpu.matmul %283, %289, %cst_159 {dimension_numbers = #tpu.dot_dimension_numbers<[1], [0], [0], [1], [0, 0, 1, 1], [], []>} : vector<2x32xf32>, vector<32x32xf32>, vector<2x32xf32> -> vector<2x32xf32>
    %291 = arith.index_cast %c4_i32 : i32 to index
    %c0_160 = arith.constant 0 : index
    %c0_161 = arith.constant 0 : index
    %292 = vector.load %arg24[%291, %c0_160, %c0_161] : memref<8x2x32xf32, #tpu.memory_space<vmem>>, vector<1x2x32xf32>
    %293 = vector.shape_cast %292 : vector<1x2x32xf32> to vector<2x32xf32>
    %294 = vector.shape_cast %290 : vector<2x32xf32> to vector<1x2x32xf32>
    tpu.vector_store %arg24[%291, %c0_160, %c0_161], %294 {strides = array<i32>} : memref<8x2x32xf32, #tpu.memory_space<vmem>>, vector<1x2x32xf32>,
    %c0_162 = arith.constant 0 : index
    %c0_163 = arith.constant 0 : index
    %295 = vector.load %arg1[%c0_162, %c0_163] : memref<2x1xi32, #tpu.memory_space<vmem>>, vector<2x1xi32>
    %c1_i32_164 = arith.constant 1 : i32
    %296 = arith.addi %c4_i32, %c1_i32_164 : i32
    %297 = vector.broadcast %296 : i32 to vector<2x1xi32>
    %298 = arith.cmpi eq, %295, %297 : vector<2x1xi32>
    %c0_165 = arith.constant 0 : index
    %c0_166 = arith.constant 0 : index
    %299 = vector.load %arg26[%c0_165, %c0_166] : memref<2x32xf32, #tpu.memory_space<vmem>>, vector<2x32xf32>
    %300 = vector.shape_cast %298 : vector<2x1xi1> to vector<2x1xi1>
    %301 = vector.broadcast %300 : vector<2x1xi1> to vector<2x32xi1>
    %302 = arith.select %301, %283, %299 : vector<2x32xi1>, vector<2x32xf32>
    %c0_167 = arith.constant 0 : index
    %c0_168 = arith.constant 0 : index
    %303 = vector.load %arg26[%c0_167, %c0_168] : memref<2x32xf32, #tpu.memory_space<vmem>>, vector<2x32xf32>
    tpu.vector_store %arg26[%c0_167, %c0_168], %302 {strides = array<i32>} : memref<2x32xf32, #tpu.memory_space<vmem>>, vector<2x32xf32>,
    %c5_i32 = arith.constant 5 : i32
    %c0_169 = arith.constant 0 : index
    %c0_170 = arith.constant 0 : index
    %304 = vector.load %arg25[%c0_169, %c0_170] : memref<2x32xf32, #tpu.memory_space<vmem>>, vector<2x32xf32>
    %305 = arith.index_cast %c5_i32 : i32 to index
    %c0_171 = arith.constant 0 : index
    %c0_172 = arith.constant 0 : index
    %306 = vector.load %arg2[%305, %c0_171, %c0_172] : memref<8x2x16xf32, #tpu.memory_space<vmem>>, vector<1x2x16xf32>
    %307 = vector.shape_cast %306 : vector<1x2x16xf32> to vector<2x16xf32>
    %c0_173 = arith.constant 0 : index
    %c0_174 = arith.constant 0 : index
    %308 = vector.load %arg5[%c0_173, %c0_174] : memref<16x96xf32, #tpu.memory_space<vmem>>, vector<16x96xf32>
    %cst_175 = arith.constant dense<0.000000e+00> : vector<2x96xf32>
    %309 = tpu.matmul %307, %308, %cst_175 {dimension_numbers = #tpu.dot_dimension_numbers<[1], [0], [0], [1], [0, 0, 1, 1], [], []>} : vector<2x16xf32>, vector<16x96xf32>, vector<2x96xf32> -> vector<2x96xf32>
    %c0_176 = arith.constant 0 : index
    %c0_177 = arith.constant 0 : index
    %310 = vector.load %arg7[%c0_176, %c0_177] : memref<1x96xf32, #tpu.memory_space<vmem>>, vector<1x96xf32>
    %311 = vector.broadcast %310 : vector<1x96xf32> to vector<2x96xf32>
    %312 = arith.addf %309, %311 : vector<2x96xf32>
    %c0_178 = arith.constant 0 : index
    %c0_179 = arith.constant 0 : index
    %313 = vector.load %arg6[%c0_178, %c0_179] : memref<32x96xf32, #tpu.memory_space<vmem>>, vector<32x96xf32>
    %cst_180 = arith.constant dense<0.000000e+00> : vector<2x96xf32>
    %314 = tpu.matmul %304, %313, %cst_180 {dimension_numbers = #tpu.dot_dimension_numbers<[1], [0], [0], [1], [0, 0, 1, 1], [], []>} : vector<2x32xf32>, vector<32x96xf32>, vector<2x96xf32> -> vector<2x96xf32>
    %c0_181 = arith.constant 0 : index
    %c0_182 = arith.constant 0 : index
    %315 = vector.load %arg8[%c0_181, %c0_182] : memref<1x96xf32, #tpu.memory_space<vmem>>, vector<1x96xf32>
    %316 = vector.broadcast %315 : vector<1x96xf32> to vector<2x96xf32>
    %317 = arith.addf %314, %316 : vector<2x96xf32>
    %318 = vector.extract_strided_slice %312 {offsets = [0, 0], sizes = [2, 32], strides = [1, 1]} : vector<2x96xf32> to vector<2x32xf32>
    %319 = vector.extract_strided_slice %317 {offsets = [0, 0], sizes = [2, 32], strides = [1, 1]} : vector<2x96xf32> to vector<2x32xf32>
    %320 = arith.addf %318, %319 : vector<2x32xf32>
    %321 = arith.negf %320 : vector<2x32xf32>
    %322 = math.exp %321 : vector<2x32xf32>
    %cst_183 = arith.constant 1.000000e+00 : f32
    %323 = vector.broadcast %cst_183 : f32 to vector<2x32xf32>
    %324 = arith.addf %323, %322 : vector<2x32xf32>
    %325 = arith.divf %323, %324 : vector<2x32xf32>
    %326 = vector.extract_strided_slice %312 {offsets = [0, 32], sizes = [2, 32], strides = [1, 1]} : vector<2x96xf32> to vector<2x32xf32>
    %327 = vector.extract_strided_slice %317 {offsets = [0, 32], sizes = [2, 32], strides = [1, 1]} : vector<2x96xf32> to vector<2x32xf32>
    %328 = arith.addf %326, %327 : vector<2x32xf32>
    %329 = arith.negf %328 : vector<2x32xf32>
    %330 = math.exp %329 : vector<2x32xf32>
    %cst_184 = arith.constant 1.000000e+00 : f32
    %331 = vector.broadcast %cst_184 : f32 to vector<2x32xf32>
    %332 = arith.addf %331, %330 : vector<2x32xf32>
    %333 = arith.divf %331, %332 : vector<2x32xf32>
    %334 = vector.extract_strided_slice %312 {offsets = [0, 64], sizes = [2, 32], strides = [1, 1]} : vector<2x96xf32> to vector<2x32xf32>
    %335 = vector.extract_strided_slice %317 {offsets = [0, 64], sizes = [2, 32], strides = [1, 1]} : vector<2x96xf32> to vector<2x32xf32>
    %336 = arith.mulf %325, %335 : vector<2x32xf32>
    %337 = arith.addf %334, %336 : vector<2x32xf32>
    %338 = math.tanh %337 : vector<2x32xf32>
    %cst_185 = arith.constant 1.000000e+00 : f32
    %339 = vector.broadcast %cst_185 : f32 to vector<2x32xf32>
    %340 = arith.subf %339, %333 : vector<2x32xf32>
    %341 = arith.mulf %340, %338 : vector<2x32xf32>
    %342 = arith.mulf %333, %304 : vector<2x32xf32>
    %343 = arith.addf %341, %342 : vector<2x32xf32>
    %c0_186 = arith.constant 0 : index
    %c0_187 = arith.constant 0 : index
    %344 = vector.load %arg25[%c0_186, %c0_187] : memref<2x32xf32, #tpu.memory_space<vmem>>, vector<2x32xf32>
    tpu.vector_store %arg25[%c0_186, %c0_187], %343 {strides = array<i32>} : memref<2x32xf32, #tpu.memory_space<vmem>>, vector<2x32xf32>,
    %345 = arith.index_cast %c5_i32 : i32 to index
    %c0_188 = arith.constant 0 : index
    %c0_189 = arith.constant 0 : index
    %346 = vector.load %arg23[%345, %c0_188, %c0_189] : memref<8x2x32xf32, #tpu.memory_space<vmem>>, vector<1x2x32xf32>
    %347 = vector.shape_cast %346 : vector<1x2x32xf32> to vector<2x32xf32>
    %348 = vector.shape_cast %343 : vector<2x32xf32> to vector<1x2x32xf32>
    tpu.vector_store %arg23[%345, %c0_188, %c0_189], %348 {strides = array<i32>} : memref<8x2x32xf32, #tpu.memory_space<vmem>>, vector<1x2x32xf32>,
    %c0_190 = arith.constant 0 : index
    %c0_191 = arith.constant 0 : index
    %349 = vector.load %arg9[%c0_190, %c0_191] : memref<32x32xf32, #tpu.memory_space<vmem>>, vector<32x32xf32>
    %cst_192 = arith.constant dense<0.000000e+00> : vector<2x32xf32>
    %350 = tpu.matmul %343, %349, %cst_192 {dimension_numbers = #tpu.dot_dimension_numbers<[1], [0], [0], [1], [0, 0, 1, 1], [], []>} : vector<2x32xf32>, vector<32x32xf32>, vector<2x32xf32> -> vector<2x32xf32>
    %351 = arith.index_cast %c5_i32 : i32 to index
    %c0_193 = arith.constant 0 : index
    %c0_194 = arith.constant 0 : index
    %352 = vector.load %arg24[%351, %c0_193, %c0_194] : memref<8x2x32xf32, #tpu.memory_space<vmem>>, vector<1x2x32xf32>
    %353 = vector.shape_cast %352 : vector<1x2x32xf32> to vector<2x32xf32>
    %354 = vector.shape_cast %350 : vector<2x32xf32> to vector<1x2x32xf32>
    tpu.vector_store %arg24[%351, %c0_193, %c0_194], %354 {strides = array<i32>} : memref<8x2x32xf32, #tpu.memory_space<vmem>>, vector<1x2x32xf32>,
    %c0_195 = arith.constant 0 : index
    %c0_196 = arith.constant 0 : index
    %355 = vector.load %arg1[%c0_195, %c0_196] : memref<2x1xi32, #tpu.memory_space<vmem>>, vector<2x1xi32>
    %c1_i32_197 = arith.constant 1 : i32
    %356 = arith.addi %c5_i32, %c1_i32_197 : i32
    %357 = vector.broadcast %356 : i32 to vector<2x1xi32>
    %358 = arith.cmpi eq, %355, %357 : vector<2x1xi32>
    %c0_198 = arith.constant 0 : index
    %c0_199 = arith.constant 0 : index
    %359 = vector.load %arg26[%c0_198, %c0_199] : memref<2x32xf32, #tpu.memory_space<vmem>>, vector<2x32xf32>
    %360 = vector.shape_cast %358 : vector<2x1xi1> to vector<2x1xi1>
    %361 = vector.broadcast %360 : vector<2x1xi1> to vector<2x32xi1>
    %362 = arith.select %361, %343, %359 : vector<2x32xi1>, vector<2x32xf32>
    %c0_200 = arith.constant 0 : index
    %c0_201 = arith.constant 0 : index
    %363 = vector.load %arg26[%c0_200, %c0_201] : memref<2x32xf32, #tpu.memory_space<vmem>>, vector<2x32xf32>
    tpu.vector_store %arg26[%c0_200, %c0_201], %362 {strides = array<i32>} : memref<2x32xf32, #tpu.memory_space<vmem>>, vector<2x32xf32>,
    %c6_i32 = arith.constant 6 : i32
    %c0_202 = arith.constant 0 : index
    %c0_203 = arith.constant 0 : index
    %364 = vector.load %arg25[%c0_202, %c0_203] : memref<2x32xf32, #tpu.memory_space<vmem>>, vector<2x32xf32>
    %365 = arith.index_cast %c6_i32 : i32 to index
    %c0_204 = arith.constant 0 : index
    %c0_205 = arith.constant 0 : index
    %366 = vector.load %arg2[%365, %c0_204, %c0_205] : memref<8x2x16xf32, #tpu.memory_space<vmem>>, vector<1x2x16xf32>
    %367 = vector.shape_cast %366 : vector<1x2x16xf32> to vector<2x16xf32>
    %c0_206 = arith.constant 0 : index
    %c0_207 = arith.constant 0 : index
    %368 = vector.load %arg5[%c0_206, %c0_207] : memref<16x96xf32, #tpu.memory_space<vmem>>, vector<16x96xf32>
    %cst_208 = arith.constant dense<0.000000e+00> : vector<2x96xf32>
    %369 = tpu.matmul %367, %368, %cst_208 {dimension_numbers = #tpu.dot_dimension_numbers<[1], [0], [0], [1], [0, 0, 1, 1], [], []>} : vector<2x16xf32>, vector<16x96xf32>, vector<2x96xf32> -> vector<2x96xf32>
    %c0_209 = arith.constant 0 : index
    %c0_210 = arith.constant 0 : index
    %370 = vector.load %arg7[%c0_209, %c0_210] : memref<1x96xf32, #tpu.memory_space<vmem>>, vector<1x96xf32>
    %371 = vector.broadcast %370 : vector<1x96xf32> to vector<2x96xf32>
    %372 = arith.addf %369, %371 : vector<2x96xf32>
    %c0_211 = arith.constant 0 : index
    %c0_212 = arith.constant 0 : index
    %373 = vector.load %arg6[%c0_211, %c0_212] : memref<32x96xf32, #tpu.memory_space<vmem>>, vector<32x96xf32>
    %cst_213 = arith.constant dense<0.000000e+00> : vector<2x96xf32>
    %374 = tpu.matmul %364, %373, %cst_213 {dimension_numbers = #tpu.dot_dimension_numbers<[1], [0], [0], [1], [0, 0, 1, 1], [], []>} : vector<2x32xf32>, vector<32x96xf32>, vector<2x96xf32> -> vector<2x96xf32>
    %c0_214 = arith.constant 0 : index
    %c0_215 = arith.constant 0 : index
    %375 = vector.load %arg8[%c0_214, %c0_215] : memref<1x96xf32, #tpu.memory_space<vmem>>, vector<1x96xf32>
    %376 = vector.broadcast %375 : vector<1x96xf32> to vector<2x96xf32>
    %377 = arith.addf %374, %376 : vector<2x96xf32>
    %378 = vector.extract_strided_slice %372 {offsets = [0, 0], sizes = [2, 32], strides = [1, 1]} : vector<2x96xf32> to vector<2x32xf32>
    %379 = vector.extract_strided_slice %377 {offsets = [0, 0], sizes = [2, 32], strides = [1, 1]} : vector<2x96xf32> to vector<2x32xf32>
    %380 = arith.addf %378, %379 : vector<2x32xf32>
    %381 = arith.negf %380 : vector<2x32xf32>
    %382 = math.exp %381 : vector<2x32xf32>
    %cst_216 = arith.constant 1.000000e+00 : f32
    %383 = vector.broadcast %cst_216 : f32 to vector<2x32xf32>
    %384 = arith.addf %383, %382 : vector<2x32xf32>
    %385 = arith.divf %383, %384 : vector<2x32xf32>
    %386 = vector.extract_strided_slice %372 {offsets = [0, 32], sizes = [2, 32], strides = [1, 1]} : vector<2x96xf32> to vector<2x32xf32>
    %387 = vector.extract_strided_slice %377 {offsets = [0, 32], sizes = [2, 32], strides = [1, 1]} : vector<2x96xf32> to vector<2x32xf32>
    %388 = arith.addf %386, %387 : vector<2x32xf32>
    %389 = arith.negf %388 : vector<2x32xf32>
    %390 = math.exp %389 : vector<2x32xf32>
    %cst_217 = arith.constant 1.000000e+00 : f32
    %391 = vector.broadcast %cst_217 : f32 to vector<2x32xf32>
    %392 = arith.addf %391, %390 : vector<2x32xf32>
    %393 = arith.divf %391, %392 : vector<2x32xf32>
    %394 = vector.extract_strided_slice %372 {offsets = [0, 64], sizes = [2, 32], strides = [1, 1]} : vector<2x96xf32> to vector<2x32xf32>
    %395 = vector.extract_strided_slice %377 {offsets = [0, 64], sizes = [2, 32], strides = [1, 1]} : vector<2x96xf32> to vector<2x32xf32>
    %396 = arith.mulf %385, %395 : vector<2x32xf32>
    %397 = arith.addf %394, %396 : vector<2x32xf32>
    %398 = math.tanh %397 : vector<2x32xf32>
    %cst_218 = arith.constant 1.000000e+00 : f32
    %399 = vector.broadcast %cst_218 : f32 to vector<2x32xf32>
    %400 = arith.subf %399, %393 : vector<2x32xf32>
    %401 = arith.mulf %400, %398 : vector<2x32xf32>
    %402 = arith.mulf %393, %364 : vector<2x32xf32>
    %403 = arith.addf %401, %402 : vector<2x32xf32>
    %c0_219 = arith.constant 0 : index
    %c0_220 = arith.constant 0 : index
    %404 = vector.load %arg25[%c0_219, %c0_220] : memref<2x32xf32, #tpu.memory_space<vmem>>, vector<2x32xf32>
    tpu.vector_store %arg25[%c0_219, %c0_220], %403 {strides = array<i32>} : memref<2x32xf32, #tpu.memory_space<vmem>>, vector<2x32xf32>,
    %405 = arith.index_cast %c6_i32 : i32 to index
    %c0_221 = arith.constant 0 : index
    %c0_222 = arith.constant 0 : index
    %406 = vector.load %arg23[%405, %c0_221, %c0_222] : memref<8x2x32xf32, #tpu.memory_space<vmem>>, vector<1x2x32xf32>
    %407 = vector.shape_cast %406 : vector<1x2x32xf32> to vector<2x32xf32>
    %408 = vector.shape_cast %403 : vector<2x32xf32> to vector<1x2x32xf32>
    tpu.vector_store %arg23[%405, %c0_221, %c0_222], %408 {strides = array<i32>} : memref<8x2x32xf32, #tpu.memory_space<vmem>>, vector<1x2x32xf32>,
    %c0_223 = arith.constant 0 : index
    %c0_224 = arith.constant 0 : index
    %409 = vector.load %arg9[%c0_223, %c0_224] : memref<32x32xf32, #tpu.memory_space<vmem>>, vector<32x32xf32>
    %cst_225 = arith.constant dense<0.000000e+00> : vector<2x32xf32>
    %410 = tpu.matmul %403, %409, %cst_225 {dimension_numbers = #tpu.dot_dimension_numbers<[1], [0], [0], [1], [0, 0, 1, 1], [], []>} : vector<2x32xf32>, vector<32x32xf32>, vector<2x32xf32> -> vector<2x32xf32>
    %411 = arith.index_cast %c6_i32 : i32 to index
    %c0_226 = arith.constant 0 : index
    %c0_227 = arith.constant 0 : index
    %412 = vector.load %arg24[%411, %c0_226, %c0_227] : memref<8x2x32xf32, #tpu.memory_space<vmem>>, vector<1x2x32xf32>
    %413 = vector.shape_cast %412 : vector<1x2x32xf32> to vector<2x32xf32>
    %414 = vector.shape_cast %410 : vector<2x32xf32> to vector<1x2x32xf32>
    tpu.vector_store %arg24[%411, %c0_226, %c0_227], %414 {strides = array<i32>} : memref<8x2x32xf32, #tpu.memory_space<vmem>>, vector<1x2x32xf32>,
    %c0_228 = arith.constant 0 : index
    %c0_229 = arith.constant 0 : index
    %415 = vector.load %arg1[%c0_228, %c0_229] : memref<2x1xi32, #tpu.memory_space<vmem>>, vector<2x1xi32>
    %c1_i32_230 = arith.constant 1 : i32
    %416 = arith.addi %c6_i32, %c1_i32_230 : i32
    %417 = vector.broadcast %416 : i32 to vector<2x1xi32>
    %418 = arith.cmpi eq, %415, %417 : vector<2x1xi32>
    %c0_231 = arith.constant 0 : index
    %c0_232 = arith.constant 0 : index
    %419 = vector.load %arg26[%c0_231, %c0_232] : memref<2x32xf32, #tpu.memory_space<vmem>>, vector<2x32xf32>
    %420 = vector.shape_cast %418 : vector<2x1xi1> to vector<2x1xi1>
    %421 = vector.broadcast %420 : vector<2x1xi1> to vector<2x32xi1>
    %422 = arith.select %421, %403, %419 : vector<2x32xi1>, vector<2x32xf32>
    %c0_233 = arith.constant 0 : index
    %c0_234 = arith.constant 0 : index
    %423 = vector.load %arg26[%c0_233, %c0_234] : memref<2x32xf32, #tpu.memory_space<vmem>>, vector<2x32xf32>
    tpu.vector_store %arg26[%c0_233, %c0_234], %422 {strides = array<i32>} : memref<2x32xf32, #tpu.memory_space<vmem>>, vector<2x32xf32>,
    %c7_i32 = arith.constant 7 : i32
    %c0_235 = arith.constant 0 : index
    %c0_236 = arith.constant 0 : index
    %424 = vector.load %arg25[%c0_235, %c0_236] : memref<2x32xf32, #tpu.memory_space<vmem>>, vector<2x32xf32>
    %425 = arith.index_cast %c7_i32 : i32 to index
    %c0_237 = arith.constant 0 : index
    %c0_238 = arith.constant 0 : index
    %426 = vector.load %arg2[%425, %c0_237, %c0_238] : memref<8x2x16xf32, #tpu.memory_space<vmem>>, vector<1x2x16xf32>
    %427 = vector.shape_cast %426 : vector<1x2x16xf32> to vector<2x16xf32>
    %c0_239 = arith.constant 0 : index
    %c0_240 = arith.constant 0 : index
    %428 = vector.load %arg5[%c0_239, %c0_240] : memref<16x96xf32, #tpu.memory_space<vmem>>, vector<16x96xf32>
    %cst_241 = arith.constant dense<0.000000e+00> : vector<2x96xf32>
    %429 = tpu.matmul %427, %428, %cst_241 {dimension_numbers = #tpu.dot_dimension_numbers<[1], [0], [0], [1], [0, 0, 1, 1], [], []>} : vector<2x16xf32>, vector<16x96xf32>, vector<2x96xf32> -> vector<2x96xf32>
    %c0_242 = arith.constant 0 : index
    %c0_243 = arith.constant 0 : index
    %430 = vector.load %arg7[%c0_242, %c0_243] : memref<1x96xf32, #tpu.memory_space<vmem>>, vector<1x96xf32>
    %431 = vector.broadcast %430 : vector<1x96xf32> to vector<2x96xf32>
    %432 = arith.addf %429, %431 : vector<2x96xf32>
    %c0_244 = arith.constant 0 : index
    %c0_245 = arith.constant 0 : index
    %433 = vector.load %arg6[%c0_244, %c0_245] : memref<32x96xf32, #tpu.memory_space<vmem>>, vector<32x96xf32>
    %cst_246 = arith.constant dense<0.000000e+00> : vector<2x96xf32>
    %434 = tpu.matmul %424, %433, %cst_246 {dimension_numbers = #tpu.dot_dimension_numbers<[1], [0], [0], [1], [0, 0, 1, 1], [], []>} : vector<2x32xf32>, vector<32x96xf32>, vector<2x96xf32> -> vector<2x96xf32>
    %c0_247 = arith.constant 0 : index
    %c0_248 = arith.constant 0 : index
    %435 = vector.load %arg8[%c0_247, %c0_248] : memref<1x96xf32, #tpu.memory_space<vmem>>, vector<1x96xf32>
    %436 = vector.broadcast %435 : vector<1x96xf32> to vector<2x96xf32>
    %437 = arith.addf %434, %436 : vector<2x96xf32>
    %438 = vector.extract_strided_slice %432 {offsets = [0, 0], sizes = [2, 32], strides = [1, 1]} : vector<2x96xf32> to vector<2x32xf32>
    %439 = vector.extract_strided_slice %437 {offsets = [0, 0], sizes = [2, 32], strides = [1, 1]} : vector<2x96xf32> to vector<2x32xf32>
    %440 = arith.addf %438, %439 : vector<2x32xf32>
    %441 = arith.negf %440 : vector<2x32xf32>
    %442 = math.exp %441 : vector<2x32xf32>
    %cst_249 = arith.constant 1.000000e+00 : f32
    %443 = vector.broadcast %cst_249 : f32 to vector<2x32xf32>
    %444 = arith.addf %443, %442 : vector<2x32xf32>
    %445 = arith.divf %443, %444 : vector<2x32xf32>
    %446 = vector.extract_strided_slice %432 {offsets = [0, 32], sizes = [2, 32], strides = [1, 1]} : vector<2x96xf32> to vector<2x32xf32>
    %447 = vector.extract_strided_slice %437 {offsets = [0, 32], sizes = [2, 32], strides = [1, 1]} : vector<2x96xf32> to vector<2x32xf32>
    %448 = arith.addf %446, %447 : vector<2x32xf32>
    %449 = arith.negf %448 : vector<2x32xf32>
    %450 = math.exp %449 : vector<2x32xf32>
    %cst_250 = arith.constant 1.000000e+00 : f32
    %451 = vector.broadcast %cst_250 : f32 to vector<2x32xf32>
    %452 = arith.addf %451, %450 : vector<2x32xf32>
    %453 = arith.divf %451, %452 : vector<2x32xf32>
    %454 = vector.extract_strided_slice %432 {offsets = [0, 64], sizes = [2, 32], strides = [1, 1]} : vector<2x96xf32> to vector<2x32xf32>
    %455 = vector.extract_strided_slice %437 {offsets = [0, 64], sizes = [2, 32], strides = [1, 1]} : vector<2x96xf32> to vector<2x32xf32>
    %456 = arith.mulf %445, %455 : vector<2x32xf32>
    %457 = arith.addf %454, %456 : vector<2x32xf32>
    %458 = math.tanh %457 : vector<2x32xf32>
    %cst_251 = arith.constant 1.000000e+00 : f32
    %459 = vector.broadcast %cst_251 : f32 to vector<2x32xf32>
    %460 = arith.subf %459, %453 : vector<2x32xf32>
    %461 = arith.mulf %460, %458 : vector<2x32xf32>
    %462 = arith.mulf %453, %424 : vector<2x32xf32>
    %463 = arith.addf %461, %462 : vector<2x32xf32>
    %c0_252 = arith.constant 0 : index
    %c0_253 = arith.constant 0 : index
    %464 = vector.load %arg25[%c0_252, %c0_253] : memref<2x32xf32, #tpu.memory_space<vmem>>, vector<2x32xf32>
    tpu.vector_store %arg25[%c0_252, %c0_253], %463 {strides = array<i32>} : memref<2x32xf32, #tpu.memory_space<vmem>>, vector<2x32xf32>,
    %465 = arith.index_cast %c7_i32 : i32 to index
    %c0_254 = arith.constant 0 : index
    %c0_255 = arith.constant 0 : index
    %466 = vector.load %arg23[%465, %c0_254, %c0_255] : memref<8x2x32xf32, #tpu.memory_space<vmem>>, vector<1x2x32xf32>
    %467 = vector.shape_cast %466 : vector<1x2x32xf32> to vector<2x32xf32>
    %468 = vector.shape_cast %463 : vector<2x32xf32> to vector<1x2x32xf32>
    tpu.vector_store %arg23[%465, %c0_254, %c0_255], %468 {strides = array<i32>} : memref<8x2x32xf32, #tpu.memory_space<vmem>>, vector<1x2x32xf32>,
    %c0_256 = arith.constant 0 : index
    %c0_257 = arith.constant 0 : index
    %469 = vector.load %arg9[%c0_256, %c0_257] : memref<32x32xf32, #tpu.memory_space<vmem>>, vector<32x32xf32>
    %cst_258 = arith.constant dense<0.000000e+00> : vector<2x32xf32>
    %470 = tpu.matmul %463, %469, %cst_258 {dimension_numbers = #tpu.dot_dimension_numbers<[1], [0], [0], [1], [0, 0, 1, 1], [], []>} : vector<2x32xf32>, vector<32x32xf32>, vector<2x32xf32> -> vector<2x32xf32>
    %471 = arith.index_cast %c7_i32 : i32 to index
    %c0_259 = arith.constant 0 : index
    %c0_260 = arith.constant 0 : index
    %472 = vector.load %arg24[%471, %c0_259, %c0_260] : memref<8x2x32xf32, #tpu.memory_space<vmem>>, vector<1x2x32xf32>
    %473 = vector.shape_cast %472 : vector<1x2x32xf32> to vector<2x32xf32>
    %474 = vector.shape_cast %470 : vector<2x32xf32> to vector<1x2x32xf32>
    tpu.vector_store %arg24[%471, %c0_259, %c0_260], %474 {strides = array<i32>} : memref<8x2x32xf32, #tpu.memory_space<vmem>>, vector<1x2x32xf32>,
    %c0_261 = arith.constant 0 : index
    %c0_262 = arith.constant 0 : index
    %475 = vector.load %arg1[%c0_261, %c0_262] : memref<2x1xi32, #tpu.memory_space<vmem>>, vector<2x1xi32>
    %c1_i32_263 = arith.constant 1 : i32
    %476 = arith.addi %c7_i32, %c1_i32_263 : i32
    %477 = vector.broadcast %476 : i32 to vector<2x1xi32>
    %478 = arith.cmpi eq, %475, %477 : vector<2x1xi32>
    %c0_264 = arith.constant 0 : index
    %c0_265 = arith.constant 0 : index
    %479 = vector.load %arg26[%c0_264, %c0_265] : memref<2x32xf32, #tpu.memory_space<vmem>>, vector<2x32xf32>
    %480 = vector.shape_cast %478 : vector<2x1xi1> to vector<2x1xi1>
    %481 = vector.broadcast %480 : vector<2x1xi1> to vector<2x32xi1>
    %482 = arith.select %481, %463, %479 : vector<2x32xi1>, vector<2x32xf32>
    %c0_266 = arith.constant 0 : index
    %c0_267 = arith.constant 0 : index
    %483 = vector.load %arg26[%c0_266, %c0_267] : memref<2x32xf32, #tpu.memory_space<vmem>>, vector<2x32xf32>
    tpu.vector_store %arg26[%c0_266, %c0_267], %482 {strides = array<i32>} : memref<2x32xf32, #tpu.memory_space<vmem>>, vector<2x32xf32>,
    %c8_i32 = arith.constant 8 : i32
    %c0_268 = arith.constant 0 : index
    %c0_269 = arith.constant 0 : index
    %484 = vector.load %arg26[%c0_268, %c0_269] : memref<2x32xf32, #tpu.memory_space<vmem>>, vector<2x32xf32>
    %c0_270 = arith.constant 0 : index
    %c0_271 = arith.constant 0 : index
    %485 = vector.load %arg25[%c0_270, %c0_271] : memref<2x32xf32, #tpu.memory_space<vmem>>, vector<2x32xf32>
    tpu.vector_store %arg25[%c0_270, %c0_271], %484 {strides = array<i32>} : memref<2x32xf32, #tpu.memory_space<vmem>>, vector<2x32xf32>,
    %c0_272 = arith.constant 0 : index
    %c0_273 = arith.constant 0 : index
    %c0_274 = arith.constant 0 : index
    %486 = vector.load %arg3[%c0_272, %c0_273, %c0_274] : memref<6x2x16xf32, #tpu.memory_space<vmem>>, vector<1x2x16xf32>
    %487 = vector.shape_cast %486 : vector<1x2x16xf32> to vector<2x16xf32>
    %c0_275 = arith.constant 0 : index
    %c0_276 = arith.constant 0 : index
    %488 = vector.load %arg27[%c0_275, %c0_276] : memref<2x16xf32, #tpu.memory_space<vmem>>, vector<2x16xf32>
    tpu.vector_store %arg27[%c0_275, %c0_276], %487 {strides = array<i32>} : memref<2x16xf32, #tpu.memory_space<vmem>>, vector<2x16xf32>,
    %c0_i32_277 = arith.constant 0 : i32
    %489 = vector.broadcast %c0_i32_277 : i32 to vector<2x5xi32>
    %c0_278 = arith.constant 0 : index
    %c0_279 = arith.constant 0 : index
    %490 = vector.load %arg22[%c0_278, %c0_279] : memref<2x5xi32, #tpu.memory_space<vmem>>, vector<2x5xi32>
    tpu.vector_store %arg22[%c0_278, %c0_279], %489 {strides = array<i32>} : memref<2x5xi32, #tpu.memory_space<vmem>>, vector<2x5xi32>,
    %491 = tpu.iota {dimensions = array<i32: 1>} : vector<2x128xi32>
    %492 = tpu.iota {dimensions = array<i32: 1>} : vector<2x5xi32>
    %c0_i32_280 = arith.constant 0 : i32
    %c0_281 = arith.constant 0 : index
    %c0_282 = arith.constant 0 : index
    %493 = vector.load %arg25[%c0_281, %c0_282] : memref<2x32xf32, #tpu.memory_space<vmem>>, vector<2x32xf32>
    %c0_283 = arith.constant 0 : index
    %c0_284 = arith.constant 0 : index
    %494 = vector.load %arg27[%c0_283, %c0_284] : memref<2x16xf32, #tpu.memory_space<vmem>>, vector<2x16xf32>
    %c0_285 = arith.constant 0 : index
    %c0_286 = arith.constant 0 : index
    %495 = vector.load %arg10[%c0_285, %c0_286] : memref<32x128xf32, #tpu.memory_space<vmem>>, vector<32x128xf32>
    %cst_287 = arith.constant dense<0.000000e+00> : vector<2x128xf32>
    %496 = tpu.matmul %493, %495, %cst_287 {dimension_numbers = #tpu.dot_dimension_numbers<[1], [0], [0], [1], [0, 0, 1, 1], [], []>} : vector<2x32xf32>, vector<32x128xf32>, vector<2x128xf32> -> vector<2x128xf32>
    %c0_288 = arith.constant 0 : index
    %c0_289 = arith.constant 0 : index
    %497 = vector.load %arg11[%c0_288, %c0_289] : memref<1x128xf32, #tpu.memory_space<vmem>>, vector<1x128xf32>
    %498 = vector.broadcast %497 : vector<1x128xf32> to vector<2x128xf32>
    %499 = arith.addf %496, %498 : vector<2x128xf32>
    %500 = vector.extract_strided_slice %499 {offsets = [0, 0], sizes = [2, 32], strides = [1, 1]} : vector<2x128xf32> to vector<2x32xf32>
    %501 = vector.extract_strided_slice %499 {offsets = [0, 32], sizes = [2, 96], strides = [1, 1]} : vector<2x128xf32> to vector<2x96xf32>
    %c0_290 = arith.constant 0 : index
    %c0_291 = arith.constant 0 : index
    %c0_292 = arith.constant 0 : index
    %502 = vector.load %arg24[%c0_290, %c0_291, %c0_292] : memref<8x2x32xf32, #tpu.memory_space<vmem>>, vector<8x2x32xf32>
    %503 = vector.shape_cast %500 : vector<2x32xf32> to vector<1x2x32xf32>
    %504 = vector.broadcast %503 : vector<1x2x32xf32> to vector<8x2x32xf32>
    %505 = arith.addf %502, %504 : vector<8x2x32xf32>
    %506 = math.tanh %505 : vector<8x2x32xf32>
    %c0_293 = arith.constant 0 : index
    %c0_294 = arith.constant 0 : index
    %507 = vector.load %arg12[%c0_293, %c0_294] : memref<1x32xf32, #tpu.memory_space<vmem>>, vector<1x32xf32>
    %508 = vector.shape_cast %507 : vector<1x32xf32> to vector<1x1x32xf32>
    %509 = vector.broadcast %508 : vector<1x1x32xf32> to vector<8x2x32xf32>
    %510 = arith.mulf %506, %509 : vector<8x2x32xf32>
    %cst_295 = arith.constant dense<0.000000e+00> : vector<8x2xf32>
    %511 = vector.multi_reduction <add>, %510, %cst_295 [2] : vector<8x2x32xf32> to vector<8x2xf32>
    %c0_296 = arith.constant 0 : index
    %c0_297 = arith.constant 0 : index
    %512 = vector.load %arg4[%c0_296, %c0_297] : memref<8x2xf32, #tpu.memory_space<vmem>>, vector<8x2xf32>
    %cst_298 = arith.constant 0.000000e+00 : f32
    %513 = vector.broadcast %cst_298 : f32 to vector<8x2xf32>
    %514 = arith.cmpf ogt, %512, %513 : vector<8x2xf32>
    %cst_299 = arith.constant -1.000000e+09 : f32
    %515 = vector.broadcast %cst_299 : f32 to vector<8x2xf32>
    %516 = arith.select %514, %511, %515 : vector<8x2xi1>, vector<8x2xf32>
    %cst_300 = arith.constant dense<0xFF800000> : vector<2xf32>
    %517 = vector.multi_reduction <maximumf>, %516, %cst_300 [0] : vector<8x2xf32> to vector<2xf32>
    %518 = vector.shape_cast %517 : vector<2xf32> to vector<1x2xf32>
    %519 = vector.broadcast %518 : vector<1x2xf32> to vector<8x2xf32>
    %520 = arith.subf %516, %519 : vector<8x2xf32>
    %521 = math.exp %520 : vector<8x2xf32>
    %cst_301 = arith.constant dense<0.000000e+00> : vector<2xf32>
    %522 = vector.multi_reduction <add>, %521, %cst_301 [0] : vector<8x2xf32> to vector<2xf32>
    %523 = vector.shape_cast %522 : vector<2xf32> to vector<1x2xf32>
    %524 = vector.broadcast %523 : vector<1x2xf32> to vector<8x2xf32>
    %525 = arith.divf %521, %524 : vector<8x2xf32>
    %526 = vector.shape_cast %525 : vector<8x2xf32> to vector<8x2x1xf32>
    %c0_302 = arith.constant 0 : index
    %c0_303 = arith.constant 0 : index
    %c0_304 = arith.constant 0 : index
    %527 = vector.load %arg23[%c0_302, %c0_303, %c0_304] : memref<8x2x32xf32, #tpu.memory_space<vmem>>, vector<8x2x32xf32>
    %528 = vector.broadcast %526 : vector<8x2x1xf32> to vector<8x2x32xf32>
    %529 = arith.mulf %528, %527 : vector<8x2x32xf32>
    %cst_305 = arith.constant dense<0.000000e+00> : vector<2x32xf32>
    %530 = vector.multi_reduction <add>, %529, %cst_305 [0] : vector<8x2x32xf32> to vector<2x32xf32>
    %c0_306 = arith.constant 0 : index
    %c0_307 = arith.constant 0 : index
    %531 = vector.load %arg13[%c0_306, %c0_307] : memref<16x96xf32, #tpu.memory_space<vmem>>, vector<16x96xf32>
    %cst_308 = arith.constant dense<0.000000e+00> : vector<2x96xf32>
    %532 = tpu.matmul %494, %531, %cst_308 {dimension_numbers = #tpu.dot_dimension_numbers<[1], [0], [0], [1], [0, 0, 1, 1], [], []>} : vector<2x16xf32>, vector<16x96xf32>, vector<2x96xf32> -> vector<2x96xf32>
    %c0_309 = arith.constant 0 : index
    %c0_310 = arith.constant 0 : index
    %533 = vector.load %arg14[%c0_309, %c0_310] : memref<32x96xf32, #tpu.memory_space<vmem>>, vector<32x96xf32>
    %cst_311 = arith.constant dense<0.000000e+00> : vector<2x96xf32>
    %534 = tpu.matmul %530, %533, %cst_311 {dimension_numbers = #tpu.dot_dimension_numbers<[1], [0], [0], [1], [0, 0, 1, 1], [], []>} : vector<2x32xf32>, vector<32x96xf32>, vector<2x96xf32> -> vector<2x96xf32>
    %535 = arith.addf %532, %534 : vector<2x96xf32>
    %c0_312 = arith.constant 0 : index
    %c0_313 = arith.constant 0 : index
    %536 = vector.load %arg15[%c0_312, %c0_313] : memref<1x96xf32, #tpu.memory_space<vmem>>, vector<1x96xf32>
    %537 = vector.broadcast %536 : vector<1x96xf32> to vector<2x96xf32>
    %538 = arith.addf %535, %537 : vector<2x96xf32>
    %539 = vector.extract_strided_slice %538 {offsets = [0, 0], sizes = [2, 32], strides = [1, 1]} : vector<2x96xf32> to vector<2x32xf32>
    %540 = vector.extract_strided_slice %501 {offsets = [0, 0], sizes = [2, 32], strides = [1, 1]} : vector<2x96xf32> to vector<2x32xf32>
    %541 = arith.addf %539, %540 : vector<2x32xf32>
    %542 = arith.negf %541 : vector<2x32xf32>
    %543 = math.exp %542 : vector<2x32xf32>
    %cst_314 = arith.constant 1.000000e+00 : f32
    %544 = vector.broadcast %cst_314 : f32 to vector<2x32xf32>
    %545 = arith.addf %544, %543 : vector<2x32xf32>
    %546 = arith.divf %544, %545 : vector<2x32xf32>
    %547 = vector.extract_strided_slice %538 {offsets = [0, 32], sizes = [2, 32], strides = [1, 1]} : vector<2x96xf32> to vector<2x32xf32>
    %548 = vector.extract_strided_slice %501 {offsets = [0, 32], sizes = [2, 32], strides = [1, 1]} : vector<2x96xf32> to vector<2x32xf32>
    %549 = arith.addf %547, %548 : vector<2x32xf32>
    %550 = arith.negf %549 : vector<2x32xf32>
    %551 = math.exp %550 : vector<2x32xf32>
    %cst_315 = arith.constant 1.000000e+00 : f32
    %552 = vector.broadcast %cst_315 : f32 to vector<2x32xf32>
    %553 = arith.addf %552, %551 : vector<2x32xf32>
    %554 = arith.divf %552, %553 : vector<2x32xf32>
    %555 = vector.extract_strided_slice %538 {offsets = [0, 64], sizes = [2, 32], strides = [1, 1]} : vector<2x96xf32> to vector<2x32xf32>
    %556 = vector.extract_strided_slice %501 {offsets = [0, 64], sizes = [2, 32], strides = [1, 1]} : vector<2x96xf32> to vector<2x32xf32>
    %557 = arith.mulf %546, %556 : vector<2x32xf32>
    %558 = arith.addf %555, %557 : vector<2x32xf32>
    %559 = math.tanh %558 : vector<2x32xf32>
    %cst_316 = arith.constant 1.000000e+00 : f32
    %560 = vector.broadcast %cst_316 : f32 to vector<2x32xf32>
    %561 = arith.subf %560, %554 : vector<2x32xf32>
    %562 = arith.mulf %561, %559 : vector<2x32xf32>
    %563 = arith.mulf %554, %493 : vector<2x32xf32>
    %564 = arith.addf %562, %563 : vector<2x32xf32>
    %c0_317 = arith.constant 0 : index
    %c0_318 = arith.constant 0 : index
    %565 = vector.load %arg25[%c0_317, %c0_318] : memref<2x32xf32, #tpu.memory_space<vmem>>, vector<2x32xf32>
    tpu.vector_store %arg25[%c0_317, %c0_318], %564 {strides = array<i32>} : memref<2x32xf32, #tpu.memory_space<vmem>>, vector<2x32xf32>,
    %c0_319 = arith.constant 0 : index
    %c0_320 = arith.constant 0 : index
    %566 = vector.load %arg16[%c0_319, %c0_320] : memref<32x128xf32, #tpu.memory_space<vmem>>, vector<32x128xf32>
    %cst_321 = arith.constant dense<0.000000e+00> : vector<2x128xf32>
    %567 = tpu.matmul %564, %566, %cst_321 {dimension_numbers = #tpu.dot_dimension_numbers<[1], [0], [0], [1], [0, 0, 1, 1], [], []>} : vector<2x32xf32>, vector<32x128xf32>, vector<2x128xf32> -> vector<2x128xf32>
    %c0_322 = arith.constant 0 : index
    %c0_323 = arith.constant 0 : index
    %568 = vector.load %arg17[%c0_322, %c0_323] : memref<32x128xf32, #tpu.memory_space<vmem>>, vector<32x128xf32>
    %cst_324 = arith.constant dense<0.000000e+00> : vector<2x128xf32>
    %569 = tpu.matmul %530, %568, %cst_324 {dimension_numbers = #tpu.dot_dimension_numbers<[1], [0], [0], [1], [0, 0, 1, 1], [], []>} : vector<2x32xf32>, vector<32x128xf32>, vector<2x128xf32> -> vector<2x128xf32>
    %570 = arith.addf %567, %569 : vector<2x128xf32>
    %c0_325 = arith.constant 0 : index
    %c0_326 = arith.constant 0 : index
    %571 = vector.load %arg18[%c0_325, %c0_326] : memref<16x128xf32, #tpu.memory_space<vmem>>, vector<16x128xf32>
    %cst_327 = arith.constant dense<0.000000e+00> : vector<2x128xf32>
    %572 = tpu.matmul %494, %571, %cst_327 {dimension_numbers = #tpu.dot_dimension_numbers<[1], [0], [0], [1], [0, 0, 1, 1], [], []>} : vector<2x16xf32>, vector<16x128xf32>, vector<2x128xf32> -> vector<2x128xf32>
    %573 = arith.addf %570, %572 : vector<2x128xf32>
    %c0_328 = arith.constant 0 : index
    %c0_329 = arith.constant 0 : index
    %574 = vector.load %arg19[%c0_328, %c0_329] : memref<1x128xf32, #tpu.memory_space<vmem>>, vector<1x128xf32>
    %575 = vector.broadcast %574 : vector<1x128xf32> to vector<2x128xf32>
    %576 = arith.addf %573, %575 : vector<2x128xf32>
    %577 = arith.index_cast %c0_i32_280 : i32 to index
    %c0_330 = arith.constant 0 : index
    %c0_331 = arith.constant 0 : index
    %578 = vector.load %arg21[%577, %c0_330, %c0_331] : memref<5x2x128xf32, #tpu.memory_space<vmem>>, vector<1x2x128xf32>
    %579 = vector.shape_cast %578 : vector<1x2x128xf32> to vector<2x128xf32>
    %580 = vector.shape_cast %576 : vector<2x128xf32> to vector<1x2x128xf32>
    tpu.vector_store %arg21[%577, %c0_330, %c0_331], %580 {strides = array<i32>} : memref<5x2x128xf32, #tpu.memory_space<vmem>>, vector<1x2x128xf32>,
    %cst_332 = arith.constant dense<0xFF800000> : vector<2xf32>
    %581 = vector.multi_reduction <maximumf>, %576, %cst_332 [1] : vector<2x128xf32> to vector<2xf32>
    %582 = vector.shape_cast %581 : vector<2xf32> to vector<2x1xf32>
    %583 = vector.broadcast %582 : vector<2x1xf32> to vector<2x128xf32>
    %584 = arith.cmpf oeq, %576, %583 : vector<2x128xf32>
    %c128_i32 = arith.constant 128 : i32
    %585 = vector.broadcast %c128_i32 : i32 to vector<2x128xi32>
    %586 = arith.select %584, %491, %585 : vector<2x128xi1>, vector<2x128xi32>
    %cst_333 = arith.constant dense<2147483647> : vector<2xi32>
    %587 = vector.multi_reduction <minsi>, %586, %cst_333 [1] : vector<2x128xi32> to vector<2xi32>
    %588 = vector.shape_cast %587 : vector<2xi32> to vector<2x1xi32>
    %589 = vector.broadcast %c0_i32_280 : i32 to vector<2x5xi32>
    %590 = arith.cmpi eq, %492, %589 : vector<2x5xi32>
    %c0_334 = arith.constant 0 : index
    %c0_335 = arith.constant 0 : index
    %591 = vector.load %arg22[%c0_334, %c0_335] : memref<2x5xi32, #tpu.memory_space<vmem>>, vector<2x5xi32>
    %592 = vector.shape_cast %588 : vector<2x1xi32> to vector<2x1xi32>
    %593 = vector.broadcast %592 : vector<2x1xi32> to vector<2x5xi32>
    %594 = arith.select %590, %593, %591 : vector<2x5xi1>, vector<2x5xi32>
    %c0_336 = arith.constant 0 : index
    %c0_337 = arith.constant 0 : index
    %595 = vector.load %arg22[%c0_336, %c0_337] : memref<2x5xi32, #tpu.memory_space<vmem>>, vector<2x5xi32>
    tpu.vector_store %arg22[%c0_336, %c0_337], %594 {strides = array<i32>} : memref<2x5xi32, #tpu.memory_space<vmem>>, vector<2x5xi32>,
    %596 = arith.index_cast %c0_i32_280 : i32 to index
    %597 = memref.load %arg0[%596] : memref<5xi32, #tpu.memory_space<smem>>
    %c1_i32_338 = arith.constant 1 : i32
    %598 = arith.cmpi eq, %597, %c1_i32_338 : i32
    %599 = arith.extui %598 : i1 to i32
    %c0_i32_339 = arith.constant 0 : i32
    %600 = arith.cmpi ne, %599, %c0_i32_339 : i32
    scf.if %600 {
      %c1_i32_594 = arith.constant 1 : i32
      %1048 = arith.addi %c0_i32_280, %c1_i32_594 : i32
      %1049 = arith.index_cast %1048 : i32 to index
      %c0_595 = arith.constant 0 : index
      %c0_596 = arith.constant 0 : index
      %1050 = vector.load %arg3[%1049, %c0_595, %c0_596] : memref<6x2x16xf32, #tpu.memory_space<vmem>>, vector<1x2x16xf32>
      %1051 = vector.shape_cast %1050 : vector<1x2x16xf32> to vector<2x16xf32>
      %c0_597 = arith.constant 0 : index
      %c0_598 = arith.constant 0 : index
      %1052 = vector.load %arg27[%c0_597, %c0_598] : memref<2x16xf32, #tpu.memory_space<vmem>>, vector<2x16xf32>
      tpu.vector_store %arg27[%c0_597, %c0_598], %1051 {strides = array<i32>} : memref<2x16xf32, #tpu.memory_space<vmem>>, vector<2x16xf32>,
    } else {
    }
    %true = arith.constant true
    %601 = arith.xori %598, %true : i1
    %602 = arith.extui %601 : i1 to i32
    %c0_i32_340 = arith.constant 0 : i32
    %603 = arith.cmpi ne, %602, %c0_i32_340 : i32
    scf.if %603 {
      %1048 = vector.broadcast %588 : vector<2x1xi32> to vector<2x128xi32>
      %1049 = arith.cmpi eq, %491, %1048 : vector<2x128xi32>
      %1050 = arith.extui %1049 : vector<2x128xi1> to vector<2x128xi32>
      %1051 = arith.sitofp %1050 : vector<2x128xi32> to vector<2x128xf32>
      %c0_594 = arith.constant 0 : index
      %c0_595 = arith.constant 0 : index
      %1052 = vector.load %arg20[%c0_594, %c0_595] : memref<128x16xf32, #tpu.memory_space<vmem>>, vector<128x16xf32>
      %cst_596 = arith.constant dense<0.000000e+00> : vector<2x16xf32>
      %1053 = tpu.matmul %1051, %1052, %cst_596 {dimension_numbers = #tpu.dot_dimension_numbers<[1], [0], [0], [1], [0, 0, 1, 1], [], []>} : vector<2x128xf32>, vector<128x16xf32>, vector<2x16xf32> -> vector<2x16xf32>
      %c0_597 = arith.constant 0 : index
      %c0_598 = arith.constant 0 : index
      %1054 = vector.load %arg27[%c0_597, %c0_598] : memref<2x16xf32, #tpu.memory_space<vmem>>, vector<2x16xf32>
      tpu.vector_store %arg27[%c0_597, %c0_598], %1053 {strides = array<i32>} : memref<2x16xf32, #tpu.memory_space<vmem>>, vector<2x16xf32>,
    } else {
    }
    %c1_i32_341 = arith.constant 1 : i32
    %c0_342 = arith.constant 0 : index
    %c0_343 = arith.constant 0 : index
    %604 = vector.load %arg25[%c0_342, %c0_343] : memref<2x32xf32, #tpu.memory_space<vmem>>, vector<2x32xf32>
    %c0_344 = arith.constant 0 : index
    %c0_345 = arith.constant 0 : index
    %605 = vector.load %arg27[%c0_344, %c0_345] : memref<2x16xf32, #tpu.memory_space<vmem>>, vector<2x16xf32>
    %c0_346 = arith.constant 0 : index
    %c0_347 = arith.constant 0 : index
    %606 = vector.load %arg10[%c0_346, %c0_347] : memref<32x128xf32, #tpu.memory_space<vmem>>, vector<32x128xf32>
    %cst_348 = arith.constant dense<0.000000e+00> : vector<2x128xf32>
    %607 = tpu.matmul %604, %606, %cst_348 {dimension_numbers = #tpu.dot_dimension_numbers<[1], [0], [0], [1], [0, 0, 1, 1], [], []>} : vector<2x32xf32>, vector<32x128xf32>, vector<2x128xf32> -> vector<2x128xf32>
    %c0_349 = arith.constant 0 : index
    %c0_350 = arith.constant 0 : index
    %608 = vector.load %arg11[%c0_349, %c0_350] : memref<1x128xf32, #tpu.memory_space<vmem>>, vector<1x128xf32>
    %609 = vector.broadcast %608 : vector<1x128xf32> to vector<2x128xf32>
    %610 = arith.addf %607, %609 : vector<2x128xf32>
    %611 = vector.extract_strided_slice %610 {offsets = [0, 0], sizes = [2, 32], strides = [1, 1]} : vector<2x128xf32> to vector<2x32xf32>
    %612 = vector.extract_strided_slice %610 {offsets = [0, 32], sizes = [2, 96], strides = [1, 1]} : vector<2x128xf32> to vector<2x96xf32>
    %c0_351 = arith.constant 0 : index
    %c0_352 = arith.constant 0 : index
    %c0_353 = arith.constant 0 : index
    %613 = vector.load %arg24[%c0_351, %c0_352, %c0_353] : memref<8x2x32xf32, #tpu.memory_space<vmem>>, vector<8x2x32xf32>
    %614 = vector.shape_cast %611 : vector<2x32xf32> to vector<1x2x32xf32>
    %615 = vector.broadcast %614 : vector<1x2x32xf32> to vector<8x2x32xf32>
    %616 = arith.addf %613, %615 : vector<8x2x32xf32>
    %617 = math.tanh %616 : vector<8x2x32xf32>
    %c0_354 = arith.constant 0 : index
    %c0_355 = arith.constant 0 : index
    %618 = vector.load %arg12[%c0_354, %c0_355] : memref<1x32xf32, #tpu.memory_space<vmem>>, vector<1x32xf32>
    %619 = vector.shape_cast %618 : vector<1x32xf32> to vector<1x1x32xf32>
    %620 = vector.broadcast %619 : vector<1x1x32xf32> to vector<8x2x32xf32>
    %621 = arith.mulf %617, %620 : vector<8x2x32xf32>
    %cst_356 = arith.constant dense<0.000000e+00> : vector<8x2xf32>
    %622 = vector.multi_reduction <add>, %621, %cst_356 [2] : vector<8x2x32xf32> to vector<8x2xf32>
    %c0_357 = arith.constant 0 : index
    %c0_358 = arith.constant 0 : index
    %623 = vector.load %arg4[%c0_357, %c0_358] : memref<8x2xf32, #tpu.memory_space<vmem>>, vector<8x2xf32>
    %cst_359 = arith.constant 0.000000e+00 : f32
    %624 = vector.broadcast %cst_359 : f32 to vector<8x2xf32>
    %625 = arith.cmpf ogt, %623, %624 : vector<8x2xf32>
    %cst_360 = arith.constant -1.000000e+09 : f32
    %626 = vector.broadcast %cst_360 : f32 to vector<8x2xf32>
    %627 = arith.select %625, %622, %626 : vector<8x2xi1>, vector<8x2xf32>
    %cst_361 = arith.constant dense<0xFF800000> : vector<2xf32>
    %628 = vector.multi_reduction <maximumf>, %627, %cst_361 [0] : vector<8x2xf32> to vector<2xf32>
    %629 = vector.shape_cast %628 : vector<2xf32> to vector<1x2xf32>
    %630 = vector.broadcast %629 : vector<1x2xf32> to vector<8x2xf32>
    %631 = arith.subf %627, %630 : vector<8x2xf32>
    %632 = math.exp %631 : vector<8x2xf32>
    %cst_362 = arith.constant dense<0.000000e+00> : vector<2xf32>
    %633 = vector.multi_reduction <add>, %632, %cst_362 [0] : vector<8x2xf32> to vector<2xf32>
    %634 = vector.shape_cast %633 : vector<2xf32> to vector<1x2xf32>
    %635 = vector.broadcast %634 : vector<1x2xf32> to vector<8x2xf32>
    %636 = arith.divf %632, %635 : vector<8x2xf32>
    %637 = vector.shape_cast %636 : vector<8x2xf32> to vector<8x2x1xf32>
    %c0_363 = arith.constant 0 : index
    %c0_364 = arith.constant 0 : index
    %c0_365 = arith.constant 0 : index
    %638 = vector.load %arg23[%c0_363, %c0_364, %c0_365] : memref<8x2x32xf32, #tpu.memory_space<vmem>>, vector<8x2x32xf32>
    %639 = vector.broadcast %637 : vector<8x2x1xf32> to vector<8x2x32xf32>
    %640 = arith.mulf %639, %638 : vector<8x2x32xf32>
    %cst_366 = arith.constant dense<0.000000e+00> : vector<2x32xf32>
    %641 = vector.multi_reduction <add>, %640, %cst_366 [0] : vector<8x2x32xf32> to vector<2x32xf32>
    %c0_367 = arith.constant 0 : index
    %c0_368 = arith.constant 0 : index
    %642 = vector.load %arg13[%c0_367, %c0_368] : memref<16x96xf32, #tpu.memory_space<vmem>>, vector<16x96xf32>
    %cst_369 = arith.constant dense<0.000000e+00> : vector<2x96xf32>
    %643 = tpu.matmul %605, %642, %cst_369 {dimension_numbers = #tpu.dot_dimension_numbers<[1], [0], [0], [1], [0, 0, 1, 1], [], []>} : vector<2x16xf32>, vector<16x96xf32>, vector<2x96xf32> -> vector<2x96xf32>
    %c0_370 = arith.constant 0 : index
    %c0_371 = arith.constant 0 : index
    %644 = vector.load %arg14[%c0_370, %c0_371] : memref<32x96xf32, #tpu.memory_space<vmem>>, vector<32x96xf32>
    %cst_372 = arith.constant dense<0.000000e+00> : vector<2x96xf32>
    %645 = tpu.matmul %641, %644, %cst_372 {dimension_numbers = #tpu.dot_dimension_numbers<[1], [0], [0], [1], [0, 0, 1, 1], [], []>} : vector<2x32xf32>, vector<32x96xf32>, vector<2x96xf32> -> vector<2x96xf32>
    %646 = arith.addf %643, %645 : vector<2x96xf32>
    %c0_373 = arith.constant 0 : index
    %c0_374 = arith.constant 0 : index
    %647 = vector.load %arg15[%c0_373, %c0_374] : memref<1x96xf32, #tpu.memory_space<vmem>>, vector<1x96xf32>
    %648 = vector.broadcast %647 : vector<1x96xf32> to vector<2x96xf32>
    %649 = arith.addf %646, %648 : vector<2x96xf32>
    %650 = vector.extract_strided_slice %649 {offsets = [0, 0], sizes = [2, 32], strides = [1, 1]} : vector<2x96xf32> to vector<2x32xf32>
    %651 = vector.extract_strided_slice %612 {offsets = [0, 0], sizes = [2, 32], strides = [1, 1]} : vector<2x96xf32> to vector<2x32xf32>
    %652 = arith.addf %650, %651 : vector<2x32xf32>
    %653 = arith.negf %652 : vector<2x32xf32>
    %654 = math.exp %653 : vector<2x32xf32>
    %cst_375 = arith.constant 1.000000e+00 : f32
    %655 = vector.broadcast %cst_375 : f32 to vector<2x32xf32>
    %656 = arith.addf %655, %654 : vector<2x32xf32>
    %657 = arith.divf %655, %656 : vector<2x32xf32>
    %658 = vector.extract_strided_slice %649 {offsets = [0, 32], sizes = [2, 32], strides = [1, 1]} : vector<2x96xf32> to vector<2x32xf32>
    %659 = vector.extract_strided_slice %612 {offsets = [0, 32], sizes = [2, 32], strides = [1, 1]} : vector<2x96xf32> to vector<2x32xf32>
    %660 = arith.addf %658, %659 : vector<2x32xf32>
    %661 = arith.negf %660 : vector<2x32xf32>
    %662 = math.exp %661 : vector<2x32xf32>
    %cst_376 = arith.constant 1.000000e+00 : f32
    %663 = vector.broadcast %cst_376 : f32 to vector<2x32xf32>
    %664 = arith.addf %663, %662 : vector<2x32xf32>
    %665 = arith.divf %663, %664 : vector<2x32xf32>
    %666 = vector.extract_strided_slice %649 {offsets = [0, 64], sizes = [2, 32], strides = [1, 1]} : vector<2x96xf32> to vector<2x32xf32>
    %667 = vector.extract_strided_slice %612 {offsets = [0, 64], sizes = [2, 32], strides = [1, 1]} : vector<2x96xf32> to vector<2x32xf32>
    %668 = arith.mulf %657, %667 : vector<2x32xf32>
    %669 = arith.addf %666, %668 : vector<2x32xf32>
    %670 = math.tanh %669 : vector<2x32xf32>
    %cst_377 = arith.constant 1.000000e+00 : f32
    %671 = vector.broadcast %cst_377 : f32 to vector<2x32xf32>
    %672 = arith.subf %671, %665 : vector<2x32xf32>
    %673 = arith.mulf %672, %670 : vector<2x32xf32>
    %674 = arith.mulf %665, %604 : vector<2x32xf32>
    %675 = arith.addf %673, %674 : vector<2x32xf32>
    %c0_378 = arith.constant 0 : index
    %c0_379 = arith.constant 0 : index
    %676 = vector.load %arg25[%c0_378, %c0_379] : memref<2x32xf32, #tpu.memory_space<vmem>>, vector<2x32xf32>
    tpu.vector_store %arg25[%c0_378, %c0_379], %675 {strides = array<i32>} : memref<2x32xf32, #tpu.memory_space<vmem>>, vector<2x32xf32>,
    %c0_380 = arith.constant 0 : index
    %c0_381 = arith.constant 0 : index
    %677 = vector.load %arg16[%c0_380, %c0_381] : memref<32x128xf32, #tpu.memory_space<vmem>>, vector<32x128xf32>
    %cst_382 = arith.constant dense<0.000000e+00> : vector<2x128xf32>
    %678 = tpu.matmul %675, %677, %cst_382 {dimension_numbers = #tpu.dot_dimension_numbers<[1], [0], [0], [1], [0, 0, 1, 1], [], []>} : vector<2x32xf32>, vector<32x128xf32>, vector<2x128xf32> -> vector<2x128xf32>
    %c0_383 = arith.constant 0 : index
    %c0_384 = arith.constant 0 : index
    %679 = vector.load %arg17[%c0_383, %c0_384] : memref<32x128xf32, #tpu.memory_space<vmem>>, vector<32x128xf32>
    %cst_385 = arith.constant dense<0.000000e+00> : vector<2x128xf32>
    %680 = tpu.matmul %641, %679, %cst_385 {dimension_numbers = #tpu.dot_dimension_numbers<[1], [0], [0], [1], [0, 0, 1, 1], [], []>} : vector<2x32xf32>, vector<32x128xf32>, vector<2x128xf32> -> vector<2x128xf32>
    %681 = arith.addf %678, %680 : vector<2x128xf32>
    %c0_386 = arith.constant 0 : index
    %c0_387 = arith.constant 0 : index
    %682 = vector.load %arg18[%c0_386, %c0_387] : memref<16x128xf32, #tpu.memory_space<vmem>>, vector<16x128xf32>
    %cst_388 = arith.constant dense<0.000000e+00> : vector<2x128xf32>
    %683 = tpu.matmul %605, %682, %cst_388 {dimension_numbers = #tpu.dot_dimension_numbers<[1], [0], [0], [1], [0, 0, 1, 1], [], []>} : vector<2x16xf32>, vector<16x128xf32>, vector<2x128xf32> -> vector<2x128xf32>
    %684 = arith.addf %681, %683 : vector<2x128xf32>
    %c0_389 = arith.constant 0 : index
    %c0_390 = arith.constant 0 : index
    %685 = vector.load %arg19[%c0_389, %c0_390] : memref<1x128xf32, #tpu.memory_space<vmem>>, vector<1x128xf32>
    %686 = vector.broadcast %685 : vector<1x128xf32> to vector<2x128xf32>
    %687 = arith.addf %684, %686 : vector<2x128xf32>
    %688 = arith.index_cast %c1_i32_341 : i32 to index
    %c0_391 = arith.constant 0 : index
    %c0_392 = arith.constant 0 : index
    %689 = vector.load %arg21[%688, %c0_391, %c0_392] : memref<5x2x128xf32, #tpu.memory_space<vmem>>, vector<1x2x128xf32>
    %690 = vector.shape_cast %689 : vector<1x2x128xf32> to vector<2x128xf32>
    %691 = vector.shape_cast %687 : vector<2x128xf32> to vector<1x2x128xf32>
    tpu.vector_store %arg21[%688, %c0_391, %c0_392], %691 {strides = array<i32>} : memref<5x2x128xf32, #tpu.memory_space<vmem>>, vector<1x2x128xf32>,
    %cst_393 = arith.constant dense<0xFF800000> : vector<2xf32>
    %692 = vector.multi_reduction <maximumf>, %687, %cst_393 [1] : vector<2x128xf32> to vector<2xf32>
    %693 = vector.shape_cast %692 : vector<2xf32> to vector<2x1xf32>
    %694 = vector.broadcast %693 : vector<2x1xf32> to vector<2x128xf32>
    %695 = arith.cmpf oeq, %687, %694 : vector<2x128xf32>
    %c128_i32_394 = arith.constant 128 : i32
    %696 = vector.broadcast %c128_i32_394 : i32 to vector<2x128xi32>
    %697 = arith.select %695, %491, %696 : vector<2x128xi1>, vector<2x128xi32>
    %cst_395 = arith.constant dense<2147483647> : vector<2xi32>
    %698 = vector.multi_reduction <minsi>, %697, %cst_395 [1] : vector<2x128xi32> to vector<2xi32>
    %699 = vector.shape_cast %698 : vector<2xi32> to vector<2x1xi32>
    %700 = vector.broadcast %c1_i32_341 : i32 to vector<2x5xi32>
    %701 = arith.cmpi eq, %492, %700 : vector<2x5xi32>
    %c0_396 = arith.constant 0 : index
    %c0_397 = arith.constant 0 : index
    %702 = vector.load %arg22[%c0_396, %c0_397] : memref<2x5xi32, #tpu.memory_space<vmem>>, vector<2x5xi32>
    %703 = vector.shape_cast %699 : vector<2x1xi32> to vector<2x1xi32>
    %704 = vector.broadcast %703 : vector<2x1xi32> to vector<2x5xi32>
    %705 = arith.select %701, %704, %702 : vector<2x5xi1>, vector<2x5xi32>
    %c0_398 = arith.constant 0 : index
    %c0_399 = arith.constant 0 : index
    %706 = vector.load %arg22[%c0_398, %c0_399] : memref<2x5xi32, #tpu.memory_space<vmem>>, vector<2x5xi32>
    tpu.vector_store %arg22[%c0_398, %c0_399], %705 {strides = array<i32>} : memref<2x5xi32, #tpu.memory_space<vmem>>, vector<2x5xi32>,
    %707 = arith.index_cast %c1_i32_341 : i32 to index
    %708 = memref.load %arg0[%707] : memref<5xi32, #tpu.memory_space<smem>>
    %c1_i32_400 = arith.constant 1 : i32
    %709 = arith.cmpi eq, %708, %c1_i32_400 : i32
    %710 = arith.extui %709 : i1 to i32
    %c0_i32_401 = arith.constant 0 : i32
    %711 = arith.cmpi ne, %710, %c0_i32_401 : i32
    scf.if %711 {
      %c1_i32_594 = arith.constant 1 : i32
      %1048 = arith.addi %c1_i32_341, %c1_i32_594 : i32
      %1049 = arith.index_cast %1048 : i32 to index
      %c0_595 = arith.constant 0 : index
      %c0_596 = arith.constant 0 : index
      %1050 = vector.load %arg3[%1049, %c0_595, %c0_596] : memref<6x2x16xf32, #tpu.memory_space<vmem>>, vector<1x2x16xf32>
      %1051 = vector.shape_cast %1050 : vector<1x2x16xf32> to vector<2x16xf32>
      %c0_597 = arith.constant 0 : index
      %c0_598 = arith.constant 0 : index
      %1052 = vector.load %arg27[%c0_597, %c0_598] : memref<2x16xf32, #tpu.memory_space<vmem>>, vector<2x16xf32>
      tpu.vector_store %arg27[%c0_597, %c0_598], %1051 {strides = array<i32>} : memref<2x16xf32, #tpu.memory_space<vmem>>, vector<2x16xf32>,
    } else {
    }
    %true_402 = arith.constant true
    %712 = arith.xori %709, %true_402 : i1
    %713 = arith.extui %712 : i1 to i32
    %c0_i32_403 = arith.constant 0 : i32
    %714 = arith.cmpi ne, %713, %c0_i32_403 : i32
    scf.if %714 {
      %1048 = vector.broadcast %699 : vector<2x1xi32> to vector<2x128xi32>
      %1049 = arith.cmpi eq, %491, %1048 : vector<2x128xi32>
      %1050 = arith.extui %1049 : vector<2x128xi1> to vector<2x128xi32>
      %1051 = arith.sitofp %1050 : vector<2x128xi32> to vector<2x128xf32>
      %c0_594 = arith.constant 0 : index
      %c0_595 = arith.constant 0 : index
      %1052 = vector.load %arg20[%c0_594, %c0_595] : memref<128x16xf32, #tpu.memory_space<vmem>>, vector<128x16xf32>
      %cst_596 = arith.constant dense<0.000000e+00> : vector<2x16xf32>
      %1053 = tpu.matmul %1051, %1052, %cst_596 {dimension_numbers = #tpu.dot_dimension_numbers<[1], [0], [0], [1], [0, 0, 1, 1], [], []>} : vector<2x128xf32>, vector<128x16xf32>, vector<2x16xf32> -> vector<2x16xf32>
      %c0_597 = arith.constant 0 : index
      %c0_598 = arith.constant 0 : index
      %1054 = vector.load %arg27[%c0_597, %c0_598] : memref<2x16xf32, #tpu.memory_space<vmem>>, vector<2x16xf32>
      tpu.vector_store %arg27[%c0_597, %c0_598], %1053 {strides = array<i32>} : memref<2x16xf32, #tpu.memory_space<vmem>>, vector<2x16xf32>,
    } else {
    }
    %c2_i32_404 = arith.constant 2 : i32
    %c0_405 = arith.constant 0 : index
    %c0_406 = arith.constant 0 : index
    %715 = vector.load %arg25[%c0_405, %c0_406] : memref<2x32xf32, #tpu.memory_space<vmem>>, vector<2x32xf32>
    %c0_407 = arith.constant 0 : index
    %c0_408 = arith.constant 0 : index
    %716 = vector.load %arg27[%c0_407, %c0_408] : memref<2x16xf32, #tpu.memory_space<vmem>>, vector<2x16xf32>
    %c0_409 = arith.constant 0 : index
    %c0_410 = arith.constant 0 : index
    %717 = vector.load %arg10[%c0_409, %c0_410] : memref<32x128xf32, #tpu.memory_space<vmem>>, vector<32x128xf32>
    %cst_411 = arith.constant dense<0.000000e+00> : vector<2x128xf32>
    %718 = tpu.matmul %715, %717, %cst_411 {dimension_numbers = #tpu.dot_dimension_numbers<[1], [0], [0], [1], [0, 0, 1, 1], [], []>} : vector<2x32xf32>, vector<32x128xf32>, vector<2x128xf32> -> vector<2x128xf32>
    %c0_412 = arith.constant 0 : index
    %c0_413 = arith.constant 0 : index
    %719 = vector.load %arg11[%c0_412, %c0_413] : memref<1x128xf32, #tpu.memory_space<vmem>>, vector<1x128xf32>
    %720 = vector.broadcast %719 : vector<1x128xf32> to vector<2x128xf32>
    %721 = arith.addf %718, %720 : vector<2x128xf32>
    %722 = vector.extract_strided_slice %721 {offsets = [0, 0], sizes = [2, 32], strides = [1, 1]} : vector<2x128xf32> to vector<2x32xf32>
    %723 = vector.extract_strided_slice %721 {offsets = [0, 32], sizes = [2, 96], strides = [1, 1]} : vector<2x128xf32> to vector<2x96xf32>
    %c0_414 = arith.constant 0 : index
    %c0_415 = arith.constant 0 : index
    %c0_416 = arith.constant 0 : index
    %724 = vector.load %arg24[%c0_414, %c0_415, %c0_416] : memref<8x2x32xf32, #tpu.memory_space<vmem>>, vector<8x2x32xf32>
    %725 = vector.shape_cast %722 : vector<2x32xf32> to vector<1x2x32xf32>
    %726 = vector.broadcast %725 : vector<1x2x32xf32> to vector<8x2x32xf32>
    %727 = arith.addf %724, %726 : vector<8x2x32xf32>
    %728 = math.tanh %727 : vector<8x2x32xf32>
    %c0_417 = arith.constant 0 : index
    %c0_418 = arith.constant 0 : index
    %729 = vector.load %arg12[%c0_417, %c0_418] : memref<1x32xf32, #tpu.memory_space<vmem>>, vector<1x32xf32>
    %730 = vector.shape_cast %729 : vector<1x32xf32> to vector<1x1x32xf32>
    %731 = vector.broadcast %730 : vector<1x1x32xf32> to vector<8x2x32xf32>
    %732 = arith.mulf %728, %731 : vector<8x2x32xf32>
    %cst_419 = arith.constant dense<0.000000e+00> : vector<8x2xf32>
    %733 = vector.multi_reduction <add>, %732, %cst_419 [2] : vector<8x2x32xf32> to vector<8x2xf32>
    %c0_420 = arith.constant 0 : index
    %c0_421 = arith.constant 0 : index
    %734 = vector.load %arg4[%c0_420, %c0_421] : memref<8x2xf32, #tpu.memory_space<vmem>>, vector<8x2xf32>
    %cst_422 = arith.constant 0.000000e+00 : f32
    %735 = vector.broadcast %cst_422 : f32 to vector<8x2xf32>
    %736 = arith.cmpf ogt, %734, %735 : vector<8x2xf32>
    %cst_423 = arith.constant -1.000000e+09 : f32
    %737 = vector.broadcast %cst_423 : f32 to vector<8x2xf32>
    %738 = arith.select %736, %733, %737 : vector<8x2xi1>, vector<8x2xf32>
    %cst_424 = arith.constant dense<0xFF800000> : vector<2xf32>
    %739 = vector.multi_reduction <maximumf>, %738, %cst_424 [0] : vector<8x2xf32> to vector<2xf32>
    %740 = vector.shape_cast %739 : vector<2xf32> to vector<1x2xf32>
    %741 = vector.broadcast %740 : vector<1x2xf32> to vector<8x2xf32>
    %742 = arith.subf %738, %741 : vector<8x2xf32>
    %743 = math.exp %742 : vector<8x2xf32>
    %cst_425 = arith.constant dense<0.000000e+00> : vector<2xf32>
    %744 = vector.multi_reduction <add>, %743, %cst_425 [0] : vector<8x2xf32> to vector<2xf32>
    %745 = vector.shape_cast %744 : vector<2xf32> to vector<1x2xf32>
    %746 = vector.broadcast %745 : vector<1x2xf32> to vector<8x2xf32>
    %747 = arith.divf %743, %746 : vector<8x2xf32>
    %748 = vector.shape_cast %747 : vector<8x2xf32> to vector<8x2x1xf32>
    %c0_426 = arith.constant 0 : index
    %c0_427 = arith.constant 0 : index
    %c0_428 = arith.constant 0 : index
    %749 = vector.load %arg23[%c0_426, %c0_427, %c0_428] : memref<8x2x32xf32, #tpu.memory_space<vmem>>, vector<8x2x32xf32>
    %750 = vector.broadcast %748 : vector<8x2x1xf32> to vector<8x2x32xf32>
    %751 = arith.mulf %750, %749 : vector<8x2x32xf32>
    %cst_429 = arith.constant dense<0.000000e+00> : vector<2x32xf32>
    %752 = vector.multi_reduction <add>, %751, %cst_429 [0] : vector<8x2x32xf32> to vector<2x32xf32>
    %c0_430 = arith.constant 0 : index
    %c0_431 = arith.constant 0 : index
    %753 = vector.load %arg13[%c0_430, %c0_431] : memref<16x96xf32, #tpu.memory_space<vmem>>, vector<16x96xf32>
    %cst_432 = arith.constant dense<0.000000e+00> : vector<2x96xf32>
    %754 = tpu.matmul %716, %753, %cst_432 {dimension_numbers = #tpu.dot_dimension_numbers<[1], [0], [0], [1], [0, 0, 1, 1], [], []>} : vector<2x16xf32>, vector<16x96xf32>, vector<2x96xf32> -> vector<2x96xf32>
    %c0_433 = arith.constant 0 : index
    %c0_434 = arith.constant 0 : index
    %755 = vector.load %arg14[%c0_433, %c0_434] : memref<32x96xf32, #tpu.memory_space<vmem>>, vector<32x96xf32>
    %cst_435 = arith.constant dense<0.000000e+00> : vector<2x96xf32>
    %756 = tpu.matmul %752, %755, %cst_435 {dimension_numbers = #tpu.dot_dimension_numbers<[1], [0], [0], [1], [0, 0, 1, 1], [], []>} : vector<2x32xf32>, vector<32x96xf32>, vector<2x96xf32> -> vector<2x96xf32>
    %757 = arith.addf %754, %756 : vector<2x96xf32>
    %c0_436 = arith.constant 0 : index
    %c0_437 = arith.constant 0 : index
    %758 = vector.load %arg15[%c0_436, %c0_437] : memref<1x96xf32, #tpu.memory_space<vmem>>, vector<1x96xf32>
    %759 = vector.broadcast %758 : vector<1x96xf32> to vector<2x96xf32>
    %760 = arith.addf %757, %759 : vector<2x96xf32>
    %761 = vector.extract_strided_slice %760 {offsets = [0, 0], sizes = [2, 32], strides = [1, 1]} : vector<2x96xf32> to vector<2x32xf32>
    %762 = vector.extract_strided_slice %723 {offsets = [0, 0], sizes = [2, 32], strides = [1, 1]} : vector<2x96xf32> to vector<2x32xf32>
    %763 = arith.addf %761, %762 : vector<2x32xf32>
    %764 = arith.negf %763 : vector<2x32xf32>
    %765 = math.exp %764 : vector<2x32xf32>
    %cst_438 = arith.constant 1.000000e+00 : f32
    %766 = vector.broadcast %cst_438 : f32 to vector<2x32xf32>
    %767 = arith.addf %766, %765 : vector<2x32xf32>
    %768 = arith.divf %766, %767 : vector<2x32xf32>
    %769 = vector.extract_strided_slice %760 {offsets = [0, 32], sizes = [2, 32], strides = [1, 1]} : vector<2x96xf32> to vector<2x32xf32>
    %770 = vector.extract_strided_slice %723 {offsets = [0, 32], sizes = [2, 32], strides = [1, 1]} : vector<2x96xf32> to vector<2x32xf32>
    %771 = arith.addf %769, %770 : vector<2x32xf32>
    %772 = arith.negf %771 : vector<2x32xf32>
    %773 = math.exp %772 : vector<2x32xf32>
    %cst_439 = arith.constant 1.000000e+00 : f32
    %774 = vector.broadcast %cst_439 : f32 to vector<2x32xf32>
    %775 = arith.addf %774, %773 : vector<2x32xf32>
    %776 = arith.divf %774, %775 : vector<2x32xf32>
    %777 = vector.extract_strided_slice %760 {offsets = [0, 64], sizes = [2, 32], strides = [1, 1]} : vector<2x96xf32> to vector<2x32xf32>
    %778 = vector.extract_strided_slice %723 {offsets = [0, 64], sizes = [2, 32], strides = [1, 1]} : vector<2x96xf32> to vector<2x32xf32>
    %779 = arith.mulf %768, %778 : vector<2x32xf32>
    %780 = arith.addf %777, %779 : vector<2x32xf32>
    %781 = math.tanh %780 : vector<2x32xf32>
    %cst_440 = arith.constant 1.000000e+00 : f32
    %782 = vector.broadcast %cst_440 : f32 to vector<2x32xf32>
    %783 = arith.subf %782, %776 : vector<2x32xf32>
    %784 = arith.mulf %783, %781 : vector<2x32xf32>
    %785 = arith.mulf %776, %715 : vector<2x32xf32>
    %786 = arith.addf %784, %785 : vector<2x32xf32>
    %c0_441 = arith.constant 0 : index
    %c0_442 = arith.constant 0 : index
    %787 = vector.load %arg25[%c0_441, %c0_442] : memref<2x32xf32, #tpu.memory_space<vmem>>, vector<2x32xf32>
    tpu.vector_store %arg25[%c0_441, %c0_442], %786 {strides = array<i32>} : memref<2x32xf32, #tpu.memory_space<vmem>>, vector<2x32xf32>,
    %c0_443 = arith.constant 0 : index
    %c0_444 = arith.constant 0 : index
    %788 = vector.load %arg16[%c0_443, %c0_444] : memref<32x128xf32, #tpu.memory_space<vmem>>, vector<32x128xf32>
    %cst_445 = arith.constant dense<0.000000e+00> : vector<2x128xf32>
    %789 = tpu.matmul %786, %788, %cst_445 {dimension_numbers = #tpu.dot_dimension_numbers<[1], [0], [0], [1], [0, 0, 1, 1], [], []>} : vector<2x32xf32>, vector<32x128xf32>, vector<2x128xf32> -> vector<2x128xf32>
    %c0_446 = arith.constant 0 : index
    %c0_447 = arith.constant 0 : index
    %790 = vector.load %arg17[%c0_446, %c0_447] : memref<32x128xf32, #tpu.memory_space<vmem>>, vector<32x128xf32>
    %cst_448 = arith.constant dense<0.000000e+00> : vector<2x128xf32>
    %791 = tpu.matmul %752, %790, %cst_448 {dimension_numbers = #tpu.dot_dimension_numbers<[1], [0], [0], [1], [0, 0, 1, 1], [], []>} : vector<2x32xf32>, vector<32x128xf32>, vector<2x128xf32> -> vector<2x128xf32>
    %792 = arith.addf %789, %791 : vector<2x128xf32>
    %c0_449 = arith.constant 0 : index
    %c0_450 = arith.constant 0 : index
    %793 = vector.load %arg18[%c0_449, %c0_450] : memref<16x128xf32, #tpu.memory_space<vmem>>, vector<16x128xf32>
    %cst_451 = arith.constant dense<0.000000e+00> : vector<2x128xf32>
    %794 = tpu.matmul %716, %793, %cst_451 {dimension_numbers = #tpu.dot_dimension_numbers<[1], [0], [0], [1], [0, 0, 1, 1], [], []>} : vector<2x16xf32>, vector<16x128xf32>, vector<2x128xf32> -> vector<2x128xf32>
    %795 = arith.addf %792, %794 : vector<2x128xf32>
    %c0_452 = arith.constant 0 : index
    %c0_453 = arith.constant 0 : index
    %796 = vector.load %arg19[%c0_452, %c0_453] : memref<1x128xf32, #tpu.memory_space<vmem>>, vector<1x128xf32>
    %797 = vector.broadcast %796 : vector<1x128xf32> to vector<2x128xf32>
    %798 = arith.addf %795, %797 : vector<2x128xf32>
    %799 = arith.index_cast %c2_i32_404 : i32 to index
    %c0_454 = arith.constant 0 : index
    %c0_455 = arith.constant 0 : index
    %800 = vector.load %arg21[%799, %c0_454, %c0_455] : memref<5x2x128xf32, #tpu.memory_space<vmem>>, vector<1x2x128xf32>
    %801 = vector.shape_cast %800 : vector<1x2x128xf32> to vector<2x128xf32>
    %802 = vector.shape_cast %798 : vector<2x128xf32> to vector<1x2x128xf32>
    tpu.vector_store %arg21[%799, %c0_454, %c0_455], %802 {strides = array<i32>} : memref<5x2x128xf32, #tpu.memory_space<vmem>>, vector<1x2x128xf32>,
    %cst_456 = arith.constant dense<0xFF800000> : vector<2xf32>
    %803 = vector.multi_reduction <maximumf>, %798, %cst_456 [1] : vector<2x128xf32> to vector<2xf32>
    %804 = vector.shape_cast %803 : vector<2xf32> to vector<2x1xf32>
    %805 = vector.broadcast %804 : vector<2x1xf32> to vector<2x128xf32>
    %806 = arith.cmpf oeq, %798, %805 : vector<2x128xf32>
    %c128_i32_457 = arith.constant 128 : i32
    %807 = vector.broadcast %c128_i32_457 : i32 to vector<2x128xi32>
    %808 = arith.select %806, %491, %807 : vector<2x128xi1>, vector<2x128xi32>
    %cst_458 = arith.constant dense<2147483647> : vector<2xi32>
    %809 = vector.multi_reduction <minsi>, %808, %cst_458 [1] : vector<2x128xi32> to vector<2xi32>
    %810 = vector.shape_cast %809 : vector<2xi32> to vector<2x1xi32>
    %811 = vector.broadcast %c2_i32_404 : i32 to vector<2x5xi32>
    %812 = arith.cmpi eq, %492, %811 : vector<2x5xi32>
    %c0_459 = arith.constant 0 : index
    %c0_460 = arith.constant 0 : index
    %813 = vector.load %arg22[%c0_459, %c0_460] : memref<2x5xi32, #tpu.memory_space<vmem>>, vector<2x5xi32>
    %814 = vector.shape_cast %810 : vector<2x1xi32> to vector<2x1xi32>
    %815 = vector.broadcast %814 : vector<2x1xi32> to vector<2x5xi32>
    %816 = arith.select %812, %815, %813 : vector<2x5xi1>, vector<2x5xi32>
    %c0_461 = arith.constant 0 : index
    %c0_462 = arith.constant 0 : index
    %817 = vector.load %arg22[%c0_461, %c0_462] : memref<2x5xi32, #tpu.memory_space<vmem>>, vector<2x5xi32>
    tpu.vector_store %arg22[%c0_461, %c0_462], %816 {strides = array<i32>} : memref<2x5xi32, #tpu.memory_space<vmem>>, vector<2x5xi32>,
    %818 = arith.index_cast %c2_i32_404 : i32 to index
    %819 = memref.load %arg0[%818] : memref<5xi32, #tpu.memory_space<smem>>
    %c1_i32_463 = arith.constant 1 : i32
    %820 = arith.cmpi eq, %819, %c1_i32_463 : i32
    %821 = arith.extui %820 : i1 to i32
    %c0_i32_464 = arith.constant 0 : i32
    %822 = arith.cmpi ne, %821, %c0_i32_464 : i32
    scf.if %822 {
      %c1_i32_594 = arith.constant 1 : i32
      %1048 = arith.addi %c2_i32_404, %c1_i32_594 : i32
      %1049 = arith.index_cast %1048 : i32 to index
      %c0_595 = arith.constant 0 : index
      %c0_596 = arith.constant 0 : index
      %1050 = vector.load %arg3[%1049, %c0_595, %c0_596] : memref<6x2x16xf32, #tpu.memory_space<vmem>>, vector<1x2x16xf32>
      %1051 = vector.shape_cast %1050 : vector<1x2x16xf32> to vector<2x16xf32>
      %c0_597 = arith.constant 0 : index
      %c0_598 = arith.constant 0 : index
      %1052 = vector.load %arg27[%c0_597, %c0_598] : memref<2x16xf32, #tpu.memory_space<vmem>>, vector<2x16xf32>
      tpu.vector_store %arg27[%c0_597, %c0_598], %1051 {strides = array<i32>} : memref<2x16xf32, #tpu.memory_space<vmem>>, vector<2x16xf32>,
    } else {
    }
    %true_465 = arith.constant true
    %823 = arith.xori %820, %true_465 : i1
    %824 = arith.extui %823 : i1 to i32
    %c0_i32_466 = arith.constant 0 : i32
    %825 = arith.cmpi ne, %824, %c0_i32_466 : i32
    scf.if %825 {
      %1048 = vector.broadcast %810 : vector<2x1xi32> to vector<2x128xi32>
      %1049 = arith.cmpi eq, %491, %1048 : vector<2x128xi32>
      %1050 = arith.extui %1049 : vector<2x128xi1> to vector<2x128xi32>
      %1051 = arith.sitofp %1050 : vector<2x128xi32> to vector<2x128xf32>
      %c0_594 = arith.constant 0 : index
      %c0_595 = arith.constant 0 : index
      %1052 = vector.load %arg20[%c0_594, %c0_595] : memref<128x16xf32, #tpu.memory_space<vmem>>, vector<128x16xf32>
      %cst_596 = arith.constant dense<0.000000e+00> : vector<2x16xf32>
      %1053 = tpu.matmul %1051, %1052, %cst_596 {dimension_numbers = #tpu.dot_dimension_numbers<[1], [0], [0], [1], [0, 0, 1, 1], [], []>} : vector<2x128xf32>, vector<128x16xf32>, vector<2x16xf32> -> vector<2x16xf32>
      %c0_597 = arith.constant 0 : index
      %c0_598 = arith.constant 0 : index
      %1054 = vector.load %arg27[%c0_597, %c0_598] : memref<2x16xf32, #tpu.memory_space<vmem>>, vector<2x16xf32>
      tpu.vector_store %arg27[%c0_597, %c0_598], %1053 {strides = array<i32>} : memref<2x16xf32, #tpu.memory_space<vmem>>, vector<2x16xf32>,
    } else {
    }
    %c3_i32_467 = arith.constant 3 : i32
    %c0_468 = arith.constant 0 : index
    %c0_469 = arith.constant 0 : index
    %826 = vector.load %arg25[%c0_468, %c0_469] : memref<2x32xf32, #tpu.memory_space<vmem>>, vector<2x32xf32>
    %c0_470 = arith.constant 0 : index
    %c0_471 = arith.constant 0 : index
    %827 = vector.load %arg27[%c0_470, %c0_471] : memref<2x16xf32, #tpu.memory_space<vmem>>, vector<2x16xf32>
    %c0_472 = arith.constant 0 : index
    %c0_473 = arith.constant 0 : index
    %828 = vector.load %arg10[%c0_472, %c0_473] : memref<32x128xf32, #tpu.memory_space<vmem>>, vector<32x128xf32>
    %cst_474 = arith.constant dense<0.000000e+00> : vector<2x128xf32>
    %829 = tpu.matmul %826, %828, %cst_474 {dimension_numbers = #tpu.dot_dimension_numbers<[1], [0], [0], [1], [0, 0, 1, 1], [], []>} : vector<2x32xf32>, vector<32x128xf32>, vector<2x128xf32> -> vector<2x128xf32>
    %c0_475 = arith.constant 0 : index
    %c0_476 = arith.constant 0 : index
    %830 = vector.load %arg11[%c0_475, %c0_476] : memref<1x128xf32, #tpu.memory_space<vmem>>, vector<1x128xf32>
    %831 = vector.broadcast %830 : vector<1x128xf32> to vector<2x128xf32>
    %832 = arith.addf %829, %831 : vector<2x128xf32>
    %833 = vector.extract_strided_slice %832 {offsets = [0, 0], sizes = [2, 32], strides = [1, 1]} : vector<2x128xf32> to vector<2x32xf32>
    %834 = vector.extract_strided_slice %832 {offsets = [0, 32], sizes = [2, 96], strides = [1, 1]} : vector<2x128xf32> to vector<2x96xf32>
    %c0_477 = arith.constant 0 : index
    %c0_478 = arith.constant 0 : index
    %c0_479 = arith.constant 0 : index
    %835 = vector.load %arg24[%c0_477, %c0_478, %c0_479] : memref<8x2x32xf32, #tpu.memory_space<vmem>>, vector<8x2x32xf32>
    %836 = vector.shape_cast %833 : vector<2x32xf32> to vector<1x2x32xf32>
    %837 = vector.broadcast %836 : vector<1x2x32xf32> to vector<8x2x32xf32>
    %838 = arith.addf %835, %837 : vector<8x2x32xf32>
    %839 = math.tanh %838 : vector<8x2x32xf32>
    %c0_480 = arith.constant 0 : index
    %c0_481 = arith.constant 0 : index
    %840 = vector.load %arg12[%c0_480, %c0_481] : memref<1x32xf32, #tpu.memory_space<vmem>>, vector<1x32xf32>
    %841 = vector.shape_cast %840 : vector<1x32xf32> to vector<1x1x32xf32>
    %842 = vector.broadcast %841 : vector<1x1x32xf32> to vector<8x2x32xf32>
    %843 = arith.mulf %839, %842 : vector<8x2x32xf32>
    %cst_482 = arith.constant dense<0.000000e+00> : vector<8x2xf32>
    %844 = vector.multi_reduction <add>, %843, %cst_482 [2] : vector<8x2x32xf32> to vector<8x2xf32>
    %c0_483 = arith.constant 0 : index
    %c0_484 = arith.constant 0 : index
    %845 = vector.load %arg4[%c0_483, %c0_484] : memref<8x2xf32, #tpu.memory_space<vmem>>, vector<8x2xf32>
    %cst_485 = arith.constant 0.000000e+00 : f32
    %846 = vector.broadcast %cst_485 : f32 to vector<8x2xf32>
    %847 = arith.cmpf ogt, %845, %846 : vector<8x2xf32>
    %cst_486 = arith.constant -1.000000e+09 : f32
    %848 = vector.broadcast %cst_486 : f32 to vector<8x2xf32>
    %849 = arith.select %847, %844, %848 : vector<8x2xi1>, vector<8x2xf32>
    %cst_487 = arith.constant dense<0xFF800000> : vector<2xf32>
    %850 = vector.multi_reduction <maximumf>, %849, %cst_487 [0] : vector<8x2xf32> to vector<2xf32>
    %851 = vector.shape_cast %850 : vector<2xf32> to vector<1x2xf32>
    %852 = vector.broadcast %851 : vector<1x2xf32> to vector<8x2xf32>
    %853 = arith.subf %849, %852 : vector<8x2xf32>
    %854 = math.exp %853 : vector<8x2xf32>
    %cst_488 = arith.constant dense<0.000000e+00> : vector<2xf32>
    %855 = vector.multi_reduction <add>, %854, %cst_488 [0] : vector<8x2xf32> to vector<2xf32>
    %856 = vector.shape_cast %855 : vector<2xf32> to vector<1x2xf32>
    %857 = vector.broadcast %856 : vector<1x2xf32> to vector<8x2xf32>
    %858 = arith.divf %854, %857 : vector<8x2xf32>
    %859 = vector.shape_cast %858 : vector<8x2xf32> to vector<8x2x1xf32>
    %c0_489 = arith.constant 0 : index
    %c0_490 = arith.constant 0 : index
    %c0_491 = arith.constant 0 : index
    %860 = vector.load %arg23[%c0_489, %c0_490, %c0_491] : memref<8x2x32xf32, #tpu.memory_space<vmem>>, vector<8x2x32xf32>
    %861 = vector.broadcast %859 : vector<8x2x1xf32> to vector<8x2x32xf32>
    %862 = arith.mulf %861, %860 : vector<8x2x32xf32>
    %cst_492 = arith.constant dense<0.000000e+00> : vector<2x32xf32>
    %863 = vector.multi_reduction <add>, %862, %cst_492 [0] : vector<8x2x32xf32> to vector<2x32xf32>
    %c0_493 = arith.constant 0 : index
    %c0_494 = arith.constant 0 : index
    %864 = vector.load %arg13[%c0_493, %c0_494] : memref<16x96xf32, #tpu.memory_space<vmem>>, vector<16x96xf32>
    %cst_495 = arith.constant dense<0.000000e+00> : vector<2x96xf32>
    %865 = tpu.matmul %827, %864, %cst_495 {dimension_numbers = #tpu.dot_dimension_numbers<[1], [0], [0], [1], [0, 0, 1, 1], [], []>} : vector<2x16xf32>, vector<16x96xf32>, vector<2x96xf32> -> vector<2x96xf32>
    %c0_496 = arith.constant 0 : index
    %c0_497 = arith.constant 0 : index
    %866 = vector.load %arg14[%c0_496, %c0_497] : memref<32x96xf32, #tpu.memory_space<vmem>>, vector<32x96xf32>
    %cst_498 = arith.constant dense<0.000000e+00> : vector<2x96xf32>
    %867 = tpu.matmul %863, %866, %cst_498 {dimension_numbers = #tpu.dot_dimension_numbers<[1], [0], [0], [1], [0, 0, 1, 1], [], []>} : vector<2x32xf32>, vector<32x96xf32>, vector<2x96xf32> -> vector<2x96xf32>
    %868 = arith.addf %865, %867 : vector<2x96xf32>
    %c0_499 = arith.constant 0 : index
    %c0_500 = arith.constant 0 : index
    %869 = vector.load %arg15[%c0_499, %c0_500] : memref<1x96xf32, #tpu.memory_space<vmem>>, vector<1x96xf32>
    %870 = vector.broadcast %869 : vector<1x96xf32> to vector<2x96xf32>
    %871 = arith.addf %868, %870 : vector<2x96xf32>
    %872 = vector.extract_strided_slice %871 {offsets = [0, 0], sizes = [2, 32], strides = [1, 1]} : vector<2x96xf32> to vector<2x32xf32>
    %873 = vector.extract_strided_slice %834 {offsets = [0, 0], sizes = [2, 32], strides = [1, 1]} : vector<2x96xf32> to vector<2x32xf32>
    %874 = arith.addf %872, %873 : vector<2x32xf32>
    %875 = arith.negf %874 : vector<2x32xf32>
    %876 = math.exp %875 : vector<2x32xf32>
    %cst_501 = arith.constant 1.000000e+00 : f32
    %877 = vector.broadcast %cst_501 : f32 to vector<2x32xf32>
    %878 = arith.addf %877, %876 : vector<2x32xf32>
    %879 = arith.divf %877, %878 : vector<2x32xf32>
    %880 = vector.extract_strided_slice %871 {offsets = [0, 32], sizes = [2, 32], strides = [1, 1]} : vector<2x96xf32> to vector<2x32xf32>
    %881 = vector.extract_strided_slice %834 {offsets = [0, 32], sizes = [2, 32], strides = [1, 1]} : vector<2x96xf32> to vector<2x32xf32>
    %882 = arith.addf %880, %881 : vector<2x32xf32>
    %883 = arith.negf %882 : vector<2x32xf32>
    %884 = math.exp %883 : vector<2x32xf32>
    %cst_502 = arith.constant 1.000000e+00 : f32
    %885 = vector.broadcast %cst_502 : f32 to vector<2x32xf32>
    %886 = arith.addf %885, %884 : vector<2x32xf32>
    %887 = arith.divf %885, %886 : vector<2x32xf32>
    %888 = vector.extract_strided_slice %871 {offsets = [0, 64], sizes = [2, 32], strides = [1, 1]} : vector<2x96xf32> to vector<2x32xf32>
    %889 = vector.extract_strided_slice %834 {offsets = [0, 64], sizes = [2, 32], strides = [1, 1]} : vector<2x96xf32> to vector<2x32xf32>
    %890 = arith.mulf %879, %889 : vector<2x32xf32>
    %891 = arith.addf %888, %890 : vector<2x32xf32>
    %892 = math.tanh %891 : vector<2x32xf32>
    %cst_503 = arith.constant 1.000000e+00 : f32
    %893 = vector.broadcast %cst_503 : f32 to vector<2x32xf32>
    %894 = arith.subf %893, %887 : vector<2x32xf32>
    %895 = arith.mulf %894, %892 : vector<2x32xf32>
    %896 = arith.mulf %887, %826 : vector<2x32xf32>
    %897 = arith.addf %895, %896 : vector<2x32xf32>
    %c0_504 = arith.constant 0 : index
    %c0_505 = arith.constant 0 : index
    %898 = vector.load %arg25[%c0_504, %c0_505] : memref<2x32xf32, #tpu.memory_space<vmem>>, vector<2x32xf32>
    tpu.vector_store %arg25[%c0_504, %c0_505], %897 {strides = array<i32>} : memref<2x32xf32, #tpu.memory_space<vmem>>, vector<2x32xf32>,
    %c0_506 = arith.constant 0 : index
    %c0_507 = arith.constant 0 : index
    %899 = vector.load %arg16[%c0_506, %c0_507] : memref<32x128xf32, #tpu.memory_space<vmem>>, vector<32x128xf32>
    %cst_508 = arith.constant dense<0.000000e+00> : vector<2x128xf32>
    %900 = tpu.matmul %897, %899, %cst_508 {dimension_numbers = #tpu.dot_dimension_numbers<[1], [0], [0], [1], [0, 0, 1, 1], [], []>} : vector<2x32xf32>, vector<32x128xf32>, vector<2x128xf32> -> vector<2x128xf32>
    %c0_509 = arith.constant 0 : index
    %c0_510 = arith.constant 0 : index
    %901 = vector.load %arg17[%c0_509, %c0_510] : memref<32x128xf32, #tpu.memory_space<vmem>>, vector<32x128xf32>
    %cst_511 = arith.constant dense<0.000000e+00> : vector<2x128xf32>
    %902 = tpu.matmul %863, %901, %cst_511 {dimension_numbers = #tpu.dot_dimension_numbers<[1], [0], [0], [1], [0, 0, 1, 1], [], []>} : vector<2x32xf32>, vector<32x128xf32>, vector<2x128xf32> -> vector<2x128xf32>
    %903 = arith.addf %900, %902 : vector<2x128xf32>
    %c0_512 = arith.constant 0 : index
    %c0_513 = arith.constant 0 : index
    %904 = vector.load %arg18[%c0_512, %c0_513] : memref<16x128xf32, #tpu.memory_space<vmem>>, vector<16x128xf32>
    %cst_514 = arith.constant dense<0.000000e+00> : vector<2x128xf32>
    %905 = tpu.matmul %827, %904, %cst_514 {dimension_numbers = #tpu.dot_dimension_numbers<[1], [0], [0], [1], [0, 0, 1, 1], [], []>} : vector<2x16xf32>, vector<16x128xf32>, vector<2x128xf32> -> vector<2x128xf32>
    %906 = arith.addf %903, %905 : vector<2x128xf32>
    %c0_515 = arith.constant 0 : index
    %c0_516 = arith.constant 0 : index
    %907 = vector.load %arg19[%c0_515, %c0_516] : memref<1x128xf32, #tpu.memory_space<vmem>>, vector<1x128xf32>
    %908 = vector.broadcast %907 : vector<1x128xf32> to vector<2x128xf32>
    %909 = arith.addf %906, %908 : vector<2x128xf32>
    %910 = arith.index_cast %c3_i32_467 : i32 to index
    %c0_517 = arith.constant 0 : index
    %c0_518 = arith.constant 0 : index
    %911 = vector.load %arg21[%910, %c0_517, %c0_518] : memref<5x2x128xf32, #tpu.memory_space<vmem>>, vector<1x2x128xf32>
    %912 = vector.shape_cast %911 : vector<1x2x128xf32> to vector<2x128xf32>
    %913 = vector.shape_cast %909 : vector<2x128xf32> to vector<1x2x128xf32>
    tpu.vector_store %arg21[%910, %c0_517, %c0_518], %913 {strides = array<i32>} : memref<5x2x128xf32, #tpu.memory_space<vmem>>, vector<1x2x128xf32>,
    %cst_519 = arith.constant dense<0xFF800000> : vector<2xf32>
    %914 = vector.multi_reduction <maximumf>, %909, %cst_519 [1] : vector<2x128xf32> to vector<2xf32>
    %915 = vector.shape_cast %914 : vector<2xf32> to vector<2x1xf32>
    %916 = vector.broadcast %915 : vector<2x1xf32> to vector<2x128xf32>
    %917 = arith.cmpf oeq, %909, %916 : vector<2x128xf32>
    %c128_i32_520 = arith.constant 128 : i32
    %918 = vector.broadcast %c128_i32_520 : i32 to vector<2x128xi32>
    %919 = arith.select %917, %491, %918 : vector<2x128xi1>, vector<2x128xi32>
    %cst_521 = arith.constant dense<2147483647> : vector<2xi32>
    %920 = vector.multi_reduction <minsi>, %919, %cst_521 [1] : vector<2x128xi32> to vector<2xi32>
    %921 = vector.shape_cast %920 : vector<2xi32> to vector<2x1xi32>
    %922 = vector.broadcast %c3_i32_467 : i32 to vector<2x5xi32>
    %923 = arith.cmpi eq, %492, %922 : vector<2x5xi32>
    %c0_522 = arith.constant 0 : index
    %c0_523 = arith.constant 0 : index
    %924 = vector.load %arg22[%c0_522, %c0_523] : memref<2x5xi32, #tpu.memory_space<vmem>>, vector<2x5xi32>
    %925 = vector.shape_cast %921 : vector<2x1xi32> to vector<2x1xi32>
    %926 = vector.broadcast %925 : vector<2x1xi32> to vector<2x5xi32>
    %927 = arith.select %923, %926, %924 : vector<2x5xi1>, vector<2x5xi32>
    %c0_524 = arith.constant 0 : index
    %c0_525 = arith.constant 0 : index
    %928 = vector.load %arg22[%c0_524, %c0_525] : memref<2x5xi32, #tpu.memory_space<vmem>>, vector<2x5xi32>
    tpu.vector_store %arg22[%c0_524, %c0_525], %927 {strides = array<i32>} : memref<2x5xi32, #tpu.memory_space<vmem>>, vector<2x5xi32>,
    %929 = arith.index_cast %c3_i32_467 : i32 to index
    %930 = memref.load %arg0[%929] : memref<5xi32, #tpu.memory_space<smem>>
    %c1_i32_526 = arith.constant 1 : i32
    %931 = arith.cmpi eq, %930, %c1_i32_526 : i32
    %932 = arith.extui %931 : i1 to i32
    %c0_i32_527 = arith.constant 0 : i32
    %933 = arith.cmpi ne, %932, %c0_i32_527 : i32
    scf.if %933 {
      %c1_i32_594 = arith.constant 1 : i32
      %1048 = arith.addi %c3_i32_467, %c1_i32_594 : i32
      %1049 = arith.index_cast %1048 : i32 to index
      %c0_595 = arith.constant 0 : index
      %c0_596 = arith.constant 0 : index
      %1050 = vector.load %arg3[%1049, %c0_595, %c0_596] : memref<6x2x16xf32, #tpu.memory_space<vmem>>, vector<1x2x16xf32>
      %1051 = vector.shape_cast %1050 : vector<1x2x16xf32> to vector<2x16xf32>
      %c0_597 = arith.constant 0 : index
      %c0_598 = arith.constant 0 : index
      %1052 = vector.load %arg27[%c0_597, %c0_598] : memref<2x16xf32, #tpu.memory_space<vmem>>, vector<2x16xf32>
      tpu.vector_store %arg27[%c0_597, %c0_598], %1051 {strides = array<i32>} : memref<2x16xf32, #tpu.memory_space<vmem>>, vector<2x16xf32>,
    } else {
    }
    %true_528 = arith.constant true
    %934 = arith.xori %931, %true_528 : i1
    %935 = arith.extui %934 : i1 to i32
    %c0_i32_529 = arith.constant 0 : i32
    %936 = arith.cmpi ne, %935, %c0_i32_529 : i32
    scf.if %936 {
      %1048 = vector.broadcast %921 : vector<2x1xi32> to vector<2x128xi32>
      %1049 = arith.cmpi eq, %491, %1048 : vector<2x128xi32>
      %1050 = arith.extui %1049 : vector<2x128xi1> to vector<2x128xi32>
      %1051 = arith.sitofp %1050 : vector<2x128xi32> to vector<2x128xf32>
      %c0_594 = arith.constant 0 : index
      %c0_595 = arith.constant 0 : index
      %1052 = vector.load %arg20[%c0_594, %c0_595] : memref<128x16xf32, #tpu.memory_space<vmem>>, vector<128x16xf32>
      %cst_596 = arith.constant dense<0.000000e+00> : vector<2x16xf32>
      %1053 = tpu.matmul %1051, %1052, %cst_596 {dimension_numbers = #tpu.dot_dimension_numbers<[1], [0], [0], [1], [0, 0, 1, 1], [], []>} : vector<2x128xf32>, vector<128x16xf32>, vector<2x16xf32> -> vector<2x16xf32>
      %c0_597 = arith.constant 0 : index
      %c0_598 = arith.constant 0 : index
      %1054 = vector.load %arg27[%c0_597, %c0_598] : memref<2x16xf32, #tpu.memory_space<vmem>>, vector<2x16xf32>
      tpu.vector_store %arg27[%c0_597, %c0_598], %1053 {strides = array<i32>} : memref<2x16xf32, #tpu.memory_space<vmem>>, vector<2x16xf32>,
    } else {
    }
    %c4_i32_530 = arith.constant 4 : i32
    %c0_531 = arith.constant 0 : index
    %c0_532 = arith.constant 0 : index
    %937 = vector.load %arg25[%c0_531, %c0_532] : memref<2x32xf32, #tpu.memory_space<vmem>>, vector<2x32xf32>
    %c0_533 = arith.constant 0 : index
    %c0_534 = arith.constant 0 : index
    %938 = vector.load %arg27[%c0_533, %c0_534] : memref<2x16xf32, #tpu.memory_space<vmem>>, vector<2x16xf32>
    %c0_535 = arith.constant 0 : index
    %c0_536 = arith.constant 0 : index
    %939 = vector.load %arg10[%c0_535, %c0_536] : memref<32x128xf32, #tpu.memory_space<vmem>>, vector<32x128xf32>
    %cst_537 = arith.constant dense<0.000000e+00> : vector<2x128xf32>
    %940 = tpu.matmul %937, %939, %cst_537 {dimension_numbers = #tpu.dot_dimension_numbers<[1], [0], [0], [1], [0, 0, 1, 1], [], []>} : vector<2x32xf32>, vector<32x128xf32>, vector<2x128xf32> -> vector<2x128xf32>
    %c0_538 = arith.constant 0 : index
    %c0_539 = arith.constant 0 : index
    %941 = vector.load %arg11[%c0_538, %c0_539] : memref<1x128xf32, #tpu.memory_space<vmem>>, vector<1x128xf32>
    %942 = vector.broadcast %941 : vector<1x128xf32> to vector<2x128xf32>
    %943 = arith.addf %940, %942 : vector<2x128xf32>
    %944 = vector.extract_strided_slice %943 {offsets = [0, 0], sizes = [2, 32], strides = [1, 1]} : vector<2x128xf32> to vector<2x32xf32>
    %945 = vector.extract_strided_slice %943 {offsets = [0, 32], sizes = [2, 96], strides = [1, 1]} : vector<2x128xf32> to vector<2x96xf32>
    %c0_540 = arith.constant 0 : index
    %c0_541 = arith.constant 0 : index
    %c0_542 = arith.constant 0 : index
    %946 = vector.load %arg24[%c0_540, %c0_541, %c0_542] : memref<8x2x32xf32, #tpu.memory_space<vmem>>, vector<8x2x32xf32>
    %947 = vector.shape_cast %944 : vector<2x32xf32> to vector<1x2x32xf32>
    %948 = vector.broadcast %947 : vector<1x2x32xf32> to vector<8x2x32xf32>
    %949 = arith.addf %946, %948 : vector<8x2x32xf32>
    %950 = math.tanh %949 : vector<8x2x32xf32>
    %c0_543 = arith.constant 0 : index
    %c0_544 = arith.constant 0 : index
    %951 = vector.load %arg12[%c0_543, %c0_544] : memref<1x32xf32, #tpu.memory_space<vmem>>, vector<1x32xf32>
    %952 = vector.shape_cast %951 : vector<1x32xf32> to vector<1x1x32xf32>
    %953 = vector.broadcast %952 : vector<1x1x32xf32> to vector<8x2x32xf32>
    %954 = arith.mulf %950, %953 : vector<8x2x32xf32>
    %cst_545 = arith.constant dense<0.000000e+00> : vector<8x2xf32>
    %955 = vector.multi_reduction <add>, %954, %cst_545 [2] : vector<8x2x32xf32> to vector<8x2xf32>
    %c0_546 = arith.constant 0 : index
    %c0_547 = arith.constant 0 : index
    %956 = vector.load %arg4[%c0_546, %c0_547] : memref<8x2xf32, #tpu.memory_space<vmem>>, vector<8x2xf32>
    %cst_548 = arith.constant 0.000000e+00 : f32
    %957 = vector.broadcast %cst_548 : f32 to vector<8x2xf32>
    %958 = arith.cmpf ogt, %956, %957 : vector<8x2xf32>
    %cst_549 = arith.constant -1.000000e+09 : f32
    %959 = vector.broadcast %cst_549 : f32 to vector<8x2xf32>
    %960 = arith.select %958, %955, %959 : vector<8x2xi1>, vector<8x2xf32>
    %cst_550 = arith.constant dense<0xFF800000> : vector<2xf32>
    %961 = vector.multi_reduction <maximumf>, %960, %cst_550 [0] : vector<8x2xf32> to vector<2xf32>
    %962 = vector.shape_cast %961 : vector<2xf32> to vector<1x2xf32>
    %963 = vector.broadcast %962 : vector<1x2xf32> to vector<8x2xf32>
    %964 = arith.subf %960, %963 : vector<8x2xf32>
    %965 = math.exp %964 : vector<8x2xf32>
    %cst_551 = arith.constant dense<0.000000e+00> : vector<2xf32>
    %966 = vector.multi_reduction <add>, %965, %cst_551 [0] : vector<8x2xf32> to vector<2xf32>
    %967 = vector.shape_cast %966 : vector<2xf32> to vector<1x2xf32>
    %968 = vector.broadcast %967 : vector<1x2xf32> to vector<8x2xf32>
    %969 = arith.divf %965, %968 : vector<8x2xf32>
    %970 = vector.shape_cast %969 : vector<8x2xf32> to vector<8x2x1xf32>
    %c0_552 = arith.constant 0 : index
    %c0_553 = arith.constant 0 : index
    %c0_554 = arith.constant 0 : index
    %971 = vector.load %arg23[%c0_552, %c0_553, %c0_554] : memref<8x2x32xf32, #tpu.memory_space<vmem>>, vector<8x2x32xf32>
    %972 = vector.broadcast %970 : vector<8x2x1xf32> to vector<8x2x32xf32>
    %973 = arith.mulf %972, %971 : vector<8x2x32xf32>
    %cst_555 = arith.constant dense<0.000000e+00> : vector<2x32xf32>
    %974 = vector.multi_reduction <add>, %973, %cst_555 [0] : vector<8x2x32xf32> to vector<2x32xf32>
    %c0_556 = arith.constant 0 : index
    %c0_557 = arith.constant 0 : index
    %975 = vector.load %arg13[%c0_556, %c0_557] : memref<16x96xf32, #tpu.memory_space<vmem>>, vector<16x96xf32>
    %cst_558 = arith.constant dense<0.000000e+00> : vector<2x96xf32>
    %976 = tpu.matmul %938, %975, %cst_558 {dimension_numbers = #tpu.dot_dimension_numbers<[1], [0], [0], [1], [0, 0, 1, 1], [], []>} : vector<2x16xf32>, vector<16x96xf32>, vector<2x96xf32> -> vector<2x96xf32>
    %c0_559 = arith.constant 0 : index
    %c0_560 = arith.constant 0 : index
    %977 = vector.load %arg14[%c0_559, %c0_560] : memref<32x96xf32, #tpu.memory_space<vmem>>, vector<32x96xf32>
    %cst_561 = arith.constant dense<0.000000e+00> : vector<2x96xf32>
    %978 = tpu.matmul %974, %977, %cst_561 {dimension_numbers = #tpu.dot_dimension_numbers<[1], [0], [0], [1], [0, 0, 1, 1], [], []>} : vector<2x32xf32>, vector<32x96xf32>, vector<2x96xf32> -> vector<2x96xf32>
    %979 = arith.addf %976, %978 : vector<2x96xf32>
    %c0_562 = arith.constant 0 : index
    %c0_563 = arith.constant 0 : index
    %980 = vector.load %arg15[%c0_562, %c0_563] : memref<1x96xf32, #tpu.memory_space<vmem>>, vector<1x96xf32>
    %981 = vector.broadcast %980 : vector<1x96xf32> to vector<2x96xf32>
    %982 = arith.addf %979, %981 : vector<2x96xf32>
    %983 = vector.extract_strided_slice %982 {offsets = [0, 0], sizes = [2, 32], strides = [1, 1]} : vector<2x96xf32> to vector<2x32xf32>
    %984 = vector.extract_strided_slice %945 {offsets = [0, 0], sizes = [2, 32], strides = [1, 1]} : vector<2x96xf32> to vector<2x32xf32>
    %985 = arith.addf %983, %984 : vector<2x32xf32>
    %986 = arith.negf %985 : vector<2x32xf32>
    %987 = math.exp %986 : vector<2x32xf32>
    %cst_564 = arith.constant 1.000000e+00 : f32
    %988 = vector.broadcast %cst_564 : f32 to vector<2x32xf32>
    %989 = arith.addf %988, %987 : vector<2x32xf32>
    %990 = arith.divf %988, %989 : vector<2x32xf32>
    %991 = vector.extract_strided_slice %982 {offsets = [0, 32], sizes = [2, 32], strides = [1, 1]} : vector<2x96xf32> to vector<2x32xf32>
    %992 = vector.extract_strided_slice %945 {offsets = [0, 32], sizes = [2, 32], strides = [1, 1]} : vector<2x96xf32> to vector<2x32xf32>
    %993 = arith.addf %991, %992 : vector<2x32xf32>
    %994 = arith.negf %993 : vector<2x32xf32>
    %995 = math.exp %994 : vector<2x32xf32>
    %cst_565 = arith.constant 1.000000e+00 : f32
    %996 = vector.broadcast %cst_565 : f32 to vector<2x32xf32>
    %997 = arith.addf %996, %995 : vector<2x32xf32>
    %998 = arith.divf %996, %997 : vector<2x32xf32>
    %999 = vector.extract_strided_slice %982 {offsets = [0, 64], sizes = [2, 32], strides = [1, 1]} : vector<2x96xf32> to vector<2x32xf32>
    %1000 = vector.extract_strided_slice %945 {offsets = [0, 64], sizes = [2, 32], strides = [1, 1]} : vector<2x96xf32> to vector<2x32xf32>
    %1001 = arith.mulf %990, %1000 : vector<2x32xf32>
    %1002 = arith.addf %999, %1001 : vector<2x32xf32>
    %1003 = math.tanh %1002 : vector<2x32xf32>
    %cst_566 = arith.constant 1.000000e+00 : f32
    %1004 = vector.broadcast %cst_566 : f32 to vector<2x32xf32>
    %1005 = arith.subf %1004, %998 : vector<2x32xf32>
    %1006 = arith.mulf %1005, %1003 : vector<2x32xf32>
    %1007 = arith.mulf %998, %937 : vector<2x32xf32>
    %1008 = arith.addf %1006, %1007 : vector<2x32xf32>
    %c0_567 = arith.constant 0 : index
    %c0_568 = arith.constant 0 : index
    %1009 = vector.load %arg25[%c0_567, %c0_568] : memref<2x32xf32, #tpu.memory_space<vmem>>, vector<2x32xf32>
    tpu.vector_store %arg25[%c0_567, %c0_568], %1008 {strides = array<i32>} : memref<2x32xf32, #tpu.memory_space<vmem>>, vector<2x32xf32>,
    %c0_569 = arith.constant 0 : index
    %c0_570 = arith.constant 0 : index
    %1010 = vector.load %arg16[%c0_569, %c0_570] : memref<32x128xf32, #tpu.memory_space<vmem>>, vector<32x128xf32>
    %cst_571 = arith.constant dense<0.000000e+00> : vector<2x128xf32>
    %1011 = tpu.matmul %1008, %1010, %cst_571 {dimension_numbers = #tpu.dot_dimension_numbers<[1], [0], [0], [1], [0, 0, 1, 1], [], []>} : vector<2x32xf32>, vector<32x128xf32>, vector<2x128xf32> -> vector<2x128xf32>
    %c0_572 = arith.constant 0 : index
    %c0_573 = arith.constant 0 : index
    %1012 = vector.load %arg17[%c0_572, %c0_573] : memref<32x128xf32, #tpu.memory_space<vmem>>, vector<32x128xf32>
    %cst_574 = arith.constant dense<0.000000e+00> : vector<2x128xf32>
    %1013 = tpu.matmul %974, %1012, %cst_574 {dimension_numbers = #tpu.dot_dimension_numbers<[1], [0], [0], [1], [0, 0, 1, 1], [], []>} : vector<2x32xf32>, vector<32x128xf32>, vector<2x128xf32> -> vector<2x128xf32>
    %1014 = arith.addf %1011, %1013 : vector<2x128xf32>
    %c0_575 = arith.constant 0 : index
    %c0_576 = arith.constant 0 : index
    %1015 = vector.load %arg18[%c0_575, %c0_576] : memref<16x128xf32, #tpu.memory_space<vmem>>, vector<16x128xf32>
    %cst_577 = arith.constant dense<0.000000e+00> : vector<2x128xf32>
    %1016 = tpu.matmul %938, %1015, %cst_577 {dimension_numbers = #tpu.dot_dimension_numbers<[1], [0], [0], [1], [0, 0, 1, 1], [], []>} : vector<2x16xf32>, vector<16x128xf32>, vector<2x128xf32> -> vector<2x128xf32>
    %1017 = arith.addf %1014, %1016 : vector<2x128xf32>
    %c0_578 = arith.constant 0 : index
    %c0_579 = arith.constant 0 : index
    %1018 = vector.load %arg19[%c0_578, %c0_579] : memref<1x128xf32, #tpu.memory_space<vmem>>, vector<1x128xf32>
    %1019 = vector.broadcast %1018 : vector<1x128xf32> to vector<2x128xf32>
    %1020 = arith.addf %1017, %1019 : vector<2x128xf32>
    %1021 = arith.index_cast %c4_i32_530 : i32 to index
    %c0_580 = arith.constant 0 : index
    %c0_581 = arith.constant 0 : index
    %1022 = vector.load %arg21[%1021, %c0_580, %c0_581] : memref<5x2x128xf32, #tpu.memory_space<vmem>>, vector<1x2x128xf32>
    %1023 = vector.shape_cast %1022 : vector<1x2x128xf32> to vector<2x128xf32>
    %1024 = vector.shape_cast %1020 : vector<2x128xf32> to vector<1x2x128xf32>
    tpu.vector_store %arg21[%1021, %c0_580, %c0_581], %1024 {strides = array<i32>} : memref<5x2x128xf32, #tpu.memory_space<vmem>>, vector<1x2x128xf32>,
    %cst_582 = arith.constant dense<0xFF800000> : vector<2xf32>
    %1025 = vector.multi_reduction <maximumf>, %1020, %cst_582 [1] : vector<2x128xf32> to vector<2xf32>
    %1026 = vector.shape_cast %1025 : vector<2xf32> to vector<2x1xf32>
    %1027 = vector.broadcast %1026 : vector<2x1xf32> to vector<2x128xf32>
    %1028 = arith.cmpf oeq, %1020, %1027 : vector<2x128xf32>
    %c128_i32_583 = arith.constant 128 : i32
    %1029 = vector.broadcast %c128_i32_583 : i32 to vector<2x128xi32>
    %1030 = arith.select %1028, %491, %1029 : vector<2x128xi1>, vector<2x128xi32>
    %cst_584 = arith.constant dense<2147483647> : vector<2xi32>
    %1031 = vector.multi_reduction <minsi>, %1030, %cst_584 [1] : vector<2x128xi32> to vector<2xi32>
    %1032 = vector.shape_cast %1031 : vector<2xi32> to vector<2x1xi32>
    %1033 = vector.broadcast %c4_i32_530 : i32 to vector<2x5xi32>
    %1034 = arith.cmpi eq, %492, %1033 : vector<2x5xi32>
    %c0_585 = arith.constant 0 : index
    %c0_586 = arith.constant 0 : index
    %1035 = vector.load %arg22[%c0_585, %c0_586] : memref<2x5xi32, #tpu.memory_space<vmem>>, vector<2x5xi32>
    %1036 = vector.shape_cast %1032 : vector<2x1xi32> to vector<2x1xi32>
    %1037 = vector.broadcast %1036 : vector<2x1xi32> to vector<2x5xi32>
    %1038 = arith.select %1034, %1037, %1035 : vector<2x5xi1>, vector<2x5xi32>
    %c0_587 = arith.constant 0 : index
    %c0_588 = arith.constant 0 : index
    %1039 = vector.load %arg22[%c0_587, %c0_588] : memref<2x5xi32, #tpu.memory_space<vmem>>, vector<2x5xi32>
    tpu.vector_store %arg22[%c0_587, %c0_588], %1038 {strides = array<i32>} : memref<2x5xi32, #tpu.memory_space<vmem>>, vector<2x5xi32>,
    %1040 = arith.index_cast %c4_i32_530 : i32 to index
    %1041 = memref.load %arg0[%1040] : memref<5xi32, #tpu.memory_space<smem>>
    %c1_i32_589 = arith.constant 1 : i32
    %1042 = arith.cmpi eq, %1041, %c1_i32_589 : i32
    %1043 = arith.extui %1042 : i1 to i32
    %c0_i32_590 = arith.constant 0 : i32
    %1044 = arith.cmpi ne, %1043, %c0_i32_590 : i32
    scf.if %1044 {
      %c1_i32_594 = arith.constant 1 : i32
      %1048 = arith.addi %c4_i32_530, %c1_i32_594 : i32
      %1049 = arith.index_cast %1048 : i32 to index
      %c0_595 = arith.constant 0 : index
      %c0_596 = arith.constant 0 : index
      %1050 = vector.load %arg3[%1049, %c0_595, %c0_596] : memref<6x2x16xf32, #tpu.memory_space<vmem>>, vector<1x2x16xf32>
      %1051 = vector.shape_cast %1050 : vector<1x2x16xf32> to vector<2x16xf32>
      %c0_597 = arith.constant 0 : index
      %c0_598 = arith.constant 0 : index
      %1052 = vector.load %arg27[%c0_597, %c0_598] : memref<2x16xf32, #tpu.memory_space<vmem>>, vector<2x16xf32>
      tpu.vector_store %arg27[%c0_597, %c0_598], %1051 {strides = array<i32>} : memref<2x16xf32, #tpu.memory_space<vmem>>, vector<2x16xf32>,
    } else {
    }
    %true_591 = arith.constant true
    %1045 = arith.xori %1042, %true_591 : i1
    %1046 = arith.extui %1045 : i1 to i32
    %c0_i32_592 = arith.constant 0 : i32
    %1047 = arith.cmpi ne, %1046, %c0_i32_592 : i32
    scf.if %1047 {
      %1048 = vector.broadcast %1032 : vector<2x1xi32> to vector<2x128xi32>
      %1049 = arith.cmpi eq, %491, %1048 : vector<2x128xi32>
      %1050 = arith.extui %1049 : vector<2x128xi1> to vector<2x128xi32>
      %1051 = arith.sitofp %1050 : vector<2x128xi32> to vector<2x128xf32>
      %c0_594 = arith.constant 0 : index
      %c0_595 = arith.constant 0 : index
      %1052 = vector.load %arg20[%c0_594, %c0_595] : memref<128x16xf32, #tpu.memory_space<vmem>>, vector<128x16xf32>
      %cst_596 = arith.constant dense<0.000000e+00> : vector<2x16xf32>
      %1053 = tpu.matmul %1051, %1052, %cst_596 {dimension_numbers = #tpu.dot_dimension_numbers<[1], [0], [0], [1], [0, 0, 1, 1], [], []>} : vector<2x128xf32>, vector<128x16xf32>, vector<2x16xf32> -> vector<2x16xf32>
      %c0_597 = arith.constant 0 : index
      %c0_598 = arith.constant 0 : index
      %1054 = vector.load %arg27[%c0_597, %c0_598] : memref<2x16xf32, #tpu.memory_space<vmem>>, vector<2x16xf32>
      tpu.vector_store %arg27[%c0_597, %c0_598], %1053 {strides = array<i32>} : memref<2x16xf32, #tpu.memory_space<vmem>>, vector<2x16xf32>,
    } else {
    }
    %c5_i32_593 = arith.constant 5 : i32
    return
  }
}

</mosaic_0001>

<bundles_post_ra>
// kernel: _forward.1
= control target key start
LH: loop header
LB: loop body
LE: loop exit
PB: predicated region body
PF: predicated region fallthrough
CT: control target
= control target key end

     0   :  { %s10424_s0 = inlined_call_operand.vmem [shape: s32[5], index: 0, kind: input, shape index: {}]   ;;  %s10425_s1 = inlined_call_operand.vmem [shape: s32[2,1], index: 1, kind: input, shape index: {}]   ;;  %s10426_s2 = inlined_call_operand.vmem [shape: f32[8,2,16], index: 2, kind: input, shape index: {}]   ;;  %s10427_s3 = inlined_call_operand.vmem [shape: f32[6,2,16], index: 3, kind: input, shape index: {}]   ;;  %s10428_s4 = inlined_call_operand.vmem [shape: f32[8,2], index: 4, kind: input, shape index: {}]   ;;  %s10429_s5 = inlined_call_operand.vmem [shape: f32[16,96], index: 5, kind: input, shape index: {}]   ;;  %s10430_s6 = inlined_call_operand.vmem [shape: f32[32,96], index: 6, kind: input, shape index: {}]   ;;  %s10431_s7 = inlined_call_operand.vmem [shape: f32[1,96], index: 7, kind: input, shape index: {}]   ;;  %s10432_s8 = inlined_call_operand.vmem [shape: f32[1,96], index: 8, kind: input, shape index: {}]   ;;  %s10433_s9 = inlined_call_operand.vmem [shape: f32[32,32], index: 9, kind: input, shape index: {}]   ;;  %s10434_s10 = inlined_call_operand.vmem [shape: f32[32,128], index: 10, kind: input, shape index: {}]   ;;  %s10435_s11 = inlined_call_operand.vmem [shape: f32[1,128], index: 11, kind: input, shape index: {}]   ;;  %s10436_s12 = inlined_call_operand.vmem [shape: f32[1,32], index: 12, kind: input, shape index: {}]   ;;  %s10437_s13 = inlined_call_operand.vmem [shape: f32[16,96], index: 13, kind: input, shape index: {}]   ;;  %s10438_s14 = inlined_call_operand.vmem [shape: f32[32,96], index: 14, kind: input, shape index: {}]   ;;  %s10439_s15 = inlined_call_operand.vmem [shape: f32[1,96], index: 15, kind: input, shape index: {}]   ;;  %s10440_s16 = inlined_call_operand.vmem [shape: f32[32,128], index: 16, kind: input, shape index: {}]   ;;  %s10441_s17 = inlined_call_operand.vmem [shape: f32[32,128], index: 17, kind: input, shape index: {}]   ;;  %s10442_s18 = inlined_call_operand.vmem [shape: f32[16,128], index: 18, kind: input, shape index: {}]   ;;  %s10443_s19 = inlined_call_operand.vmem [shape: f32[1,128], index: 19, kind: input, shape index: {}]   ;;  %s10444_s20 = inlined_call_operand.vmem [shape: f32[128,16], index: 20, kind: input, shape index: {}]   ;;  %s10445_s21 = inlined_call_operand.vmem [shape: f32[5,2,128], index: 21, kind: output, shape index: {0}]   ;;  %s10446_s22 = inlined_call_operand.hbm [shape: s32[2,5], index: 22, kind: output, shape index: {1}]  }
   0x1   :  { %10453 = sst [smem:[#allocation13_spill]] %s10424_s0 }
   0x2   :  { %10454 = sst [smem:[#allocation14_spill]] %s10425_s1 }
   0x3   :  { %10455 = sst [smem:[#allocation15_spill]] %s10426_s2 }
   0x4   :  { %10456 = sst [smem:[#allocation16_spill]] %s10427_s3 }
   0x5   :  { %10457 = sst [smem:[#allocation17_spill]] %s10428_s4 }
   0x6   :  { %10458 = sst [smem:[#allocation18_spill]] %s10429_s5 }
   0x7   :  { %10459 = sst [smem:[#allocation19_spill]] %s10430_s6 }
   0x8   :  { %28 = vsyncpa [#allocation9], 0 }
   0x9   :  { %29 = vsyncpa [#allocation8], 0  ;;  %s10460_s29 = sld [smem:[#allocation13_spill]] }
   0xf   :  { %s36_s30 = sshll.u32 %s10460_s29, 4  ;;  %s37_s30 = int_to_ptr.vmem [resolvable:$true] %s36_s30 }
  0x10   :  { %s8598_s4 = scalar_lea.vmem %s37_s30, 16  ;;  %p8603_p1 = scmp.lt.s32.totalorder %s37_s30, %s37_s30 }
  0x11   :  { %p8599_p0 = scmp.ne.s32.totalorder %s37_s30, %s8598_s4  ;;  %p8604_p2 = scmp.lt.s32.totalorder %s8598_s4, %s8598_s4 }
  0x13   :  { %p8605_p3 = por %p8604_p2, %p8603_p1 }
  0x15   :  { %p8606_p4 = pnand %p8605_p3, %p8599_p0 }
  0x17   :  { %8609 = shalt.err (!%p8606_p4)
}
  0x18   :  { %s8636_s0 = smov [#allocation7]  }
  0x19   :  { %39 = dma.vmem_to_smem %s37_s30, 16, %s8636_s0, [#allocation9]  }
  0x1a   :  { %8632 = dma.done.wait [#allocation9], 16  }
  0x1b   :  { %8633 = vsyncadd [#allocation9], 4294967280 }
  0x1c   :  { %83 = sfence }
  0x1d   :  { %s10461_s5 = sld [smem:[#allocation19_spill]]  ;;  %s10462_s2 = sld [smem:[#allocation18_spill]]  ;;  %v8637_v3 = vmov 0.0|0.0   ;;  %vm84_vm0 = vcmask 254976   ;;  %vm8638_vm1 = vmmov 0   ;;  %v8639_v9 = vmov 0.0  }
  0x1e   :  { %8002 = vmatprep.subr.bf16.mxu1 %v8637_v3  ;;  %7999 = vmatprep.subr.bf16.mxu0 %v8637_v3  ;;  %85 = vst.msk [vmem:[#allocation4] sm:$0x3] %vm84_vm0, %v8639_v9  ;;  %86 = vst.msk [vmem:[#allocation5] sm:$0x3] %vm84_vm0, %v8639_v9  ;;  %s10463_s1 = sld [smem:[#allocation15_spill]]  ;;  %vm10451_vm2 = vcmask 130048  }
  0x1f   :  { %7306 = vmatprep.mubr.msk.f32.mxu0 %vm8638_vm1, %v8639_v9  ;;  %7317 = vmatprep.mubr.msk.f32.mxu1 %vm8638_vm1, %v8639_v9  ;;  %vm183_vm3 = vcmask 261120   ;;  %v8837_v14 = vld [vmem:[%s10432_s8] ss:$0 sm:$0xff]  ;;  %s8640_s25 = smov 64   ;;  %v293_v31 = vld [vmem:[%s10433_s9 + $0x8] sm:$0xff]  ;;  %v294_v32 = vld [vmem:[%s10433_s9 + $0x10] sm:$0xff] }
  0x20   :  { %v8844_v19 = vld [vmem:[%s10431_s7] ss:$0 sm:$0xff]  ;;  %v295_v34 = vld [vmem:[%s10433_s9 + $0x18] sm:$0xff]  ;;  %s8641_s6 = smov 96   ;;  %s8642_s26 = smov 32  }
  0x21   :  { %v292_v30 = vld [vmem:[%s10433_s9] sm:$0xff]  ;;  %v8863_v35 = vpack.c.bf16 %v295_v34, %v294_v32  ;;  %s10464_s29 = sld [smem:[#allocation14_spill]]  ;;  %s10466_s0 = sld [smem:[#allocation16_spill]] }
  0x22   :  { %v8857_v33 = vpack.c.bf16 %v293_v31, %v292_v30  ;;  %s3271_s3 = sld [smem:[#allocation7]] }
  0x23   :  { %v172_v0 = vld [vmem:[%s10461_s5] sm:$0xff]  ;;  %v173_v1 = vld [vmem:[%s10461_s5 + $0x8] sm:$0xff]  ;;  %v174_v6 = vld [vmem:[%s10461_s5 + $0x10] sm:$0xff] }
  0x24   :  { %v89_v2 = vld [vmem:[%s10462_s2] sm:$0xff]  ;;  %v8793_v4 = vpack.c.bf16 %v173_v1, %v172_v0  ;;  %v90_v5 = vld [vmem:[%s10462_s2 + $0x8] sm:$0xff]  ;;  %v175_v7 = vld [vmem:[%s10461_s5 + $0x18] sm:$0xff] }
  0x25   :  { %v8805_v8 = vpack.c.bf16 %v90_v5, %v89_v2  ;;  %v8816_v10 = vpack.c.bf16 %v175_v7, %v174_v6  ;;  %v88_v11 = vld [vmem:[%s10463_s1] sm:$0x3]  ;;  %v6846_v38 = vld [vmem:[%s10463_s1 + $0x2] sm:$0x3]  ;;  %v6853_v0 = vld [vmem:[%s10463_s1 + $0x4] sm:$0x3] }
  0x26   :  { %8004 = vmatpush3.bf16.msra.mxu1 %v8793_v4  ;;  %v87_v12 = vld [vmem:[#allocation4] sm:$0x3] }
  0x27   :  { %8005 = vmatprep.subr.bf16.mxu1 %v8637_v3  ;;  %8001 = vmatpush3.bf16.msra.mxu0 %v8805_v8 }
  0x28   :  { %8008 = vmatprep.subr.bf16.mxu0 %v8637_v3  ;;  %p6906_p5 = scmp.ne.s32.totalorder %s3271_s3, 1 }
  0x2a   :  { %8007 = vmatpush3.bf16.msra.mxu1 %v8816_v10  ;;  %7307 = vmatmul.mubr.msk.f32.vlgmr.msra.gmra.mrb[0].mxu0 %vm10451_vm2, %v88_v11 }
  0x2b   :  { %7328 = vmatprep.mubr.msk.f32.mxu0 %vm8638_vm1, %v8639_v9  ;;  %8014 = vmatprep.subr.bf16.mxu1 %v8637_v3 }
  0x2c   :  { %8010 = vmatpush3.bf16.msra.mxu0 %v8857_v33 }
  0x2d   :  { %7318 = vmatmul.mubr.msk.f32.vlgmr.msra.gmra.mrb[0].mxu1 %vm183_vm3, %v87_v12  ;;  %8011 = vmatprep.subr.bf16.mxu0 %v8637_v3 }
  0x2e   :  { %8016 = vmatpush3.bf16.msra.mxu1 %v8805_v8  ;;  %7335 = vmatprep.mubr.msk.f32.mxu1 %vm8638_vm1, %v8639_v9 }
  0x2f   :  { %8023 = vmatprep.subr.bf16.mxu1 %v8637_v3 }
  0x30   :  { %8013 = vmatpush3.bf16.msra.mxu0 %v8863_v35 }
  0x31   :  { %8017 = vmatprep.subr.bf16.mxu0 %v8637_v3  ;;  %7336 = vmatmul.mubr.msk.f32.vlgmr.msra.gmra.mrb[2].mxu1 %vm10451_vm2, %v6846_v38 }
  0x32   :  { %8025 = vmatpush3.bf16.msra.mxu1 %v8857_v33  ;;  %7357 = vmatprep.mubr.msk.f32.mxu1 %vm8638_vm1, %v8639_v9 }
  0x33   :  { %8026 = vmatprep.subr.bf16.mxu1 %v8637_v3 }
  0x36   :  { %8028 = vmatpush3.bf16.msra.mxu1 %v8863_v35 }
  0x37   :  { %8032 = vmatprep.subr.bf16.mxu1 %v8637_v3 }
  0xfd   :  { %v168_v13 = vpop.f32.mrb[0].mxu0 }
  0xfe   :  { %v7308_v15 = vpop.f32.mrb[1].mxu0  ;;  %v169_v20 = vadd.f32 %v8844_v19, %v168_v13 }
 0x100   :  { %v253_v16 = vpop.f32.mrb[0].mxu1 }
 0x101   :  { %v254_v17 = vadd.f32 %v8837_v14, %v253_v16  ;;  %v7319_v18 = vpop.f32.mrb[1].mxu1 }
 0x103   :  { %265 = vrot.lane.b32.xlu0 %v254_v17, %s8640_s25  ;;  %v257_v21 = vadd.f32 %v254_v17, %v169_v20 }
 0x104   :  { %v468_v46 = vpop.f32.mrb[2].mxu1 }
 0x105   :  { %v6844_v22 = vmul.f32 -1.442695, %v257_v21  ;;  %v7337_v47 = vpop.f32.mrb[3].mxu1  ;;  %v469_v53 = vadd.f32 %v8844_v19, %v468_v46 }
 0x107   :  { %8420 = vpow2.f32 %v6844_v22 }
 0x111   :  { %v8421_v23 = vpop.eup %8420 }
 0x112   :  { %v261_v24 = vadd.f32 1.0, %v8421_v23 }
 0x114   :  { %8422 = vrcp.f32 %v261_v24 }
 0x11e   :  { %v8423_v25 = vpop.eup %8422 }
 0x11f   :  { %v275_v39 = vsub.f32 1.0, %v8423_v25 }
 0x175   :  { %v266_v26 = vpop.permute.xlu0 %265 }
 0x176   :  { %v268_v27 = vmul.f32 %v8423_v25, %v266_v26 }
 0x178   :  { %270 = vrot.lane.b32.xlu0 %v268_v27, %s8640_s25 }
 0x1ea   :  { %v271_v28 = vpop.permute.xlu0 %270 }
 0x1eb   :  { %v273_v29 = vadd.f32 %v271_v28, %v169_v20 }
 0x1ed   :  { %8424 = vtanh.f32 %v273_v29 }
 0x1f7   :  { %v8425_v36 = vpop.eup %8424 }
 0x1f8   :  { %277 = vrot.lane.b32.xlu1 %v8425_v36, %s8641_s6  ;;  %v6860_v36 = vld [vmem:[%s10463_s1 + $0x6] sm:$0x3] }
 0x1fc   :  { %281 = vrot.lane.b32.xlu1 %v87_v12, %s8642_s26 }
 0x26a   :  { %v278_v37 = vpop.permute.xlu1 %277 }
 0x26b   :  { %v280_v41 = vmul.f32 %v278_v37, %v275_v39 }
 0x26e   :  { %v282_v40 = vpop.permute.xlu1 %281 }
 0x26f   :  { %v284_v42 = vmul.f32 %v8423_v25, %v282_v40 }
 0x271   :  { %v8878_v43 = vadd.f32 %v284_v42, %v280_v41 }
 0x273   :  { %287 = vrot.lane.b32.xlu0 %v8878_v43, %s8641_s6 }
 0x2e5   :  { %v288_v44 = vpop.permute.xlu0 %287 }
 0x2e6   :  { %290 = vst.msk [vmem:[#allocation4] sm:$0x3] %vm84_vm0, %v288_v44  ;;  %291 = vst.msk [vmem:[#allocation2] sm:$0x3] %vm84_vm0, %v288_v44  ;;  %7329 = vmatmul.mubr.msk.f32.vlgmr.msra.gmra.mrb[2].mxu0 %vm183_vm3, %v288_v44 }
 0x2e7   :  { %8019 = vmatpush3.bf16.msra.mxu0 %v8793_v4  ;;  %7346 = vmatprep.mubr.msk.f32.mxu0 %vm8638_vm1, %v8639_v9 }
 0x2e8   :  { %8020 = vmatprep.subr.bf16.mxu0 %v8637_v3 }
 0x2eb   :  { %8022 = vmatpush3.bf16.msra.mxu0 %v8816_v10 }
 0x2ec   :  { %8029 = vmatprep.subr.bf16.mxu0 %v8637_v3 }
 0x2ed   :  { %v387_v45 = vld [vmem:[#allocation4] sm:$0x3] }
 0x2ee   :  { %7347 = vmatmul.mubr.msk.f32.vlgmr.msra.gmra.mrb[4].mxu0 %vm183_vm3, %v387_v45 }
 0x2ef   :  { %8031 = vmatpush3.bf16.msra.mxu0 %v8805_v8  ;;  %7364 = vmatprep.mubr.msk.f32.mxu0 %vm8638_vm1, %v8639_v9 }
 0x2f0   :  { %8038 = vmatprep.subr.bf16.mxu0 %v8637_v3 }
 0x2f2   :  { %7365 = vmatmul.mubr.msk.f32.vlgmr.msra.gmra.mrb[6].mxu0 %vm10451_vm2, %v6853_v0  ;;  %v6867_v0 = vld [vmem:[%s10463_s1 + $0x8] sm:$0x3] }
 0x2f3   :  { %8040 = vmatpush3.bf16.msra.mxu0 %v8857_v33  ;;  %7386 = vmatprep.mubr.msk.f32.mxu0 %vm8638_vm1, %v8639_v9 }
 0x2f4   :  { %8041 = vmatprep.subr.bf16.mxu0 %v8637_v3 }
 0x2f7   :  { %8043 = vmatpush3.bf16.msra.mxu0 %v8863_v35 }
 0x2f8   :  { %8047 = vmatprep.subr.bf16.mxu0 %v8637_v3 }
 0x3b9   :  { %v364_v48 = vpop.f32.mrb[2].mxu0 }
 0x3ba   :  { %368 = vst.msk [vmem:[#allocation3] sm:$0x3] %vm84_vm0, %v364_v48  ;;  %v7330_v49 = vpop.f32.mrb[3].mxu0 }
 0x3c1   :  { %v552_v50 = vpop.f32.mrb[4].mxu0 }
 0x3c2   :  { %v553_v51 = vadd.f32 %v8837_v14, %v552_v50  ;;  %v7348_v52 = vpop.f32.mrb[5].mxu0 }
 0x3c4   :  { %564 = vrot.lane.b32.xlu1 %v553_v51, %s8640_s25  ;;  %v556_v54 = vadd.f32 %v553_v51, %v469_v53 }
 0x3c5   :  { %v769_v15 = vpop.f32.mrb[6].mxu0 }
 0x3c6   :  { %v6851_v55 = vmul.f32 -1.442695, %v556_v54  ;;  %v7366_v16 = vpop.f32.mrb[7].mxu0  ;;  %v770_v23 = vadd.f32 %v8844_v19, %v769_v15 }
 0x3c8   :  { %8426 = vpow2.f32 %v6851_v55 }
 0x3d2   :  { %v8427_v56 = vpop.eup %8426 }
 0x3d3   :  { %v560_v57 = vadd.f32 1.0, %v8427_v56 }
 0x3d5   :  { %8428 = vrcp.f32 %v560_v57 }
 0x3df   :  { %v8429_v58 = vpop.eup %8428 }
 0x3e0   :  { %v574_v2 = vsub.f32 1.0, %v8429_v58 }
 0x436   :  { %v565_v59 = vpop.permute.xlu1 %564 }
 0x437   :  { %v567_v60 = vmul.f32 %v8429_v58, %v565_v59 }
 0x439   :  { %569 = vrot.lane.b32.xlu0 %v567_v60, %s8640_s25 }
 0x43d   :  { %580 = vrot.lane.b32.xlu0 %v387_v45, %s8642_s26 }
 0x4ab   :  { %v570_v61 = vpop.permute.xlu0 %569 }
 0x4ac   :  { %v572_v62 = vadd.f32 %v570_v61, %v469_v53 }
 0x4ae   :  { %8430 = vtanh.f32 %v572_v62 }
 0x4af   :  { %v581_v1 = vpop.permute.xlu0 %580 }
 0x4b0   :  { %v583_v6 = vmul.f32 %v8429_v58, %v581_v1 }
 0x4b8   :  { %v8431_v63 = vpop.eup %8430 }
 0x4b9   :  { %576 = vrot.lane.b32.xlu1 %v8431_v63, %s8641_s6 }
 0x52b   :  { %v577_v5 = vpop.permute.xlu1 %576 }
 0x52c   :  { %v579_v7 = vmul.f32 %v577_v5, %v574_v2 }
 0x52e   :  { %v8913_v11 = vadd.f32 %v583_v6, %v579_v7 }
 0x530   :  { %586 = vrot.lane.b32.xlu1 %v8913_v11, %s8641_s6 }
 0x5a2   :  { %v587_v12 = vpop.permute.xlu1 %586 }
 0x5a3   :  { %589 = vst.msk [vmem:[#allocation4] sm:$0x3] %vm84_vm0, %v587_v12  ;;  %591 = vst.msk [vmem:[#allocation2 + $0x2] sm:$0x3] %vm84_vm0, %v587_v12  ;;  %7358 = vmatmul.mubr.msk.f32.vlgmr.msra.gmra.mrb[4].mxu1 %vm183_vm3, %v587_v12 }
 0x5a4   :  { %8034 = vmatpush3.bf16.msra.mxu1 %v8793_v4  ;;  %7375 = vmatprep.mubr.msk.f32.mxu1 %vm8638_vm1, %v8639_v9 }
 0x5a5   :  { %8035 = vmatprep.subr.bf16.mxu1 %v8637_v3 }
 0x5a8   :  { %8037 = vmatpush3.bf16.msra.mxu1 %v8816_v10 }
 0x5a9   :  { %8044 = vmatprep.subr.bf16.mxu1 %v8637_v3 }
 0x5aa   :  { %v688_v13 = vld [vmem:[#allocation4] sm:$0x3] }
 0x5ab   :  { %7376 = vmatmul.mubr.msk.f32.vlgmr.msra.gmra.mrb[6].mxu1 %vm183_vm3, %v688_v13 }
 0x5ac   :  { %8046 = vmatpush3.bf16.msra.mxu1 %v8805_v8  ;;  %7393 = vmatprep.mubr.msk.f32.mxu1 %vm8638_vm1, %v8639_v9 }
 0x5ad   :  { %8053 = vmatprep.subr.bf16.mxu1 %v8637_v3 }
 0x5af   :  { %7394 = vmatmul.mubr.msk.f32.vlgmr.msra.gmra.mrb[8].mxu1 %vm10451_vm2, %v6860_v36 }
 0x5b0   :  { %8055 = vmatpush3.bf16.msra.mxu1 %v8857_v33  ;;  %7415 = vmatprep.mubr.msk.f32.mxu1 %vm8638_vm1, %v8639_v9 }
 0x5b1   :  { %8056 = vmatprep.subr.bf16.mxu1 %v8637_v3 }
 0x5b4   :  { %8058 = vmatpush3.bf16.msra.mxu1 %v8863_v35 }
 0x5b5   :  { %8062 = vmatprep.subr.bf16.mxu1 %v8637_v3 }
 0x676   :  { %v664_v17 = vpop.f32.mrb[4].mxu1 }
 0x677   :  { %669 = vst.msk [vmem:[#allocation3 + $0x2] sm:$0x3] %vm84_vm0, %v664_v17  ;;  %v7359_v18 = vpop.f32.mrb[5].mxu1 }
 0x67e   :  { %v853_v20 = vpop.f32.mrb[6].mxu1 }
 0x67f   :  { %v854_v21 = vadd.f32 %v8837_v14, %v853_v20  ;;  %v7377_v22 = vpop.f32.mrb[7].mxu1 }
 0x681   :  { %865 = vrot.lane.b32.xlu0 %v854_v21, %s8640_s25  ;;  %v857_v24 = vadd.f32 %v854_v21, %v770_v23 }
 0x682   :  { %v1070_v46 = vpop.f32.mrb[8].mxu1 }
 0x683   :  { %v6858_v25 = vmul.f32 -1.442695, %v857_v24  ;;  %v7395_v47 = vpop.f32.mrb[9].mxu1  ;;  %v1071_v53 = vadd.f32 %v8844_v19, %v1070_v46 }
 0x685   :  { %8432 = vpow2.f32 %v6858_v25 }
 0x68f   :  { %v8433_v26 = vpop.eup %8432 }
 0x690   :  { %v861_v27 = vadd.f32 1.0, %v8433_v26 }
 0x692   :  { %8434 = vrcp.f32 %v861_v27 }
 0x69c   :  { %v8435_v28 = vpop.eup %8434 }
 0x69d   :  { %v875_v38 = vsub.f32 1.0, %v8435_v28 }
 0x6f3   :  { %v866_v29 = vpop.permute.xlu0 %865 }
 0x6f4   :  { %v868_v30 = vmul.f32 %v8435_v28, %v866_v29 }
 0x6f6   :  { %870 = vrot.lane.b32.xlu1 %v868_v30, %s8640_s25 }
 0x6fa   :  { %881 = vrot.lane.b32.xlu1 %v688_v13, %s8642_s26 }
 0x768   :  { %v871_v31 = vpop.permute.xlu1 %870 }
 0x769   :  { %v873_v32 = vadd.f32 %v871_v31, %v770_v23 }
 0x76b   :  { %8436 = vtanh.f32 %v873_v32 }
 0x76c   :  { %v882_v37 = vpop.permute.xlu1 %881 }
 0x76d   :  { %v884_v40 = vmul.f32 %v8435_v28, %v882_v37  ;;  %v6874_v37 = vld [vmem:[%s10463_s1 + $0xa] sm:$0x3] }
 0x775   :  { %v8437_v34 = vpop.eup %8436 }
 0x776   :  { %877 = vrot.lane.b32.xlu0 %v8437_v34, %s8641_s6 }
 0x7e8   :  { %v878_v39 = vpop.permute.xlu0 %877 }
 0x7e9   :  { %v880_v41 = vmul.f32 %v878_v39, %v875_v38 }
 0x7eb   :  { %v8948_v42 = vadd.f32 %v884_v40, %v880_v41 }
 0x7ed   :  { %887 = vrot.lane.b32.xlu0 %v8948_v42, %s8641_s6 }
 0x85f   :  { %v888_v44 = vpop.permute.xlu0 %887 }
 0x860   :  { %890 = vst.msk [vmem:[#allocation4] sm:$0x3] %vm84_vm0, %v888_v44  ;;  %892 = vst.msk [vmem:[#allocation2 + $0x4] sm:$0x3] %vm84_vm0, %v888_v44  ;;  %7387 = vmatmul.mubr.msk.f32.vlgmr.msra.gmra.mrb[8].mxu0 %vm183_vm3, %v888_v44 }
 0x861   :  { %8049 = vmatpush3.bf16.msra.mxu0 %v8793_v4  ;;  %7404 = vmatprep.mubr.msk.f32.mxu0 %vm8638_vm1, %v8639_v9 }
 0x862   :  { %8050 = vmatprep.subr.bf16.mxu0 %v8637_v3 }
 0x865   :  { %8052 = vmatpush3.bf16.msra.mxu0 %v8816_v10 }
 0x866   :  { %8059 = vmatprep.subr.bf16.mxu0 %v8637_v3 }
 0x867   :  { %v989_v45 = vld [vmem:[#allocation4] sm:$0x3] }
 0x868   :  { %7405 = vmatmul.mubr.msk.f32.vlgmr.msra.gmra.mrb[10].mxu0 %vm183_vm3, %v989_v45 }
 0x869   :  { %8061 = vmatpush3.bf16.msra.mxu0 %v8805_v8  ;;  %7422 = vmatprep.mubr.msk.f32.mxu0 %vm8638_vm1, %v8639_v9 }
 0x86a   :  { %8068 = vmatprep.subr.bf16.mxu0 %v8637_v3 }
 0x86c   :  { %7423 = vmatmul.mubr.msk.f32.vlgmr.msra.gmra.mrb[12].mxu0 %vm10451_vm2, %v6867_v0  ;;  %v670_v0 = vld [vmem:[%s10464_s29] sm:$0x3] }
 0x86d   :  { %8070 = vmatpush3.bf16.msra.mxu0 %v8857_v33  ;;  %7444 = vmatprep.mubr.msk.f32.mxu0 %vm8638_vm1, %v8639_v9  ;;  %vm671_vm5 = vcmp.eq.s32.totalorder %v670_v0, 2 }
 0x86e   :  { %8071 = vmatprep.subr.bf16.mxu0 %v8637_v3 }
 0x871   :  { %8073 = vmatpush3.bf16.msra.mxu0 %v8863_v35 }
 0x872   :  { %8077 = vmatprep.subr.bf16.mxu0 %v8637_v3 }
 0x933   :  { %v965_v48 = vpop.f32.mrb[8].mxu0 }
 0x934   :  { %970 = vst.msk [vmem:[#allocation3 + $0x4] sm:$0x3] %vm84_vm0, %v965_v48  ;;  %v7388_v49 = vpop.f32.mrb[9].mxu0 }
 0x93b   :  { %v1154_v50 = vpop.f32.mrb[10].mxu0 }
 0x93c   :  { %v1155_v51 = vadd.f32 %v8837_v14, %v1154_v50  ;;  %v7406_v52 = vpop.f32.mrb[11].mxu0 }
 0x93e   :  { %1166 = vrot.lane.b32.xlu1 %v1155_v51, %s8640_s25  ;;  %v1158_v54 = vadd.f32 %v1155_v51, %v1071_v53 }
 0x93f   :  { %v1371_v16 = vpop.f32.mrb[12].mxu0 }
 0x940   :  { %v6865_v55 = vmul.f32 -1.442695, %v1158_v54  ;;  %v7424_v17 = vpop.f32.mrb[13].mxu0  ;;  %v1372_v24 = vadd.f32 %v8844_v19, %v1371_v16 }
 0x942   :  { %8438 = vpow2.f32 %v6865_v55 }
 0x94c   :  { %v8439_v56 = vpop.eup %8438 }
 0x94d   :  { %v1162_v57 = vadd.f32 1.0, %v8439_v56 }
 0x94f   :  { %8440 = vrcp.f32 %v1162_v57 }
 0x959   :  { %v8441_v58 = vpop.eup %8440 }
 0x95a   :  { %v1176_v2 = vsub.f32 1.0, %v8441_v58 }
 0x9b0   :  { %v1167_v59 = vpop.permute.xlu1 %1166 }
 0x9b1   :  { %v1169_v60 = vmul.f32 %v8441_v58, %v1167_v59 }
 0x9b3   :  { %1171 = vrot.lane.b32.xlu0 %v1169_v60, %s8640_s25 }
 0x9b7   :  { %1182 = vrot.lane.b32.xlu0 %v989_v45, %s8642_s26 }
 0xa25   :  { %v1172_v61 = vpop.permute.xlu0 %1171 }
 0xa26   :  { %v1174_v62 = vadd.f32 %v1172_v61, %v1071_v53 }
 0xa28   :  { %8442 = vtanh.f32 %v1174_v62  ;;  %v369_v62 = vld [vmem:[%s10464_s29] sm:$0x3] }
 0xa29   :  { %v1183_v1 = vpop.permute.xlu0 %1182  ;;  %vm370_vm4 = vcmp.eq.s32.totalorder %v369_v62, 1 }
 0xa2a   :  { %v1185_v6 = vmul.f32 %v8441_v58, %v1183_v1 }
 0xa32   :  { %v8443_v63 = vpop.eup %8442 }
 0xa33   :  { %1178 = vrot.lane.b32.xlu1 %v8443_v63, %s8641_s6  ;;  %v8643_v63 = vmov 0  }
 0xa34   :  { %8418 = vset.pattern.permute.xlu0 %v8643_v63  ;;  %8419 = vset.pattern.permute.xlu1 %v8643_v63  ;;  %v372_v1 = vsel %vm370_vm4, 1, %v8643_v63 }
 0xaa5   :  { %v1179_v5 = vpop.permute.xlu1 %1178 }
 0xaa6   :  { %v1181_v7 = vmul.f32 %v1179_v5, %v1176_v2  ;;  %v673_v2 = vsel %vm671_vm5, 1, %v8643_v63 }
 0xaa8   :  { %v8983_v12 = vadd.f32 %v1185_v6, %v1181_v7 }
 0xaaa   :  { %1188 = vrot.lane.b32.xlu1 %v8983_v12, %s8641_s6 }
 0xb1c   :  { %v1189_v13 = vpop.permute.xlu1 %1188 }
 0xb1d   :  { %1191 = vst.msk [vmem:[#allocation4] sm:$0x3] %vm84_vm0, %v1189_v13  ;;  %1193 = vst.msk [vmem:[#allocation2 + $0x6] sm:$0x3] %vm84_vm0, %v1189_v13  ;;  %7416 = vmatmul.mubr.msk.f32.vlgmr.msra.gmra.mrb[10].mxu1 %vm183_vm3, %v1189_v13  ;;  %v6881_v13 = vld [vmem:[%s10463_s1 + $0xc] sm:$0x3] }
 0xb1e   :  { %8064 = vmatpush3.bf16.msra.mxu1 %v8793_v4  ;;  %7433 = vmatprep.mubr.msk.f32.mxu1 %vm8638_vm1, %v8639_v9 }
 0xb1f   :  { %8065 = vmatprep.subr.bf16.mxu1 %v8637_v3 }
 0xb22   :  { %8067 = vmatpush3.bf16.msra.mxu1 %v8816_v10 }
 0xb23   :  { %8074 = vmatprep.subr.bf16.mxu1 %v8637_v3 }
 0xb24   :  { %v1290_v15 = vld [vmem:[#allocation4] sm:$0x3] }
 0xb25   :  { %7434 = vmatmul.mubr.msk.f32.vlgmr.msra.gmra.mrb[12].mxu1 %vm183_vm3, %v1290_v15 }
 0xb26   :  { %8076 = vmatpush3.bf16.msra.mxu1 %v8805_v8  ;;  %7451 = vmatprep.mubr.msk.f32.mxu1 %vm8638_vm1, %v8639_v9 }
 0xb27   :  { %8083 = vmatprep.subr.bf16.mxu1 %v8637_v3 }
 0xb29   :  { %7452 = vmatmul.mubr.msk.f32.vlgmr.msra.gmra.mrb[14].mxu1 %vm10451_vm2, %v6874_v37 }
 0xb2a   :  { %8085 = vmatpush3.bf16.msra.mxu1 %v8857_v33  ;;  %7473 = vmatprep.mubr.msk.f32.mxu1 %vm8638_vm1, %v8639_v9 }
 0xb2b   :  { %8086 = vmatprep.subr.bf16.mxu1 %v8637_v3 }
 0xb2e   :  { %8088 = vmatpush3.bf16.msra.mxu1 %v8863_v35 }
 0xb2f   :  { %8092 = vmatprep.subr.bf16.mxu1 %v8637_v3 }
 0xbf0   :  { %v1266_v18 = vpop.f32.mrb[10].mxu1 }
 0xbf1   :  { %1271 = vst.msk [vmem:[#allocation3 + $0x6] sm:$0x3] %vm84_vm0, %v1266_v18  ;;  %v7417_v20 = vpop.f32.mrb[11].mxu1 }
 0xbf8   :  { %v1455_v21 = vpop.f32.mrb[12].mxu1 }
 0xbf9   :  { %v1456_v22 = vadd.f32 %v8837_v14, %v1455_v21  ;;  %v7435_v23 = vpop.f32.mrb[13].mxu1 }
 0xbfb   :  { %1467 = vrot.lane.b32.xlu0 %v1456_v22, %s8640_s25  ;;  %v1459_v25 = vadd.f32 %v1456_v22, %v1372_v24  ;;  %v371_v22 = vld [vmem:[#allocation5] sm:$0x3] }
 0xbfc   :  { %v1672_v48 = vpop.f32.mrb[14].mxu1 }
 0xbfd   :  { %v6872_v26 = vmul.f32 -1.442695, %v1459_v25  ;;  %v7453_v49 = vpop.f32.mrb[15].mxu1  ;;  %v1673_v55 = vadd.f32 %v8844_v19, %v1672_v48 }
 0xbff   :  { %8444 = vpow2.f32 %v6872_v26 }
 0xc09   :  { %v8445_v27 = vpop.eup %8444 }
 0xc0a   :  { %v1463_v28 = vadd.f32 1.0, %v8445_v27 }
 0xc0c   :  { %8446 = vrcp.f32 %v1463_v28 }
 0xc16   :  { %v8447_v29 = vpop.eup %8446 }
 0xc17   :  { %v1477_v39 = vsub.f32 1.0, %v8447_v29 }
 0xc6d   :  { %v1468_v30 = vpop.permute.xlu0 %1467 }
 0xc6e   :  { %v1470_v31 = vmul.f32 %v8447_v29, %v1468_v30 }
 0xc70   :  { %1472 = vrot.lane.b32.xlu1 %v1470_v31, %s8640_s25 }
 0xc74   :  { %1483 = vrot.lane.b32.xlu1 %v1290_v15, %s8642_s26 }
 0xce2   :  { %v1473_v32 = vpop.permute.xlu1 %1472 }
 0xce3   :  { %v1475_v34 = vadd.f32 %v1473_v32, %v1372_v24 }
 0xce5   :  { %8448 = vtanh.f32 %v1475_v34 }
 0xce6   :  { %v1484_v38 = vpop.permute.xlu1 %1483 }
 0xce7   :  { %v1486_v41 = vmul.f32 %v8447_v29, %v1484_v38 }
 0xcef   :  { %v8449_v36 = vpop.eup %8448 }
 0xcf0   :  { %1479 = vrot.lane.b32.xlu0 %v8449_v36, %s8641_s6 }
 0xd62   :  { %v1480_v40 = vpop.permute.xlu0 %1479 }
 0xd63   :  { %v1482_v44 = vmul.f32 %v1480_v40, %v1477_v39 }
 0xd65   :  { %v9018_v45 = vadd.f32 %v1486_v41, %v1482_v44 }
 0xd67   :  { %1489 = vrot.lane.b32.xlu0 %v9018_v45, %s8641_s6 }
 0xdd9   :  { %v1490_v46 = vpop.permute.xlu0 %1489 }
 0xdda   :  { %1492 = vst.msk [vmem:[#allocation4] sm:$0x3] %vm84_vm0, %v1490_v46  ;;  %1494 = vst.msk [vmem:[#allocation2 + $0x8] sm:$0x3] %vm84_vm0, %v1490_v46  ;;  %7445 = vmatmul.mubr.msk.f32.vlgmr.msra.gmra.mrb[14].mxu0 %vm183_vm3, %v1490_v46 }
 0xddb   :  { %8079 = vmatpush3.bf16.msra.mxu0 %v8793_v4  ;;  %7462 = vmatprep.mubr.msk.f32.mxu0 %vm8638_vm1, %v8639_v9 }
 0xddc   :  { %8080 = vmatprep.subr.bf16.mxu0 %v8637_v3 }
 0xddf   :  { %8082 = vmatpush3.bf16.msra.mxu0 %v8816_v10 }
 0xde0   :  { %8089 = vmatprep.subr.bf16.mxu0 %v8637_v3 }
 0xde1   :  { %v1591_v47 = vld [vmem:[#allocation4] sm:$0x3] }
 0xde2   :  { %7463 = vmatmul.mubr.msk.f32.vlgmr.msra.gmra.mrb[16].mxu0 %vm183_vm3, %v1591_v47 }
 0xde3   :  { %8091 = vmatpush3.bf16.msra.mxu0 %v8805_v8  ;;  %7480 = vmatprep.mubr.msk.f32.mxu0 %vm8638_vm1, %v8639_v9 }
 0xde4   :  { %8098 = vmatprep.subr.bf16.mxu0 %v8637_v3 }
 0xde6   :  { %7481 = vmatmul.mubr.msk.f32.vlgmr.msra.gmra.mrb[18].mxu0 %vm10451_vm2, %v6881_v13 }
 0xde7   :  { %8100 = vmatpush3.bf16.msra.mxu0 %v8857_v33  ;;  %7502 = vmatprep.mubr.msk.f32.mxu0 %vm8638_vm1, %v8639_v9 }
 0xde8   :  { %8101 = vmatprep.subr.bf16.mxu0 %v8637_v3 }
 0xdeb   :  { %8103 = vmatpush3.bf16.msra.mxu0 %v8863_v35 }
 0xdec   :  { %8107 = vmatprep.subr.bf16.mxu0 %v8637_v3 }
 0xead   :  { %v1567_v50 = vpop.f32.mrb[14].mxu0 }
 0xeae   :  { %1572 = vst.msk [vmem:[#allocation3 + $0x8] sm:$0x3] %vm84_vm0, %v1567_v50  ;;  %v7446_v51 = vpop.f32.mrb[15].mxu0 }
 0xeb5   :  { %v1756_v52 = vpop.f32.mrb[16].mxu0 }
 0xeb6   :  { %v1757_v53 = vadd.f32 %v8837_v14, %v1756_v52  ;;  %v7464_v54 = vpop.f32.mrb[17].mxu0  ;;  %v1272_v52 = vld [vmem:[%s10464_s29] sm:$0x3] }
 0xeb7   :  { %vm1273_vm10 = vcmp.eq.s32.totalorder %v1272_v52, 4 }
 0xeb8   :  { %1768 = vrot.lane.b32.xlu1 %v1757_v53, %s8640_s25  ;;  %v1760_v8 = vadd.f32 %v1757_v53, %v1673_v55 }
 0xeba   :  { %v6879_v56 = vmul.f32 -1.442695, %v1760_v8 }
 0xebc   :  { %8450 = vpow2.f32 %v6879_v56 }
 0xec6   :  { %v8451_v57 = vpop.eup %8450 }
 0xec7   :  { %v1764_v58 = vadd.f32 1.0, %v8451_v57 }
 0xec9   :  { %8452 = vrcp.f32 %v1764_v58 }
 0xed3   :  { %v8453_v59 = vpop.eup %8452 }
 0xed4   :  { %v1778_v16 = vsub.f32 1.0, %v8453_v59 }
 0xf2a   :  { %v1769_v60 = vpop.permute.xlu1 %1768 }
 0xf2b   :  { %v1771_v61 = vmul.f32 %v8453_v59, %v1769_v60  ;;  %v2197_v60 = vld [vmem:[%s10462_s2 + $0x8] sm:$0xff] }
 0xf2d   :  { %1773 = vrot.lane.b32.xlu0 %v1771_v61, %s8640_s25 }
 0xf31   :  { %1784 = vrot.lane.b32.xlu0 %v1591_v47, %s8642_s26 }
 0xf35   :  { %374 = vperm.xlu0 %8418, %v372_v1   ;;  %v6888_v1 = vld [vmem:[%s10463_s1 + $0xe] sm:$0x3] }
 0xf39   :  { %675 = vperm.xlu0 %8418, %v673_v2  }
 0xf9f   :  { %v1774_v5 = vpop.permute.xlu0 %1773 }
 0xfa0   :  { %v1776_v6 = vadd.f32 %v1774_v5, %v1673_v55  ;;  %v1275_v55 = vsel %vm1273_vm10, 1, %v8643_v63  ;;  %vm2698_vm10 = vcmask 1043459  }
 0xfa2   :  { %8454 = vtanh.f32 %v1776_v6 }
 0xfa3   :  { %v1785_v15 = vpop.permute.xlu0 %1784 }
 0xfa4   :  { %v1787_v18 = vmul.f32 %v8453_v59, %v1785_v15  ;;  %v2196_v59 = vld [vmem:[%s10462_s2] sm:$0xff]  ;;  %s10465_s2 = sld [smem:[#allocation17_spill]] }
 0xfa5   :  { %v8105_v61 = vpack.c.bf16 %v2197_v60, %v2196_v59  ;;  %v2398_v59 = vld [vmem:[%s10433_s9] sm:$0xff]  ;;  %v2399_v60 = vld [vmem:[%s10433_s9 + $0x8] sm:$0xff] }
 0xfac   :  { %v8455_v7 = vpop.eup %8454 }
 0xfad   :  { %1780 = vrot.lane.b32.xlu1 %v8455_v7, %s8641_s6 }
 0xfb4   :  { %v375_v23 = vpop.permute.xlu0 %374 }
 0xfb5   :  { %vm376_vm6 = vcmp.eq.s32.totalorder %v375_v23, 1  ;;  %v2281_v23 = vld [vmem:[%s10461_s5 + $0x18] sm:$0xff] }
 0xfb8   :  { %v676_v36 = vpop.permute.xlu0 %675 }
 0xfb9   :  { %vm677_vm8 = vcmp.eq.s32.totalorder %v676_v36, 1 }
0x101f   :  { %v1781_v17 = vpop.permute.xlu1 %1780 }
0x1020   :  { %v1783_v20 = vmul.f32 %v1781_v17, %v1778_v16  ;;  %v2278_v17 = vld [vmem:[%s10461_s5] sm:$0xff] }
0x1022   :  { %v9063_v21 = vadd.f32 %v1787_v18, %v1783_v20  ;;  %v2279_v18 = vld [vmem:[%s10461_s5 + $0x8] sm:$0xff]  ;;  %v1874_v20 = vld [vmem:[%s10464_s29] sm:$0x3] }
0x1023   :  { %vm1875_vm13 = vcmp.eq.s32.totalorder %v1874_v20, 6  ;;  %v2505_v20 = vld [vmem:[%s10434_s10] sm:$0xff] }
0x1024   :  { %1790 = vrot.lane.b32.xlu1 %v9063_v21, %s8641_s6 }
0x1028   :  { %378 = vrot.lane.b32.xlu1 %v371_v22, %s8642_s26  ;;  %v8108_v22 = vpack.c.bf16 %v2279_v18, %v2278_v17 }
0x1096   :  { %v1791_v33 = vpop.permute.xlu1 %1790 }
0x1097   :  { %1793 = vst.msk [vmem:[#allocation4] sm:$0x3] %vm84_vm0, %v1791_v33  ;;  %1795 = vst.msk [vmem:[#allocation2 + $0xa] sm:$0x3] %vm84_vm0, %v1791_v33  ;;  %7474 = vmatmul.mubr.msk.f32.vlgmr.msra.gmra.mrb[16].mxu1 %vm183_vm3, %v1791_v33  ;;  %v2280_v33 = vld [vmem:[%s10461_s5 + $0x10] sm:$0xff] }
0x1098   :  { %8094 = vmatpush3.bf16.msra.mxu1 %v8793_v4  ;;  %7491 = vmatprep.mubr.msk.f32.mxu1 %vm8638_vm1, %v8639_v9  ;;  %v1973_v4 = vpop.f32.mrb[18].mxu0 }
0x1099   :  { %8095 = vmatprep.subr.bf16.mxu1 %v8637_v3  ;;  %v7482_v26 = vpop.f32.mrb[19].mxu0  ;;  %v1974_v39 = vadd.f32 %v8844_v19, %v1973_v4  ;;  %v1877_v4 = vsel %vm1875_vm13, 1, %v8643_v63  ;;  %vm2704_vm13 = vcmask 1046534  }
0x109a   :  { %v379_v35 = vpop.permute.xlu1 %378 }
0x109b   :  { %v381_v24 = vsel %vm376_vm6, %v8878_v43, %v379_v35  ;;  %v971_v43 = vld [vmem:[%s10464_s29] sm:$0x3] }
0x109c   :  { %8097 = vmatpush3.bf16.msra.mxu1 %v8816_v10  ;;  %383 = vrot.lane.b32.xlu1 %v381_v24, %s8641_s6  ;;  %vm972_vm7 = vcmp.eq.s32.totalorder %v971_v43, 3 }
0x109d   :  { %8104 = vmatprep.subr.bf16.mxu1 %v8637_v3  ;;  %v974_v28 = vsel %vm972_vm7, 1, %v8643_v63 }
0x109e   :  { %v1892_v25 = vld [vmem:[#allocation4] sm:$0x3] }
0x109f   :  { %7492 = vmatmul.mubr.msk.f32.vlgmr.msra.gmra.mrb[18].mxu1 %vm183_vm3, %v1892_v25 }
0x10a0   :  { %7509 = vmatprep.mubr.msk.f32.mxu1 %vm8638_vm1, %v8639_v9  ;;  %8106 = vmatpush3.bf16.msra.mxu1 %v8105_v61  ;;  %v8114_v61 = vpack.c.bf16 %v2399_v60, %v2398_v59 }
0x10a1   :  { %8113 = vmatprep.subr.bf16.mxu1 %v8637_v3 }
0x10a3   :  { %7510 = vmatmul.mubr.msk.f32.vlgmr.msra.gmra.mrb[20].mxu1 %vm10451_vm2, %v6888_v1  ;;  %v2401_v1 = vld [vmem:[%s10433_s9 + $0x18] sm:$0xff] }
0x10a4   :  { %7531 = vmatprep.mubr.msk.f32.mxu1 %vm8638_vm1, %v8639_v9  ;;  %8115 = vmatpush3.bf16.msra.mxu1 %v8114_v61 }
0x10a5   :  { %8116 = vmatprep.subr.bf16.mxu1 %v8637_v3 }
0x110e   :  { %v384_v27 = vpop.permute.xlu1 %383 }
0x110f   :  { %386 = vst.msk [vmem:[#allocation5] sm:$0x3] %vm84_vm0, %v384_v27 }
0x1116   :  { %v672_v10 = vld [vmem:[#allocation5] sm:$0x3] }
0x1117   :  { %679 = vrot.lane.b32.xlu1 %v672_v10, %s8642_s26 }
0x111b   :  { %976 = vperm.xlu1 %8419, %v974_v28  }
0x116a   :  { %v1868_v29 = vpop.f32.mrb[16].mxu1 }
0x116b   :  { %1873 = vst.msk [vmem:[#allocation3 + $0xa] sm:$0x3] %vm84_vm0, %v1868_v29  ;;  %v7475_v30 = vpop.f32.mrb[17].mxu1 }
0x1172   :  { %v2057_v31 = vpop.f32.mrb[18].mxu1 }
0x1173   :  { %v2058_v32 = vadd.f32 %v8837_v14, %v2057_v31  ;;  %v7493_v34 = vpop.f32.mrb[19].mxu1 }
0x1175   :  { %2069 = vrot.lane.b32.xlu1 %v2058_v32, %s8640_s25  ;;  %v2061_v40 = vadd.f32 %v2058_v32, %v1974_v39 }
0x1176   :  { %v2274_v27 = vpop.f32.mrb[20].mxu1 }
0x1177   :  { %v6886_v41 = vmul.f32 -1.442695, %v2061_v40  ;;  %v7511_v43 = vpop.f32.mrb[21].mxu1 }
0x1179   :  { %8456 = vpow2.f32 %v6886_v41 }
0x1183   :  { %v8457_v44 = vpop.eup %8456 }
0x1184   :  { %v2065_v46 = vadd.f32 1.0, %v8457_v44 }
0x1186   :  { %8458 = vrcp.f32 %v2065_v46 }
0x1189   :  { %v680_v37 = vpop.permute.xlu1 %679 }
0x118a   :  { %v682_v38 = vsel %vm677_vm8, %v8913_v11, %v680_v37  ;;  %v6891_v37 = vld [vmem:[%s10432_s8] ss:$0 sm:$0xff]  ;;  %vm2694_vm8 = vcmask 1041409  }
0x118b   :  { %684 = vrot.lane.b32.xlu0 %v682_v38, %s8641_s6 }
0x1190   :  { %v8459_v14 = vpop.eup %8458 }
0x1191   :  { %v2079_v5 = vsub.f32 1.0, %v8459_v14 }
0x119a   :  { %v977_v47 = vpop.permute.xlu1 %976 }
0x119b   :  { %vm978_vm9 = vcmp.eq.s32.totalorder %v977_v47, 1 }
0x11e7   :  { %v2070_v48 = vpop.permute.xlu1 %2069 }
0x11e8   :  { %v2072_v49 = vmul.f32 %v8459_v14, %v2070_v48  ;;  %v2175_v48 = vld [vmem:[%s10464_s29] sm:$0x3] }
0x11e9   :  { %vm2176_vm4 = vcmp.eq.s32.totalorder %v2175_v48, 7 }
0x11ea   :  { %2074 = vrot.lane.b32.xlu1 %v2072_v49, %s8640_s25 }
0x11fd   :  { %v685_v50 = vpop.permute.xlu0 %684 }
0x11fe   :  { %687 = vst.msk [vmem:[#allocation5] sm:$0x3] %vm84_vm0, %v685_v50 }
0x1205   :  { %v973_v11 = vld [vmem:[#allocation5] sm:$0x3] }
0x1206   :  { %980 = vrot.lane.b32.xlu0 %v973_v11, %s8642_s26  ;;  %v2178_v11 = vsel %vm2176_vm4, 1, %v8643_v63  ;;  %vm10452_vm4 = vcmask 15360  }
0x125c   :  { %v2075_v51 = vpop.permute.xlu1 %2074 }
0x125d   :  { %v2077_v19 = vadd.f32 %v2075_v51, %v1974_v39 }
0x125f   :  { %8460 = vtanh.f32 %v2077_v19  ;;  %v2476_v19 = vld [vmem:[%s10464_s29] sm:$0x3] }
0x1260   :  { %vm2477_vm5 = vcmp.eq.s32.totalorder %v2476_v19, 8  ;;  %v6897_v19 = vld [vmem:[%s10436_s12] ss:$0 sm:$0xff] }
0x1269   :  { %v8461_v8 = vpop.eup %8460 }
0x1278   :  { %v981_v53 = vpop.permute.xlu0 %980 }
0x1279   :  { %v983_v54 = vsel %vm978_vm9, %v8948_v42, %v981_v53  ;;  %v1573_v42 = vld [vmem:[%s10464_s29] sm:$0x3]  ;;  %vm2696_vm9 = vcmask 1042434  }
0x127a   :  { %985 = vrot.lane.b32.xlu0 %v983_v54, %s8641_s6  ;;  %vm1574_vm12 = vcmp.eq.s32.totalorder %v1573_v42, 5  ;;  %v2479_v54 = vsel %vm2477_vm5, 1, %v8643_v63  ;;  %vm2497_vm5 = vcmask 123904  }
0x127b   :  { %v1576_v6 = vsel %vm1574_vm12, 1, %v8643_v63  ;;  %vm2702_vm12 = vcmask 1045509  }
0x127e   :  { %1277 = vperm.xlu0 %8418, %v1275_v55  }
0x1282   :  { %2081 = vrot.lane.b32.xlu0 %v8461_v8, %s8641_s6 }
0x12ec   :  { %v986_v56 = vpop.permute.xlu0 %985 }
0x12ed   :  { %988 = vst.msk [vmem:[#allocation5] sm:$0x3] %vm84_vm0, %v986_v56 }
0x12f4   :  { %v1274_v57 = vld [vmem:[#allocation5] sm:$0x3] }
0x12f5   :  { %1281 = vrot.lane.b32.xlu1 %v1274_v57, %s8642_s26 }
0x12f9   :  { %2085 = vrot.lane.b32.xlu1 %v1892_v25, %s8642_s26  ;;  %v8111_v25 = vpack.c.bf16 %v2281_v23, %v2280_v33  ;;  %v2507_v23 = vld [vmem:[%s10434_s10 + $0x10] sm:$0xff] }
0x12fd   :  { %v1278_v58 = vpop.permute.xlu0 %1277 }
0x12fe   :  { %vm1279_vm11 = vcmp.eq.s32.totalorder %v1278_v58, 1 }
0x1301   :  { %v2082_v2 = vpop.permute.xlu0 %2081 }
0x1302   :  { %v2084_v13 = vmul.f32 %v2082_v2, %v2079_v5 }
0x1367   :  { %v1282_v62 = vpop.permute.xlu1 %1281 }
0x1368   :  { %v1284_v0 = vsel %vm1279_vm11, %v8983_v12, %v1282_v62  ;;  %vm2700_vm11 = vcmask 1044484  }
0x1369   :  { %1286 = vrot.lane.b32.xlu0 %v1284_v0, %s8641_s6  ;;  %v2400_v0 = vld [vmem:[%s10433_s9 + $0x10] sm:$0xff] }
0x136a   :  { %v8117_v2 = vpack.c.bf16 %v2401_v1, %v2400_v0 }
0x136b   :  { %v2086_v7 = vpop.permute.xlu1 %2085 }
0x136c   :  { %v2088_v15 = vmul.f32 %v8459_v14, %v2086_v7  ;;  %8118 = vmatpush3.bf16.msra.mxu1 %v8117_v2 }
0x136d   :  { %1578 = vperm.xlu0 %8418, %v1576_v6   ;;  %8125 = vmatprep.subr.bf16.mxu1 %v8637_v3 }
0x136e   :  { %v9128_v12 = vadd.f32 %v2088_v15, %v2084_v13 }
0x1370   :  { %2091 = vrot.lane.b32.xlu1 %v9128_v12, %s8641_s6 }
0x13db   :  { %v1287_v16 = vpop.permute.xlu0 %1286 }
0x13dc   :  { %1289 = vst.msk [vmem:[#allocation5] sm:$0x3] %vm84_vm0, %v1287_v16 }
0x13e2   :  { %v2092_v35 = vpop.permute.xlu1 %2091 }
0x13e3   :  { %2094 = vst.msk [vmem:[#allocation4] sm:$0x3] %vm84_vm0, %v2092_v35  ;;  %2096 = vst.msk [vmem:[#allocation2 + $0xc] sm:$0x3] %vm84_vm0, %v2092_v35  ;;  %7503 = vmatmul.mubr.msk.f32.vlgmr.msra.gmra.mrb[20].mxu0 %vm183_vm3, %v2092_v35  ;;  %v1575_v24 = vld [vmem:[#allocation5] sm:$0x3] }
0x13e4   :  { %1582 = vrot.lane.b32.xlu1 %v1575_v24, %s8642_s26  ;;  %8109 = vmatpush3.bf16.msra.mxu0 %v8108_v22  ;;  %v2506_v22 = vld [vmem:[%s10434_s10 + $0x8] sm:$0xff]  ;;  %v2508_v35 = vld [vmem:[%s10434_s10 + $0x18] sm:$0xff] }
0x13e5   :  { %8110 = vmatprep.subr.bf16.mxu0 %v8637_v3  ;;  %7520 = vmatprep.mubr.msk.f32.mxu0 %vm8638_vm1, %v8639_v9  ;;  %v8120_v33 = vpack.c.bf16 %v2506_v22, %v2505_v20  ;;  %v8123_v24 = vpack.c.bf16 %v2508_v35, %v2507_v23 }
0x13e8   :  { %1879 = vperm.xlu1 %8419, %v1877_v4   ;;  %8112 = vmatpush3.bf16.msra.mxu0 %v8111_v25 }
0x13e9   :  { %8119 = vmatprep.subr.bf16.mxu0 %v8637_v3 }
0x13ea   :  { %v2193_v26 = vld [vmem:[#allocation4] sm:$0x3] }
0x13eb   :  { %7521 = vmatmul.mubr.msk.f32.vlgmr.msra.gmra.mrb[22].mxu0 %vm183_vm3, %v2193_v26 }
0x13ec   :  { %7542 = vmatprep.mubr.msk.f32.mxu0 %vm8638_vm1, %v8639_v9  ;;  %v1579_v10 = vpop.permute.xlu0 %1578  ;;  %8121 = vmatpush3.bf16.msra.mxu0 %v8120_v33 }
0x13ed   :  { %vm1580_vm14 = vcmp.eq.s32.totalorder %v1579_v10, 1  ;;  %8122 = vmatprep.subr.bf16.mxu0 %v8637_v3 }
0x13f0   :  { %8124 = vmatpush3.bf16.msra.mxu0 %v8123_v24 }
0x13f1   :  { %8131 = vmatprep.subr.bf16.mxu0 %v8637_v3 }
0x1456   :  { %v1583_v28 = vpop.permute.xlu1 %1582 }
0x1457   :  { %v1585_v29 = vsel %vm1580_vm14, %v9018_v45, %v1583_v28  ;;  %v6889_v45 = vld [vmem:[%s10431_s7] ss:$0 sm:$0xff]  ;;  %vm2706_vm14 = vcmask 1047559  }
0x1458   :  { %1587 = vrot.lane.b32.xlu0 %v1585_v29, %s8641_s6  ;;  %v2275_v40 = vadd.f32 %v6889_v45, %v2274_v27 }
0x1467   :  { %v1880_v14 = vpop.permute.xlu1 %1879 }
0x1468   :  { %vm1881_vm15 = vcmp.eq.s32.totalorder %v1880_v14, 1  ;;  %v2594_v14 = vld [vmem:[#allocation3 + $0xa] sm:$0x3] }
0x14b6   :  { %v2169_v30 = vpop.f32.mrb[20].mxu0 }
0x14b7   :  { %2174 = vst.msk [vmem:[#allocation3 + $0xc] sm:$0x3] %vm84_vm0, %v2169_v30  ;;  %v7504_v31 = vpop.f32.mrb[21].mxu0  ;;  %v6895_v30 = vld [vmem:[%s10435_s11] ss:$0 sm:$0xff] }
0x14be   :  { %v2358_v32 = vpop.f32.mrb[22].mxu0 }
0x14bf   :  { %v7522_v34 = vpop.f32.mrb[23].mxu0  ;;  %v2359_v39 = vadd.f32 %v6891_v37, %v2358_v32  ;;  %v2589_v37 = vld [vmem:[#allocation3] sm:$0x3] }
0x14c1   :  { %v2362_v41 = vadd.f32 %v2359_v39, %v2275_v40 }
0x14c3   :  { %v6893_v44 = vmul.f32 -1.442695, %v2362_v41  ;;  %v2592_v41 = vld [vmem:[#allocation3 + $0x6] sm:$0x3] }
0x14c5   :  { %8462 = vpow2.f32 %v6893_v44 }
0x14ca   :  { %v1588_v36 = vpop.permute.xlu0 %1587 }
0x14cb   :  { %1590 = vst.msk [vmem:[#allocation5] sm:$0x3] %vm84_vm0, %v1588_v36  ;;  %v2590_v36 = vld [vmem:[#allocation3 + $0x2] sm:$0x3] }
0x14cf   :  { %v8463_v46 = vpop.eup %8462 }
0x14d0   :  { %v2366_v47 = vadd.f32 1.0, %v8463_v46  ;;  %v2593_v46 = vld [vmem:[#allocation3 + $0x8] sm:$0x3] }
0x14d2   :  { %v1876_v38 = vld [vmem:[#allocation5] sm:$0x3]  ;;  %8464 = vrcp.f32 %v2366_v47 }
0x14d3   :  { %1883 = vrot.lane.b32.xlu0 %v1876_v38, %s8642_s26  ;;  %v2591_v38 = vld [vmem:[#allocation3 + $0x4] sm:$0x3] }
0x14d7   :  { %2370 = vrot.lane.b32.xlu0 %v2359_v39, %s8640_s25 }
0x14dc   :  { %v8465_v52 = vpop.eup %8464 }
0x14dd   :  { %v2380_v13 = vsub.f32 1.0, %v8465_v52 }
0x1545   :  { %v1884_v49 = vpop.permute.xlu0 %1883 }
0x1546   :  { %v1886_v50 = vsel %vm1881_vm15, %v9063_v21, %v1884_v49  ;;  %v2595_v49 = vld [vmem:[#allocation3 + $0xc] sm:$0x3] }
0x1547   :  { %1888 = vrot.lane.b32.xlu1 %v1886_v50, %s8641_s6 }
0x1549   :  { %v2371_v51 = vpop.permute.xlu0 %2370 }
0x154a   :  { %v2373_v53 = vmul.f32 %v8465_v52, %v2371_v51 }
0x154b   :  { %2180 = vperm.xlu1 %8419, %v2178_v11  }
0x154f   :  { %2375 = vrot.lane.b32.xlu1 %v2373_v53, %s8640_s25 }
0x1553   :  { %2481 = vperm.xlu1 %8419, %v2479_v54  }
0x1557   :  { %2386 = vrot.lane.b32.xlu1 %v2193_v26, %s8642_s26 }
0x15b9   :  { %v1889_v21 = vpop.permute.xlu1 %1888 }
0x15ba   :  { %1891 = vst.msk [vmem:[#allocation5] sm:$0x3] %vm84_vm0, %v1889_v21 }
0x15c1   :  { %v2177_v55 = vld [vmem:[#allocation5] sm:$0x3] }
0x15c2   :  { %2184 = vrot.lane.b32.xlu0 %v2177_v55, %s8642_s26 }
0x15ca   :  { %v2181_v8 = vpop.permute.xlu1 %2180 }
0x15cb   :  { %vm2182_vm6 = vcmp.eq.s32.totalorder %v2181_v8, 1 }
0x15ce   :  { %v2376_v56 = vpop.permute.xlu1 %2375 }
0x15cf   :  { %v2378_v57 = vadd.f32 %v2376_v56, %v2275_v40 }
0x15d1   :  { %8466 = vtanh.f32 %v2378_v57 }
0x15d2   :  { %v2482_v5 = vpop.permute.xlu1 %2481 }
0x15d3   :  { %vm2483_vm7 = vcmp.eq.s32.totalorder %v2482_v5, 1 }
0x15d6   :  { %v2387_v15 = vpop.permute.xlu1 %2386 }
0x15d7   :  { %v2389_v17 = vmul.f32 %v8465_v52, %v2387_v15 }
0x15db   :  { %v8467_v62 = vpop.eup %8466 }
0x1634   :  { %v2185_v58 = vpop.permute.xlu0 %2184 }
0x1635   :  { %v2187_v42 = vsel %vm2182_vm6, %v9128_v12, %v2185_v58  ;;  %vm3246_vm6 = vcmask 1041408  }
0x1636   :  { %2189 = vrot.lane.b32.xlu0 %v2187_v42, %s8641_s6 }
0x163a   :  { %2382 = vrot.lane.b32.xlu0 %v8467_v62, %s8641_s6 }
0x16a8   :  { %v2190_v6 = vpop.permute.xlu0 %2189 }
0x16a9   :  { %2192 = vst.msk [vmem:[#allocation5] sm:$0x3] %vm84_vm0, %v2190_v6 }
0x16ac   :  { %v2383_v7 = vpop.permute.xlu0 %2382 }
0x16ad   :  { %v2385_v12 = vmul.f32 %v2383_v7, %v2380_v13 }
0x16af   :  { %v2390_v18 = vadd.f32 %v2389_v17, %v2385_v12  ;;  %v2501_v17 = vlaneseq }
0x16b0   :  { %v2478_v16 = vld [vmem:[#allocation5] sm:$0x3] }
0x16b1   :  { %2485 = vrot.lane.b32.xlu0 %v2478_v16, %s8642_s26  ;;  %v9261_v20 = vshrl.u32 %v2501_v17, 7 }
0x16b5   :  { %2392 = vrot.lane.b32.xlu0 %v2390_v18, %s8641_s6 }
0x1723   :  { %v2486_v25 = vpop.permute.xlu0 %2485 }
0x1724   :  { %v2488_v4 = vsel %vm2483_vm7, %v2390_v18, %v2486_v25  ;;  %v9259_v18 = vand.u32 127, %v2501_v17  ;;  %v9310_v17 = vsub.s32 4, %v9261_v20 }
0x1725   :  { %2490 = vrot.lane.b32.xlu1 %v2488_v4, %s8641_s6 }
0x1726   :  { %v9265_v22 = vsub.s32 %v9259_v18, %v9261_v20 }
0x1727   :  { %v2393_v26 = vpop.permute.xlu0 %2392 }
0x1728   :  { %2395 = vst.msk [vmem:[#allocation4] sm:$0x3] %vm84_vm0, %v2393_v26  ;;  %2397 = vst.msk [vmem:[#allocation2 + $0xe] sm:$0x3] %vm84_vm0, %v2393_v26  ;;  %7532 = vmatmul.mubr.msk.f32.vlgmr.msra.gmra.mrb[22].mxu1 %vm183_vm3, %v2393_v26 }
0x1729   :  { %7553 = vmatprep.mubr.msk.f32.mxu1 %vm8638_vm1, %v8639_v9 }
0x1797   :  { %v2491_v27 = vpop.permute.xlu1 %2490 }
0x1798   :  { %2493 = vst.msk [vmem:[#allocation5] sm:$0x3] %vm84_vm0, %v2491_v27 }
0x179f   :  { %v2494_v43 = vld [vmem:[#allocation5] sm:$0x3] }
0x17a0   :  { %2495 = vst.msk [vmem:[#allocation4] sm:$0x3] %vm84_vm0, %v2494_v43 }
0x17a7   :  { %v9228_v10 = vld [vmem:[#allocation4] sm:$0x3] }
0x17a8   :  { %7543 = vmatmul.mubr.msk.f32.vlgmr.msra.gmra.mrb[24].mxu0 %vm183_vm3, %v9228_v10 }
0x17a9   :  { %7560 = vmatprep.mubr.msk.f32.mxu0 %vm8638_vm1, %v8639_v9 }
0x17fb   :  { %v2470_v28 = vpop.f32.mrb[22].mxu1 }
0x17fc   :  { %2475 = vst.msk [vmem:[#allocation3 + $0xe] sm:$0x3] %vm84_vm0, %v2470_v28  ;;  %v7533_v29 = vpop.f32.mrb[23].mxu1 }
0x1803   :  { %v2596_v11 = vld [vmem:[#allocation3 + $0xe] sm:$0x3] }
0x187b   :  { %v2585_v31 = vpop.f32.mrb[24].mxu0 }
0x187c   :  { %v9238_v32 = vadd.f32 %v6895_v30, %v2585_v31  ;;  %v7544_v34 = vpop.f32.mrb[25].mxu0 }
0x187e   :  { %v2598_v39 = vadd.f32 %v2590_v36, %v9238_v32  ;;  %v2597_v45 = vadd.f32 %v2589_v37, %v9238_v32  ;;  %v2599_v40 = vadd.f32 %v2591_v38, %v9238_v32  ;;  %v2600_v44 = vadd.f32 %v2592_v41, %v9238_v32  ;;  %v2652_v38 = vld [vmem:[%s10465_s2] sm:$0xff]  ;;  %s10467_s2 = sld [smem:[#allocation16_spill]] (!%p6906_p5) }
0x187f   :  { %v2601_v47 = vadd.f32 %v2593_v46, %v9238_v32  ;;  %v2602_v48 = vadd.f32 %v2594_v14, %v9238_v32  ;;  %v2603_v50 = vadd.f32 %v2595_v49, %v9238_v32  ;;  %v2604_v51 = vadd.f32 %v2596_v11, %v9238_v32 }
0x1880   :  { %8468 = vtanh.f32 %v2598_v39  ;;  %vm2653_vm15 = vcmp.gt.f32.partialorder %v2652_v38, 0.0  ;;  %v2786_v38 = vld [vmem:[#allocation2] sm:$0x3] }
0x1881   :  { %8470 = vtanh.f32 %v2597_v45 }
0x1882   :  { %8472 = vtanh.f32 %v2599_v40 }
0x1883   :  { %8474 = vtanh.f32 %v2600_v44 }
0x1884   :  { %8476 = vtanh.f32 %v2601_v47 }
0x1885   :  { %8478 = vtanh.f32 %v2602_v48 }
0x1886   :  { %8480 = vtanh.f32 %v2603_v50 }
0x1887   :  { %8482 = vtanh.f32 %v2604_v51 }
0x188a   :  { %v8469_v52 = vpop.eup %8468 }
0x188b   :  { %v8471_v53 = vpop.eup %8470  ;;  %v2621_v54 = vmul.f32 %v8469_v52, %v6897_v19 }
0x188c   :  { %v8473_v21 = vpop.eup %8472  ;;  %v2620_v55 = vmul.f32 %v8471_v53, %v6897_v19 }
0x188d   :  { %v8475_v8 = vpop.eup %8474  ;;  %v2631_v56 = vsel %vm84_vm0, %v2621_v54, 0.0  ;;  %v2622_v57 = vmul.f32 %v8473_v21, %v6897_v19 }
0x188e   :  { %v8477_v58 = vpop.eup %8476  ;;  %2632 = vadd.xlane.f32.xlu0 %v2631_v56  ;;  %v2628_v42 = vsel %vm84_vm0, %v2620_v55, 0.0  ;;  %v2623_v59 = vmul.f32 %v8475_v8, %v6897_v19 }
0x188f   :  { %v8479_v60 = vpop.eup %8478  ;;  %2629 = vadd.xlane.f32.xlu1 %v2628_v42  ;;  %v2634_v61 = vsel %vm84_vm0, %v2622_v57, 0.0  ;;  %v2624_v62 = vmul.f32 %v8477_v58, %v6897_v19 }
0x1890   :  { %v8481_v0 = vpop.eup %8480  ;;  %v2637_v1 = vsel %vm84_vm0, %v2623_v59, 0.0  ;;  %v2625_v2 = vmul.f32 %v8479_v60, %v6897_v19  ;;  %v9288_v60 = vsub.s32 1, %v9261_v20 }
0x1891   :  { %v8483_v5 = vpop.eup %8482  ;;  %v2640_v6 = vsel %vm84_vm0, %v2624_v62, 0.0  ;;  %v2626_v7 = vmul.f32 %v8481_v0, %v6897_v19 }
0x1892   :  { %2635 = vadd.xlane.f32.xlu0 %v2634_v61  ;;  %v2643_v13 = vsel %vm84_vm0, %v2625_v2, 0.0  ;;  %v2627_v15 = vmul.f32 %v8483_v5, %v6897_v19  ;;  %v9291_v61 = vsub.s32 0, %v9261_v20  ;;  %v9296_v5 = vsub.s32 2, %v9261_v20 }
0x1893   :  { %2638 = vadd.xlane.f32.xlu1 %v2637_v1  ;;  %v2646_v12 = vsel %vm84_vm0, %v2626_v7, 0.0  ;;  %v2819_v7 = vld [vmem:[%s10438_s14] sm:$0xff] }
0x1894   :  { %v2649_v16 = vsel %vm84_vm0, %v2627_v15, 0.0 }
0x1896   :  { %2641 = vadd.xlane.f32.xlu0 %v2640_v6  ;;  %v9299_v6 = vsub.s32 3, %v9261_v20 }
0x1897   :  { %2644 = vadd.xlane.f32.xlu1 %v2643_v13  ;;  %v2820_v13 = vld [vmem:[%s10438_s14 + $0x8] sm:$0xff] }
0x1898   :  { %v8126_v15 = vpack.c.bf16 %v2820_v13, %v2819_v7 }
0x189a   :  { %2647 = vadd.xlane.f32.xlu0 %v2646_v12  ;;  %8127 = vmatpush3.bf16.msra.mxu1 %v8126_v15  ;;  %v3018_v15 = vld [vmem:[%s10441_s17] sm:$0xff] }
0x189b   :  { %2650 = vadd.xlane.f32.xlu1 %v2649_v16  ;;  %8128 = vmatprep.subr.bf16.mxu1 %v8637_v3 }
0x191b   :  { %v2633_v33 = vpop.xlane.xlu0 %2632 }
0x191c   :  { %v2630_v23 = vpop.xlane.xlu1 %2629  ;;  %v2669_v35 = vrot.slane %v2633_v33, %v9265_v22  ;;  %v9313_v33 = vsub.s32 5, %v9261_v20 }
0x191d   :  { %v2665_v24 = vrot.slane %v2630_v23, %v9265_v22  ;;  %v2496_v23 = vld [vmem:[%s10466_s0] sm:$0x3] }
0x191e   :  { %2498 = vst.msk [vmem:[#allocation6] sm:$0x3] %vm2497_vm5, %v2496_v23 }
0x191f   :  { %v2636_v25 = vpop.xlane.xlu0 %2635  ;;  %v2695_v27 = vsel %vm2694_vm8, %v2669_v35, %v2665_v24  ;;  %v2821_v35 = vld [vmem:[%s10438_s14 + $0x10] sm:$0xff]  ;;  %v2822_v24 = vld [vmem:[%s10438_s14 + $0x18] sm:$0xff] }
0x1920   :  { %v2673_v4 = vrot.slane %v2636_v25, %v9265_v22  ;;  %v2639_v26 = vpop.xlane.xlu1 %2638  ;;  %v2817_v25 = vld [vmem:[%s10437_s13] sm:$0xff] }
0x1921   :  { %v2677_v43 = vrot.slane %v2639_v26, %v9265_v22  ;;  %v8129_v26 = vpack.c.bf16 %v2822_v24, %v2821_v35 }
0x1922   :  { %v2697_v28 = vsel %vm2696_vm9, %v2673_v4, %v2695_v27  ;;  %v9329_v4 = vsub.s32 6, %v9261_v20  ;;  %v2818_v27 = vld [vmem:[%s10437_s13 + $0x8] sm:$0xff] }
0x1923   :  { %v2642_v29 = vpop.xlane.xlu0 %2641  ;;  %v2699_v34 = vsel %vm2698_vm10, %v2677_v43, %v2697_v28  ;;  %8130 = vmatpush3.bf16.msra.mxu1 %v8129_v26  ;;  %v3020_v26 = vld [vmem:[%s10441_s17 + $0x10] sm:$0xff] }
0x1924   :  { %v2681_v30 = vrot.slane %v2642_v29, %v9265_v22  ;;  %v2645_v31 = vpop.xlane.xlu1 %2644  ;;  %v9338_v29 = vsub.s32 7, %v9261_v20  ;;  %8134 = vmatprep.subr.bf16.mxu1 %v8637_v3  ;;  %v2787_v20 = vld [vmem:[#allocation2 + $0x2] sm:$0x3] }
0x1925   :  { %v2685_v36 = vrot.slane %v2645_v31, %v9265_v22 }
0x1926   :  { %v2701_v37 = vsel %vm2700_vm11, %v2681_v30, %v2699_v34  ;;  %v8132_v30 = vpack.c.bf16 %v2818_v27, %v2817_v25  ;;  %v3021_v27 = vld [vmem:[%s10441_s17 + $0x18] sm:$0xff] }
0x1927   :  { %v2648_v39 = vpop.xlane.xlu0 %2647  ;;  %v2703_v41 = vsel %vm2702_vm12, %v2685_v36, %v2701_v37  ;;  %v9344_v36 = vld [vmem:[#allocation6] sm:$0x3] }
0x1928   :  { %v2689_v45 = vrot.slane %v2648_v39, %v9265_v22  ;;  %v2651_v40 = vpop.xlane.xlu1 %2650  ;;  %8133 = vmatpush3.bf16.msra.mxu0 %v8132_v30 }
0x1929   :  { %v2693_v44 = vrot.slane %v2651_v40, %v9265_v22  ;;  %8140 = vmatprep.subr.bf16.mxu0 %v8637_v3 }
0x192a   :  { %v2705_v46 = vsel %vm2704_vm13, %v2689_v45, %v2703_v41 }
0x192b   :  { %v2707_v47 = vsel %vm2706_vm14, %v2693_v44, %v2705_v46  ;;  %7561 = vmatmul.mubr.msk.f32.vlgmr.msra.gmra.mrb[26].mxu0 %vm10451_vm2, %v9344_v36  ;;  %v2788_v46 = vld [vmem:[#allocation2 + $0x4] sm:$0x3] }
0x192c   :  { %v2709_v14 = vsel %vm2653_vm15, %v2707_v47, -1e+09  ;;  %7582 = vmatprep.mubr.msk.f32.mxu0 %vm8638_vm1, %v8639_v9  ;;  %vm2499_vm15 = vcmask 33792  }
0x192d   :  { %v2711_v48 = vsel %vm10452_vm4, %v2709_v14, -inf  ;;  %2500 = vst.msk [vmem:[#allocation10] sm:$0x3] %vm2499_vm15, %v8643_v63  ;;  %v6907_v63 = vld [vmem:[%s10467_s2 + $0x2] sm:$0x3] (!%p6906_p5) }
0x192e   :  { %v2712_v49 = vrot.slane %v2711_v48, 4  ;;  %3278 = vst.msk [vmem:[#allocation6] sm:$0x3] (!%p6906_p5), %vm2497_vm5, %v6907_v63 }
0x1930   :  { %v2713_v50 = vmax.f32 %v2711_v48, %v2712_v49 }
0x1932   :  { %v2714_v11 = vrot.slane %v2713_v50, 2 }
0x1934   :  { %v2715_v51 = vmax.f32 %v2713_v50, %v2714_v11 }
0x1936   :  { %v2716_v19 = vrot.slane %v2715_v51, 1 }
0x1938   :  { %v2717_v52 = vmax.f32 %v2715_v51, %v2716_v19  ;;  %v2790_v19 = vld [vmem:[#allocation2 + $0x8] sm:$0x3] }
0x193a   :  { %v2718_v53 = vsub.f32 %v2709_v14, %v2717_v52  ;;  %v2789_v14 = vld [vmem:[#allocation2 + $0x6] sm:$0x3] }
0x193c   :  { %v2719_v54 = vmul.f32 1.442695, %v2718_v53  ;;  %v2791_v53 = vld [vmem:[#allocation2 + $0xa] sm:$0x3] }
0x193e   :  { %8484 = vpow2.f32 %v2719_v54 }
0x1948   :  { %v8485_v21 = vpop.eup %8484 }
0x1949   :  { %v2721_v55 = vsel %vm10452_vm4, %v8485_v21, 0.0 }
0x194a   :  { %v2722_v8 = vrot.slane %v2721_v55, 4 }
0x194c   :  { %v2723_v56 = vadd.f32 %v2722_v8, %v2721_v55 }
0x194e   :  { %v2724_v57 = vrot.slane %v2723_v56, 2 }
0x1950   :  { %v2725_v58 = vadd.f32 %v2724_v57, %v2723_v56 }
0x1952   :  { %v2726_v42 = vrot.slane %v2725_v58, 1 }
0x1954   :  { %v2727_v59 = vadd.f32 %v2726_v42, %v2725_v58  ;;  %v2792_v42 = vld [vmem:[#allocation2 + $0xc] sm:$0x3] }
0x1956   :  { %8486 = vrcp.f32 %v2727_v59 }
0x1960   :  { %v8487_v62 = vpop.eup %8486 }
0x1961   :  { %v2729_v0 = vmul.f32 %v8487_v62, %v8485_v21  ;;  %v2793_v62 = vld [vmem:[#allocation2 + $0xe] sm:$0x3] }
0x1963   :  { %v2740_v1 = vrot.slane %v2729_v0, %v9288_v60  ;;  %v2733_v2 = vrot.slane %v2729_v0, %v9291_v61  ;;  %v2747_v12 = vrot.slane %v2729_v0, %v9296_v5  ;;  %v2754_v16 = vrot.slane %v2729_v0, %v9299_v6 }
0x1964   :  { %v2761_v43 = vrot.slane %v2729_v0, %v9310_v17  ;;  %v2768_v28 = vrot.slane %v2729_v0, %v9313_v33  ;;  %v2775_v31 = vrot.slane %v2729_v0, %v9329_v4  ;;  %v2782_v34 = vrot.slane %v2729_v0, %v9338_v29 }
0x1965   :  { %2742 = vbcast.lane.b32.xlu1 %v2740_v1, 256  ;;  %2735 = vbcast.lane.b32.xlu0 %v2733_v2, 256 }
0x1969   :  { %2749 = vbcast.lane.b32.xlu1 %v2747_v12, 256  ;;  %2756 = vbcast.lane.b32.xlu0 %v2754_v16, 256  ;;  %v3019_v12 = vld [vmem:[%s10441_s17 + $0x8] sm:$0xff] }
0x196a   :  { %v8135_v24 = vpack.c.bf16 %v3019_v12, %v3018_v15  ;;  %v6905_v15 = vld [vmem:[%s10443_s19] ss:$0 sm:$0xff] }
0x196d   :  { %2763 = vbcast.lane.b32.xlu1 %v2761_v43, 256  ;;  %2770 = vbcast.lane.b32.xlu0 %v2768_v28, 256  ;;  %v8138_v43 = vpack.c.bf16 %v3021_v27, %v3020_v26 }
0x1971   :  { %2777 = vbcast.lane.b32.xlu1 %v2775_v31, 256  ;;  %2784 = vbcast.lane.b32.xlu0 %v2782_v34, 256  ;;  %v6900_v34 = vld [vmem:[%s10439_s15] ss:$0 sm:$0xff] }
0x1975   :  { %2978 = vrot.lane.b32.xlu1 %v9238_v32, %s8641_s6  ;;  %2988 = vrot.lane.b32.xlu0 %v9238_v32, %s8642_s26 }
0x19d7   :  { %v2743_v37 = vpop.permute.xlu1 %2742  ;;  %v2736_v39 = vpop.permute.xlu0 %2735 }
0x19d8   :  { %v2795_v45 = vmul.f32 %v2787_v20, %v2743_v37  ;;  %v2794_v40 = vmul.f32 %v2786_v38, %v2736_v39 }
0x19da   :  { %v2803_v41 = vsel %vm84_vm0, %v2795_v45, 0.0  ;;  %v2802_v44 = vsel %vm84_vm0, %v2794_v40, 0.0 }
0x19db   :  { %v2750_v47 = vpop.permute.xlu1 %2749  ;;  %v2757_v48 = vpop.permute.xlu0 %2756  ;;  %v2804_v11 = vadd.f32 %v2803_v41, %v2802_v44 }
0x19dc   :  { %v2796_v49 = vmul.f32 %v2788_v46, %v2750_v47  ;;  %v2797_v50 = vmul.f32 %v2789_v14, %v2757_v48 }
0x19de   :  { %v2805_v51 = vsel %vm84_vm0, %v2796_v49, 0.0  ;;  %v2807_v21 = vsel %vm84_vm0, %v2797_v50, 0.0 }
0x19df   :  { %v2806_v32 = vadd.f32 %v2805_v51, %v2804_v11  ;;  %v2764_v52 = vpop.permute.xlu1 %2763  ;;  %v2771_v54 = vpop.permute.xlu0 %2770  ;;  %v3014_v51 = vld [vmem:[%s10440_s16] sm:$0xff] }
0x19e0   :  { %v2798_v55 = vmul.f32 %v2790_v19, %v2764_v52  ;;  %v2799_v8 = vmul.f32 %v2791_v53, %v2771_v54  ;;  %v3016_v19 = vld [vmem:[%s10440_s16 + $0x10] sm:$0xff]  ;;  %v3164_v53 = vld [vmem:[%s10442_s18] sm:$0xff]  ;;  %v3165_v54 = vld [vmem:[%s10442_s18 + $0x8] sm:$0xff] }
0x19e1   :  { %v2808_v56 = vadd.f32 %v2807_v21, %v2806_v32  ;;  %v3015_v32 = vld [vmem:[%s10440_s16 + $0x8] sm:$0xff]  ;;  %v8147_v21 = vpack.c.bf16 %v3165_v54, %v3164_v53 }
0x19e2   :  { %v2809_v57 = vsel %vm84_vm0, %v2798_v55, 0.0  ;;  %v2811_v1 = vsel %vm84_vm0, %v2799_v8, 0.0  ;;  %v8141_v52 = vpack.c.bf16 %v3015_v32, %v3014_v51 }
0x19e3   :  { %v2810_v58 = vadd.f32 %v2809_v57, %v2808_v56  ;;  %v2778_v59 = vpop.permute.xlu1 %2777  ;;  %v2785_v0 = vpop.permute.xlu0 %2784 }
0x19e4   :  { %v2800_v2 = vmul.f32 %v2792_v42, %v2778_v59  ;;  %v2801_v7 = vmul.f32 %v2793_v62, %v2785_v0  ;;  %8142 = vmatpush3.bf16.msra.mxu0 %v8141_v52 }
0x19e5   :  { %v2812_v13 = vadd.f32 %v2811_v1, %v2810_v58  ;;  %8143 = vmatprep.subr.bf16.mxu0 %v8637_v3 }
0x19e6   :  { %v2813_v16 = vsel %vm84_vm0, %v2800_v2, 0.0  ;;  %v2815_v35 = vsel %vm84_vm0, %v2801_v7, 0.0 }
0x19e7   :  { %v2814_v23 = vadd.f32 %v2813_v16, %v2812_v13  ;;  %v2979_v39 = vpop.permute.xlu1 %2978  ;;  %v2989_v48 = vpop.permute.xlu0 %2988 }
0x19e9   :  { %v2816_v25 = vadd.f32 %v2815_v35, %v2814_v23 }
0x19eb   :  { %7554 = vmatmul.mubr.msk.f32.vlgmr.msra.gmra.mrb[24].mxu1 %vm183_vm3, %v2816_v25 }
0x19ec   :  { %8136 = vmatpush3.bf16.msra.mxu1 %v8135_v24  ;;  %7571 = vmatprep.mubr.msk.f32.mxu1 %vm8638_vm1, %v8639_v9 }
0x19ed   :  { %8137 = vmatprep.subr.bf16.mxu1 %v8637_v3 }
0x19f0   :  { %8139 = vmatpush3.bf16.msra.mxu1 %v8138_v43 }
0x19f1   :  { %8146 = vmatprep.subr.bf16.mxu1 %v8637_v3 }
0x19f3   :  { %7572 = vmatmul.mubr.msk.f32.vlgmr.msra.gmra.mrb[26].mxu1 %vm183_vm3, %v2816_v25 }
0x19f4   :  { %7589 = vmatprep.mubr.msk.f32.mxu1 %vm8638_vm1, %v8639_v9  ;;  %8148 = vmatpush3.bf16.msra.mxu1 %v8147_v21 }
0x19f7   :  { %7590 = vmatmul.mubr.msk.f32.vlgmr.msra.gmra.mrb[28].mxu1 %vm10451_vm2, %v9344_v36 }
0x19fe   :  { %v2965_v28 = vpop.f32.mrb[26].mxu0 }
0x19ff   :  { %v7562_v30 = vpop.f32.mrb[27].mxu0 }
0x1abe   :  { %v2892_v31 = vpop.f32.mrb[24].mxu1 }
0x1abf   :  { %v2966_v20 = vadd.f32 %v2965_v28, %v2892_v31  ;;  %v7555_v37 = vpop.f32.mrb[25].mxu1 }
0x1ac1   :  { %v2976_v38 = vadd.f32 %v6900_v34, %v2966_v20 }
0x1ac3   :  { %v2981_v45 = vadd.f32 %v2979_v39, %v2976_v38  ;;  %v3268_v39 = vld [vmem:[#allocation10] sm:$0x3] }
0x1ac5   :  { %v6901_v40 = vmul.f32 -1.442695, %v2981_v45 }
0x1ac6   :  { %v3088_v41 = vpop.f32.mrb[26].mxu1 }
0x1ac7   :  { %8488 = vpow2.f32 %v6901_v40  ;;  %v7573_v44 = vpop.f32.mrb[27].mxu1 }
0x1aca   :  { %v3232_v1 = vpop.f32.mrb[28].mxu1 }
0x1acb   :  { %v7591_v2 = vpop.f32.mrb[29].mxu1 }
0x1ad1   :  { %v8489_v46 = vpop.eup %8488 }
0x1ad2   :  { %v2985_v47 = vadd.f32 1.0, %v8489_v46 }
0x1ad4   :  { %8490 = vrcp.f32 %v2985_v47 }
0x1ade   :  { %v8491_v14 = vpop.eup %8490 }
0x1adf   :  { %v2991_v49 = vmul.f32 %v8491_v14, %v2989_v48  ;;  %v2998_v57 = vsub.f32 1.0, %v8491_v14 }
0x1ae1   :  { %2993 = vrot.lane.b32.xlu1 %v2991_v49, %s8640_s25 }
0x1ae5   :  { %3004 = vrot.lane.b32.xlu1 %v9228_v10, %s8642_s26  ;;  %v3017_v10 = vld [vmem:[%s10440_s16 + $0x18] sm:$0xff] }
0x1ae6   :  { %v8144_v55 = vpack.c.bf16 %v3017_v10, %v3016_v19 }
0x1ae8   :  { %8145 = vmatpush3.bf16.msra.mxu0 %v8144_v55 }
0x1b53   :  { %v2994_v50 = vpop.permute.xlu1 %2993 }
0x1b54   :  { %v2996_v11 = vadd.f32 %v2994_v50, %v2976_v38 }
0x1b56   :  { %8492 = vtanh.f32 %v2996_v11 }
0x1b57   :  { %v3005_v56 = vpop.permute.xlu1 %3004 }
0x1b58   :  { %v3007_v42 = vmul.f32 %v8491_v14, %v3005_v56 }
0x1b60   :  { %v8493_v8 = vpop.eup %8492 }
0x1b61   :  { %3000 = vrot.lane.b32.xlu0 %v8493_v8, %s8641_s6 }
0x1bd3   :  { %v3001_v58 = vpop.permute.xlu0 %3000 }
0x1bd4   :  { %v3003_v59 = vmul.f32 %v3001_v58, %v2998_v57 }
0x1bd6   :  { %v3008_v62 = vadd.f32 %v3007_v42, %v3003_v59 }
0x1bd8   :  { %3010 = vrot.lane.b32.xlu0 %v3008_v62, %s8641_s6 }
0x1c4a   :  { %v3011_v0 = vpop.permute.xlu0 %3010 }
0x1c4b   :  { %3013 = vst.msk [vmem:[#allocation4] sm:$0x3] %vm84_vm0, %v3011_v0  ;;  %7583 = vmatmul.mubr.msk.f32.vlgmr.msra.gmra.mrb[28].mxu0 %vm183_vm3, %v3011_v0 }
0x1d1e   :  { %v3160_v7 = vpop.f32.mrb[28].mxu0 }
0x1d1f   :  { %v3161_v36 = vadd.f32 %v3160_v7, %v3088_v41  ;;  %v7584_v13 = vpop.f32.mrb[29].mxu0 }
0x1d21   :  { %v3236_v12 = vadd.f32 %v3232_v1, %v3161_v36 }
0x1d23   :  { %v3244_v16 = vadd.f32 %v6905_v15, %v3236_v12 }
0x1d25   :  { %3245 = vst [vmem:[%s10445_s21] sm:$0x3] %v3244_v16  ;;  %v3247_v23 = vsel %vm3246_vm6, %v3244_v16, -inf }
0x1d26   :  { %3248 = vmax.xlane.f32.xlu1 %v3247_v23 }
0x1db3   :  { %v3249_v35 = vpop.xlane.xlu1 %3248 }
0x1db4   :  { %vm3250_vm7 = vcmp.eq.f32.partialorder %v3244_v16, %v3249_v35 }
0x1db5   :  { %v3251_v24 = vsel %vm3250_vm7, %v9259_v18, 128  ;;  %vm3267_vm7 = vcmp.eq.s32.totalorder %v9259_v18, 0 }
0x1db6   :  { %v3252_v25 = vsel %vm3246_vm6, %v3251_v24, 2147483647 }
0x1db7   :  { %v3254_v26 = vshra.s32 %v3252_v25, 16  ;;  %v3253_v43 = vand.u32 65535, %v3252_v25 }
0x1db9   :  { %v3256_v27 = vcvt.s32.f32 %v3254_v26  ;;  %v3255_v30 = vcvt.s32.f32 %v3253_v43 }
0x1dbb   :  { %3257 = vmin.xlane.f32.xlu0 %v3256_v27 }
0x1e48   :  { %v3258_v28 = vpop.xlane.xlu0 %3257 }
0x1e49   :  { %vm3259_vm2 = vcmp.eq.f32.partialorder %v3256_v27, %v3258_v28  ;;  %v3264_v34 = vcvt.f32.s32 %v3258_v28 }
0x1e4a   :  { %v3260_v31 = vsel %vm3259_vm2, %v3255_v30, inf }
0x1e4b   :  { %3261 = vmin.xlane.f32.xlu0 %v3260_v31  ;;  %v3265_v37 = vshll.u32 %v3264_v34, 16 }
0x1ed8   :  { %v3262_v20 = vpop.xlane.xlu0 %3261  ;;  %3275 = sbr.rel (%p6906_p5) target bundleno = 7903 (0x1edf), region = 93 }
0x1ed9   :  { %v3263_v38 = vcvt.f32.s32 %v3262_v20 }
0x1edb   :  { %v3266_v45 = vadd.s32 %v3265_v37, %v3263_v38 }
0x1edd   :  { %v3269_v40 = vsel %vm3267_vm7, %v3266_v45, %v3268_v39 }
0x1ede   :  { %3270 = vst.msk [vmem:[#allocation10] sm:$0x3] %vm2499_vm15, %v3269_v40 }
0x1edf PF:  { %p6908_p6 = scmp.eq.s32.totalorder %s3271_s3, 1 }
0x1ee0   :  { %v3286_v41 = vld [vmem:[%s10444_s20] sm:$0xff] (!%p6908_p6)  ;;  %v3287_v44 = vld [vmem:[%s10444_s20 + $0x8] sm:$0xff] (!%p6908_p6)  ;;  %v3288_v46 = vld [vmem:[%s10444_s20 + $0x10] sm:$0xff] (!%p6908_p6)  ;;  %v8644_v47 = vmov (!%p6908_p6), 0.0|0.0   ;;  %vm8645_vm2 = vmmov (!%p6908_p6), 0   ;;  %v8646_v49 = vmov (!%p6908_p6), 0.0   ;;  %vm3283_vm7 = vcmp.eq.s32.totalorder (!%p6908_p6), %v9259_v18, %v3266_v45 }
0x1ee1   :  { %3282 = sbr.rel (%p6908_p6) target bundleno = 8151 (0x1fd7), region = 97  ;;  %8149 = vmatprep.subr.bf16.mxu0 (!%p6908_p6), %v8644_v47  ;;  %v8150_v14 = vpack.c.bf16 (!%p6908_p6), %v3287_v44, %v3286_v41  ;;  %v3289_v48 = vld [vmem:[%s10444_s20 + $0x18] sm:$0xff] (!%p6908_p6)  ;;  %7624 = vmatprep.mubr.msk.f32.mxu0 (!%p6908_p6), %vm8645_vm2, %v8646_v49  ;;  %v3290_v11 = vld [vmem:[%s10444_s20 + $0x20] sm:$0xff] (!%p6908_p6)  ;;  %v3291_v51 = vld [vmem:[%s10444_s20 + $0x28] sm:$0xff] (!%p6908_p6)  ;;  %v8647_v1 = vmov (!%p6908_p6), 1.0  }
0x1ee2   :  { %v8153_v50 = vpack.c.bf16 (!%p6908_p6), %v3289_v48, %v3288_v46  ;;  %v8156_v32 = vpack.c.bf16 (!%p6908_p6), %v3291_v51, %v3290_v11  ;;  %v3292_v19 = vld [vmem:[%s10444_s20 + $0x30] sm:$0xff] (!%p6908_p6)  ;;  %v3293_v52 = vld [vmem:[%s10444_s20 + $0x38] sm:$0xff] (!%p6908_p6)  ;;  %v3294_v53 = vld [vmem:[%s10444_s20 + $0x40] sm:$0xff] (!%p6908_p6) }
0x1ee3   :  { %8151 = vmatpush3.bf16.msra.mxu0 (!%p6908_p6), %v8150_v14  ;;  %v8159_v10 = vpack.c.bf16 (!%p6908_p6), %v3293_v52, %v3292_v19  ;;  %v3295_v54 = vld [vmem:[%s10444_s20 + $0x48] sm:$0xff] (!%p6908_p6)  ;;  %v3296_v55 = vld [vmem:[%s10444_s20 + $0x50] sm:$0xff] (!%p6908_p6)  ;;  %v3297_v8 = vld [vmem:[%s10444_s20 + $0x58] sm:$0xff] (!%p6908_p6) }
0x1ee4   :  { %8152 = vmatprep.subr.bf16.mxu0 (!%p6908_p6), %v8644_v47  ;;  %v8162_v21 = vpack.c.bf16 (!%p6908_p6), %v3295_v54, %v3294_v53  ;;  %v8165_v56 = vpack.c.bf16 (!%p6908_p6), %v3297_v8, %v3296_v55  ;;  %v3298_v57 = vld [vmem:[%s10444_s20 + $0x60] sm:$0xff] (!%p6908_p6)  ;;  %v3299_v58 = vld [vmem:[%s10444_s20 + $0x68] sm:$0xff] (!%p6908_p6)  ;;  %v3300_v59 = vld [vmem:[%s10444_s20 + $0x70] sm:$0xff] (!%p6908_p6) }
0x1ee5   :  { %v8168_v42 = vpack.c.bf16 (!%p6908_p6), %v3299_v58, %v3298_v57  ;;  %v3301_v62 = vld [vmem:[%s10444_s20 + $0x78] sm:$0xff] (!%p6908_p6) }
0x1ee6   :  { %v8171_v0 = vpack.c.bf16 (!%p6908_p6), %v3301_v62, %v3300_v59 }
0x1ee7   :  { %8154 = vmatpush3.bf16.msra.mxu0 (!%p6908_p6), %v8153_v50 }
0x1ee8   :  { %8155 = vmatprep.subr.bf16.mxu0 %v8644_v47 }
0x1eeb   :  { %8157 = vmatpush3.bf16.msra.mxu0 %v8156_v32 }
0x1eec   :  { %8158 = vmatprep.subr.bf16.mxu0 %v8644_v47 }
0x1eef   :  { %8160 = vmatpush3.bf16.msra.mxu0 %v8159_v10 }
0x1ef0   :  { %8161 = vmatprep.subr.bf16.mxu0 %v8644_v47 }
0x1ef3   :  { %8163 = vmatpush3.bf16.msra.mxu0 %v8162_v21 }
0x1ef4   :  { %8164 = vmatprep.subr.bf16.mxu0 %v8644_v47 }
0x1ef7   :  { %8166 = vmatpush3.bf16.msra.mxu0 %v8165_v56 }
0x1ef8   :  { %8167 = vmatprep.subr.bf16.mxu0 %v8644_v47 }
0x1efb   :  { %8169 = vmatpush3.bf16.msra.mxu0 %v8168_v42 }
0x1efc   :  { %8170 = vmatprep.subr.bf16.mxu0 %v8644_v47 }
0x1eff   :  { %8172 = vmatpush3.bf16.msra.mxu0 %v8171_v0 }
0x1f02   :  { %7625 = vmatmul.mubr.msk.f32.vlgmr.msra.gmra.mrb[0].mxu0 %vm3283_vm7, %v8647_v1 }
0x1fd5   :  { %v3368_v2 = vpop.f32.mrb[0].mxu0 }
0x1fd6   :  { %3372 = vst.msk [vmem:[#allocation6] sm:$0x3] %vm2497_vm5, %v3368_v2  ;;  %v7626_v7 = vpop.f32.mrb[1].mxu0 }
0x1fd7 PF:  { %8173 = vmatprep.subr.bf16.mxu0 %v8637_v3  ;;  %v3375_v36 = vld [vmem:[%s10434_s10] sm:$0xff]  ;;  %v3376_v13 = vld [vmem:[%s10434_s10 + $0x8] sm:$0xff]  ;;  %v3377_v15 = vld [vmem:[%s10434_s10 + $0x10] sm:$0xff]  ;;  %7635 = vmatprep.mubr.msk.f32.mxu0 %vm8638_vm1, %v8639_v9  ;;  %s10468_s1 = sld [smem:[#allocation17_spill]]  ;;  %vm10469_vm7 = vcmask 130048   ;;  %s6923_s27 = sld [smem:[#allocation7 + $0x1]] }
0x1fd8   :  { %v8174_v12 = vpack.c.bf16 %v3376_v13, %v3375_v36  ;;  %v3378_v16 = vld [vmem:[%s10434_s10 + $0x18] sm:$0xff]  ;;  %8179 = vmatprep.subr.bf16.mxu1 %v8637_v3  ;;  %7646 = vmatprep.mubr.msk.f32.mxu1 %vm8638_vm1, %v8639_v9  ;;  %v9499_v35 = vld [vmem:[#allocation4] sm:$0x3]  ;;  %v3461_v25 = vld [vmem:[#allocation3 + $0x4] sm:$0x3] }
0x1fd9   :  { %v8177_v23 = vpack.c.bf16 %v3378_v16, %v3377_v15  ;;  %v6911_v24 = vld [vmem:[%s10435_s11] ss:$0 sm:$0xff]  ;;  %v3459_v27 = vld [vmem:[#allocation3] sm:$0x3]  ;;  %v3462_v43 = vld [vmem:[#allocation3 + $0x6] sm:$0x3] }
0x1fda   :  { %8175 = vmatpush3.bf16.msra.mxu0 %v8174_v12  ;;  %v3460_v31 = vld [vmem:[#allocation3 + $0x2] sm:$0x3]  ;;  %v3464_v34 = vld [vmem:[#allocation3 + $0xa] sm:$0x3]  ;;  %v3463_v39 = vld [vmem:[#allocation3 + $0x8] sm:$0x3] }
0x1fdb   :  { %8176 = vmatprep.subr.bf16.mxu0 %v8637_v3  ;;  %v3466_v41 = vld [vmem:[#allocation3 + $0xe] sm:$0x3]  ;;  %v3465_v44 = vld [vmem:[#allocation3 + $0xc] sm:$0x3]  ;;  %v6913_v14 = vld [vmem:[%s10436_s12] ss:$0 sm:$0xff] }
0x1fdd   :  { %p6924_p7 = scmp.ne.s32.totalorder %s6923_s27, 1 }
0x1fde   :  { %8178 = vmatpush3.bf16.msra.mxu0 %v8177_v23  ;;  %s10471_s5 = sld [smem:[#allocation16_spill]] (!%p6924_p7) }
0x1fdf   :  { %8185 = vmatprep.subr.bf16.mxu0 %v8637_v3 }
0x1fe1   :  { %7636 = vmatmul.mubr.msk.f32.vlgmr.msra.gmra.mrb[0].mxu0 %vm183_vm3, %v9499_v35 }
0x1fe2   :  { %7653 = vmatprep.mubr.msk.f32.mxu0 %vm8638_vm1, %v8639_v9 }
0x20b4   :  { %v3455_v26 = vpop.f32.mrb[0].mxu0 }
0x20b5   :  { %v9509_v28 = vadd.f32 %v6911_v24, %v3455_v26  ;;  %v7637_v30 = vpop.f32.mrb[1].mxu0 }
0x20b7   :  { %v3469_v20 = vadd.f32 %v3461_v25, %v9509_v28  ;;  %v3467_v37 = vadd.f32 %v3459_v27, %v9509_v28  ;;  %v3470_v38 = vadd.f32 %v3462_v43, %v9509_v28  ;;  %v3468_v45 = vadd.f32 %v3460_v31, %v9509_v28 }
0x20b8   :  { %v3472_v40 = vadd.f32 %v3464_v34, %v9509_v28  ;;  %v3471_v63 = vadd.f32 %v3463_v39, %v9509_v28  ;;  %v3474_v46 = vadd.f32 %v3466_v41, %v9509_v28  ;;  %v3473_v47 = vadd.f32 %v3465_v44, %v9509_v28  ;;  %v3522_v39 = vld [vmem:[%s10468_s1] sm:$0xff] }
0x20b9   :  { %8494 = vtanh.f32 %v3469_v20  ;;  %vm3523_vm2 = vcmp.gt.f32.partialorder %v3522_v39, 0.0 }
0x20ba   :  { %8496 = vtanh.f32 %v3467_v37 }
0x20bb   :  { %8498 = vtanh.f32 %v3470_v38 }
0x20bc   :  { %8500 = vtanh.f32 %v3468_v45 }
0x20bd   :  { %8502 = vtanh.f32 %v3472_v40 }
0x20be   :  { %8504 = vtanh.f32 %v3471_v63 }
0x20bf   :  { %8506 = vtanh.f32 %v3474_v46 }
0x20c0   :  { %8508 = vtanh.f32 %v3473_v47 }
0x20c3   :  { %v8495_v48 = vpop.eup %8494 }
0x20c4   :  { %v8497_v49 = vpop.eup %8496  ;;  %v3492_v50 = vmul.f32 %v8495_v48, %v6913_v14 }
0x20c5   :  { %v8499_v11 = vpop.eup %8498  ;;  %v3490_v51 = vmul.f32 %v8497_v49, %v6913_v14 }
0x20c6   :  { %v8501_v32 = vpop.eup %8500  ;;  %v3504_v19 = vsel %vm84_vm0, %v3492_v50, 0.0  ;;  %v3493_v52 = vmul.f32 %v8499_v11, %v6913_v14 }
0x20c7   :  { %v8503_v10 = vpop.eup %8502  ;;  %3505 = vadd.xlane.f32.xlu1 %v3504_v19  ;;  %v3498_v53 = vsel %vm84_vm0, %v3490_v51, 0.0  ;;  %v3491_v54 = vmul.f32 %v8501_v32, %v6913_v14 }
0x20c8   :  { %v8505_v21 = vpop.eup %8504  ;;  %3499 = vadd.xlane.f32.xlu0 %v3498_v53  ;;  %v3507_v55 = vsel %vm84_vm0, %v3493_v52, 0.0  ;;  %v3495_v8 = vmul.f32 %v8503_v10, %v6913_v14 }
0x20c9   :  { %v8507_v56 = vpop.eup %8506  ;;  %v3501_v57 = vsel %vm84_vm0, %v3491_v54, 0.0  ;;  %v3494_v58 = vmul.f32 %v8505_v21, %v6913_v14 }
0x20ca   :  { %v8509_v42 = vpop.eup %8508  ;;  %v3513_v59 = vsel %vm84_vm0, %v3495_v8, 0.0  ;;  %v3497_v62 = vmul.f32 %v8507_v56, %v6913_v14 }
0x20cb   :  { %3508 = vadd.xlane.f32.xlu1 %v3507_v55  ;;  %v3510_v0 = vsel %vm84_vm0, %v3494_v58, 0.0  ;;  %v3496_v1 = vmul.f32 %v8509_v42, %v6913_v14 }
0x20cc   :  { %3502 = vadd.xlane.f32.xlu0 %v3501_v57  ;;  %v3519_v2 = vsel %vm84_vm0, %v3497_v62, 0.0 }
0x20cd   :  { %v3516_v7 = vsel %vm84_vm0, %v3496_v1, 0.0 }
0x20cf   :  { %3514 = vadd.xlane.f32.xlu1 %v3513_v59 }
0x20d0   :  { %3511 = vadd.xlane.f32.xlu0 %v3510_v0 }
0x20d3   :  { %3520 = vadd.xlane.f32.xlu1 %v3519_v2  ;;  %v3681_v2 = vld [vmem:[%s10438_s14] sm:$0xff] }
0x20d4   :  { %3517 = vadd.xlane.f32.xlu0 %v3516_v7  ;;  %v3682_v7 = vld [vmem:[%s10438_s14 + $0x8] sm:$0xff] }
0x2154   :  { %v3506_v36 = vpop.xlane.xlu1 %3505 }
0x2155   :  { %v3500_v13 = vpop.xlane.xlu0 %3499  ;;  %v3543_v24 = vrot.slane %v3506_v36, %v9265_v22  ;;  %v8180_v36 = vpack.c.bf16 %v3682_v7, %v3681_v2 }
0x2156   :  { %v3535_v16 = vrot.slane %v3500_v13, %v9265_v22 }
0x2157   :  { %8181 = vmatpush3.bf16.msra.mxu1 %v8180_v36 }
0x2158   :  { %v3509_v15 = vpop.xlane.xlu1 %3508  ;;  %8182 = vmatprep.subr.bf16.mxu1 %v8637_v3 }
0x2159   :  { %v3503_v12 = vpop.xlane.xlu0 %3502  ;;  %v3547_v25 = vrot.slane %v3509_v15, %v9265_v22 }
0x215a   :  { %v3539_v23 = vrot.slane %v3503_v12, %v9265_v22  ;;  %v3683_v12 = vld [vmem:[%s10438_s14 + $0x10] sm:$0xff] }
0x215c   :  { %v3564_v26 = vsel %vm2694_vm8, %v3539_v23, %v3535_v16  ;;  %v3515_v27 = vpop.xlane.xlu1 %3514  ;;  %v3684_v16 = vld [vmem:[%s10438_s14 + $0x18] sm:$0xff]  ;;  %v3679_v23 = vld [vmem:[%s10437_s13] sm:$0xff] }
0x215d   :  { %v3565_v43 = vsel %vm2696_vm9, %v3543_v24, %v3564_v26  ;;  %v3512_v30 = vpop.xlane.xlu0 %3511  ;;  %v3555_v20 = vrot.slane %v3515_v27, %v9265_v22  ;;  %v8183_v24 = vpack.c.bf16 %v3684_v16, %v3683_v12  ;;  %v3882_v12 = vld [vmem:[%s10441_s17 + $0x10] sm:$0xff]  ;;  %v3883_v16 = vld [vmem:[%s10441_s17 + $0x18] sm:$0xff] }
0x215e   :  { %v3566_v31 = vsel %vm2698_vm10, %v3547_v25, %v3565_v43  ;;  %v3551_v34 = vrot.slane %v3512_v30, %v9265_v22  ;;  %v3680_v25 = vld [vmem:[%s10437_s13 + $0x8] sm:$0xff]  ;;  %v9576_v43 = vld [vmem:[#allocation6] sm:$0x3] }
0x215f   :  { %v8186_v26 = vpack.c.bf16 %v3680_v25, %v3679_v23  ;;  %8184 = vmatpush3.bf16.msra.mxu1 %v8183_v24  ;;  %v8192_v23 = vpack.c.bf16 %v3883_v16, %v3882_v12 }
0x2160   :  { %v3567_v37 = vsel %vm2700_vm11, %v3551_v34, %v3566_v31  ;;  %v3521_v38 = vpop.xlane.xlu1 %3520  ;;  %8188 = vmatprep.subr.bf16.mxu1 %v8637_v3  ;;  %v3649_v31 = vld [vmem:[#allocation2 + $0x2] sm:$0x3]  ;;  %v3648_v34 = vld [vmem:[#allocation2] sm:$0x3] }
0x2161   :  { %v3563_v45 = vrot.slane %v3521_v38, %v9265_v22  ;;  %v3518_v40 = vpop.xlane.xlu0 %3517  ;;  %v3568_v41 = vsel %vm2702_vm12, %v3555_v20, %v3567_v37  ;;  %8187 = vmatpush3.bf16.msra.mxu0 %v8186_v26 }
0x2162   :  { %v3559_v63 = vrot.slane %v3518_v40, %v9265_v22  ;;  %8194 = vmatprep.subr.bf16.mxu0 %v8637_v3 }
0x2164   :  { %v3569_v44 = vsel %vm2704_vm13, %v3559_v63, %v3568_v41  ;;  %7654 = vmatmul.mubr.msk.f32.vlgmr.msra.gmra.mrb[2].mxu0 %vm10469_vm7, %v9576_v43 }
0x2165   :  { %v3570_v46 = vsel %vm2706_vm14, %v3563_v45, %v3569_v44  ;;  %7675 = vmatprep.mubr.msk.f32.mxu0 %vm8638_vm1, %v8639_v9  ;;  %v3650_v45 = vld [vmem:[#allocation2 + $0x4] sm:$0x3] }
0x2166   :  { %v3572_v47 = vsel %vm3523_vm2, %v3570_v46, -1e+09  ;;  %vm10470_vm2 = vmmov %vm10469_vm7 }
0x2167   :  { %v3573_v14 = vsel %vm10452_vm4, %v3572_v47, -inf }
0x2168   :  { %v3574_v48 = vrot.slane %v3573_v14, 4 }
0x216a   :  { %v3575_v49 = vmax.f32 %v3573_v14, %v3574_v48  ;;  %v3651_v14 = vld [vmem:[#allocation2 + $0x6] sm:$0x3] }
0x216c   :  { %v3576_v50 = vrot.slane %v3575_v49, 2 }
0x216e   :  { %v3577_v11 = vmax.f32 %v3575_v49, %v3576_v50 }
0x2170   :  { %v3578_v51 = vrot.slane %v3577_v11, 1 }
0x2172   :  { %v3579_v32 = vmax.f32 %v3577_v11, %v3578_v51 }
0x2174   :  { %v3580_v19 = vsub.f32 %v3572_v47, %v3579_v32  ;;  %v3652_v47 = vld [vmem:[#allocation2 + $0x8] sm:$0x3]  ;;  %v3654_v32 = vld [vmem:[#allocation2 + $0xc] sm:$0x3] }
0x2176   :  { %v3581_v52 = vmul.f32 1.442695, %v3580_v19 }
0x2178   :  { %8510 = vpow2.f32 %v3581_v52  ;;  %v3653_v52 = vld [vmem:[#allocation2 + $0xa] sm:$0x3] }
0x2182   :  { %v8511_v10 = vpop.eup %8510 }
0x2183   :  { %v3583_v53 = vsel %vm10452_vm4, %v8511_v10, 0.0  ;;  %vm4129_vm4 = vcmp.eq.s32.totalorder %v9259_v18, 1 }
0x2184   :  { %v3584_v54 = vrot.slane %v3583_v53, 4 }
0x2186   :  { %v3585_v21 = vadd.f32 %v3584_v54, %v3583_v53 }
0x2188   :  { %v3586_v55 = vrot.slane %v3585_v21, 2 }
0x218a   :  { %v3587_v8 = vadd.f32 %v3586_v55, %v3585_v21 }
0x218c   :  { %v3588_v56 = vrot.slane %v3587_v8, 1 }
0x218e   :  { %v3589_v57 = vadd.f32 %v3588_v56, %v3587_v8 }
0x2190   :  { %8512 = vrcp.f32 %v3589_v57  ;;  %v3655_v57 = vld [vmem:[#allocation2 + $0xe] sm:$0x3] }
0x219a   :  { %v8513_v58 = vpop.eup %8512 }
0x219b   :  { %v3591_v42 = vmul.f32 %v8513_v58, %v8511_v10 }
0x219d   :  { %v3602_v59 = vrot.slane %v3591_v42, %v9288_v60  ;;  %v3595_v62 = vrot.slane %v3591_v42, %v9291_v61  ;;  %v3609_v0 = vrot.slane %v3591_v42, %v9296_v5  ;;  %v3623_v1 = vrot.slane %v3591_v42, %v9310_v17 }
0x219e   :  { %v3616_v13 = vrot.slane %v3591_v42, %v9299_v6  ;;  %v3637_v15 = vrot.slane %v3591_v42, %v9329_v4  ;;  %v3630_v27 = vrot.slane %v3591_v42, %v9313_v33  ;;  %v3644_v30 = vrot.slane %v3591_v42, %v9338_v29 }
0x219f   :  { %3604 = vbcast.lane.b32.xlu1 %v3602_v59, 256  ;;  %3597 = vbcast.lane.b32.xlu0 %v3595_v62, 256  ;;  %v3880_v62 = vld [vmem:[%s10441_s17] sm:$0xff] }
0x21a3   :  { %3611 = vbcast.lane.b32.xlu1 %v3609_v0, 256  ;;  %3625 = vbcast.lane.b32.xlu0 %v3623_v1, 256  ;;  %v3881_v0 = vld [vmem:[%s10441_s17 + $0x8] sm:$0xff] }
0x21a7   :  { %3618 = vbcast.lane.b32.xlu1 %v3616_v13, 256  ;;  %3639 = vbcast.lane.b32.xlu0 %v3637_v15, 256  ;;  %v8189_v13 = vpack.c.bf16 %v3881_v0, %v3880_v62  ;;  %v6921_v62 = vld [vmem:[%s10443_s19] ss:$0 sm:$0xff] }
0x21ab   :  { %3632 = vbcast.lane.b32.xlu1 %v3630_v27, 256  ;;  %3840 = vrot.lane.b32.xlu0 %v9509_v28, %s8641_s6  ;;  %v6916_v27 = vld [vmem:[%s10439_s15] ss:$0 sm:$0xff] }
0x21af   :  { %3646 = vbcast.lane.b32.xlu1 %v3644_v30, 256 }
0x21b3   :  { %3850 = vrot.lane.b32.xlu1 %v9509_v28, %s8642_s26 }
0x2211   :  { %v3605_v20 = vpop.permute.xlu1 %3604  ;;  %v3598_v37 = vpop.permute.xlu0 %3597 }
0x2212   :  { %v3657_v38 = vmul.f32 %v3649_v31, %v3605_v20  ;;  %v3656_v39 = vmul.f32 %v3648_v34, %v3598_v37 }
0x2214   :  { %v3665_v41 = vsel %vm84_vm0, %v3657_v38, 0.0  ;;  %v3664_v44 = vsel %vm84_vm0, %v3656_v39, 0.0 }
0x2215   :  { %v3612_v40 = vpop.permute.xlu1 %3611  ;;  %v3626_v63 = vpop.permute.xlu0 %3625  ;;  %v3666_v49 = vadd.f32 %v3665_v41, %v3664_v44 }
0x2216   :  { %v3658_v46 = vmul.f32 %v3650_v45, %v3612_v40  ;;  %v3660_v50 = vmul.f32 %v3652_v47, %v3626_v63 }
0x2218   :  { %v3667_v48 = vsel %vm84_vm0, %v3658_v46, 0.0  ;;  %v3671_v21 = vsel %vm84_vm0, %v3660_v50, 0.0 }
0x2219   :  { %v3619_v28 = vpop.permute.xlu1 %3618  ;;  %v3668_v51 = vadd.f32 %v3667_v48, %v3666_v49  ;;  %v3640_v19 = vpop.permute.xlu0 %3639  ;;  %v3876_v48 = vld [vmem:[%s10440_s16] sm:$0xff]  ;;  %v3877_v49 = vld [vmem:[%s10440_s16 + $0x8] sm:$0xff] }
0x221a   :  { %v3659_v11 = vmul.f32 %v3651_v14, %v3619_v28  ;;  %v3662_v55 = vmul.f32 %v3654_v32, %v3640_v19  ;;  %v3878_v28 = vld [vmem:[%s10440_s16 + $0x10] sm:$0xff]  ;;  %v8195_v50 = vpack.c.bf16 %v3877_v49, %v3876_v48 }
0x221c   :  { %v3669_v10 = vsel %vm84_vm0, %v3659_v11, 0.0  ;;  %v3675_v1 = vsel %vm84_vm0, %v3662_v55, 0.0  ;;  %v4026_v11 = vld [vmem:[%s10442_s18] sm:$0xff]  ;;  %8196 = vmatpush3.bf16.msra.mxu0 %v8195_v50 }
0x221d   :  { %v3670_v53 = vadd.f32 %v3669_v10, %v3668_v51  ;;  %v3633_v54 = vpop.permute.xlu1 %3632  ;;  %v3841_v20 = vpop.permute.xlu0 %3840  ;;  %v4027_v51 = vld [vmem:[%s10442_s18 + $0x8] sm:$0xff]  ;;  %8197 = vmatprep.subr.bf16.mxu0 %v8637_v3 }
0x221e   :  { %v3661_v8 = vmul.f32 %v3653_v52, %v3633_v54  ;;  %v8201_v32 = vpack.c.bf16 %v4027_v51, %v4026_v11 }
0x221f   :  { %v3672_v56 = vadd.f32 %v3671_v21, %v3670_v53 }
0x2220   :  { %v3673_v58 = vsel %vm84_vm0, %v3661_v8, 0.0 }
0x2221   :  { %v3674_v42 = vadd.f32 %v3673_v58, %v3672_v56  ;;  %v3647_v59 = vpop.permute.xlu1 %3646 }
0x2222   :  { %v3663_v2 = vmul.f32 %v3655_v57, %v3647_v59 }
0x2223   :  { %v3676_v7 = vadd.f32 %v3675_v1, %v3674_v42 }
0x2224   :  { %v3677_v36 = vsel %vm84_vm0, %v3663_v2, 0.0 }
0x2225   :  { %v3678_v15 = vadd.f32 %v3677_v36, %v3676_v7  ;;  %v3851_v44 = vpop.permute.xlu1 %3850 }
0x2227   :  { %7647 = vmatmul.mubr.msk.f32.vlgmr.msra.gmra.mrb[0].mxu1 %vm183_vm3, %v3678_v15 }
0x2228   :  { %8190 = vmatpush3.bf16.msra.mxu1 %v8189_v13  ;;  %7664 = vmatprep.mubr.msk.f32.mxu1 %vm8638_vm1, %v8639_v9 }
0x2229   :  { %8191 = vmatprep.subr.bf16.mxu1 %v8637_v3 }
0x222c   :  { %8193 = vmatpush3.bf16.msra.mxu1 %v8192_v23 }
0x222d   :  { %8200 = vmatprep.subr.bf16.mxu1 %v8637_v3 }
0x222f   :  { %7665 = vmatmul.mubr.msk.f32.vlgmr.msra.gmra.mrb[2].mxu1 %vm183_vm3, %v3678_v15 }
0x2230   :  { %7682 = vmatprep.mubr.msk.f32.mxu1 %vm8638_vm1, %v8639_v9  ;;  %8202 = vmatpush3.bf16.msra.mxu1 %v8201_v32 }
0x2233   :  { %7683 = vmatmul.mubr.msk.f32.vlgmr.msra.gmra.mrb[4].mxu1 %vm10470_vm2, %v9576_v43 }
0x2237   :  { %v3827_v24 = vpop.f32.mrb[2].mxu0 }
0x2238   :  { %v7655_v25 = vpop.f32.mrb[3].mxu0 }
0x22fa   :  { %v3754_v26 = vpop.f32.mrb[0].mxu1 }
0x22fb   :  { %v3828_v30 = vadd.f32 %v3827_v24, %v3754_v26  ;;  %v7648_v31 = vpop.f32.mrb[1].mxu1 }
0x22fd   :  { %v3838_v34 = vadd.f32 %v6916_v27, %v3828_v30 }
0x22ff   :  { %v3843_v37 = vadd.f32 %v3841_v20, %v3838_v34 }
0x2301   :  { %v6917_v38 = vmul.f32 -1.442695, %v3843_v37 }
0x2302   :  { %v3950_v39 = vpop.f32.mrb[2].mxu1 }
0x2303   :  { %8514 = vpow2.f32 %v6917_v38  ;;  %v7666_v45 = vpop.f32.mrb[3].mxu1  ;;  %v6925_v38 = vld [vmem:[%s10471_s5 + $0x4] sm:$0x3] (!%p6924_p7) }
0x2304   :  { %4140 = vst.msk [vmem:[#allocation6] sm:$0x3] (!%p6924_p7), %vm2497_vm5, %v6925_v38 }
0x2306   :  { %v4094_v57 = vpop.f32.mrb[4].mxu1 }
0x2307   :  { %v7684_v58 = vpop.f32.mrb[5].mxu1 }
0x230d   :  { %v8515_v40 = vpop.eup %8514 }
0x230e   :  { %v3847_v63 = vadd.f32 1.0, %v8515_v40 }
0x2310   :  { %8516 = vrcp.f32 %v3847_v63 }
0x231a   :  { %v8517_v41 = vpop.eup %8516 }
0x231b   :  { %v3853_v46 = vmul.f32 %v8517_v41, %v3851_v44  ;;  %v3860_v53 = vsub.f32 1.0, %v8517_v41 }
0x231d   :  { %3855 = vrot.lane.b32.xlu0 %v3853_v46, %s8640_s25 }
0x2321   :  { %3866 = vrot.lane.b32.xlu0 %v9499_v35, %s8642_s26  ;;  %v3879_v35 = vld [vmem:[%s10440_s16 + $0x18] sm:$0xff] }
0x2322   :  { %v8198_v19 = vpack.c.bf16 %v3879_v35, %v3878_v28 }
0x2324   :  { %8199 = vmatpush3.bf16.msra.mxu0 %v8198_v19 }
0x238f   :  { %v3856_v47 = vpop.permute.xlu0 %3855 }
0x2390   :  { %v3858_v14 = vadd.f32 %v3856_v47, %v3838_v34  ;;  %v4130_v34 = vld [vmem:[#allocation10] sm:$0x3] }
0x2392   :  { %8518 = vtanh.f32 %v3858_v14 }
0x2393   :  { %v3867_v10 = vpop.permute.xlu0 %3866 }
0x2394   :  { %v3869_v21 = vmul.f32 %v8517_v41, %v3867_v10 }
0x239c   :  { %v8519_v52 = vpop.eup %8518 }
0x239d   :  { %3862 = vrot.lane.b32.xlu1 %v8519_v52, %s8641_s6 }
0x240f   :  { %v3863_v54 = vpop.permute.xlu1 %3862 }
0x2410   :  { %v3865_v55 = vmul.f32 %v3863_v54, %v3860_v53 }
0x2412   :  { %v3870_v8 = vadd.f32 %v3869_v21, %v3865_v55 }
0x2414   :  { %3872 = vrot.lane.b32.xlu1 %v3870_v8, %s8641_s6 }
0x2486   :  { %v3873_v56 = vpop.permute.xlu1 %3872 }
0x2487   :  { %3875 = vst.msk [vmem:[#allocation4] sm:$0x3] %vm84_vm0, %v3873_v56  ;;  %7676 = vmatmul.mubr.msk.f32.vlgmr.msra.gmra.mrb[4].mxu0 %vm183_vm3, %v3873_v56 }
0x255a   :  { %v4022_v42 = vpop.f32.mrb[4].mxu0 }
0x255b   :  { %v4023_v43 = vadd.f32 %v4022_v42, %v3950_v39  ;;  %v7677_v59 = vpop.f32.mrb[5].mxu0 }
0x255d   :  { %v4098_v0 = vadd.f32 %v4094_v57, %v4023_v43 }
0x255f   :  { %v4106_v1 = vadd.f32 %v6921_v62, %v4098_v0 }
0x2561   :  { %6922 = vst [vmem:[%s10445_s21 + $0x2] sm:$0x3] %v4106_v1  ;;  %v4109_v2 = vsel %vm3246_vm6, %v4106_v1, -inf }
0x2562   :  { %4110 = vmax.xlane.f32.xlu0 %v4109_v2 }
0x25ef   :  { %v4111_v7 = vpop.xlane.xlu0 %4110 }
0x25f0   :  { %vm4112_vm7 = vcmp.eq.f32.partialorder %v4106_v1, %v4111_v7 }
0x25f1   :  { %v4113_v36 = vsel %vm4112_vm7, %v9259_v18, 128 }
0x25f2   :  { %v4114_v13 = vsel %vm3246_vm6, %v4113_v36, 2147483647 }
0x25f3   :  { %v4116_v15 = vshra.s32 %v4114_v13, 16  ;;  %v4115_v16 = vand.u32 65535, %v4114_v13 }
0x25f5   :  { %v4118_v12 = vcvt.s32.f32 %v4116_v15  ;;  %v4117_v24 = vcvt.s32.f32 %v4115_v16 }
0x25f7   :  { %4119 = vmin.xlane.f32.xlu1 %v4118_v12 }
0x2684   :  { %v4120_v23 = vpop.xlane.xlu1 %4119 }
0x2685   :  { %vm4121_vm2 = vcmp.eq.f32.partialorder %v4118_v12, %v4120_v23  ;;  %v4126_v26 = vcvt.f32.s32 %v4120_v23 }
0x2686   :  { %v4122_v25 = vsel %vm4121_vm2, %v4117_v24, inf }
0x2687   :  { %4123 = vmin.xlane.f32.xlu0 %v4122_v25  ;;  %v4127_v30 = vshll.u32 %v4126_v26, 16 }
0x2714   :  { %v4124_v27 = vpop.xlane.xlu0 %4123  ;;  %4137 = sbr.rel (%p6924_p7) target bundleno = 10011 (0x271b), region = 101 }
0x2715   :  { %v4125_v31 = vcvt.f32.s32 %v4124_v27 }
0x2717   :  { %v4128_v20 = vadd.s32 %v4127_v30, %v4125_v31 }
0x2719   :  { %v4131_v37 = vsel %vm4129_vm4, %v4128_v20, %v4130_v34 }
0x271a   :  { %4132 = vst.msk [vmem:[#allocation10] sm:$0x3] %vm2499_vm15, %v4131_v37 }
0x271b PF:  { %p6926_p8 = scmp.eq.s32.totalorder %s6923_s27, 1 }
0x271c   :  { %v4148_v39 = vld [vmem:[%s10444_s20] sm:$0xff] (!%p6926_p8)  ;;  %v4149_v45 = vld [vmem:[%s10444_s20 + $0x8] sm:$0xff] (!%p6926_p8)  ;;  %v4150_v40 = vld [vmem:[%s10444_s20 + $0x10] sm:$0xff] (!%p6926_p8)  ;;  %v8648_v63 = vmov (!%p6926_p8), 0.0|0.0   ;;  %vm8649_vm4 = vmmov (!%p6926_p8), 0   ;;  %v8650_v46 = vmov (!%p6926_p8), 0.0   ;;  %vm4145_vm7 = vcmp.eq.s32.totalorder (!%p6926_p8), %v9259_v18, %v4128_v20 }
0x271d   :  { %4144 = sbr.rel (%p6926_p8) target bundleno = 10259 (0x2813), region = 105  ;;  %8203 = vmatprep.subr.bf16.mxu0 (!%p6926_p8), %v8648_v63  ;;  %v8204_v41 = vpack.c.bf16 (!%p6926_p8), %v4149_v45, %v4148_v39  ;;  %v4151_v44 = vld [vmem:[%s10444_s20 + $0x18] sm:$0xff] (!%p6926_p8)  ;;  %7717 = vmatprep.mubr.msk.f32.mxu0 (!%p6926_p8), %vm8649_vm4, %v8650_v46  ;;  %v4152_v14 = vld [vmem:[%s10444_s20 + $0x20] sm:$0xff] (!%p6926_p8)  ;;  %v4153_v48 = vld [vmem:[%s10444_s20 + $0x28] sm:$0xff] (!%p6926_p8)  ;;  %v8651_v57 = vmov (!%p6926_p8), 1.0  }
0x271e   :  { %v8207_v47 = vpack.c.bf16 (!%p6926_p8), %v4151_v44, %v4150_v40  ;;  %v8210_v49 = vpack.c.bf16 (!%p6926_p8), %v4153_v48, %v4152_v14  ;;  %v4154_v28 = vld [vmem:[%s10444_s20 + $0x30] sm:$0xff] (!%p6926_p8)  ;;  %v4155_v50 = vld [vmem:[%s10444_s20 + $0x38] sm:$0xff] (!%p6926_p8)  ;;  %v4156_v11 = vld [vmem:[%s10444_s20 + $0x40] sm:$0xff] (!%p6926_p8) }
0x271f   :  { %8205 = vmatpush3.bf16.msra.mxu0 (!%p6926_p8), %v8204_v41  ;;  %v8213_v35 = vpack.c.bf16 (!%p6926_p8), %v4155_v50, %v4154_v28  ;;  %v4157_v51 = vld [vmem:[%s10444_s20 + $0x48] sm:$0xff] (!%p6926_p8)  ;;  %v4158_v19 = vld [vmem:[%s10444_s20 + $0x50] sm:$0xff] (!%p6926_p8)  ;;  %v4159_v52 = vld [vmem:[%s10444_s20 + $0x58] sm:$0xff] (!%p6926_p8) }
0x2720   :  { %8206 = vmatprep.subr.bf16.mxu0 (!%p6926_p8), %v8648_v63  ;;  %v8216_v32 = vpack.c.bf16 (!%p6926_p8), %v4157_v51, %v4156_v11  ;;  %v8219_v10 = vpack.c.bf16 (!%p6926_p8), %v4159_v52, %v4158_v19  ;;  %v4160_v53 = vld [vmem:[%s10444_s20 + $0x60] sm:$0xff] (!%p6926_p8)  ;;  %v4161_v54 = vld [vmem:[%s10444_s20 + $0x68] sm:$0xff] (!%p6926_p8)  ;;  %v4162_v55 = vld [vmem:[%s10444_s20 + $0x70] sm:$0xff] (!%p6926_p8) }
0x2721   :  { %v8222_v21 = vpack.c.bf16 (!%p6926_p8), %v4161_v54, %v4160_v53  ;;  %v4163_v8 = vld [vmem:[%s10444_s20 + $0x78] sm:$0xff] (!%p6926_p8) }
0x2722   :  { %v8225_v56 = vpack.c.bf16 (!%p6926_p8), %v4163_v8, %v4162_v55 }
0x2723   :  { %8208 = vmatpush3.bf16.msra.mxu0 (!%p6926_p8), %v8207_v47 }
0x2724   :  { %8209 = vmatprep.subr.bf16.mxu0 %v8648_v63 }
0x2727   :  { %8211 = vmatpush3.bf16.msra.mxu0 %v8210_v49 }
0x2728   :  { %8212 = vmatprep.subr.bf16.mxu0 %v8648_v63 }
0x272b   :  { %8214 = vmatpush3.bf16.msra.mxu0 %v8213_v35 }
0x272c   :  { %8215 = vmatprep.subr.bf16.mxu0 %v8648_v63 }
0x272f   :  { %8217 = vmatpush3.bf16.msra.mxu0 %v8216_v32 }
0x2730   :  { %8218 = vmatprep.subr.bf16.mxu0 %v8648_v63 }
0x2733   :  { %8220 = vmatpush3.bf16.msra.mxu0 %v8219_v10 }
0x2734   :  { %8221 = vmatprep.subr.bf16.mxu0 %v8648_v63 }
0x2737   :  { %8223 = vmatpush3.bf16.msra.mxu0 %v8222_v21 }
0x2738   :  { %8224 = vmatprep.subr.bf16.mxu0 %v8648_v63 }
0x273b   :  { %8226 = vmatpush3.bf16.msra.mxu0 %v8225_v56 }
0x273e   :  { %7718 = vmatmul.mubr.msk.f32.vlgmr.msra.gmra.mrb[0].mxu0 %vm4145_vm7, %v8651_v57 }
0x2811   :  { %v4230_v58 = vpop.f32.mrb[0].mxu0 }
0x2812   :  { %4234 = vst.msk [vmem:[#allocation6] sm:$0x3] %vm2497_vm5, %v4230_v58  ;;  %v7719_v42 = vpop.f32.mrb[1].mxu0 }
0x2813 PF:  { %8227 = vmatprep.subr.bf16.mxu0 %v8637_v3  ;;  %v4237_v43 = vld [vmem:[%s10434_s10] sm:$0xff]  ;;  %v4238_v59 = vld [vmem:[%s10434_s10 + $0x8] sm:$0xff]  ;;  %v4239_v62 = vld [vmem:[%s10434_s10 + $0x10] sm:$0xff]  ;;  %7728 = vmatprep.mubr.msk.f32.mxu0 %vm8638_vm1, %v8639_v9  ;;  %s10472_s9 = sld [smem:[#allocation17_spill]]  ;;  %vm10473_vm4 = vcmask 15360   ;;  %s6941_s24 = sld [smem:[#allocation7 + $0x2]] }
0x2814   :  { %v8228_v0 = vpack.c.bf16 %v4238_v59, %v4237_v43  ;;  %v4240_v1 = vld [vmem:[%s10434_s10 + $0x18] sm:$0xff]  ;;  %8233 = vmatprep.subr.bf16.mxu1 %v8637_v3  ;;  %7739 = vmatprep.mubr.msk.f32.mxu1 %vm8638_vm1, %v8639_v9  ;;  %v9732_v7 = vld [vmem:[#allocation4] sm:$0x3]  ;;  %v4323_v13 = vld [vmem:[#allocation3 + $0x4] sm:$0x3] }
0x2815   :  { %v8231_v2 = vpack.c.bf16 %v4240_v1, %v4239_v62  ;;  %v6929_v36 = vld [vmem:[%s10435_s11] ss:$0 sm:$0xff]  ;;  %v4321_v12 = vld [vmem:[#allocation3] sm:$0x3]  ;;  %v4324_v16 = vld [vmem:[#allocation3 + $0x6] sm:$0x3] }
0x2816   :  { %8229 = vmatpush3.bf16.msra.mxu0 %v8228_v0  ;;  %v4322_v25 = vld [vmem:[#allocation3 + $0x2] sm:$0x3]  ;;  %v4326_v26 = vld [vmem:[#allocation3 + $0xa] sm:$0x3]  ;;  %v4325_v34 = vld [vmem:[#allocation3 + $0x8] sm:$0x3] }
0x2817   :  { %8230 = vmatprep.subr.bf16.mxu0 %v8637_v3  ;;  %v4328_v39 = vld [vmem:[#allocation3 + $0xe] sm:$0x3]  ;;  %v4327_v45 = vld [vmem:[#allocation3 + $0xc] sm:$0x3]  ;;  %v6931_v41 = vld [vmem:[%s10436_s12] ss:$0 sm:$0xff] }
0x2818   :  { %vm10474_vm7 = vmmov %vm10473_vm4 }
0x2819   :  { %p6942_p9 = scmp.ne.s32.totalorder %s6941_s24, 1 }
0x281a   :  { %8232 = vmatpush3.bf16.msra.mxu0 %v8231_v2  ;;  %s10477_s28 = sld [smem:[#allocation16_spill]] (!%p6942_p9) }
0x281b   :  { %8239 = vmatprep.subr.bf16.mxu0 %v8637_v3 }
0x281d   :  { %7729 = vmatmul.mubr.msk.f32.vlgmr.msra.gmra.mrb[0].mxu0 %vm183_vm3, %v9732_v7 }
0x281e   :  { %7746 = vmatprep.mubr.msk.f32.mxu0 %vm8638_vm1, %v8639_v9 }
0x28f0   :  { %v4317_v15 = vpop.f32.mrb[0].mxu0 }
0x28f1   :  { %v9742_v23 = vadd.f32 %v6929_v36, %v4317_v15  ;;  %v7730_v24 = vpop.f32.mrb[1].mxu0 }
0x28f3   :  { %v4331_v27 = vadd.f32 %v4323_v13, %v9742_v23  ;;  %v4329_v30 = vadd.f32 %v4321_v12, %v9742_v23  ;;  %v4332_v31 = vadd.f32 %v4324_v16, %v9742_v23  ;;  %v4330_v20 = vadd.f32 %v4322_v25, %v9742_v23 }
0x28f4   :  { %v4334_v37 = vadd.f32 %v4326_v26, %v9742_v23  ;;  %v4333_v38 = vadd.f32 %v4325_v34, %v9742_v23  ;;  %v4336_v40 = vadd.f32 %v4328_v39, %v9742_v23  ;;  %v4335_v63 = vadd.f32 %v4327_v45, %v9742_v23  ;;  %v4384_v34 = vld [vmem:[%s10472_s9] sm:$0xff] }
0x28f5   :  { %8520 = vtanh.f32 %v4331_v27  ;;  %vm4385_vm2 = vcmp.gt.f32.partialorder %v4384_v34, 0.0 }
0x28f6   :  { %8522 = vtanh.f32 %v4329_v30 }
0x28f7   :  { %8524 = vtanh.f32 %v4332_v31 }
0x28f8   :  { %8526 = vtanh.f32 %v4330_v20 }
0x28f9   :  { %8528 = vtanh.f32 %v4334_v37 }
0x28fa   :  { %8530 = vtanh.f32 %v4333_v38 }
0x28fb   :  { %8532 = vtanh.f32 %v4336_v40 }
0x28fc   :  { %8534 = vtanh.f32 %v4335_v63 }
0x28ff   :  { %v8521_v44 = vpop.eup %8520 }
0x2900   :  { %v8523_v46 = vpop.eup %8522  ;;  %v4354_v47 = vmul.f32 %v8521_v44, %v6931_v41 }
0x2901   :  { %v8525_v14 = vpop.eup %8524  ;;  %v4352_v48 = vmul.f32 %v8523_v46, %v6931_v41 }
0x2902   :  { %v8527_v49 = vpop.eup %8526  ;;  %v4366_v28 = vsel %vm84_vm0, %v4354_v47, 0.0  ;;  %v4355_v50 = vmul.f32 %v8525_v14, %v6931_v41 }
0x2903   :  { %v8529_v35 = vpop.eup %8528  ;;  %4367 = vadd.xlane.f32.xlu1 %v4366_v28  ;;  %v4360_v11 = vsel %vm84_vm0, %v4352_v48, 0.0  ;;  %v4353_v51 = vmul.f32 %v8527_v49, %v6931_v41 }
0x2904   :  { %v8531_v32 = vpop.eup %8530  ;;  %4361 = vadd.xlane.f32.xlu0 %v4360_v11  ;;  %v4369_v19 = vsel %vm84_vm0, %v4355_v50, 0.0  ;;  %v4357_v52 = vmul.f32 %v8529_v35, %v6931_v41 }
0x2905   :  { %v8533_v10 = vpop.eup %8532  ;;  %v4363_v53 = vsel %vm84_vm0, %v4353_v51, 0.0  ;;  %v4356_v54 = vmul.f32 %v8531_v32, %v6931_v41 }
0x2906   :  { %v8535_v21 = vpop.eup %8534  ;;  %v4375_v55 = vsel %vm84_vm0, %v4357_v52, 0.0  ;;  %v4359_v8 = vmul.f32 %v8533_v10, %v6931_v41 }
0x2907   :  { %4370 = vadd.xlane.f32.xlu1 %v4369_v19  ;;  %v4372_v56 = vsel %vm84_vm0, %v4356_v54, 0.0  ;;  %v4358_v57 = vmul.f32 %v8535_v21, %v6931_v41 }
0x2908   :  { %4364 = vadd.xlane.f32.xlu0 %v4363_v53  ;;  %v4381_v58 = vsel %vm84_vm0, %v4359_v8, 0.0 }
0x2909   :  { %v4378_v42 = vsel %vm84_vm0, %v4358_v57, 0.0 }
0x290b   :  { %4376 = vadd.xlane.f32.xlu1 %v4375_v55 }
0x290c   :  { %4373 = vadd.xlane.f32.xlu0 %v4372_v56 }
0x290f   :  { %4382 = vadd.xlane.f32.xlu1 %v4381_v58  ;;  %v4543_v58 = vld [vmem:[%s10438_s14] sm:$0xff] }
0x2910   :  { %4379 = vadd.xlane.f32.xlu0 %v4378_v42  ;;  %v4544_v42 = vld [vmem:[%s10438_s14 + $0x8] sm:$0xff] }
0x2990   :  { %v4368_v43 = vpop.xlane.xlu1 %4367 }
0x2991   :  { %v4362_v59 = vpop.xlane.xlu0 %4361  ;;  %v4405_v36 = vrot.slane %v4368_v43, %v9265_v22  ;;  %v8234_v43 = vpack.c.bf16 %v4544_v42, %v4543_v58 }
0x2992   :  { %v4397_v1 = vrot.slane %v4362_v59, %v9265_v22 }
0x2993   :  { %8235 = vmatpush3.bf16.msra.mxu1 %v8234_v43 }
0x2994   :  { %v4371_v62 = vpop.xlane.xlu1 %4370  ;;  %8236 = vmatprep.subr.bf16.mxu1 %v8637_v3 }
0x2995   :  { %v4365_v0 = vpop.xlane.xlu0 %4364  ;;  %v4409_v13 = vrot.slane %v4371_v62, %v9265_v22 }
0x2996   :  { %v4401_v2 = vrot.slane %v4365_v0, %v9265_v22  ;;  %v4545_v0 = vld [vmem:[%s10438_s14 + $0x10] sm:$0xff] }
0x2998   :  { %v4426_v15 = vsel %vm2694_vm8, %v4401_v2, %v4397_v1  ;;  %v4377_v12 = vpop.xlane.xlu1 %4376  ;;  %v4546_v1 = vld [vmem:[%s10438_s14 + $0x18] sm:$0xff]  ;;  %v4541_v2 = vld [vmem:[%s10437_s13] sm:$0xff] }
0x2999   :  { %v4427_v16 = vsel %vm2696_vm9, %v4405_v36, %v4426_v15  ;;  %v4374_v24 = vpop.xlane.xlu0 %4373  ;;  %v4417_v27 = vrot.slane %v4377_v12, %v9265_v22  ;;  %v8237_v36 = vpack.c.bf16 %v4546_v1, %v4545_v0  ;;  %v4744_v0 = vld [vmem:[%s10441_s17 + $0x10] sm:$0xff]  ;;  %v4745_v1 = vld [vmem:[%s10441_s17 + $0x18] sm:$0xff] }
0x299a   :  { %v4428_v25 = vsel %vm2698_vm10, %v4409_v13, %v4427_v16  ;;  %v4413_v26 = vrot.slane %v4374_v24, %v9265_v22  ;;  %v4542_v13 = vld [vmem:[%s10437_s13 + $0x8] sm:$0xff]  ;;  %v9809_v16 = vld [vmem:[#allocation6] sm:$0x3] }
0x299b   :  { %v8240_v15 = vpack.c.bf16 %v4542_v13, %v4541_v2  ;;  %8238 = vmatpush3.bf16.msra.mxu1 %v8237_v36  ;;  %v8246_v2 = vpack.c.bf16 %v4745_v1, %v4744_v0 }
0x299c   :  { %v4429_v30 = vsel %vm2700_vm11, %v4413_v26, %v4428_v25  ;;  %v4383_v31 = vpop.xlane.xlu1 %4382  ;;  %8242 = vmatprep.subr.bf16.mxu1 %v8637_v3  ;;  %v4511_v25 = vld [vmem:[#allocation2 + $0x2] sm:$0x3]  ;;  %v4510_v26 = vld [vmem:[#allocation2] sm:$0x3] }
0x299d   :  { %v4425_v20 = vrot.slane %v4383_v31, %v9265_v22  ;;  %v4380_v37 = vpop.xlane.xlu0 %4379  ;;  %v4430_v39 = vsel %vm2702_vm12, %v4417_v27, %v4429_v30  ;;  %8241 = vmatpush3.bf16.msra.mxu0 %v8240_v15 }
0x299e   :  { %v4421_v38 = vrot.slane %v4380_v37, %v9265_v22  ;;  %8248 = vmatprep.subr.bf16.mxu0 %v8637_v3 }
0x29a0   :  { %v4431_v45 = vsel %vm2704_vm13, %v4421_v38, %v4430_v39 }
0x29a1   :  { %v4432_v40 = vsel %vm2706_vm14, %v4425_v20, %v4431_v45  ;;  %v4512_v20 = vld [vmem:[#allocation2 + $0x4] sm:$0x3] }
0x29a2   :  { %v4434_v63 = vsel %vm4385_vm2, %v4432_v40, -1e+09  ;;  %vm10475_vm2 = vcmask 130048  }
0x29a3   :  { %v4435_v41 = vsel %vm10473_vm4, %v4434_v63, -inf  ;;  %7747 = vmatmul.mubr.msk.f32.vlgmr.msra.gmra.mrb[2].mxu0 %vm10475_vm2, %v9809_v16  ;;  %vm10476_vm4 = vmmov %vm10475_vm2 }
0x29a4   :  { %v4436_v44 = vrot.slane %v4435_v41, 4  ;;  %7768 = vmatprep.mubr.msk.f32.mxu0 %vm8638_vm1, %v8639_v9 }
0x29a6   :  { %v4437_v46 = vmax.f32 %v4435_v41, %v4436_v44  ;;  %v4513_v41 = vld [vmem:[#allocation2 + $0x6] sm:$0x3] }
0x29a8   :  { %v4438_v47 = vrot.slane %v4437_v46, 2 }
0x29aa   :  { %v4439_v14 = vmax.f32 %v4437_v46, %v4438_v47 }
0x29ac   :  { %v4440_v48 = vrot.slane %v4439_v14, 1 }
0x29ae   :  { %v4441_v49 = vmax.f32 %v4439_v14, %v4440_v48 }
0x29b0   :  { %v4442_v28 = vsub.f32 %v4434_v63, %v4441_v49  ;;  %v4514_v63 = vld [vmem:[#allocation2 + $0x8] sm:$0x3]  ;;  %v4516_v49 = vld [vmem:[#allocation2 + $0xc] sm:$0x3] }
0x29b2   :  { %v4443_v50 = vmul.f32 1.442695, %v4442_v28 }
0x29b4   :  { %8536 = vpow2.f32 %v4443_v50  ;;  %v4515_v50 = vld [vmem:[#allocation2 + $0xa] sm:$0x3] }
0x29be   :  { %v8537_v35 = vpop.eup %8536 }
0x29bf   :  { %v4445_v11 = vsel %vm10474_vm7, %v8537_v35, 0.0 }
0x29c0   :  { %v4446_v51 = vrot.slane %v4445_v11, 4 }
0x29c2   :  { %v4447_v32 = vadd.f32 %v4446_v51, %v4445_v11 }
0x29c4   :  { %v4448_v19 = vrot.slane %v4447_v32, 2 }
0x29c6   :  { %v4449_v52 = vadd.f32 %v4448_v19, %v4447_v32 }
0x29c8   :  { %v4450_v10 = vrot.slane %v4449_v52, 1 }
0x29ca   :  { %v4451_v53 = vadd.f32 %v4450_v10, %v4449_v52 }
0x29cc   :  { %8538 = vrcp.f32 %v4451_v53  ;;  %v4517_v53 = vld [vmem:[#allocation2 + $0xe] sm:$0x3] }
0x29d6   :  { %v8539_v54 = vpop.eup %8538 }
0x29d7   :  { %v4453_v21 = vmul.f32 %v8539_v54, %v8537_v35 }
0x29d9   :  { %v4464_v55 = vrot.slane %v4453_v21, %v9288_v60  ;;  %v4457_v8 = vrot.slane %v4453_v21, %v9291_v61  ;;  %v4471_v56 = vrot.slane %v4453_v21, %v9296_v5  ;;  %v4485_v57 = vrot.slane %v4453_v21, %v9310_v17 }
0x29da   :  { %v4478_v59 = vrot.slane %v4453_v21, %v9299_v6  ;;  %v4499_v62 = vrot.slane %v4453_v21, %v9329_v4  ;;  %v4492_v12 = vrot.slane %v4453_v21, %v9313_v33  ;;  %v4506_v24 = vrot.slane %v4453_v21, %v9338_v29 }
0x29db   :  { %4466 = vbcast.lane.b32.xlu1 %v4464_v55, 256  ;;  %4459 = vbcast.lane.b32.xlu0 %v4457_v8, 256  ;;  %v4742_v8 = vld [vmem:[%s10441_s17] sm:$0xff] }
0x29df   :  { %4473 = vbcast.lane.b32.xlu1 %v4471_v56, 256  ;;  %4487 = vbcast.lane.b32.xlu0 %v4485_v57, 256  ;;  %v4743_v56 = vld [vmem:[%s10441_s17 + $0x8] sm:$0xff] }
0x29e3   :  { %4480 = vbcast.lane.b32.xlu1 %v4478_v59, 256  ;;  %4501 = vbcast.lane.b32.xlu0 %v4499_v62, 256  ;;  %v8243_v59 = vpack.c.bf16 %v4743_v56, %v4742_v8  ;;  %v6939_v8 = vld [vmem:[%s10443_s19] ss:$0 sm:$0xff] }
0x29e7   :  { %4494 = vbcast.lane.b32.xlu1 %v4492_v12, 256  ;;  %4702 = vrot.lane.b32.xlu0 %v9742_v23, %s8641_s6  ;;  %v6934_v12 = vld [vmem:[%s10439_s15] ss:$0 sm:$0xff] }
0x29eb   :  { %4508 = vbcast.lane.b32.xlu1 %v4506_v24, 256 }
0x29ef   :  { %4712 = vrot.lane.b32.xlu1 %v9742_v23, %s8642_s26 }
0x2a4d   :  { %v4467_v27 = vpop.permute.xlu1 %4466  ;;  %v4460_v30 = vpop.permute.xlu0 %4459 }
0x2a4e   :  { %v4519_v31 = vmul.f32 %v4511_v25, %v4467_v27  ;;  %v4518_v34 = vmul.f32 %v4510_v26, %v4460_v30 }
0x2a50   :  { %v4527_v39 = vsel %vm84_vm0, %v4519_v31, 0.0  ;;  %v4526_v45 = vsel %vm84_vm0, %v4518_v34, 0.0 }
0x2a51   :  { %v4474_v37 = vpop.permute.xlu1 %4473  ;;  %v4488_v38 = vpop.permute.xlu0 %4487  ;;  %v4528_v46 = vadd.f32 %v4527_v39, %v4526_v45 }
0x2a52   :  { %v4520_v40 = vmul.f32 %v4512_v20, %v4474_v37  ;;  %v4522_v47 = vmul.f32 %v4514_v63, %v4488_v38 }
0x2a54   :  { %v4529_v44 = vsel %vm84_vm0, %v4520_v40, 0.0  ;;  %v4533_v32 = vsel %vm84_vm0, %v4522_v47, 0.0 }
0x2a55   :  { %v4481_v23 = vpop.permute.xlu1 %4480  ;;  %v4530_v48 = vadd.f32 %v4529_v44, %v4528_v46  ;;  %v4502_v28 = vpop.permute.xlu0 %4501  ;;  %v4738_v44 = vld [vmem:[%s10440_s16] sm:$0xff]  ;;  %v4739_v46 = vld [vmem:[%s10440_s16 + $0x8] sm:$0xff] }
0x2a56   :  { %v4521_v14 = vmul.f32 %v4513_v41, %v4481_v23  ;;  %v4524_v19 = vmul.f32 %v4516_v49, %v4502_v28  ;;  %v4740_v23 = vld [vmem:[%s10440_s16 + $0x10] sm:$0xff]  ;;  %v8249_v47 = vpack.c.bf16 %v4739_v46, %v4738_v44 }
0x2a58   :  { %v4531_v35 = vsel %vm84_vm0, %v4521_v14, 0.0  ;;  %v4537_v57 = vsel %vm84_vm0, %v4524_v19, 0.0  ;;  %v4888_v14 = vld [vmem:[%s10442_s18] sm:$0xff]  ;;  %8250 = vmatpush3.bf16.msra.mxu0 %v8249_v47 }
0x2a59   :  { %v4532_v11 = vadd.f32 %v4531_v35, %v4530_v48  ;;  %v4495_v51 = vpop.permute.xlu1 %4494  ;;  %v4703_v27 = vpop.permute.xlu0 %4702  ;;  %v4889_v48 = vld [vmem:[%s10442_s18 + $0x8] sm:$0xff]  ;;  %8251 = vmatprep.subr.bf16.mxu0 %v8637_v3 }
0x2a5a   :  { %v4523_v52 = vmul.f32 %v4515_v50, %v4495_v51  ;;  %v8255_v49 = vpack.c.bf16 %v4889_v48, %v4888_v14 }
0x2a5b   :  { %v4534_v10 = vadd.f32 %v4533_v32, %v4532_v11 }
0x2a5c   :  { %v4535_v54 = vsel %vm84_vm0, %v4523_v52, 0.0 }
0x2a5d   :  { %v4536_v21 = vadd.f32 %v4535_v54, %v4534_v10  ;;  %v4509_v55 = vpop.permute.xlu1 %4508 }
0x2a5e   :  { %v4525_v58 = vmul.f32 %v4517_v53, %v4509_v55 }
0x2a5f   :  { %v4538_v42 = vadd.f32 %v4537_v57, %v4536_v21 }
0x2a60   :  { %v4539_v43 = vsel %vm84_vm0, %v4525_v58, 0.0 }
0x2a61   :  { %v4540_v62 = vadd.f32 %v4539_v43, %v4538_v42  ;;  %v4713_v45 = vpop.permute.xlu1 %4712 }
0x2a63   :  { %7740 = vmatmul.mubr.msk.f32.vlgmr.msra.gmra.mrb[0].mxu1 %vm183_vm3, %v4540_v62 }
0x2a64   :  { %8244 = vmatpush3.bf16.msra.mxu1 %v8243_v59  ;;  %7757 = vmatprep.mubr.msk.f32.mxu1 %vm8638_vm1, %v8639_v9 }
0x2a65   :  { %8245 = vmatprep.subr.bf16.mxu1 %v8637_v3 }
0x2a68   :  { %8247 = vmatpush3.bf16.msra.mxu1 %v8246_v2 }
0x2a69   :  { %8254 = vmatprep.subr.bf16.mxu1 %v8637_v3 }
0x2a6b   :  { %7758 = vmatmul.mubr.msk.f32.vlgmr.msra.gmra.mrb[2].mxu1 %vm183_vm3, %v4540_v62 }
0x2a6c   :  { %7775 = vmatprep.mubr.msk.f32.mxu1 %vm8638_vm1, %v8639_v9  ;;  %8256 = vmatpush3.bf16.msra.mxu1 %v8255_v49 }
0x2a6f   :  { %7776 = vmatmul.mubr.msk.f32.vlgmr.msra.gmra.mrb[4].mxu1 %vm10476_vm4, %v9809_v16  ;;  %vm4991_vm4 = vcmp.eq.s32.totalorder %v9259_v18, 2 }
0x2a76   :  { %v4689_v36 = vpop.f32.mrb[2].mxu0 }
0x2a77   :  { %v7748_v13 = vpop.f32.mrb[3].mxu0 }
0x2b36   :  { %v4616_v15 = vpop.f32.mrb[0].mxu1 }
0x2b37   :  { %v4690_v24 = vadd.f32 %v4689_v36, %v4616_v15  ;;  %v7741_v25 = vpop.f32.mrb[1].mxu1 }
0x2b39   :  { %v4700_v26 = vadd.f32 %v6934_v12, %v4690_v24 }
0x2b3b   :  { %v4705_v30 = vadd.f32 %v4703_v27, %v4700_v26 }
0x2b3d   :  { %v6935_v31 = vmul.f32 -1.442695, %v4705_v30 }
0x2b3e   :  { %v4812_v34 = vpop.f32.mrb[2].mxu1 }
0x2b3f   :  { %8540 = vpow2.f32 %v6935_v31  ;;  %v7759_v20 = vpop.f32.mrb[3].mxu1  ;;  %v6943_v31 = vld [vmem:[%s10477_s28 + $0x6] sm:$0x3] (!%p6942_p9) }
0x2b40   :  { %5002 = vst.msk [vmem:[#allocation6] sm:$0x3] (!%p6942_p9), %vm2497_vm5, %v6943_v31 }
0x2b42   :  { %v4956_v53 = vpop.f32.mrb[4].mxu1 }
0x2b43   :  { %v7777_v54 = vpop.f32.mrb[5].mxu1 }
0x2b49   :  { %v8541_v37 = vpop.eup %8540 }
0x2b4a   :  { %v4709_v38 = vadd.f32 1.0, %v8541_v37 }
0x2b4c   :  { %8542 = vrcp.f32 %v4709_v38 }
0x2b56   :  { %v8543_v39 = vpop.eup %8542 }
0x2b57   :  { %v4715_v40 = vmul.f32 %v8543_v39, %v4713_v45  ;;  %v4722_v11 = vsub.f32 1.0, %v8543_v39 }
0x2b59   :  { %4717 = vrot.lane.b32.xlu0 %v4715_v40, %s8640_s25 }
0x2b5d   :  { %4728 = vrot.lane.b32.xlu0 %v9732_v7, %s8642_s26  ;;  %v4741_v7 = vld [vmem:[%s10440_s16 + $0x18] sm:$0xff] }
0x2b5e   :  { %v8252_v28 = vpack.c.bf16 %v4741_v7, %v4740_v23 }
0x2b60   :  { %8253 = vmatpush3.bf16.msra.mxu0 %v8252_v28 }
0x2bcb   :  { %v4718_v63 = vpop.permute.xlu0 %4717 }
0x2bcc   :  { %v4720_v41 = vadd.f32 %v4718_v63, %v4700_v26  ;;  %v4992_v26 = vld [vmem:[#allocation10] sm:$0x3] }
0x2bce   :  { %8544 = vtanh.f32 %v4720_v41 }
0x2bcf   :  { %v4729_v35 = vpop.permute.xlu0 %4728 }
0x2bd0   :  { %v4731_v32 = vmul.f32 %v8543_v39, %v4729_v35 }
0x2bd8   :  { %v8545_v50 = vpop.eup %8544 }
0x2bd9   :  { %4724 = vrot.lane.b32.xlu1 %v8545_v50, %s8641_s6 }
0x2c4b   :  { %v4725_v51 = vpop.permute.xlu1 %4724 }
0x2c4c   :  { %v4727_v19 = vmul.f32 %v4725_v51, %v4722_v11 }
0x2c4e   :  { %v4732_v52 = vadd.f32 %v4731_v32, %v4727_v19 }
0x2c50   :  { %4734 = vrot.lane.b32.xlu1 %v4732_v52, %s8641_s6 }
0x2cc2   :  { %v4735_v10 = vpop.permute.xlu1 %4734 }
0x2cc3   :  { %4737 = vst.msk [vmem:[#allocation4] sm:$0x3] %vm84_vm0, %v4735_v10  ;;  %7769 = vmatmul.mubr.msk.f32.vlgmr.msra.gmra.mrb[4].mxu0 %vm183_vm3, %v4735_v10 }
0x2d96   :  { %v4884_v21 = vpop.f32.mrb[4].mxu0 }
0x2d97   :  { %v4885_v16 = vadd.f32 %v4884_v21, %v4812_v34  ;;  %v7770_v55 = vpop.f32.mrb[5].mxu0 }
0x2d99   :  { %v4960_v56 = vadd.f32 %v4956_v53, %v4885_v16 }
0x2d9b   :  { %v4968_v57 = vadd.f32 %v6939_v8, %v4960_v56 }
0x2d9d   :  { %6940 = vst [vmem:[%s10445_s21 + $0x4] sm:$0x3] %v4968_v57  ;;  %v4971_v58 = vsel %vm3246_vm6, %v4968_v57, -inf }
0x2d9e   :  { %4972 = vmax.xlane.f32.xlu0 %v4971_v58 }
0x2e2b   :  { %v4973_v42 = vpop.xlane.xlu0 %4972 }
0x2e2c   :  { %vm4974_vm7 = vcmp.eq.f32.partialorder %v4968_v57, %v4973_v42 }
0x2e2d   :  { %v4975_v43 = vsel %vm4974_vm7, %v9259_v18, 128 }
0x2e2e   :  { %v4976_v59 = vsel %vm3246_vm6, %v4975_v43, 2147483647 }
0x2e2f   :  { %v4978_v62 = vshra.s32 %v4976_v59, 16  ;;  %v4977_v1 = vand.u32 65535, %v4976_v59 }
0x2e31   :  { %v4980_v0 = vcvt.s32.f32 %v4978_v62  ;;  %v4979_v36 = vcvt.s32.f32 %v4977_v1 }
0x2e33   :  { %4981 = vmin.xlane.f32.xlu1 %v4980_v0 }
0x2ec0   :  { %v4982_v2 = vpop.xlane.xlu1 %4981 }
0x2ec1   :  { %vm4983_vm2 = vcmp.eq.f32.partialorder %v4980_v0, %v4982_v2  ;;  %v4988_v15 = vcvt.f32.s32 %v4982_v2 }
0x2ec2   :  { %v4984_v13 = vsel %vm4983_vm2, %v4979_v36, inf }
0x2ec3   :  { %4985 = vmin.xlane.f32.xlu0 %v4984_v13  ;;  %v4989_v24 = vshll.u32 %v4988_v15, 16 }
0x2f50   :  { %v4986_v12 = vpop.xlane.xlu0 %4985  ;;  %4999 = sbr.rel (%p6942_p9) target bundleno = 12119 (0x2f57), region = 109 }
0x2f51   :  { %v4987_v25 = vcvt.f32.s32 %v4986_v12 }
0x2f53   :  { %v4990_v27 = vadd.s32 %v4989_v24, %v4987_v25 }
0x2f55   :  { %v4993_v30 = vsel %vm4991_vm4, %v4990_v27, %v4992_v26 }
0x2f56   :  { %4994 = vst.msk [vmem:[#allocation10] sm:$0x3] %vm2499_vm15, %v4993_v30 }
0x2f57 PF:  { %p6944_p10 = scmp.eq.s32.totalorder %s6941_s24, 1 }
0x2f58   :  { %v5010_v34 = vld [vmem:[%s10444_s20] sm:$0xff] (!%p6944_p10)  ;;  %v5011_v20 = vld [vmem:[%s10444_s20 + $0x8] sm:$0xff] (!%p6944_p10)  ;;  %v5012_v37 = vld [vmem:[%s10444_s20 + $0x10] sm:$0xff] (!%p6944_p10)  ;;  %v8652_v38 = vmov (!%p6944_p10), 0.0|0.0   ;;  %vm8653_vm7 = vmmov (!%p6944_p10), 0   ;;  %v8654_v40 = vmov (!%p6944_p10), 0.0   ;;  %vm5007_vm2 = vcmp.eq.s32.totalorder (!%p6944_p10), %v9259_v18, %v4990_v27 }
0x2f59   :  { %5006 = sbr.rel (%p6944_p10) target bundleno = 12367 (0x304f), region = 113  ;;  %8257 = vmatprep.subr.bf16.mxu0 (!%p6944_p10), %v8652_v38  ;;  %v8258_v39 = vpack.c.bf16 (!%p6944_p10), %v5011_v20, %v5010_v34  ;;  %v5013_v45 = vld [vmem:[%s10444_s20 + $0x18] sm:$0xff] (!%p6944_p10)  ;;  %7810 = vmatprep.mubr.msk.f32.mxu0 (!%p6944_p10), %vm8653_vm7, %v8654_v40  ;;  %v5014_v41 = vld [vmem:[%s10444_s20 + $0x20] sm:$0xff] (!%p6944_p10)  ;;  %v5015_v44 = vld [vmem:[%s10444_s20 + $0x28] sm:$0xff] (!%p6944_p10)  ;;  %v8655_v53 = vmov (!%p6944_p10), 1.0  }
0x2f5a   :  { %v8261_v63 = vpack.c.bf16 (!%p6944_p10), %v5013_v45, %v5012_v37  ;;  %v8264_v46 = vpack.c.bf16 (!%p6944_p10), %v5015_v44, %v5014_v41  ;;  %v5016_v23 = vld [vmem:[%s10444_s20 + $0x30] sm:$0xff] (!%p6944_p10)  ;;  %v5017_v47 = vld [vmem:[%s10444_s20 + $0x38] sm:$0xff] (!%p6944_p10)  ;;  %v5018_v14 = vld [vmem:[%s10444_s20 + $0x40] sm:$0xff] (!%p6944_p10) }
0x2f5b   :  { %8259 = vmatpush3.bf16.msra.mxu0 (!%p6944_p10), %v8258_v39  ;;  %v8267_v7 = vpack.c.bf16 (!%p6944_p10), %v5017_v47, %v5016_v23  ;;  %v5019_v48 = vld [vmem:[%s10444_s20 + $0x48] sm:$0xff] (!%p6944_p10)  ;;  %v5020_v28 = vld [vmem:[%s10444_s20 + $0x50] sm:$0xff] (!%p6944_p10)  ;;  %v5021_v50 = vld [vmem:[%s10444_s20 + $0x58] sm:$0xff] (!%p6944_p10) }
0x2f5c   :  { %8260 = vmatprep.subr.bf16.mxu0 (!%p6944_p10), %v8652_v38  ;;  %v8270_v49 = vpack.c.bf16 (!%p6944_p10), %v5019_v48, %v5018_v14  ;;  %v8273_v35 = vpack.c.bf16 (!%p6944_p10), %v5021_v50, %v5020_v28  ;;  %v5022_v11 = vld [vmem:[%s10444_s20 + $0x60] sm:$0xff] (!%p6944_p10)  ;;  %v5023_v51 = vld [vmem:[%s10444_s20 + $0x68] sm:$0xff] (!%p6944_p10)  ;;  %v5024_v19 = vld [vmem:[%s10444_s20 + $0x70] sm:$0xff] (!%p6944_p10) }
0x2f5d   :  { %v8276_v32 = vpack.c.bf16 (!%p6944_p10), %v5023_v51, %v5022_v11  ;;  %v5025_v52 = vld [vmem:[%s10444_s20 + $0x78] sm:$0xff] (!%p6944_p10) }
0x2f5e   :  { %v8279_v10 = vpack.c.bf16 (!%p6944_p10), %v5025_v52, %v5024_v19 }
0x2f5f   :  { %8262 = vmatpush3.bf16.msra.mxu0 (!%p6944_p10), %v8261_v63 }
0x2f60   :  { %8263 = vmatprep.subr.bf16.mxu0 %v8652_v38 }
0x2f63   :  { %8265 = vmatpush3.bf16.msra.mxu0 %v8264_v46 }
0x2f64   :  { %8266 = vmatprep.subr.bf16.mxu0 %v8652_v38 }
0x2f67   :  { %8268 = vmatpush3.bf16.msra.mxu0 %v8267_v7 }
0x2f68   :  { %8269 = vmatprep.subr.bf16.mxu0 %v8652_v38 }
0x2f6b   :  { %8271 = vmatpush3.bf16.msra.mxu0 %v8270_v49 }
0x2f6c   :  { %8272 = vmatprep.subr.bf16.mxu0 %v8652_v38 }
0x2f6f   :  { %8274 = vmatpush3.bf16.msra.mxu0 %v8273_v35 }
0x2f70   :  { %8275 = vmatprep.subr.bf16.mxu0 %v8652_v38 }
0x2f73   :  { %8277 = vmatpush3.bf16.msra.mxu0 %v8276_v32 }
0x2f74   :  { %8278 = vmatprep.subr.bf16.mxu0 %v8652_v38 }
0x2f77   :  { %8280 = vmatpush3.bf16.msra.mxu0 %v8279_v10 }
0x2f7a   :  { %7811 = vmatmul.mubr.msk.f32.vlgmr.msra.gmra.mrb[0].mxu0 %vm5007_vm2, %v8655_v53 }
0x304d   :  { %v5092_v54 = vpop.f32.mrb[0].mxu0 }
0x304e   :  { %5096 = vst.msk [vmem:[#allocation6] sm:$0x3] %vm2497_vm5, %v5092_v54  ;;  %v7812_v21 = vpop.f32.mrb[1].mxu0 }
0x304f PF:  { %8281 = vmatprep.subr.bf16.mxu0 %v8637_v3  ;;  %v5099_v16 = vld [vmem:[%s10434_s10] sm:$0xff]  ;;  %v5100_v55 = vld [vmem:[%s10434_s10 + $0x8] sm:$0xff]  ;;  %v5101_v8 = vld [vmem:[%s10434_s10 + $0x10] sm:$0xff]  ;;  %7821 = vmatprep.mubr.msk.f32.mxu0 %vm8638_vm1, %v8639_v9  ;;  %s10478_s2 = sld [smem:[#allocation17_spill]]  ;;  %vm10479_vm7 = vcmask 15360   ;;  %s6959_s23 = sld [smem:[#allocation7 + $0x3]] }
0x3050   :  { %v8282_v56 = vpack.c.bf16 %v5100_v55, %v5099_v16  ;;  %v5102_v57 = vld [vmem:[%s10434_s10 + $0x18] sm:$0xff]  ;;  %8287 = vmatprep.subr.bf16.mxu1 %v8637_v3  ;;  %7832 = vmatprep.mubr.msk.f32.mxu1 %vm8638_vm1, %v8639_v9  ;;  %v9965_v42 = vld [vmem:[#allocation4] sm:$0x3]  ;;  %v5185_v59 = vld [vmem:[#allocation3 + $0x4] sm:$0x3] }
0x3051   :  { %v8285_v58 = vpack.c.bf16 %v5102_v57, %v5101_v8  ;;  %v6947_v43 = vld [vmem:[%s10435_s11] ss:$0 sm:$0xff]  ;;  %v5183_v0 = vld [vmem:[#allocation3] sm:$0x3]  ;;  %v5186_v1 = vld [vmem:[#allocation3 + $0x6] sm:$0x3] }
0x3052   :  { %8283 = vmatpush3.bf16.msra.mxu0 %v8282_v56  ;;  %v5184_v13 = vld [vmem:[#allocation3 + $0x2] sm:$0x3]  ;;  %v5188_v15 = vld [vmem:[#allocation3 + $0xa] sm:$0x3]  ;;  %v5187_v26 = vld [vmem:[#allocation3 + $0x8] sm:$0x3] }
0x3053   :  { %8284 = vmatprep.subr.bf16.mxu0 %v8637_v3  ;;  %v5190_v34 = vld [vmem:[#allocation3 + $0xe] sm:$0x3]  ;;  %v5189_v20 = vld [vmem:[#allocation3 + $0xc] sm:$0x3]  ;;  %v6949_v39 = vld [vmem:[%s10436_s12] ss:$0 sm:$0xff] }
0x3054   :  { %vm10480_vm2 = vmmov %vm10479_vm7 }
0x3055   :  { %p6960_p11 = scmp.ne.s32.totalorder %s6959_s23, 1 }
0x3056   :  { %8286 = vmatpush3.bf16.msra.mxu0 %v8285_v58  ;;  %s10483_s3 = sld [smem:[#allocation16_spill]] (!%p6960_p11) }
0x3057   :  { %8293 = vmatprep.subr.bf16.mxu0 %v8637_v3 }
0x3059   :  { %7822 = vmatmul.mubr.msk.f32.vlgmr.msra.gmra.mrb[0].mxu0 %vm183_vm3, %v9965_v42 }
0x305a   :  { %7839 = vmatprep.mubr.msk.f32.mxu0 %vm8638_vm1, %v8639_v9 }
0x312c   :  { %v5179_v62 = vpop.f32.mrb[0].mxu0 }
0x312d   :  { %v9975_v2 = vadd.f32 %v6947_v43, %v5179_v62  ;;  %v7823_v36 = vpop.f32.mrb[1].mxu0 }
0x312f   :  { %v5193_v12 = vadd.f32 %v5185_v59, %v9975_v2  ;;  %v5191_v24 = vadd.f32 %v5183_v0, %v9975_v2  ;;  %v5194_v25 = vadd.f32 %v5186_v1, %v9975_v2  ;;  %v5192_v27 = vadd.f32 %v5184_v13, %v9975_v2 }
0x3130   :  { %v5196_v30 = vadd.f32 %v5188_v15, %v9975_v2  ;;  %v5195_v31 = vadd.f32 %v5187_v26, %v9975_v2  ;;  %v5198_v37 = vadd.f32 %v5190_v34, %v9975_v2  ;;  %v5197_v38 = vadd.f32 %v5189_v20, %v9975_v2  ;;  %v5246_v26 = vld [vmem:[%s10478_s2] sm:$0xff] }
0x3131   :  { %8546 = vtanh.f32 %v5193_v12  ;;  %vm5247_vm4 = vcmp.gt.f32.partialorder %v5246_v26, 0.0 }
0x3132   :  { %8548 = vtanh.f32 %v5191_v24 }
0x3133   :  { %8550 = vtanh.f32 %v5194_v25 }
0x3134   :  { %8552 = vtanh.f32 %v5192_v27 }
0x3135   :  { %8554 = vtanh.f32 %v5196_v30 }
0x3136   :  { %8556 = vtanh.f32 %v5195_v31 }
0x3137   :  { %8558 = vtanh.f32 %v5198_v37 }
0x3138   :  { %8560 = vtanh.f32 %v5197_v38 }
0x313b   :  { %v8547_v45 = vpop.eup %8546 }
0x313c   :  { %v8549_v40 = vpop.eup %8548  ;;  %v5216_v63 = vmul.f32 %v8547_v45, %v6949_v39 }
0x313d   :  { %v8551_v41 = vpop.eup %8550  ;;  %v5214_v44 = vmul.f32 %v8549_v40, %v6949_v39 }
0x313e   :  { %v8553_v46 = vpop.eup %8552  ;;  %v5228_v23 = vsel %vm84_vm0, %v5216_v63, 0.0  ;;  %v5217_v47 = vmul.f32 %v8551_v41, %v6949_v39 }
0x313f   :  { %v8555_v7 = vpop.eup %8554  ;;  %5229 = vadd.xlane.f32.xlu1 %v5228_v23  ;;  %v5222_v14 = vsel %vm84_vm0, %v5214_v44, 0.0  ;;  %v5215_v48 = vmul.f32 %v8553_v46, %v6949_v39 }
0x3140   :  { %v8557_v49 = vpop.eup %8556  ;;  %5223 = vadd.xlane.f32.xlu0 %v5222_v14  ;;  %v5231_v28 = vsel %vm84_vm0, %v5217_v47, 0.0  ;;  %v5219_v50 = vmul.f32 %v8555_v7, %v6949_v39 }
0x3141   :  { %v8559_v35 = vpop.eup %8558  ;;  %v5225_v11 = vsel %vm84_vm0, %v5215_v48, 0.0  ;;  %v5218_v51 = vmul.f32 %v8557_v49, %v6949_v39 }
0x3142   :  { %v8561_v32 = vpop.eup %8560  ;;  %v5237_v19 = vsel %vm84_vm0, %v5219_v50, 0.0  ;;  %v5221_v52 = vmul.f32 %v8559_v35, %v6949_v39 }
0x3143   :  { %5232 = vadd.xlane.f32.xlu1 %v5231_v28  ;;  %v5234_v10 = vsel %vm84_vm0, %v5218_v51, 0.0  ;;  %v5220_v53 = vmul.f32 %v8561_v32, %v6949_v39 }
0x3144   :  { %5226 = vadd.xlane.f32.xlu0 %v5225_v11  ;;  %v5243_v54 = vsel %vm84_vm0, %v5221_v52, 0.0 }
0x3145   :  { %v5240_v21 = vsel %vm84_vm0, %v5220_v53, 0.0 }
0x3147   :  { %5238 = vadd.xlane.f32.xlu1 %v5237_v19 }
0x3148   :  { %5235 = vadd.xlane.f32.xlu0 %v5234_v10 }
0x314b   :  { %5244 = vadd.xlane.f32.xlu1 %v5243_v54  ;;  %v5405_v54 = vld [vmem:[%s10438_s14] sm:$0xff] }
0x314c   :  { %5241 = vadd.xlane.f32.xlu0 %v5240_v21  ;;  %v5406_v21 = vld [vmem:[%s10438_s14 + $0x8] sm:$0xff] }
0x31cc   :  { %v5230_v16 = vpop.xlane.xlu1 %5229 }
0x31cd   :  { %v5224_v55 = vpop.xlane.xlu0 %5223  ;;  %v5267_v43 = vrot.slane %v5230_v16, %v9265_v22  ;;  %v8288_v16 = vpack.c.bf16 %v5406_v21, %v5405_v54 }
0x31ce   :  { %v5259_v57 = vrot.slane %v5224_v55, %v9265_v22 }
0x31cf   :  { %8289 = vmatpush3.bf16.msra.mxu1 %v8288_v16 }
0x31d0   :  { %v5233_v8 = vpop.xlane.xlu1 %5232  ;;  %8290 = vmatprep.subr.bf16.mxu1 %v8637_v3 }
0x31d1   :  { %v5227_v56 = vpop.xlane.xlu0 %5226  ;;  %v5271_v59 = vrot.slane %v5233_v8, %v9265_v22 }
0x31d2   :  { %v5263_v58 = vrot.slane %v5227_v56, %v9265_v22  ;;  %v5407_v56 = vld [vmem:[%s10438_s14 + $0x10] sm:$0xff] }
0x31d4   :  { %v5288_v62 = vsel %vm2694_vm8, %v5263_v58, %v5259_v57  ;;  %v5239_v0 = vpop.xlane.xlu1 %5238  ;;  %v5408_v57 = vld [vmem:[%s10438_s14 + $0x18] sm:$0xff]  ;;  %v5403_v58 = vld [vmem:[%s10437_s13] sm:$0xff] }
0x31d5   :  { %v5289_v1 = vsel %vm2696_vm9, %v5267_v43, %v5288_v62  ;;  %v5236_v36 = vpop.xlane.xlu0 %5235  ;;  %v5279_v12 = vrot.slane %v5239_v0, %v9265_v22  ;;  %v8291_v43 = vpack.c.bf16 %v5408_v57, %v5407_v56  ;;  %v5606_v56 = vld [vmem:[%s10441_s17 + $0x10] sm:$0xff]  ;;  %v5607_v57 = vld [vmem:[%s10441_s17 + $0x18] sm:$0xff] }
0x31d6   :  { %v5290_v13 = vsel %vm2698_vm10, %v5271_v59, %v5289_v1  ;;  %v5275_v15 = vrot.slane %v5236_v36, %v9265_v22  ;;  %v5404_v59 = vld [vmem:[%s10437_s13 + $0x8] sm:$0xff]  ;;  %v10042_v1 = vld [vmem:[#allocation6] sm:$0x3] }
0x31d7   :  { %v8294_v62 = vpack.c.bf16 %v5404_v59, %v5403_v58  ;;  %8292 = vmatpush3.bf16.msra.mxu1 %v8291_v43  ;;  %v8300_v58 = vpack.c.bf16 %v5607_v57, %v5606_v56 }
0x31d8   :  { %v5291_v24 = vsel %vm2700_vm11, %v5275_v15, %v5290_v13  ;;  %v5245_v25 = vpop.xlane.xlu1 %5244  ;;  %8296 = vmatprep.subr.bf16.mxu1 %v8637_v3  ;;  %v5373_v13 = vld [vmem:[#allocation2 + $0x2] sm:$0x3]  ;;  %v5372_v15 = vld [vmem:[#allocation2] sm:$0x3] }
0x31d9   :  { %v5287_v27 = vrot.slane %v5245_v25, %v9265_v22  ;;  %v5242_v30 = vpop.xlane.xlu0 %5241  ;;  %v5292_v34 = vsel %vm2702_vm12, %v5279_v12, %v5291_v24  ;;  %8295 = vmatpush3.bf16.msra.mxu0 %v8294_v62 }
0x31da   :  { %v5283_v31 = vrot.slane %v5242_v30, %v9265_v22  ;;  %8302 = vmatprep.subr.bf16.mxu0 %v8637_v3 }
0x31dc   :  { %v5293_v20 = vsel %vm2704_vm13, %v5283_v31, %v5292_v34 }
0x31dd   :  { %v5294_v37 = vsel %vm2706_vm14, %v5287_v27, %v5293_v20  ;;  %v5374_v27 = vld [vmem:[#allocation2 + $0x4] sm:$0x3] }
0x31de   :  { %v5296_v38 = vsel %vm5247_vm4, %v5294_v37, -1e+09  ;;  %vm10481_vm4 = vcmask 130048  }
0x31df   :  { %v5297_v39 = vsel %vm10479_vm7, %v5296_v38, -inf  ;;  %7840 = vmatmul.mubr.msk.f32.vlgmr.msra.gmra.mrb[2].mxu0 %vm10481_vm4, %v10042_v1  ;;  %vm10482_vm7 = vmmov %vm10481_vm4 }
0x31e0   :  { %v5298_v45 = vrot.slane %v5297_v39, 4  ;;  %7861 = vmatprep.mubr.msk.f32.mxu0 %vm8638_vm1, %v8639_v9 }
0x31e2   :  { %v5299_v40 = vmax.f32 %v5297_v39, %v5298_v45  ;;  %v5375_v39 = vld [vmem:[#allocation2 + $0x6] sm:$0x3] }
0x31e4   :  { %v5300_v63 = vrot.slane %v5299_v40, 2 }
0x31e6   :  { %v5301_v41 = vmax.f32 %v5299_v40, %v5300_v63 }
0x31e8   :  { %v5302_v44 = vrot.slane %v5301_v41, 1 }
0x31ea   :  { %v5303_v46 = vmax.f32 %v5301_v41, %v5302_v44 }
0x31ec   :  { %v5304_v23 = vsub.f32 %v5296_v38, %v5303_v46  ;;  %v5376_v38 = vld [vmem:[#allocation2 + $0x8] sm:$0x3]  ;;  %v5378_v46 = vld [vmem:[#allocation2 + $0xc] sm:$0x3] }
0x31ee   :  { %v5305_v47 = vmul.f32 1.442695, %v5304_v23 }
0x31f0   :  { %8562 = vpow2.f32 %v5305_v47  ;;  %v5377_v47 = vld [vmem:[#allocation2 + $0xa] sm:$0x3] }
0x31fa   :  { %v8563_v7 = vpop.eup %8562 }
0x31fb   :  { %v5307_v14 = vsel %vm10480_vm2, %v8563_v7, 0.0 }
0x31fc   :  { %v5308_v48 = vrot.slane %v5307_v14, 4 }
0x31fe   :  { %v5309_v49 = vadd.f32 %v5308_v48, %v5307_v14 }
0x3200   :  { %v5310_v28 = vrot.slane %v5309_v49, 2 }
0x3202   :  { %v5311_v50 = vadd.f32 %v5310_v28, %v5309_v49 }
0x3204   :  { %v5312_v35 = vrot.slane %v5311_v50, 1 }
0x3206   :  { %v5313_v11 = vadd.f32 %v5312_v35, %v5311_v50 }
0x3208   :  { %8564 = vrcp.f32 %v5313_v11  ;;  %v5379_v11 = vld [vmem:[#allocation2 + $0xe] sm:$0x3] }
0x3212   :  { %v8565_v51 = vpop.eup %8564 }
0x3213   :  { %v5315_v32 = vmul.f32 %v8565_v51, %v8563_v7 }
0x3215   :  { %v5326_v19 = vrot.slane %v5315_v32, %v9288_v60  ;;  %v5319_v52 = vrot.slane %v5315_v32, %v9291_v61  ;;  %v5333_v10 = vrot.slane %v5315_v32, %v9296_v5  ;;  %v5347_v53 = vrot.slane %v5315_v32, %v9310_v17 }
0x3216   :  { %v5340_v55 = vrot.slane %v5315_v32, %v9299_v6  ;;  %v5361_v8 = vrot.slane %v5315_v32, %v9329_v4  ;;  %v5354_v0 = vrot.slane %v5315_v32, %v9313_v33  ;;  %v5368_v36 = vrot.slane %v5315_v32, %v9338_v29 }
0x3217   :  { %5328 = vbcast.lane.b32.xlu1 %v5326_v19, 256  ;;  %5321 = vbcast.lane.b32.xlu0 %v5319_v52, 256  ;;  %v5604_v52 = vld [vmem:[%s10441_s17] sm:$0xff] }
0x321b   :  { %5335 = vbcast.lane.b32.xlu1 %v5333_v10, 256  ;;  %5349 = vbcast.lane.b32.xlu0 %v5347_v53, 256  ;;  %v5605_v10 = vld [vmem:[%s10441_s17 + $0x8] sm:$0xff] }
0x321f   :  { %5342 = vbcast.lane.b32.xlu1 %v5340_v55, 256  ;;  %5363 = vbcast.lane.b32.xlu0 %v5361_v8, 256  ;;  %v8297_v55 = vpack.c.bf16 %v5605_v10, %v5604_v52  ;;  %v6957_v52 = vld [vmem:[%s10443_s19] ss:$0 sm:$0xff] }
0x3223   :  { %5356 = vbcast.lane.b32.xlu1 %v5354_v0, 256  ;;  %5564 = vrot.lane.b32.xlu0 %v9975_v2, %s8641_s6  ;;  %v6952_v0 = vld [vmem:[%s10439_s15] ss:$0 sm:$0xff] }
0x3227   :  { %5370 = vbcast.lane.b32.xlu1 %v5368_v36, 256 }
0x322b   :  { %5574 = vrot.lane.b32.xlu1 %v9975_v2, %s8642_s26 }
0x3289   :  { %v5329_v12 = vpop.permute.xlu1 %5328  ;;  %v5322_v24 = vpop.permute.xlu0 %5321 }
0x328a   :  { %v5381_v25 = vmul.f32 %v5373_v13, %v5329_v12  ;;  %v5380_v26 = vmul.f32 %v5372_v15, %v5322_v24 }
0x328c   :  { %v5389_v34 = vsel %vm84_vm0, %v5381_v25, 0.0  ;;  %v5388_v20 = vsel %vm84_vm0, %v5380_v26, 0.0 }
0x328d   :  { %v5336_v30 = vpop.permute.xlu1 %5335  ;;  %v5350_v31 = vpop.permute.xlu0 %5349  ;;  %v5390_v40 = vadd.f32 %v5389_v34, %v5388_v20 }
0x328e   :  { %v5382_v37 = vmul.f32 %v5374_v27, %v5336_v30  ;;  %v5384_v63 = vmul.f32 %v5376_v38, %v5350_v31 }
0x3290   :  { %v5391_v45 = vsel %vm84_vm0, %v5382_v37, 0.0  ;;  %v5395_v49 = vsel %vm84_vm0, %v5384_v63, 0.0 }
0x3291   :  { %v5343_v2 = vpop.permute.xlu1 %5342  ;;  %v5392_v44 = vadd.f32 %v5391_v45, %v5390_v40  ;;  %v5364_v23 = vpop.permute.xlu0 %5363  ;;  %v5600_v45 = vld [vmem:[%s10440_s16] sm:$0xff]  ;;  %v5601_v40 = vld [vmem:[%s10440_s16 + $0x8] sm:$0xff] }
0x3292   :  { %v5383_v41 = vmul.f32 %v5375_v39, %v5343_v2  ;;  %v5386_v28 = vmul.f32 %v5378_v46, %v5364_v23  ;;  %v5602_v2 = vld [vmem:[%s10440_s16 + $0x10] sm:$0xff]  ;;  %v8303_v63 = vpack.c.bf16 %v5601_v40, %v5600_v45 }
0x3294   :  { %v5393_v7 = vsel %vm84_vm0, %v5383_v41, 0.0  ;;  %v5399_v53 = vsel %vm84_vm0, %v5386_v28, 0.0  ;;  %v5750_v41 = vld [vmem:[%s10442_s18] sm:$0xff]  ;;  %8304 = vmatpush3.bf16.msra.mxu0 %v8303_v63 }
0x3295   :  { %v5394_v14 = vadd.f32 %v5393_v7, %v5392_v44  ;;  %v5357_v48 = vpop.permute.xlu1 %5356  ;;  %v5565_v12 = vpop.permute.xlu0 %5564  ;;  %v5751_v44 = vld [vmem:[%s10442_s18 + $0x8] sm:$0xff]  ;;  %8305 = vmatprep.subr.bf16.mxu0 %v8637_v3 }
0x3296   :  { %v5385_v50 = vmul.f32 %v5377_v47, %v5357_v48  ;;  %v8309_v46 = vpack.c.bf16 %v5751_v44, %v5750_v41 }
0x3297   :  { %v5396_v35 = vadd.f32 %v5395_v49, %v5394_v14 }
0x3298   :  { %v5397_v51 = vsel %vm84_vm0, %v5385_v50, 0.0 }
0x3299   :  { %v5398_v32 = vadd.f32 %v5397_v51, %v5396_v35  ;;  %v5371_v19 = vpop.permute.xlu1 %5370 }
0x329a   :  { %v5387_v54 = vmul.f32 %v5379_v11, %v5371_v19 }
0x329b   :  { %v5400_v21 = vadd.f32 %v5399_v53, %v5398_v32 }
0x329c   :  { %v5401_v16 = vsel %vm84_vm0, %v5387_v54, 0.0 }
0x329d   :  { %v5402_v8 = vadd.f32 %v5401_v16, %v5400_v21  ;;  %v5575_v20 = vpop.permute.xlu1 %5574 }
0x329f   :  { %7833 = vmatmul.mubr.msk.f32.vlgmr.msra.gmra.mrb[0].mxu1 %vm183_vm3, %v5402_v8 }
0x32a0   :  { %8298 = vmatpush3.bf16.msra.mxu1 %v8297_v55  ;;  %7850 = vmatprep.mubr.msk.f32.mxu1 %vm8638_vm1, %v8639_v9 }
0x32a1   :  { %8299 = vmatprep.subr.bf16.mxu1 %v8637_v3 }
0x32a4   :  { %8301 = vmatpush3.bf16.msra.mxu1 %v8300_v58 }
0x32a5   :  { %8308 = vmatprep.subr.bf16.mxu1 %v8637_v3 }
0x32a7   :  { %7851 = vmatmul.mubr.msk.f32.vlgmr.msra.gmra.mrb[2].mxu1 %vm183_vm3, %v5402_v8 }
0x32a8   :  { %7868 = vmatprep.mubr.msk.f32.mxu1 %vm8638_vm1, %v8639_v9  ;;  %8310 = vmatpush3.bf16.msra.mxu1 %v8309_v46 }
0x32ab   :  { %7869 = vmatmul.mubr.msk.f32.vlgmr.msra.gmra.mrb[4].mxu1 %vm10482_vm7, %v10042_v1  ;;  %vm5853_vm7 = vcmp.eq.s32.totalorder %v9259_v18, 3 }
0x32b2   :  { %v5551_v43 = vpop.f32.mrb[2].mxu0 }
0x32b3   :  { %v7841_v59 = vpop.f32.mrb[3].mxu0 }
0x3372   :  { %v5478_v62 = vpop.f32.mrb[0].mxu1 }
0x3373   :  { %v5552_v36 = vadd.f32 %v5551_v43, %v5478_v62  ;;  %v7834_v13 = vpop.f32.mrb[1].mxu1 }
0x3375   :  { %v5562_v15 = vadd.f32 %v6952_v0, %v5552_v36 }
0x3377   :  { %v5567_v24 = vadd.f32 %v5565_v12, %v5562_v15 }
0x3379   :  { %v6953_v25 = vmul.f32 -1.442695, %v5567_v24 }
0x337a   :  { %v5674_v26 = vpop.f32.mrb[2].mxu1 }
0x337b   :  { %8566 = vpow2.f32 %v6953_v25  ;;  %v7852_v27 = vpop.f32.mrb[3].mxu1  ;;  %v6961_v25 = vld [vmem:[%s10483_s3 + $0x8] sm:$0x3] (!%p6960_p11) }
0x337c   :  { %5864 = vst.msk [vmem:[#allocation6] sm:$0x3] (!%p6960_p11), %vm2497_vm5, %v6961_v25 }
0x337e   :  { %v5818_v11 = vpop.f32.mrb[4].mxu1 }
0x337f   :  { %v7870_v51 = vpop.f32.mrb[5].mxu1 }
0x3385   :  { %v8567_v30 = vpop.eup %8566 }
0x3386   :  { %v5571_v31 = vadd.f32 1.0, %v8567_v30 }
0x3388   :  { %8568 = vrcp.f32 %v5571_v31 }
0x3392   :  { %v8569_v34 = vpop.eup %8568 }
0x3393   :  { %v5577_v37 = vmul.f32 %v8569_v34, %v5575_v20  ;;  %v5584_v14 = vsub.f32 1.0, %v8569_v34 }
0x3395   :  { %5579 = vrot.lane.b32.xlu0 %v5577_v37, %s8640_s25 }
0x3399   :  { %5590 = vrot.lane.b32.xlu0 %v9965_v42, %s8642_s26  ;;  %v5603_v42 = vld [vmem:[%s10440_s16 + $0x18] sm:$0xff] }
0x339a   :  { %v8306_v23 = vpack.c.bf16 %v5603_v42, %v5602_v2 }
0x339c   :  { %8307 = vmatpush3.bf16.msra.mxu0 %v8306_v23 }
0x3407   :  { %v5580_v38 = vpop.permute.xlu0 %5579 }
0x3408   :  { %v5582_v39 = vadd.f32 %v5580_v38, %v5562_v15  ;;  %v5854_v15 = vld [vmem:[#allocation10] sm:$0x3] }
0x340a   :  { %8570 = vtanh.f32 %v5582_v39 }
0x340b   :  { %v5591_v7 = vpop.permute.xlu0 %5590 }
0x340c   :  { %v5593_v49 = vmul.f32 %v8569_v34, %v5591_v7 }
0x3414   :  { %v8571_v47 = vpop.eup %8570 }
0x3415   :  { %5586 = vrot.lane.b32.xlu1 %v8571_v47, %s8641_s6 }
0x3487   :  { %v5587_v48 = vpop.permute.xlu1 %5586 }
0x3488   :  { %v5589_v28 = vmul.f32 %v5587_v48, %v5584_v14 }
0x348a   :  { %v5594_v50 = vadd.f32 %v5593_v49, %v5589_v28 }
0x348c   :  { %5596 = vrot.lane.b32.xlu1 %v5594_v50, %s8641_s6 }
0x34fe   :  { %v5597_v35 = vpop.permute.xlu1 %5596 }
0x34ff   :  { %5599 = vst.msk [vmem:[#allocation4] sm:$0x3] %vm84_vm0, %v5597_v35  ;;  %7862 = vmatmul.mubr.msk.f32.vlgmr.msra.gmra.mrb[4].mxu0 %vm183_vm3, %v5597_v35 }
0x35d2   :  { %v5746_v32 = vpop.f32.mrb[4].mxu0 }
0x35d3   :  { %v5747_v1 = vadd.f32 %v5746_v32, %v5674_v26  ;;  %v7863_v19 = vpop.f32.mrb[5].mxu0 }
0x35d5   :  { %v5822_v10 = vadd.f32 %v5818_v11, %v5747_v1 }
0x35d7   :  { %v5830_v53 = vadd.f32 %v6957_v52, %v5822_v10 }
0x35d9   :  { %6958 = vst [vmem:[%s10445_s21 + $0x6] sm:$0x3] %v5830_v53  ;;  %v5833_v54 = vsel %vm3246_vm6, %v5830_v53, -inf }
0x35da   :  { %5834 = vmax.xlane.f32.xlu0 %v5833_v54 }
0x3667   :  { %v5835_v21 = vpop.xlane.xlu0 %5834 }
0x3668   :  { %vm5836_vm2 = vcmp.eq.f32.partialorder %v5830_v53, %v5835_v21 }
0x3669   :  { %v5837_v16 = vsel %vm5836_vm2, %v9259_v18, 128 }
0x366a   :  { %v5838_v55 = vsel %vm3246_vm6, %v5837_v16, 2147483647 }
0x366b   :  { %v5840_v8 = vshra.s32 %v5838_v55, 16  ;;  %v5839_v57 = vand.u32 65535, %v5838_v55 }
0x366d   :  { %v5842_v56 = vcvt.s32.f32 %v5840_v8  ;;  %v5841_v43 = vcvt.s32.f32 %v5839_v57 }
0x366f   :  { %5843 = vmin.xlane.f32.xlu1 %v5842_v56 }
0x36fc   :  { %v5844_v58 = vpop.xlane.xlu1 %5843 }
0x36fd   :  { %vm5845_vm4 = vcmp.eq.f32.partialorder %v5842_v56, %v5844_v58  ;;  %v5850_v62 = vcvt.f32.s32 %v5844_v58 }
0x36fe   :  { %v5846_v59 = vsel %vm5845_vm4, %v5841_v43, inf }
0x36ff   :  { %5847 = vmin.xlane.f32.xlu0 %v5846_v59  ;;  %v5851_v36 = vshll.u32 %v5850_v62, 16 }
0x378c   :  { %v5848_v0 = vpop.xlane.xlu0 %5847  ;;  %5861 = sbr.rel (%p6960_p11) target bundleno = 14227 (0x3793), region = 117 }
0x378d   :  { %v5849_v13 = vcvt.f32.s32 %v5848_v0 }
0x378f   :  { %v5852_v12 = vadd.s32 %v5851_v36, %v5849_v13 }
0x3791   :  { %v5855_v24 = vsel %vm5853_vm7, %v5852_v12, %v5854_v15 }
0x3792   :  { %5856 = vst.msk [vmem:[#allocation10] sm:$0x3] %vm2499_vm15, %v5855_v24 }
0x3793 PF:  { %p6962_p12 = scmp.eq.s32.totalorder %s6959_s23, 1 }
0x3794   :  { %v5872_v26 = vld [vmem:[%s10444_s20] sm:$0xff] (!%p6962_p12)  ;;  %v5873_v27 = vld [vmem:[%s10444_s20 + $0x8] sm:$0xff] (!%p6962_p12)  ;;  %v5874_v30 = vld [vmem:[%s10444_s20 + $0x10] sm:$0xff] (!%p6962_p12)  ;;  %v8656_v31 = vmov (!%p6962_p12), 0.0|0.0   ;;  %vm8657_vm2 = vmmov (!%p6962_p12), 0   ;;  %v8658_v37 = vmov (!%p6962_p12), 0.0   ;;  %vm5869_vm4 = vcmp.eq.s32.totalorder (!%p6962_p12), %v9259_v18, %v5852_v12 }
0x3795   :  { %5868 = sbr.rel (%p6962_p12) target bundleno = 14475 (0x388b), region = 121  ;;  %8311 = vmatprep.subr.bf16.mxu0 (!%p6962_p12), %v8656_v31  ;;  %v8312_v34 = vpack.c.bf16 (!%p6962_p12), %v5873_v27, %v5872_v26  ;;  %v5875_v20 = vld [vmem:[%s10444_s20 + $0x18] sm:$0xff] (!%p6962_p12)  ;;  %7903 = vmatprep.mubr.msk.f32.mxu0 (!%p6962_p12), %vm8657_vm2, %v8658_v37  ;;  %v5876_v39 = vld [vmem:[%s10444_s20 + $0x20] sm:$0xff] (!%p6962_p12)  ;;  %v5877_v45 = vld [vmem:[%s10444_s20 + $0x28] sm:$0xff] (!%p6962_p12)  ;;  %v8659_v11 = vmov (!%p6962_p12), 1.0  }
0x3796   :  { %v8315_v38 = vpack.c.bf16 (!%p6962_p12), %v5875_v20, %v5874_v30  ;;  %v8318_v40 = vpack.c.bf16 (!%p6962_p12), %v5877_v45, %v5876_v39  ;;  %v5878_v2 = vld [vmem:[%s10444_s20 + $0x30] sm:$0xff] (!%p6962_p12)  ;;  %v5879_v63 = vld [vmem:[%s10444_s20 + $0x38] sm:$0xff] (!%p6962_p12)  ;;  %v5880_v41 = vld [vmem:[%s10444_s20 + $0x40] sm:$0xff] (!%p6962_p12) }
0x3797   :  { %8313 = vmatpush3.bf16.msra.mxu0 (!%p6962_p12), %v8312_v34  ;;  %v8321_v42 = vpack.c.bf16 (!%p6962_p12), %v5879_v63, %v5878_v2  ;;  %v5881_v44 = vld [vmem:[%s10444_s20 + $0x48] sm:$0xff] (!%p6962_p12)  ;;  %v5882_v23 = vld [vmem:[%s10444_s20 + $0x50] sm:$0xff] (!%p6962_p12)  ;;  %v5883_v47 = vld [vmem:[%s10444_s20 + $0x58] sm:$0xff] (!%p6962_p12) }
0x3798   :  { %8314 = vmatprep.subr.bf16.mxu0 (!%p6962_p12), %v8656_v31  ;;  %v8324_v46 = vpack.c.bf16 (!%p6962_p12), %v5881_v44, %v5880_v41  ;;  %v8327_v7 = vpack.c.bf16 (!%p6962_p12), %v5883_v47, %v5882_v23  ;;  %v5884_v14 = vld [vmem:[%s10444_s20 + $0x60] sm:$0xff] (!%p6962_p12)  ;;  %v5885_v48 = vld [vmem:[%s10444_s20 + $0x68] sm:$0xff] (!%p6962_p12)  ;;  %v5886_v28 = vld [vmem:[%s10444_s20 + $0x70] sm:$0xff] (!%p6962_p12) }
0x3799   :  { %v8330_v49 = vpack.c.bf16 (!%p6962_p12), %v5885_v48, %v5884_v14  ;;  %v5887_v50 = vld [vmem:[%s10444_s20 + $0x78] sm:$0xff] (!%p6962_p12) }
0x379a   :  { %v8333_v35 = vpack.c.bf16 (!%p6962_p12), %v5887_v50, %v5886_v28 }
0x379b   :  { %8316 = vmatpush3.bf16.msra.mxu0 (!%p6962_p12), %v8315_v38 }
0x379c   :  { %8317 = vmatprep.subr.bf16.mxu0 %v8656_v31 }
0x379f   :  { %8319 = vmatpush3.bf16.msra.mxu0 %v8318_v40 }
0x37a0   :  { %8320 = vmatprep.subr.bf16.mxu0 %v8656_v31 }
0x37a3   :  { %8322 = vmatpush3.bf16.msra.mxu0 %v8321_v42 }
0x37a4   :  { %8323 = vmatprep.subr.bf16.mxu0 %v8656_v31 }
0x37a7   :  { %8325 = vmatpush3.bf16.msra.mxu0 %v8324_v46 }
0x37a8   :  { %8326 = vmatprep.subr.bf16.mxu0 %v8656_v31 }
0x37ab   :  { %8328 = vmatpush3.bf16.msra.mxu0 %v8327_v7 }
0x37ac   :  { %8329 = vmatprep.subr.bf16.mxu0 %v8656_v31 }
0x37af   :  { %8331 = vmatpush3.bf16.msra.mxu0 %v8330_v49 }
0x37b0   :  { %8332 = vmatprep.subr.bf16.mxu0 %v8656_v31 }
0x37b3   :  { %8334 = vmatpush3.bf16.msra.mxu0 %v8333_v35 }
0x37b6   :  { %7904 = vmatmul.mubr.msk.f32.vlgmr.msra.gmra.mrb[0].mxu0 %vm5869_vm4, %v8659_v11 }
0x3889   :  { %v5954_v51 = vpop.f32.mrb[0].mxu0 }
0x388a   :  { %5958 = vst.msk [vmem:[#allocation6] sm:$0x3] %vm2497_vm5, %v5954_v51  ;;  %v7905_v32 = vpop.f32.mrb[1].mxu0 }
0x388b PF:  { %8335 = vmatprep.subr.bf16.mxu0 %v8637_v3  ;;  %v5961_v1 = vld [vmem:[%s10434_s10] sm:$0xff]  ;;  %v5962_v19 = vld [vmem:[%s10434_s10 + $0x8] sm:$0xff]  ;;  %v5963_v52 = vld [vmem:[%s10434_s10 + $0x10] sm:$0xff]  ;;  %7914 = vmatprep.mubr.msk.f32.mxu0 %vm8638_vm1, %v8639_v9  ;;  %s10484_s27 = sld [smem:[#allocation17_spill]] }
0x388c   :  { %v8336_v10 = vpack.c.bf16 %v5962_v19, %v5961_v1  ;;  %v5964_v53 = vld [vmem:[%s10434_s10 + $0x18] sm:$0xff]  ;;  %8341 = vmatprep.subr.bf16.mxu1 %v8637_v3  ;;  %7925 = vmatprep.mubr.msk.f32.mxu1 %vm8638_vm1, %v8639_v9  ;;  %v10198_v21 = vld [vmem:[#allocation4] sm:$0x3]  ;;  %v6047_v55 = vld [vmem:[#allocation3 + $0x4] sm:$0x3] }
0x388d   :  { %v8339_v54 = vpack.c.bf16 %v5964_v53, %v5963_v52  ;;  %v6965_v16 = vld [vmem:[%s10435_s11] ss:$0 sm:$0xff]  ;;  %v6045_v56 = vld [vmem:[#allocation3] sm:$0x3]  ;;  %v6048_v57 = vld [vmem:[#allocation3 + $0x6] sm:$0x3] }
0x388e   :  { %8337 = vmatpush3.bf16.msra.mxu0 %v8336_v10  ;;  %v6046_v59 = vld [vmem:[#allocation3 + $0x2] sm:$0x3]  ;;  %v6050_v62 = vld [vmem:[#allocation3 + $0xa] sm:$0x3]  ;;  %v6049_v15 = vld [vmem:[#allocation3 + $0x8] sm:$0x3] }
0x388f   :  { %8338 = vmatprep.subr.bf16.mxu0 %v8637_v3  ;;  %v6052_v26 = vld [vmem:[#allocation3 + $0xe] sm:$0x3]  ;;  %v6051_v27 = vld [vmem:[#allocation3 + $0xc] sm:$0x3]  ;;  %v6967_v34 = vld [vmem:[%s10436_s12] ss:$0 sm:$0xff] }
0x3892   :  { %8340 = vmatpush3.bf16.msra.mxu0 %v8339_v54 }
0x3893   :  { %8347 = vmatprep.subr.bf16.mxu0 %v8637_v3 }
0x3895   :  { %7915 = vmatmul.mubr.msk.f32.vlgmr.msra.gmra.mrb[0].mxu0 %vm183_vm3, %v10198_v21 }
0x3896   :  { %7932 = vmatprep.mubr.msk.f32.mxu0 %vm8638_vm1, %v8639_v9 }
0x3968   :  { %v6041_v8 = vpop.f32.mrb[0].mxu0 }
0x3969   :  { %v10208_v58 = vadd.f32 %v6965_v16, %v6041_v8  ;;  %v7916_v43 = vpop.f32.mrb[1].mxu0 }
0x396b   :  { %v6055_v0 = vadd.f32 %v6047_v55, %v10208_v58  ;;  %v6053_v36 = vadd.f32 %v6045_v56, %v10208_v58  ;;  %v6056_v13 = vadd.f32 %v6048_v57, %v10208_v58  ;;  %v6054_v12 = vadd.f32 %v6046_v59, %v10208_v58 }
0x396c   :  { %v6058_v24 = vadd.f32 %v6050_v62, %v10208_v58  ;;  %v6057_v25 = vadd.f32 %v6049_v15, %v10208_v58  ;;  %v6060_v30 = vadd.f32 %v6052_v26, %v10208_v58  ;;  %v6059_v31 = vadd.f32 %v6051_v27, %v10208_v58  ;;  %v6108_v15 = vld [vmem:[%s10484_s27] sm:$0xff] }
0x396d   :  { %8572 = vtanh.f32 %v6055_v0 }
0x396e   :  { %8574 = vtanh.f32 %v6053_v36 }
0x396f   :  { %8576 = vtanh.f32 %v6056_v13 }
0x3970   :  { %8578 = vtanh.f32 %v6054_v12 }
0x3971   :  { %8580 = vtanh.f32 %v6058_v24 }
0x3972   :  { %8582 = vtanh.f32 %v6057_v25 }
0x3973   :  { %8584 = vtanh.f32 %v6060_v30 }
0x3974   :  { %8586 = vtanh.f32 %v6059_v31 }
0x3977   :  { %v8573_v20 = vpop.eup %8572 }
0x3978   :  { %v8575_v37 = vpop.eup %8574  ;;  %v6078_v38 = vmul.f32 %v8573_v20, %v6967_v34 }
0x3979   :  { %v8577_v39 = vpop.eup %8576  ;;  %v6076_v45 = vmul.f32 %v8575_v37, %v6967_v34 }
0x397a   :  { %v8579_v40 = vpop.eup %8578  ;;  %v6090_v2 = vsel %vm84_vm0, %v6078_v38, 0.0  ;;  %v6079_v63 = vmul.f32 %v8577_v39, %v6967_v34 }
0x397b   :  { %v8581_v42 = vpop.eup %8580  ;;  %6091 = vadd.xlane.f32.xlu1 %v6090_v2  ;;  %v6084_v41 = vsel %vm84_vm0, %v6076_v45, 0.0  ;;  %v6077_v44 = vmul.f32 %v8579_v40, %v6967_v34 }
0x397c   :  { %v8583_v46 = vpop.eup %8582  ;;  %6085 = vadd.xlane.f32.xlu0 %v6084_v41  ;;  %v6093_v23 = vsel %vm84_vm0, %v6079_v63, 0.0  ;;  %v6081_v47 = vmul.f32 %v8581_v42, %v6967_v34 }
0x397d   :  { %v8585_v7 = vpop.eup %8584  ;;  %v6087_v14 = vsel %vm84_vm0, %v6077_v44, 0.0  ;;  %v6080_v48 = vmul.f32 %v8583_v46, %v6967_v34 }
0x397e   :  { %v8587_v49 = vpop.eup %8586  ;;  %v6099_v28 = vsel %vm84_vm0, %v6081_v47, 0.0  ;;  %v6083_v50 = vmul.f32 %v8585_v7, %v6967_v34 }
0x397f   :  { %6094 = vadd.xlane.f32.xlu1 %v6093_v23  ;;  %v6096_v35 = vsel %vm84_vm0, %v6080_v48, 0.0  ;;  %v6082_v11 = vmul.f32 %v8587_v49, %v6967_v34 }
0x3980   :  { %6088 = vadd.xlane.f32.xlu0 %v6087_v14  ;;  %v6105_v51 = vsel %vm84_vm0, %v6083_v50, 0.0 }
0x3981   :  { %v6102_v32 = vsel %vm84_vm0, %v6082_v11, 0.0  ;;  %v6267_v11 = vld [vmem:[%s10438_s14] sm:$0xff] }
0x3983   :  { %6100 = vadd.xlane.f32.xlu1 %v6099_v28 }
0x3984   :  { %6097 = vadd.xlane.f32.xlu0 %v6096_v35 }
0x3987   :  { %6106 = vadd.xlane.f32.xlu1 %v6105_v51  ;;  %v6268_v51 = vld [vmem:[%s10438_s14 + $0x8] sm:$0xff] }
0x3988   :  { %6103 = vadd.xlane.f32.xlu0 %v6102_v32  ;;  %v8342_v32 = vpack.c.bf16 %v6268_v51, %v6267_v11 }
0x398a   :  { %8343 = vmatpush3.bf16.msra.mxu1 %v8342_v32  ;;  %v6970_v32 = vld [vmem:[%s10439_s15] ss:$0 sm:$0xff] }
0x398b   :  { %8344 = vmatprep.subr.bf16.mxu1 %v8637_v3 }
0x3a08   :  { %v6092_v1 = vpop.xlane.xlu1 %6091 }
0x3a09   :  { %v6086_v19 = vpop.xlane.xlu0 %6085  ;;  %v6129_v16 = vrot.slane %v6092_v1, %v9265_v22  ;;  %v6265_v1 = vld [vmem:[%s10437_s13] sm:$0xff] }
0x3a0a   :  { %v6121_v53 = vrot.slane %v6086_v19, %v9265_v22 }
0x3a0c   :  { %v6095_v52 = vpop.xlane.xlu1 %6094 }
0x3a0d   :  { %v6089_v10 = vpop.xlane.xlu0 %6088  ;;  %v6133_v55 = vrot.slane %v6095_v52, %v9265_v22 }
0x3a0e   :  { %v6125_v54 = vrot.slane %v6089_v10, %v9265_v22  ;;  %v10275_v10 = vld [vmem:[#allocation6] sm:$0x3] }
0x3a10   :  { %v6150_v8 = vsel %vm2694_vm8, %v6125_v54, %v6121_v53  ;;  %v6101_v56 = vpop.xlane.xlu1 %6100  ;;  %vm6109_vm8 = vcmp.gt.f32.partialorder %v6108_v15, 0.0  ;;  %v6234_v54 = vld [vmem:[#allocation2] sm:$0x3] }
0x3a11   :  { %v6151_v57 = vsel %vm2696_vm9, %v6129_v16, %v6150_v8  ;;  %v6098_v43 = vpop.xlane.xlu0 %6097  ;;  %v6141_v0 = vrot.slane %v6101_v56, %v9265_v22  ;;  %vm10485_vm9 = vcmask 15360  }
0x3a12   :  { %v6152_v59 = vsel %vm2698_vm10, %v6133_v55, %v6151_v57  ;;  %v6137_v62 = vrot.slane %v6098_v43, %v9265_v22  ;;  %vm10486_vm10 = vmmov %vm10485_vm9  ;;  %v6236_v57 = vld [vmem:[#allocation2 + $0x4] sm:$0x3] }
0x3a14   :  { %v6153_v36 = vsel %vm2700_vm11, %v6137_v62, %v6152_v59  ;;  %v6107_v13 = vpop.xlane.xlu1 %6106  ;;  %vm10487_vm11 = vcmask 130048  }
0x3a15   :  { %v6149_v12 = vrot.slane %v6107_v13, %v9265_v22  ;;  %v6104_v24 = vpop.xlane.xlu0 %6103  ;;  %v6154_v26 = vsel %vm2702_vm12, %v6141_v0, %v6153_v36  ;;  %v6238_v36 = vld [vmem:[#allocation2 + $0x8] sm:$0x3]  ;;  %v6237_v13 = vld [vmem:[#allocation2 + $0x6] sm:$0x3]  ;;  %vm6715_vm12 = vcmp.eq.s32.totalorder %v9259_v18, 4 }
0x3a16   :  { %v6145_v25 = vrot.slane %v6104_v24, %v9265_v22 }
0x3a18   :  { %v6155_v27 = vsel %vm2704_vm13, %v6145_v25, %v6154_v26 }
0x3a19   :  { %v6156_v30 = vsel %vm2706_vm14, %v6149_v12, %v6155_v27  ;;  %v6240_v27 = vld [vmem:[#allocation2 + $0xc] sm:$0x3] }
0x3a1a   :  { %v6158_v31 = vsel %vm6109_vm8, %v6156_v30, -1e+09 }
0x3a1b   :  { %v6159_v34 = vsel %vm10485_vm9, %v6158_v31, -inf }
0x3a1c   :  { %v6160_v20 = vrot.slane %v6159_v34, 4 }
0x3a1e   :  { %v6161_v37 = vmax.f32 %v6159_v34, %v6160_v20 }
0x3a20   :  { %v6162_v38 = vrot.slane %v6161_v37, 2 }
0x3a22   :  { %v6163_v39 = vmax.f32 %v6161_v37, %v6162_v38 }
0x3a24   :  { %v6164_v45 = vrot.slane %v6163_v39, 1 }
0x3a26   :  { %v6165_v40 = vmax.f32 %v6163_v39, %v6164_v45 }
0x3a28   :  { %v6166_v2 = vsub.f32 %v6158_v31, %v6165_v40  ;;  %v6239_v31 = vld [vmem:[#allocation2 + $0xa] sm:$0x3] }
0x3a2a   :  { %v6167_v63 = vmul.f32 1.442695, %v6166_v2  ;;  %v6241_v2 = vld [vmem:[#allocation2 + $0xe] sm:$0x3] }
0x3a2c   :  { %8588 = vpow2.f32 %v6167_v63 }
0x3a36   :  { %v8589_v22 = vpop.eup %8588 }
0x3a37   :  { %v6169_v42 = vsel %vm10486_vm10, %v8589_v22, 0.0 }
0x3a38   :  { %v6170_v41 = vrot.slane %v6169_v42, 4 }
0x3a3a   :  { %v6171_v44 = vadd.f32 %v6170_v41, %v6169_v42  ;;  %v6466_v41 = vld [vmem:[%s10441_s17] sm:$0xff] }
0x3a3c   :  { %v6172_v46 = vrot.slane %v6171_v44, 2 }
0x3a3e   :  { %v6173_v23 = vadd.f32 %v6172_v46, %v6171_v44  ;;  %v6467_v44 = vld [vmem:[%s10441_s17 + $0x8] sm:$0xff] }
0x3a40   :  { %v6174_v47 = vrot.slane %v6173_v23, 1 }
0x3a42   :  { %v6175_v7 = vadd.f32 %v6174_v47, %v6173_v23 }
0x3a44   :  { %8590 = vrcp.f32 %v6175_v7 }
0x3a4e   :  { %v8591_v14 = vpop.eup %8590 }
0x3a4f   :  { %v6177_v48 = vmul.f32 %v8591_v14, %v8589_v22  ;;  %v8351_v14 = vpack.c.bf16 %v6467_v44, %v6466_v41 }
0x3a51   :  { %v6188_v49 = vrot.slane %v6177_v48, %v9288_v60  ;;  %v6181_v28 = vrot.slane %v6177_v48, %v9291_v61  ;;  %v6195_v50 = vrot.slane %v6177_v48, %v9296_v5  ;;  %v6209_v35 = vrot.slane %v6177_v48, %v9310_v17  ;;  %v6269_v5 = vld [vmem:[%s10438_s14 + $0x10] sm:$0xff]  ;;  %v6270_v17 = vld [vmem:[%s10438_s14 + $0x18] sm:$0xff] }
0x3a52   :  { %v6202_v60 = vrot.slane %v6177_v48, %v9299_v6  ;;  %v6223_v61 = vrot.slane %v6177_v48, %v9329_v4  ;;  %v8345_v19 = vpack.c.bf16 %v6270_v17, %v6269_v5  ;;  %v6266_v6 = vld [vmem:[%s10437_s13 + $0x8] sm:$0xff]  ;;  %v6216_v52 = vrot.slane %v6177_v48, %v9313_v33  ;;  %v6235_v33 = vld [vmem:[#allocation2 + $0x2] sm:$0x3] }
0x3a53   :  { %6190 = vbcast.lane.b32.xlu1 %v6188_v49, 256  ;;  %6183 = vbcast.lane.b32.xlu0 %v6181_v28, 256  ;;  %v8348_v4 = vpack.c.bf16 %v6266_v6, %v6265_v1  ;;  %v6230_v53 = vrot.slane %v6177_v48, %v9338_v29  ;;  %v6468_v49 = vld [vmem:[%s10441_s17 + $0x10] sm:$0xff]  ;;  %v6469_v28 = vld [vmem:[%s10441_s17 + $0x18] sm:$0xff] }
0x3a54   :  { %8346 = vmatpush3.bf16.msra.mxu1 %v8345_v19 }
0x3a55   :  { %8349 = vmatpush3.bf16.msra.mxu0 %v8348_v4  ;;  %8350 = vmatprep.subr.bf16.mxu1 %v8637_v3 }
0x3a56   :  { %8356 = vmatprep.subr.bf16.mxu0 %v8637_v3 }
0x3a57   :  { %6197 = vbcast.lane.b32.xlu1 %v6195_v50, 256  ;;  %6211 = vbcast.lane.b32.xlu0 %v6209_v35, 256  ;;  %v8354_v50 = vpack.c.bf16 %v6469_v28, %v6468_v49 }
0x3a58   :  { %7933 = vmatmul.mubr.msk.f32.vlgmr.msra.gmra.mrb[2].mxu0 %vm10487_vm11, %v10275_v10 }
0x3a59   :  { %7954 = vmatprep.mubr.msk.f32.mxu0 %vm8638_vm1, %v8639_v9 }
0x3a5b   :  { %6204 = vbcast.lane.b32.xlu1 %v6202_v60, 256  ;;  %6225 = vbcast.lane.b32.xlu0 %v6223_v61, 256 }
0x3a5f   :  { %6218 = vbcast.lane.b32.xlu1 %v6216_v52, 256  ;;  %6426 = vrot.lane.b32.xlu0 %v10208_v58, %s8641_s6 }
0x3a63   :  { %6232 = vbcast.lane.b32.xlu1 %v6230_v53, 256 }
0x3a67   :  { %6436 = vrot.lane.b32.xlu1 %v10208_v58, %s8642_s26 }
0x3ac5   :  { %v6191_v16 = vpop.permute.xlu1 %6190  ;;  %v6184_v55 = vpop.permute.xlu0 %6183 }
0x3ac6   :  { %v6243_v8 = vmul.f32 %v6235_v33, %v6191_v16  ;;  %v6242_v56 = vmul.f32 %v6234_v54, %v6184_v55 }
0x3ac8   :  { %v6251_v62 = vsel %vm84_vm0, %v6243_v8, 0.0  ;;  %v6250_v29 = vsel %vm84_vm0, %v6242_v56, 0.0  ;;  %v6462_v8 = vld [vmem:[%s10440_s16] sm:$0xff]  ;;  %v6463_v56 = vld [vmem:[%s10440_s16 + $0x8] sm:$0xff] }
0x3ac9   :  { %v6198_v43 = vpop.permute.xlu1 %6197  ;;  %v6212_v59 = vpop.permute.xlu0 %6211  ;;  %v6252_v12 = vadd.f32 %v6251_v62, %v6250_v29  ;;  %v6613_v62 = vld [vmem:[%s10442_s18 + $0x8] sm:$0xff] }
0x3aca   :  { %v6244_v0 = vmul.f32 %v6236_v57, %v6198_v43  ;;  %v6246_v24 = vmul.f32 %v6238_v36, %v6212_v59  ;;  %v6464_v57 = vld [vmem:[%s10440_s16 + $0x10] sm:$0xff]  ;;  %v8357_v43 = vpack.c.bf16 %v6463_v56, %v6462_v8  ;;  %v6612_v59 = vld [vmem:[%s10442_s18] sm:$0xff] }
0x3acb   :  { %v8363_v29 = vpack.c.bf16 %v6613_v62, %v6612_v59 }
0x3acc   :  { %v6253_v15 = vsel %vm84_vm0, %v6244_v0, 0.0  ;;  %v6257_v38 = vsel %vm84_vm0, %v6246_v24, 0.0  ;;  %8358 = vmatpush3.bf16.msra.mxu0 %v8357_v43 }
0x3acd   :  { %v6205_v58 = vpop.permute.xlu1 %6204  ;;  %v6254_v26 = vadd.f32 %v6253_v15, %v6252_v12  ;;  %v6226_v30 = vpop.permute.xlu0 %6225  ;;  %8359 = vmatprep.subr.bf16.mxu0 %v8637_v3 }
0x3ace   :  { %v6245_v25 = vmul.f32 %v6237_v13, %v6205_v58  ;;  %v6248_v39 = vmul.f32 %v6240_v27, %v6226_v30 }
0x3ad0   :  { %v6255_v34 = vsel %vm84_vm0, %v6245_v25, 0.0  ;;  %v6261_v46 = vsel %vm84_vm0, %v6248_v39, 0.0 }
0x3ad1   :  { %v6256_v20 = vadd.f32 %v6255_v34, %v6254_v26  ;;  %v6219_v37 = vpop.permute.xlu1 %6218  ;;  %v6427_v17 = vpop.permute.xlu0 %6426  ;;  %v6975_v34 = vld [vmem:[%s10443_s19] ss:$0 sm:$0xff]  ;;  %s6977_s19 = sld [smem:[#allocation7 + $0x4]] }
0x3ad2   :  { %v6247_v45 = vmul.f32 %v6239_v31, %v6219_v37 }
0x3ad3   :  { %v6258_v40 = vadd.f32 %v6257_v38, %v6256_v20 }
0x3ad4   :  { %v6259_v63 = vsel %vm84_vm0, %v6247_v45, 0.0 }
0x3ad5   :  { %v6260_v22 = vadd.f32 %v6259_v63, %v6258_v40  ;;  %v6233_v42 = vpop.permute.xlu1 %6232 }
0x3ad6   :  { %v6249_v23 = vmul.f32 %v6241_v2, %v6233_v42 }
0x3ad7   :  { %v6262_v47 = vadd.f32 %v6261_v46, %v6260_v22  ;;  %p6978_p13 = scmp.ne.s32.totalorder %s6977_s19, 1 }
0x3ad8   :  { %v6263_v7 = vsel %vm84_vm0, %v6249_v23, 0.0  ;;  %s10489_s13 = sld [smem:[#allocation16_spill]] (!%p6978_p13) }
0x3ad9   :  { %v6264_v48 = vadd.f32 %v6263_v7, %v6262_v47  ;;  %v6437_v33 = vpop.permute.xlu1 %6436 }
0x3adb   :  { %7926 = vmatmul.mubr.msk.f32.vlgmr.msra.gmra.mrb[0].mxu1 %vm183_vm3, %v6264_v48 }
0x3adc   :  { %8352 = vmatpush3.bf16.msra.mxu1 %v8351_v14  ;;  %7943 = vmatprep.mubr.msk.f32.mxu1 %vm8638_vm1, %v8639_v9  ;;  %v6716_v14 = vld [vmem:[#allocation10] sm:$0x3] }
0x3add   :  { %8353 = vmatprep.subr.bf16.mxu1 %v8637_v3 }
0x3ade   :  { %v6979_v28 = vld [vmem:[%s10489_s13 + $0xa] sm:$0x3] (!%p6978_p13) }
0x3adf   :  { %6726 = vst.msk [vmem:[#allocation6] sm:$0x3] (!%p6978_p13), %vm2497_vm5, %v6979_v28 }
0x3ae0   :  { %8355 = vmatpush3.bf16.msra.mxu1 %v8354_v50 }
0x3ae1   :  { %8362 = vmatprep.subr.bf16.mxu1 %v8637_v3 }
0x3ae3   :  { %7944 = vmatmul.mubr.msk.f32.vlgmr.msra.gmra.mrb[2].mxu1 %vm183_vm3, %v6264_v48 }
0x3ae4   :  { %7961 = vmatprep.mubr.msk.f32.mxu1 %vm8638_vm1, %v8639_v9  ;;  %8364 = vmatpush3.bf16.msra.mxu1 %v8363_v29  ;;  %vm10488_vm1 = vmmov %vm10487_vm11 }
0x3ae7   :  { %7962 = vmatmul.mubr.msk.f32.vlgmr.msra.gmra.mrb[4].mxu1 %vm10488_vm1, %v10275_v10 }
0x3b2b   :  { %v6413_v35 = vpop.f32.mrb[2].mxu0 }
0x3b2c   :  { %v7934_v11 = vpop.f32.mrb[3].mxu0 }
0x3bae   :  { %v6340_v51 = vpop.f32.mrb[0].mxu1 }
0x3baf   :  { %v6414_v60 = vadd.f32 %v6413_v35, %v6340_v51  ;;  %v7927_v61 = vpop.f32.mrb[1].mxu1 }
0x3bb1   :  { %v6424_v5 = vadd.f32 %v6970_v32, %v6414_v60 }
0x3bb3   :  { %v6429_v1 = vadd.f32 %v6427_v17, %v6424_v5 }
0x3bb5   :  { %v6971_v19 = vmul.f32 -1.442695, %v6429_v1 }
0x3bb6   :  { %v6536_v6 = vpop.f32.mrb[2].mxu1 }
0x3bb7   :  { %8592 = vpow2.f32 %v6971_v19  ;;  %v7945_v4 = vpop.f32.mrb[3].mxu1 }
0x3bba   :  { %v6680_v3 = vpop.f32.mrb[4].mxu1 }
0x3bbb   :  { %v7963_v27 = vpop.f32.mrb[5].mxu1 }
0x3bc1   :  { %v8593_v52 = vpop.eup %8592 }
0x3bc2   :  { %v6433_v53 = vadd.f32 1.0, %v8593_v52 }
0x3bc4   :  { %8594 = vrcp.f32 %v6433_v53 }
0x3bce   :  { %v8595_v9 = vpop.eup %8594 }
0x3bcf   :  { %v6439_v54 = vmul.f32 %v8595_v9, %v6437_v33  ;;  %v6446_v15 = vsub.f32 1.0, %v8595_v9 }
0x3bd1   :  { %6441 = vrot.lane.b32.xlu0 %v6439_v54, %s8640_s25 }
0x3bd5   :  { %6452 = vrot.lane.b32.xlu0 %v10198_v21, %s8642_s26  ;;  %v6465_v21 = vld [vmem:[%s10440_s16 + $0x18] sm:$0xff] }
0x3bd6   :  { %v8360_v0 = vpack.c.bf16 %v6465_v21, %v6464_v57 }
0x3bd8   :  { %8361 = vmatpush3.bf16.msra.mxu0 %v8360_v0 }
0x3c43   :  { %v6442_v16 = vpop.permute.xlu0 %6441 }
0x3c44   :  { %v6444_v55 = vadd.f32 %v6442_v16, %v6424_v5 }
0x3c46   :  { %8596 = vtanh.f32 %v6444_v55 }
0x3c47   :  { %v6453_v13 = vpop.permute.xlu0 %6452 }
0x3c48   :  { %v6455_v58 = vmul.f32 %v8595_v9, %v6453_v13 }
0x3c50   :  { %v8597_v36 = vpop.eup %8596 }
0x3c51   :  { %6448 = vrot.lane.b32.xlu1 %v8597_v36, %s8641_s6 }
0x3cc3   :  { %v6449_v12 = vpop.permute.xlu1 %6448 }
0x3cc4   :  { %v6451_v24 = vmul.f32 %v6449_v12, %v6446_v15 }
0x3cc6   :  { %v6456_v25 = vadd.f32 %v6455_v58, %v6451_v24 }
0x3cc8   :  { %6458 = vrot.lane.b32.xlu1 %v6456_v25, %s8641_s6 }
0x3d3a   :  { %v6459_v26 = vpop.permute.xlu1 %6458 }
0x3d3b   :  { %6461 = vst.msk [vmem:[#allocation4] sm:$0x3] %vm84_vm0, %v6459_v26  ;;  %7955 = vmatmul.mubr.msk.f32.vlgmr.msra.gmra.mrb[4].mxu0 %vm183_vm3, %v6459_v26 }
0x3e0e   :  { %v6608_v30 = vpop.f32.mrb[4].mxu0 }
0x3e0f   :  { %v6609_v10 = vadd.f32 %v6608_v30, %v6536_v6  ;;  %v7956_v31 = vpop.f32.mrb[5].mxu0 }
0x3e11   :  { %v6684_v20 = vadd.f32 %v6680_v3, %v6609_v10 }
0x3e13   :  { %v6692_v37 = vadd.f32 %v6975_v34, %v6684_v20 }
0x3e15   :  { %6976 = vst [vmem:[%s10445_s21 + $0x8] sm:$0x3] %v6692_v37  ;;  %v6695_v38 = vsel %vm3246_vm6, %v6692_v37, -inf }
0x3e16   :  { %6696 = vmax.xlane.f32.xlu0 %v6695_v38 }
0x3ea3   :  { %v6697_v39 = vpop.xlane.xlu0 %6696 }
0x3ea4   :  { %vm6698_vm0 = vcmp.eq.f32.partialorder %v6692_v37, %v6697_v39 }
0x3ea5   :  { %v6699_v45 = vsel %vm6698_vm0, %v9259_v18, 128 }
0x3ea6   :  { %v6700_v40 = vsel %vm3246_vm6, %v6699_v45, 2147483647 }
0x3ea7   :  { %v6702_v2 = vshra.s32 %v6700_v40, 16  ;;  %v6701_v22 = vand.u32 65535, %v6700_v40 }
0x3ea9   :  { %v6704_v63 = vcvt.s32.f32 %v6702_v2  ;;  %v6703_v41 = vcvt.s32.f32 %v6701_v22 }
0x3eab   :  { %6705 = vmin.xlane.f32.xlu1 %v6704_v63 }
0x3f38   :  { %v6706_v42 = vpop.xlane.xlu1 %6705 }
0x3f39   :  { %vm6707_vm3 = vcmp.eq.f32.partialorder %v6704_v63, %v6706_v42  ;;  %v6712_v46 = vcvt.f32.s32 %v6706_v42 }
0x3f3a   :  { %v6708_v44 = vsel %vm6707_vm3, %v6703_v41, inf }
0x3f3b   :  { %6709 = vmin.xlane.f32.xlu0 %v6708_v44  ;;  %v6713_v47 = vshll.u32 %v6712_v46, 16 }
0x3fc8   :  { %v6710_v23 = vpop.xlane.xlu0 %6709  ;;  %6723 = sbr.rel (%p6978_p13) target bundleno = 16335 (0x3fcf), region = 125 }
0x3fc9   :  { %v6711_v7 = vcvt.f32.s32 %v6710_v23 }
0x3fcb   :  { %v6714_v48 = vadd.s32 %v6713_v47, %v6711_v7 }
0x3fcd   :  { %v6717_v49 = vsel %vm6715_vm12, %v6714_v48, %v6716_v14 }
0x3fce   :  { %6718 = vst.msk [vmem:[#allocation10] sm:$0x3] %vm2499_vm15, %v6717_v49 }
0x3fcf PF:  { %p6980_p0 = scmp.eq.s32.totalorder %s6977_s19, 1 }
0x3fd0   :  { %v6734_v50 = vld [vmem:[%s10444_s20] sm:$0xff] (!%p6980_p0)  ;;  %v6735_v35 = vld [vmem:[%s10444_s20 + $0x8] sm:$0xff] (!%p6980_p0)  ;;  %v6736_v11 = vld [vmem:[%s10444_s20 + $0x10] sm:$0xff] (!%p6980_p0)  ;;  %v8660_v51 = vmov (!%p6980_p0), 0.0|0.0   ;;  %vm8661_vm13 = vmmov (!%p6980_p0), 0   ;;  %v8662_v61 = vmov (!%p6980_p0), 0.0   ;;  %vm6731_vm14 = vcmp.eq.s32.totalorder (!%p6980_p0), %v9259_v18, %v6714_v48 }
0x3fd1   :  { %6730 = sbr.rel (%p6980_p0) target bundleno = 16583 (0x40c7), region = 129  ;;  %8365 = vmatprep.subr.bf16.mxu0 (!%p6980_p0), %v8660_v51  ;;  %v8366_v32 = vpack.c.bf16 (!%p6980_p0), %v6735_v35, %v6734_v50  ;;  %v6737_v60 = vld [vmem:[%s10444_s20 + $0x18] sm:$0xff] (!%p6980_p0)  ;;  %7996 = vmatprep.mubr.msk.f32.mxu0 (!%p6980_p0), %vm8661_vm13, %v8662_v61  ;;  %v6738_v17 = vld [vmem:[%s10444_s20 + $0x20] sm:$0xff] (!%p6980_p0)  ;;  %v6739_v1 = vld [vmem:[%s10444_s20 + $0x28] sm:$0xff] (!%p6980_p0)  ;;  %v8663_v62 = vmov (!%p6980_p0), 1.0  }
0x3fd2   :  { %v8369_v5 = vpack.c.bf16 (!%p6980_p0), %v6737_v60, %v6736_v11  ;;  %v8372_v19 = vpack.c.bf16 (!%p6980_p0), %v6739_v1, %v6738_v17  ;;  %v6740_v6 = vld [vmem:[%s10444_s20 + $0x30] sm:$0xff] (!%p6980_p0)  ;;  %v6741_v4 = vld [vmem:[%s10444_s20 + $0x38] sm:$0xff] (!%p6980_p0)  ;;  %v6742_v53 = vld [vmem:[%s10444_s20 + $0x40] sm:$0xff] (!%p6980_p0) }
0x3fd3   :  { %8367 = vmatpush3.bf16.msra.mxu0 (!%p6980_p0), %v8366_v32  ;;  %v8375_v52 = vpack.c.bf16 (!%p6980_p0), %v6741_v4, %v6740_v6  ;;  %v6743_v9 = vld [vmem:[%s10444_s20 + $0x48] sm:$0xff] (!%p6980_p0)  ;;  %v6744_v54 = vld [vmem:[%s10444_s20 + $0x50] sm:$0xff] (!%p6980_p0)  ;;  %v6745_v16 = vld [vmem:[%s10444_s20 + $0x58] sm:$0xff] (!%p6980_p0) }
0x3fd4   :  { %8368 = vmatprep.subr.bf16.mxu0 (!%p6980_p0), %v8660_v51  ;;  %v8378_v33 = vpack.c.bf16 (!%p6980_p0), %v6743_v9, %v6742_v53  ;;  %v8381_v55 = vpack.c.bf16 (!%p6980_p0), %v6745_v16, %v6744_v54  ;;  %v6746_v8 = vld [vmem:[%s10444_s20 + $0x60] sm:$0xff] (!%p6980_p0)  ;;  %v6747_v56 = vld [vmem:[%s10444_s20 + $0x68] sm:$0xff] (!%p6980_p0)  ;;  %v6748_v43 = vld [vmem:[%s10444_s20 + $0x70] sm:$0xff] (!%p6980_p0) }
0x3fd5   :  { %v8384_v57 = vpack.c.bf16 (!%p6980_p0), %v6747_v56, %v6746_v8  ;;  %v6749_v21 = vld [vmem:[%s10444_s20 + $0x78] sm:$0xff] (!%p6980_p0) }
0x3fd6   :  { %v8387_v59 = vpack.c.bf16 (!%p6980_p0), %v6749_v21, %v6748_v43 }
0x3fd7   :  { %8370 = vmatpush3.bf16.msra.mxu0 (!%p6980_p0), %v8369_v5 }
0x3fd8   :  { %8371 = vmatprep.subr.bf16.mxu0 %v8660_v51 }
0x3fdb   :  { %8373 = vmatpush3.bf16.msra.mxu0 %v8372_v19 }
0x3fdc   :  { %8374 = vmatprep.subr.bf16.mxu0 %v8660_v51 }
0x3fdf   :  { %8376 = vmatpush3.bf16.msra.mxu0 %v8375_v52 }
0x3fe0   :  { %8377 = vmatprep.subr.bf16.mxu0 %v8660_v51 }
0x3fe3   :  { %8379 = vmatpush3.bf16.msra.mxu0 %v8378_v33 }
0x3fe4   :  { %8380 = vmatprep.subr.bf16.mxu0 %v8660_v51 }
0x3fe7   :  { %8382 = vmatpush3.bf16.msra.mxu0 %v8381_v55 }
0x3fe8   :  { %8383 = vmatprep.subr.bf16.mxu0 %v8660_v51 }
0x3feb   :  { %8385 = vmatpush3.bf16.msra.mxu0 %v8384_v57 }
0x3fec   :  { %8386 = vmatprep.subr.bf16.mxu0 %v8660_v51 }
0x3fef   :  { %8388 = vmatpush3.bf16.msra.mxu0 %v8387_v59 }
0x3ff2   :  { %7997 = vmatmul.mubr.msk.f32.vlgmr.msra.gmra.mrb[0].mxu0 %vm6731_vm14, %v8663_v62 }
0x40c5   :  { %v6816_v29 = vpop.f32.mrb[0].mxu0 }
0x40c6   :  { %6820 = vst.msk [vmem:[#allocation6] sm:$0x3] %vm2497_vm5, %v6816_v29  ;;  %v7998_v0 = vpop.f32.mrb[1].mxu0 }
0x40c7 PF:  { %s8664_s23 = smov [#allocation10]  }
0x40c8   :  { %s6829_s12 = sshll.u32 %s8664_s23, 4  ;;  %s6830_s12 = int_to_ptr.vmem [resolvable:$true] %s6829_s12 }
0x40c9   :  { %s8610_s24 = scalar_lea.vmem %s6830_s12, 32  ;;  %p8615_p2 = scmp.lt.s32.totalorder %s6830_s12, %s6830_s12 }
0x40ca   :  { %p8611_p1 = scmp.ne.s32.totalorder %s6830_s12, %s8610_s24  ;;  %p8616_p3 = scmp.lt.s32.totalorder %s8610_s24, %s8610_s24 }
0x40cc   :  { %p8617_p4 = por %p8616_p3, %p8615_p2 }
0x40ce   :  { %p8618_p5 = pnand %p8617_p4, %p8611_p1 }
0x40d0   :  { %8621 = shalt.err (!%p8618_p5)
}
0x40d1   :  { %s8622_s17 = scalar_lea.hbm %s10446_s22, 32 }
0x40d2   :  { %p8623_p6 = scmp.ne.s32.totalorder %s10446_s22, %s8622_s17  ;;  %p8626_p7 = scmp.lt.u32.totalorder %s8622_s17, %s10446_s22 }
0x40d4   :  { %p8628_p8 = pnand %p8626_p7, %p8623_p6 }
0x40d6   :  { %8631 = shalt.err (!%p8628_p8)
}
0x40d7   :  { %6832 = dma.vmem_to_hbm [thread:$0]  %s6830_s12, 32, %s10446_s22, [#allocation8]  }
0x40d8   :  { %8634 = dma.done.wait [#allocation8], 32  }
0x40d9   :  { %8635 = vsyncadd [#allocation8], 4294967264 }
0x40da   :  { %6838 = vsyncpa [#allocation8], 1 }
0x40db   :  { %6839 = vsyncpa [#allocation9], 1 }

</bundles_post_ra>
